<compile_context>
chip_gen: v7x
topology: tpu7x:2x2x1
jax: 0.10.0
libtpu: 0.0.40
codegen_flags: <defaults>
</compile_context>

<pallas_src>
import functools

import jax
import jax.numpy as jnp
import numpy as np
from jax.experimental import pallas as pl
from jax.experimental.pallas import tpu as pltpu

LANE = 128              # TPU lane width: channel axis is padded to this
NUM_CLASSES = 10
NUM_CONV_LAYERS = 5     # conv1, layer1..layer4


def _round_up(x, m):
    return (x + m - 1) // m * m


# ------------------------------ fused kernel ------------------------------

def _fused_backbone_kernel(x_ref, w_ref, s_ref, fcw_ref, fcb_ref, o_ref,
                           buf_a, buf_b, *, h1, w1):
    """Entire backbone for ONE image, all activations VMEM-resident.

    x_ref  : (1, R1, C)   f32  zero-halo padded input, spatially flattened
    w_ref  : (5, 9, C, C) bf16 per-layer / per-tap conv weights (BN scale folded)
    s_ref  : (5, C)       f32  folded BN shifts
    fcw_ref: (C, C)       f32  classifier weight (padded)
    fcb_ref: (1, C)       f32  classifier bias (padded)
    o_ref  : (1, 1, C)    f32  logits (padded to C lanes)
    buf_a/buf_b: (R2, C)  f32  ping-pong zero-halo activation buffers (8x8 stage)
    """
    h2, w2 = h1 // 2, w1 // 2
    wp1, wp2 = w1 + 2, w2 + 2
    wide1, wide2 = h1 * wp1, h2 * wp2

    # Scratch persists across grid steps (and each TensorCore owns its own copy
    # on v7x), so re-establish the zero halos every image (~100 KB of stores).
    buf_a[...] = jnp.zeros_like(buf_a)
    buf_b[...] = jnp.zeros_like(buf_b)

    shifts = s_ref[...]                                     # (5, C) f32

    def conv3x3(load_tap, li, rows, wp):
        # Halo-inclusive "wide" conv: tap (dy, dx) is one contiguous row slice
        # at offset dy*wp + dx (no re-gathered im2col copies).  The wp - w
        # garbage columns per output row are handled by the caller.
        acc = jnp.zeros((rows, LANE), jnp.float32)
        for t in range(9):
            dy, dx = divmod(t, 3)
            tap = load_tap(dy * wp + dx, rows).astype(jnp.bfloat16)
            # TODO(synk): K-pack the 9 taps (K = 9*Cin_real -> 128/256) into a
            # single matmul for v6e/v7x MXU utilization + MRB accumulation.
            acc = acc + jnp.dot(tap, w_ref[li, t],
                                preferred_element_type=jnp.float32)
        return jnp.maximum(acc + shifts[li:li + 1, :], 0.0)

    # ---- conv1 + bn1 + relu -------------------------------------------------
    y1 = conv3x3(lambda s, n: x_ref[0, pl.ds(s, n), :], 0, wide1, wp1)

    # ---- maxpool 2x2 / stride 2 (fused epilogue), write interior of buf_a ----
    v = y1.reshape(h1, wp1, LANE)[:, :w1, :]                # valid (h1, w1, C)
    v = v.reshape(h1, w2, 2, LANE)
    hmax = jnp.maximum(v[:, :, 0, :], v[:, :, 1, :])        # (h1, w2, C)
    hmax = hmax.reshape(h2, 2, w2, LANE)
    pooled = jnp.maximum(hmax[:, 0], hmax[:, 1])            # (h2, w2, C)
    for y in range(h2):
        buf_a[pl.ds((y + 1) * wp2 + 1, w2), :] = pooled[y]

    # 0/1 mask killing the 2 garbage columns of a wide (h2, wp2) conv output.
    col = jax.lax.broadcasted_iota(jnp.int32, (wide2, LANE), 0) % wp2
    colmask = (col < w2).astype(jnp.float32)

    # ---- layer1..layer3: conv + folded BN + relu ------------------------------
    # Storing the masked *wide* result at flat offset w2+3 puts every valid
    # pixel at its zero-halo-padded position and writes zeros onto the halos it
    # touches, so each inter-layer handoff is ONE contiguous lane-dense store.
    src, dst = buf_a, buf_b
    for li in (1, 2, 3):
        y = conv3x3(lambda s, n, r=src: r[pl.ds(s, n), :], li, wide2, wp2)
        dst[pl.ds(w2 + 3, wide2), :] = y * colmask
        src, dst = dst, src

    # ---- layer4 + global average pool over the h2*w2 valid positions ---------
    y4 = conv3x3(lambda s, n, r=src: r[pl.ds(s, n), :], 4, wide2, wp2)
    pooled_vec = jnp.sum(y4 * colmask, axis=0, keepdims=True) * (1.0 / (h2 * w2))

    # ---- torch.flatten(x, 1) + classifier -------------------------------------
    o_ref[0, :, :] = (jnp.dot(pooled_vec, fcw_ref[...],
                              preferred_element_type=jnp.float32)
                      + fcb_ref[...])


# ------------------------------ Pallas wrapper ------------------------------

def activation_map_extractor_forward(x_nchw, prep):
    n, cin, h1, w1 = x_nchw.shape
    assert h1 % 2 == 0 and w1 % 2 == 0  # TODO(synk): floor-mode pooling for odd sizes
    h2, w2 = h1 // 2, w1 // 2
    wp1, wp2 = w1 + 2, w2 + 2
    rows1 = (h1 + 2) * wp1
    r1 = _round_up(rows1 + 2, 8)                 # +2 rows of tap-slice slack
    r2 = _round_up((h2 + 2) * wp2 + 2, 8)

    # One-time input layout (single cheap XLA op): NCHW->NHWC, zero spatial halo,
    # channel pad to 128 lanes, flatten spatial so every 3x3 tap inside the
    # kernel is a contiguous row slice.
    x = jnp.transpose(x_nchw, (0, 2, 3, 1)).astype(jnp.float32)
    x = jnp.pad(x, ((0, 0), (1, 1), (1, 1), (0, LANE - cin)))
    x = x.reshape(n, rows1, LANE)
    x = jnp.pad(x, ((0, 0), (0, r1 - rows1), (0, 0)))

    kernel = functools.partial(_fused_backbone_kernel, h1=h1, w1=w1)
    out = pl.pallas_call(
        kernel,
        out_shape=jax.ShapeDtypeStruct((n, 1, LANE), jnp.float32),
        grid=(n,),
        in_specs=[
            pl.BlockSpec((1, r1, LANE), lambda i: (i, 0, 0)),             # image
            pl.BlockSpec((NUM_CONV_LAYERS, 9, LANE, LANE),
                         lambda i: (0, 0, 0, 0)),                         # conv weights
            pl.BlockSpec((NUM_CONV_LAYERS, LANE), lambda i: (0, 0)),      # BN shifts
            pl.BlockSpec((LANE, LANE), lambda i: (0, 0)),                 # fc weight
            pl.BlockSpec((1, LANE), lambda i: (0, 0)),                    # fc bias
        ],
        out_specs=pl.BlockSpec((1, 1, LANE), lambda i: (i, 0, 0)),
        scratch_shapes=[pltpu.VMEM((r2, LANE), jnp.float32),
                        pltpu.VMEM((r2, LANE), jnp.float32)],
        compiler_params=pltpu.CompilerParams(
            dimension_semantics=("parallel",)),
    )(x, prep["w_all"], prep["shifts"], prep["fc_w"], prep["fc_b"])
    return {"avgpool": out.reshape(n, LANE)[:, :NUM_CLASSES]}


# ----------------------- synthetic backbone params -----------------------

def make_params(key):
    # channel plan: conv1: 4->8, layer1: 8->8, layer2: 8->16, layer3/4: 16->16,
    # classifier: Linear(16 -> 10)
    plan = [("conv1", 4, 8), ("layer1", 8, 8), ("layer2", 8, 16),
            ("layer3", 16, 16), ("layer4", 16, 16)]
    params = {}
    keys = jax.random.split(key, 2 * len(plan) + 2)
    eps = 1e-5
    for idx, (name, cin, cout) in enumerate(plan):
        wk, bk = keys[2 * idx], keys[2 * idx + 1]
        params[f"{name}_w"] = (jax.random.normal(wk, (cout, cin, 3, 3), jnp.float32)
                               * (1.0 / np.sqrt(cin * 9)))
        k1, k2, k3, k4 = jax.random.split(bk, 4)
        gamma = 1.0 + 0.1 * jax.random.normal(k1, (cout,), jnp.float32)
        beta = 0.1 * jax.random.normal(k2, (cout,), jnp.float32)
        mean = 0.1 * jax.random.normal(k3, (cout,), jnp.float32)
        var = jnp.abs(jax.random.normal(k4, (cout,), jnp.float32)) + 1.0
        bn_name = "bn1" if name == "conv1" else name
        scale = gamma / jnp.sqrt(var + eps)
        params[f"{bn_name}_scale"] = scale
        params[f"{bn_name}_shift"] = beta - mean * scale
    params["fc_w"] = (jax.random.normal(keys[-2], (16, 10), jnp.float32)
                      * (1.0 / np.sqrt(16)))
    params["fc_b"] = 0.1 * jax.random.normal(keys[-1], (10,), jnp.float32)
    return params


def prepare_params(params, cp=LANE):
    """Host-side weight prep: fold BN scale into conv weights, pad channels to
    128 lanes, stack all 5 layers into one (5, 9, C, C) bf16 tensor."""
    plan = [("conv1", "bn1"), ("layer1", "layer1"), ("layer2", "layer2"),
            ("layer3", "layer3"), ("layer4", "layer4")]
    w_all, shifts = [], []
    for conv_name, bn_name in plan:
        w = params[f"{conv_name}_w"]                              # (O, I, 3, 3)
        scale = params[f"{bn_name}_scale"]
        shift = params[f"{bn_name}_shift"]
        cout, cin, k, _ = w.shape
        wf = w * scale[:, None, None, None]                       # fold BN scale
        w9 = jnp.transpose(wf, (2, 3, 1, 0)).reshape(k * k, cin, cout)
        w9 = jnp.pad(w9, ((0, 0), (0, cp - cin), (0, cp - cout)))
        w_all.append(w9.astype(jnp.bfloat16))
        shifts.append(jnp.pad(shift, (0, cp - cout)))
    prep = {
        "w_all": jnp.stack(w_all, axis=0),                        # (5, 9, C, C) bf16
        "shifts": jnp.stack(shifts, axis=0).astype(jnp.float32),  # (5, C) f32
    }
    fc_w, fc_b = params["fc_w"], params["fc_b"]
    cfin, ncls = fc_w.shape
    prep["fc_w"] = jnp.pad(fc_w, ((0, cp - cfin), (0, cp - ncls))).astype(jnp.float32)
    prep["fc_b"] = jnp.pad(fc_b, (0, cp - ncls)).reshape(1, cp).astype(jnp.float32)
    return prep


# --------------------------- pure-JAX reference ---------------------------

def reference_forward(x_nchw, params):
    """Same math as the Pallas path (BN scale folded, bf16 conv operands,
    f32 accumulation) expressed with stock XLA ops."""
    x = jnp.transpose(x_nchw, (0, 2, 3, 1))

    def cbr(x, w, scale, shift):
        wf = w * scale[:, None, None, None]
        w_hwio = jnp.transpose(wf, (2, 3, 1, 0)).astype(jnp.bfloat16)
        y = jax.lax.conv_general_dilated(
            x.astype(jnp.bfloat16), w_hwio, (1, 1), "SAME",
            dimension_numbers=("NHWC", "HWIO", "NHWC"),
            preferred_element_type=jnp.float32)
        return jnp.maximum(y + shift, 0.0)

    x = cbr(x, params["conv1_w"], params["bn1_scale"], params["bn1_shift"])
    n, h, w, c = x.shape
    x = x.reshape(n, h // 2, 2, w // 2, 2, c).max(axis=(2, 4))
    for i in range(1, 5):
        x = cbr(x, params[f"layer{i}_w"],
                params[f"layer{i}_scale"], params[f"layer{i}_shift"])
    pooled = x.mean(axis=(1, 2))
    return pooled @ params["fc_w"] + params["fc_b"]


if __name__ == "__main__":
    key = jax.random.PRNGKey(0)
    pkey, xkey = jax.random.split(key)
    params = make_params(pkey)
    prep = prepare_params(params)
    x = jax.random.normal(xkey, (2, 4, 16, 16), jnp.float32)   # NCHW, like PyTorch

    fwd = jax.jit(activation_map_extractor_forward)
    out = fwd(x, prep)
    logits = jax.block_until_ready(out["avgpool"])
    assert logits.shape == (2, NUM_CLASSES)

    ref = jax.block_until_ready(reference_forward(x, params))
    np.testing.assert_allclose(np.asarray(logits), np.asarray(ref),
                               rtol=2e-3, atol=2e-3)
    print("KERNEL_OK")
</pallas_src>

<mosaic_0001>
module attributes {stable_mosaic.version = 11 : i64} {
  func.func @_fused_backbone_kernel(%arg0: i32, %arg1: memref<1x328x128xf32, #tpu.memory_space<vmem>>, %arg2: memref<5x9x128x128xbf16, #tpu.memory_space<vmem>>, %arg3: memref<5x128xf32, #tpu.memory_space<vmem>>, %arg4: memref<128x128xf32, #tpu.memory_space<vmem>>, %arg5: memref<1x128xf32, #tpu.memory_space<vmem>>, %arg6: memref<1x1x128xf32, #tpu.memory_space<vmem>>, %arg7: memref<104x128xf32, #tpu.memory_space<vmem>>, %arg8: memref<104x128xf32, #tpu.memory_space<vmem>>) attributes {dimension_semantics = [#tpu.dimension_semantics<parallel>], iteration_bounds = array<i64: 2>, scalar_prefetch = 0 : i64, scratch_operands = 2 : i64, tpu.core_type = #tpu.core_type<tc>, window_params = [{transform_indices = @transform_0, window_bounds = array<i64: 1, 328, 128>}, {pipeline_mode = #tpu.pipeline_mode<synchronous>, transform_indices = @transform_1, window_bounds = array<i64: 5, 9, 128, 128>}, {pipeline_mode = #tpu.pipeline_mode<synchronous>, transform_indices = @transform_2, window_bounds = array<i64: 5, 128>}, {pipeline_mode = #tpu.pipeline_mode<synchronous>, transform_indices = @transform_3, window_bounds = array<i64: 128, 128>}, {pipeline_mode = #tpu.pipeline_mode<synchronous>, transform_indices = @transform_4, window_bounds = array<i64: 1, 128>}, {transform_indices = @transform_5, window_bounds = array<i64: 1, 1, 128>}]} {
    %cst = arith.constant 0.000000e+00 : f32
    %0 = vector.broadcast %cst : f32 to vector<104x128xf32>
    %c0 = arith.constant 0 : index
    %c0_0 = arith.constant 0 : index
    %1 = vector.load %arg7[%c0, %c0_0] : memref<104x128xf32, #tpu.memory_space<vmem>>, vector<104x128xf32>
    tpu.vector_store %arg7[%c0, %c0_0], %0 {strides = array<i32>} : memref<104x128xf32, #tpu.memory_space<vmem>>, vector<104x128xf32>,
    %cst_1 = arith.constant 0.000000e+00 : f32
    %2 = vector.broadcast %cst_1 : f32 to vector<104x128xf32>
    %c0_2 = arith.constant 0 : index
    %c0_3 = arith.constant 0 : index
    %3 = vector.load %arg8[%c0_2, %c0_3] : memref<104x128xf32, #tpu.memory_space<vmem>>, vector<104x128xf32>
    tpu.vector_store %arg8[%c0_2, %c0_3], %2 {strides = array<i32>} : memref<104x128xf32, #tpu.memory_space<vmem>>, vector<104x128xf32>,
    %c0_4 = arith.constant 0 : index
    %c0_5 = arith.constant 0 : index
    %4 = vector.load %arg3[%c0_4, %c0_5] : memref<5x128xf32, #tpu.memory_space<vmem>>, vector<5x128xf32>
    %cst_6 = arith.constant 0.000000e+00 : f32
    %5 = vector.broadcast %cst_6 : f32 to vector<288x128xf32>
    %c0_7 = arith.constant 0 : index
    %c0_8 = arith.constant 0 : index
    %c0_9 = arith.constant 0 : index
    %6 = vector.load %arg1[%c0_7, %c0_8, %c0_9] : memref<1x328x128xf32, #tpu.memory_space<vmem>>, vector<1x288x128xf32>
    %7 = vector.shape_cast %6 : vector<1x288x128xf32> to vector<288x128xf32>
    %8 = arith.truncf %7 : vector<288x128xf32> to vector<288x128xbf16>
    %c0_10 = arith.constant 0 : index
    %c0_11 = arith.constant 0 : index
    %c0_12 = arith.constant 0 : index
    %c0_13 = arith.constant 0 : index
    %9 = vector.load %arg2[%c0_10, %c0_11, %c0_12, %c0_13] : memref<5x9x128x128xbf16, #tpu.memory_space<vmem>>, vector<1x1x128x128xbf16>
    %10 = vector.shape_cast %9 : vector<1x1x128x128xbf16> to vector<128x128xbf16>
    %cst_14 = arith.constant dense<0.000000e+00> : vector<288x128xf32>
    %11 = tpu.matmul %8, %10, %cst_14 {dimension_numbers = #tpu.dot_dimension_numbers<[1], [0], [0], [1], [0, 0, 1, 1], [], []>} : vector<288x128xbf16>, vector<128x128xbf16>, vector<288x128xf32> -> vector<288x128xf32>
    %12 = arith.addf %5, %11 : vector<288x128xf32>
    %c0_15 = arith.constant 0 : index
    %c1 = arith.constant 1 : index
    %c0_16 = arith.constant 0 : index
    %13 = vector.load %arg1[%c0_15, %c1, %c0_16] : memref<1x328x128xf32, #tpu.memory_space<vmem>>, vector<1x288x128xf32>
    %14 = vector.shape_cast %13 : vector<1x288x128xf32> to vector<288x128xf32>
    %15 = arith.truncf %14 : vector<288x128xf32> to vector<288x128xbf16>
    %c0_17 = arith.constant 0 : index
    %c1_18 = arith.constant 1 : index
    %c0_19 = arith.constant 0 : index
    %c0_20 = arith.constant 0 : index
    %16 = vector.load %arg2[%c0_17, %c1_18, %c0_19, %c0_20] : memref<5x9x128x128xbf16, #tpu.memory_space<vmem>>, vector<1x1x128x128xbf16>
    %17 = vector.shape_cast %16 : vector<1x1x128x128xbf16> to vector<128x128xbf16>
    %cst_21 = arith.constant dense<0.000000e+00> : vector<288x128xf32>
    %18 = tpu.matmul %15, %17, %cst_21 {dimension_numbers = #tpu.dot_dimension_numbers<[1], [0], [0], [1], [0, 0, 1, 1], [], []>} : vector<288x128xbf16>, vector<128x128xbf16>, vector<288x128xf32> -> vector<288x128xf32>
    %19 = arith.addf %12, %18 : vector<288x128xf32>
    %c0_22 = arith.constant 0 : index
    %c2 = arith.constant 2 : index
    %c0_23 = arith.constant 0 : index
    %20 = vector.load %arg1[%c0_22, %c2, %c0_23] : memref<1x328x128xf32, #tpu.memory_space<vmem>>, vector<1x288x128xf32>
    %21 = vector.shape_cast %20 : vector<1x288x128xf32> to vector<288x128xf32>
    %22 = arith.truncf %21 : vector<288x128xf32> to vector<288x128xbf16>
    %c0_24 = arith.constant 0 : index
    %c2_25 = arith.constant 2 : index
    %c0_26 = arith.constant 0 : index
    %c0_27 = arith.constant 0 : index
    %23 = vector.load %arg2[%c0_24, %c2_25, %c0_26, %c0_27] : memref<5x9x128x128xbf16, #tpu.memory_space<vmem>>, vector<1x1x128x128xbf16>
    %24 = vector.shape_cast %23 : vector<1x1x128x128xbf16> to vector<128x128xbf16>
    %cst_28 = arith.constant dense<0.000000e+00> : vector<288x128xf32>
    %25 = tpu.matmul %22, %24, %cst_28 {dimension_numbers = #tpu.dot_dimension_numbers<[1], [0], [0], [1], [0, 0, 1, 1], [], []>} : vector<288x128xbf16>, vector<128x128xbf16>, vector<288x128xf32> -> vector<288x128xf32>
    %26 = arith.addf %19, %25 : vector<288x128xf32>
    %c0_29 = arith.constant 0 : index
    %c18 = arith.constant 18 : index
    %c0_30 = arith.constant 0 : index
    %27 = vector.load %arg1[%c0_29, %c18, %c0_30] : memref<1x328x128xf32, #tpu.memory_space<vmem>>, vector<1x288x128xf32>
    %28 = vector.shape_cast %27 : vector<1x288x128xf32> to vector<288x128xf32>
    %29 = arith.truncf %28 : vector<288x128xf32> to vector<288x128xbf16>
    %c0_31 = arith.constant 0 : index
    %c3 = arith.constant 3 : index
    %c0_32 = arith.constant 0 : index
    %c0_33 = arith.constant 0 : index
    %30 = vector.load %arg2[%c0_31, %c3, %c0_32, %c0_33] : memref<5x9x128x128xbf16, #tpu.memory_space<vmem>>, vector<1x1x128x128xbf16>
    %31 = vector.shape_cast %30 : vector<1x1x128x128xbf16> to vector<128x128xbf16>
    %cst_34 = arith.constant dense<0.000000e+00> : vector<288x128xf32>
    %32 = tpu.matmul %29, %31, %cst_34 {dimension_numbers = #tpu.dot_dimension_numbers<[1], [0], [0], [1], [0, 0, 1, 1], [], []>} : vector<288x128xbf16>, vector<128x128xbf16>, vector<288x128xf32> -> vector<288x128xf32>
    %33 = arith.addf %26, %32 : vector<288x128xf32>
    %c0_35 = arith.constant 0 : index
    %c19 = arith.constant 19 : index
    %c0_36 = arith.constant 0 : index
    %34 = vector.load %arg1[%c0_35, %c19, %c0_36] : memref<1x328x128xf32, #tpu.memory_space<vmem>>, vector<1x288x128xf32>
    %35 = vector.shape_cast %34 : vector<1x288x128xf32> to vector<288x128xf32>
    %36 = arith.truncf %35 : vector<288x128xf32> to vector<288x128xbf16>
    %c0_37 = arith.constant 0 : index
    %c4 = arith.constant 4 : index
    %c0_38 = arith.constant 0 : index
    %c0_39 = arith.constant 0 : index
    %37 = vector.load %arg2[%c0_37, %c4, %c0_38, %c0_39] : memref<5x9x128x128xbf16, #tpu.memory_space<vmem>>, vector<1x1x128x128xbf16>
    %38 = vector.shape_cast %37 : vector<1x1x128x128xbf16> to vector<128x128xbf16>
    %cst_40 = arith.constant dense<0.000000e+00> : vector<288x128xf32>
    %39 = tpu.matmul %36, %38, %cst_40 {dimension_numbers = #tpu.dot_dimension_numbers<[1], [0], [0], [1], [0, 0, 1, 1], [], []>} : vector<288x128xbf16>, vector<128x128xbf16>, vector<288x128xf32> -> vector<288x128xf32>
    %40 = arith.addf %33, %39 : vector<288x128xf32>
    %c0_41 = arith.constant 0 : index
    %c20 = arith.constant 20 : index
    %c0_42 = arith.constant 0 : index
    %41 = vector.load %arg1[%c0_41, %c20, %c0_42] : memref<1x328x128xf32, #tpu.memory_space<vmem>>, vector<1x288x128xf32>
    %42 = vector.shape_cast %41 : vector<1x288x128xf32> to vector<288x128xf32>
    %43 = arith.truncf %42 : vector<288x128xf32> to vector<288x128xbf16>
    %c0_43 = arith.constant 0 : index
    %c5 = arith.constant 5 : index
    %c0_44 = arith.constant 0 : index
    %c0_45 = arith.constant 0 : index
    %44 = vector.load %arg2[%c0_43, %c5, %c0_44, %c0_45] : memref<5x9x128x128xbf16, #tpu.memory_space<vmem>>, vector<1x1x128x128xbf16>
    %45 = vector.shape_cast %44 : vector<1x1x128x128xbf16> to vector<128x128xbf16>
    %cst_46 = arith.constant dense<0.000000e+00> : vector<288x128xf32>
    %46 = tpu.matmul %43, %45, %cst_46 {dimension_numbers = #tpu.dot_dimension_numbers<[1], [0], [0], [1], [0, 0, 1, 1], [], []>} : vector<288x128xbf16>, vector<128x128xbf16>, vector<288x128xf32> -> vector<288x128xf32>
    %47 = arith.addf %40, %46 : vector<288x128xf32>
    %c0_47 = arith.constant 0 : index
    %c36 = arith.constant 36 : index
    %c0_48 = arith.constant 0 : index
    %48 = vector.load %arg1[%c0_47, %c36, %c0_48] : memref<1x328x128xf32, #tpu.memory_space<vmem>>, vector<1x288x128xf32>
    %49 = vector.shape_cast %48 : vector<1x288x128xf32> to vector<288x128xf32>
    %50 = arith.truncf %49 : vector<288x128xf32> to vector<288x128xbf16>
    %c0_49 = arith.constant 0 : index
    %c6 = arith.constant 6 : index
    %c0_50 = arith.constant 0 : index
    %c0_51 = arith.constant 0 : index
    %51 = vector.load %arg2[%c0_49, %c6, %c0_50, %c0_51] : memref<5x9x128x128xbf16, #tpu.memory_space<vmem>>, vector<1x1x128x128xbf16>
    %52 = vector.shape_cast %51 : vector<1x1x128x128xbf16> to vector<128x128xbf16>
    %cst_52 = arith.constant dense<0.000000e+00> : vector<288x128xf32>
    %53 = tpu.matmul %50, %52, %cst_52 {dimension_numbers = #tpu.dot_dimension_numbers<[1], [0], [0], [1], [0, 0, 1, 1], [], []>} : vector<288x128xbf16>, vector<128x128xbf16>, vector<288x128xf32> -> vector<288x128xf32>
    %54 = arith.addf %47, %53 : vector<288x128xf32>
    %c0_53 = arith.constant 0 : index
    %c37 = arith.constant 37 : index
    %c0_54 = arith.constant 0 : index
    %55 = vector.load %arg1[%c0_53, %c37, %c0_54] : memref<1x328x128xf32, #tpu.memory_space<vmem>>, vector<1x288x128xf32>
    %56 = vector.shape_cast %55 : vector<1x288x128xf32> to vector<288x128xf32>
    %57 = arith.truncf %56 : vector<288x128xf32> to vector<288x128xbf16>
    %c0_55 = arith.constant 0 : index
    %c7 = arith.constant 7 : index
    %c0_56 = arith.constant 0 : index
    %c0_57 = arith.constant 0 : index
    %58 = vector.load %arg2[%c0_55, %c7, %c0_56, %c0_57] : memref<5x9x128x128xbf16, #tpu.memory_space<vmem>>, vector<1x1x128x128xbf16>
    %59 = vector.shape_cast %58 : vector<1x1x128x128xbf16> to vector<128x128xbf16>
    %cst_58 = arith.constant dense<0.000000e+00> : vector<288x128xf32>
    %60 = tpu.matmul %57, %59, %cst_58 {dimension_numbers = #tpu.dot_dimension_numbers<[1], [0], [0], [1], [0, 0, 1, 1], [], []>} : vector<288x128xbf16>, vector<128x128xbf16>, vector<288x128xf32> -> vector<288x128xf32>
    %61 = arith.addf %54, %60 : vector<288x128xf32>
    %c0_59 = arith.constant 0 : index
    %c38 = arith.constant 38 : index
    %c0_60 = arith.constant 0 : index
    %62 = vector.load %arg1[%c0_59, %c38, %c0_60] : memref<1x328x128xf32, #tpu.memory_space<vmem>>, vector<1x288x128xf32>
    %63 = vector.shape_cast %62 : vector<1x288x128xf32> to vector<288x128xf32>
    %64 = arith.truncf %63 : vector<288x128xf32> to vector<288x128xbf16>
    %c0_61 = arith.constant 0 : index
    %c8 = arith.constant 8 : index
    %c0_62 = arith.constant 0 : index
    %c0_63 = arith.constant 0 : index
    %65 = vector.load %arg2[%c0_61, %c8, %c0_62, %c0_63] : memref<5x9x128x128xbf16, #tpu.memory_space<vmem>>, vector<1x1x128x128xbf16>
    %66 = vector.shape_cast %65 : vector<1x1x128x128xbf16> to vector<128x128xbf16>
    %cst_64 = arith.constant dense<0.000000e+00> : vector<288x128xf32>
    %67 = tpu.matmul %64, %66, %cst_64 {dimension_numbers = #tpu.dot_dimension_numbers<[1], [0], [0], [1], [0, 0, 1, 1], [], []>} : vector<288x128xbf16>, vector<128x128xbf16>, vector<288x128xf32> -> vector<288x128xf32>
    %68 = arith.addf %61, %67 : vector<288x128xf32>
    %69 = vector.extract_strided_slice %4 {offsets = [0, 0], sizes = [1, 128], strides = [1, 1]} : vector<5x128xf32> to vector<1x128xf32>
    %70 = vector.broadcast %69 : vector<1x128xf32> to vector<288x128xf32>
    %71 = arith.addf %68, %70 : vector<288x128xf32>
    %cst_65 = arith.constant 0.000000e+00 : f32
    %72 = vector.broadcast %cst_65 : f32 to vector<288x128xf32>
    %73 = arith.maximumf %71, %72 : vector<288x128xf32>
    %74 = vector.shape_cast %73 : vector<288x128xf32> to vector<16x18x128xf32>
    %75 = vector.extract_strided_slice %74 {offsets = [0, 0, 0], sizes = [16, 16, 128], strides = [1, 1, 1]} : vector<16x18x128xf32> to vector<16x16x128xf32>
    %76 = vector.shape_cast %75 : vector<16x16x128xf32> to vector<16x8x2x128xf32>
    %77 = vector.extract_strided_slice %76 {offsets = [0, 0, 0, 0], sizes = [16, 8, 1, 128], strides = [1, 1, 1, 1]} : vector<16x8x2x128xf32> to vector<16x8x1x128xf32>
    %78 = vector.shape_cast %77 : vector<16x8x1x128xf32> to vector<16x8x128xf32>
    %79 = vector.extract_strided_slice %76 {offsets = [0, 0, 1, 0], sizes = [16, 8, 1, 128], strides = [1, 1, 1, 1]} : vector<16x8x2x128xf32> to vector<16x8x1x128xf32>
    %80 = vector.shape_cast %79 : vector<16x8x1x128xf32> to vector<16x8x128xf32>
    %81 = arith.maximumf %78, %80 : vector<16x8x128xf32>
    %82 = vector.shape_cast %81 : vector<16x8x128xf32> to vector<8x2x8x128xf32>
    %83 = vector.extract_strided_slice %82 {offsets = [0, 0, 0, 0], sizes = [8, 1, 8, 128], strides = [1, 1, 1, 1]} : vector<8x2x8x128xf32> to vector<8x1x8x128xf32>
    %84 = vector.shape_cast %83 : vector<8x1x8x128xf32> to vector<8x8x128xf32>
    %85 = vector.extract_strided_slice %82 {offsets = [0, 1, 0, 0], sizes = [8, 1, 8, 128], strides = [1, 1, 1, 1]} : vector<8x2x8x128xf32> to vector<8x1x8x128xf32>
    %86 = vector.shape_cast %85 : vector<8x1x8x128xf32> to vector<8x8x128xf32>
    %87 = arith.maximumf %84, %86 : vector<8x8x128xf32>
    %88 = vector.extract_strided_slice %87 {offsets = [0, 0, 0], sizes = [1, 8, 128], strides = [1, 1, 1]} : vector<8x8x128xf32> to vector<1x8x128xf32>
    %89 = vector.shape_cast %88 : vector<1x8x128xf32> to vector<8x128xf32>
    %c11 = arith.constant 11 : index
    %c0_66 = arith.constant 0 : index
    %90 = vector.load %arg7[%c11, %c0_66] : memref<104x128xf32, #tpu.memory_space<vmem>>, vector<8x128xf32>
    tpu.vector_store %arg7[%c11, %c0_66], %89 {strides = array<i32>} : memref<104x128xf32, #tpu.memory_space<vmem>>, vector<8x128xf32>,
    %91 = vector.extract_strided_slice %87 {offsets = [1, 0, 0], sizes = [1, 8, 128], strides = [1, 1, 1]} : vector<8x8x128xf32> to vector<1x8x128xf32>
    %92 = vector.shape_cast %91 : vector<1x8x128xf32> to vector<8x128xf32>
    %c21 = arith.constant 21 : index
    %c0_67 = arith.constant 0 : index
    %93 = vector.load %arg7[%c21, %c0_67] : memref<104x128xf32, #tpu.memory_space<vmem>>, vector<8x128xf32>
    tpu.vector_store %arg7[%c21, %c0_67], %92 {strides = array<i32>} : memref<104x128xf32, #tpu.memory_space<vmem>>, vector<8x128xf32>,
    %94 = vector.extract_strided_slice %87 {offsets = [2, 0, 0], sizes = [1, 8, 128], strides = [1, 1, 1]} : vector<8x8x128xf32> to vector<1x8x128xf32>
    %95 = vector.shape_cast %94 : vector<1x8x128xf32> to vector<8x128xf32>
    %c31 = arith.constant 31 : index
    %c0_68 = arith.constant 0 : index
    %96 = vector.load %arg7[%c31, %c0_68] : memref<104x128xf32, #tpu.memory_space<vmem>>, vector<8x128xf32>
    tpu.vector_store %arg7[%c31, %c0_68], %95 {strides = array<i32>} : memref<104x128xf32, #tpu.memory_space<vmem>>, vector<8x128xf32>,
    %97 = vector.extract_strided_slice %87 {offsets = [3, 0, 0], sizes = [1, 8, 128], strides = [1, 1, 1]} : vector<8x8x128xf32> to vector<1x8x128xf32>
    %98 = vector.shape_cast %97 : vector<1x8x128xf32> to vector<8x128xf32>
    %c41 = arith.constant 41 : index
    %c0_69 = arith.constant 0 : index
    %99 = vector.load %arg7[%c41, %c0_69] : memref<104x128xf32, #tpu.memory_space<vmem>>, vector<8x128xf32>
    tpu.vector_store %arg7[%c41, %c0_69], %98 {strides = array<i32>} : memref<104x128xf32, #tpu.memory_space<vmem>>, vector<8x128xf32>,
    %100 = vector.extract_strided_slice %87 {offsets = [4, 0, 0], sizes = [1, 8, 128], strides = [1, 1, 1]} : vector<8x8x128xf32> to vector<1x8x128xf32>
    %101 = vector.shape_cast %100 : vector<1x8x128xf32> to vector<8x128xf32>
    %c51 = arith.constant 51 : index
    %c0_70 = arith.constant 0 : index
    %102 = vector.load %arg7[%c51, %c0_70] : memref<104x128xf32, #tpu.memory_space<vmem>>, vector<8x128xf32>
    tpu.vector_store %arg7[%c51, %c0_70], %101 {strides = array<i32>} : memref<104x128xf32, #tpu.memory_space<vmem>>, vector<8x128xf32>,
    %103 = vector.extract_strided_slice %87 {offsets = [5, 0, 0], sizes = [1, 8, 128], strides = [1, 1, 1]} : vector<8x8x128xf32> to vector<1x8x128xf32>
    %104 = vector.shape_cast %103 : vector<1x8x128xf32> to vector<8x128xf32>
    %c61 = arith.constant 61 : index
    %c0_71 = arith.constant 0 : index
    %105 = vector.load %arg7[%c61, %c0_71] : memref<104x128xf32, #tpu.memory_space<vmem>>, vector<8x128xf32>
    tpu.vector_store %arg7[%c61, %c0_71], %104 {strides = array<i32>} : memref<104x128xf32, #tpu.memory_space<vmem>>, vector<8x128xf32>,
    %106 = vector.extract_strided_slice %87 {offsets = [6, 0, 0], sizes = [1, 8, 128], strides = [1, 1, 1]} : vector<8x8x128xf32> to vector<1x8x128xf32>
    %107 = vector.shape_cast %106 : vector<1x8x128xf32> to vector<8x128xf32>
    %c71 = arith.constant 71 : index
    %c0_72 = arith.constant 0 : index
    %108 = vector.load %arg7[%c71, %c0_72] : memref<104x128xf32, #tpu.memory_space<vmem>>, vector<8x128xf32>
    tpu.vector_store %arg7[%c71, %c0_72], %107 {strides = array<i32>} : memref<104x128xf32, #tpu.memory_space<vmem>>, vector<8x128xf32>,
    %109 = vector.extract_strided_slice %87 {offsets = [7, 0, 0], sizes = [1, 8, 128], strides = [1, 1, 1]} : vector<8x8x128xf32> to vector<1x8x128xf32>
    %110 = vector.shape_cast %109 : vector<1x8x128xf32> to vector<8x128xf32>
    %c81 = arith.constant 81 : index
    %c0_73 = arith.constant 0 : index
    %111 = vector.load %arg7[%c81, %c0_73] : memref<104x128xf32, #tpu.memory_space<vmem>>, vector<8x128xf32>
    tpu.vector_store %arg7[%c81, %c0_73], %110 {strides = array<i32>} : memref<104x128xf32, #tpu.memory_space<vmem>>, vector<8x128xf32>,
    %112 = tpu.iota {dimensions = array<i32: 0>} : vector<80x128xi32>
    %c10_i32 = arith.constant 10 : i32
    %c0_i32 = arith.constant 0 : i32
    %113 = arith.cmpi eq, %c10_i32, %c0_i32 : i32
    %c1_i32 = arith.constant 1 : i32
    %114 = arith.select %113, %c1_i32, %c10_i32 : i32
    %115 = vector.broadcast %114 : i32 to vector<80x128xi32>
    %116 = arith.remsi %112, %115 : vector<80x128xi32>
    %c0_i32_74 = arith.constant 0 : i32
    %117 = vector.broadcast %c0_i32_74 : i32 to vector<80x128xi32>
    %118 = arith.cmpi ne, %116, %117 : vector<80x128xi32>
    %c0_i32_75 = arith.constant 0 : i32
    %119 = vector.broadcast %c0_i32_75 : i32 to vector<80x128xi32>
    %120 = arith.cmpi slt, %116, %119 : vector<80x128xi32>
    %c0_i32_76 = arith.constant 0 : i32
    %121 = arith.cmpi slt, %114, %c0_i32_76 : i32
    %122 = vector.broadcast %121 : i1 to vector<80x128xi1>
    %123 = vector.broadcast %122 : vector<80x128xi1> to vector<80x128xi1>
    %124 = arith.xori %120, %123 : vector<80x128xi1>
    %125 = arith.andi %124, %118 : vector<80x128xi1>
    %126 = vector.broadcast %114 : i32 to vector<80x128xi32>
    %127 = arith.addi %116, %126 : vector<80x128xi32>
    %128 = arith.select %125, %127, %116 : vector<80x128xi1>, vector<80x128xi32>
    %c8_i32 = arith.constant 8 : i32
    %129 = vector.broadcast %c8_i32 : i32 to vector<80x128xi32>
    %130 = arith.cmpi slt, %128, %129 : vector<80x128xi32>
    %131 = arith.extui %130 : vector<80x128xi1> to vector<80x128xi32>
    %132 = arith.sitofp %131 : vector<80x128xi32> to vector<80x128xf32>
    %cst_77 = arith.constant 0.000000e+00 : f32
    %133 = vector.broadcast %cst_77 : f32 to vector<80x128xf32>
    %c0_78 = arith.constant 0 : index
    %c0_79 = arith.constant 0 : index
    %134 = vector.load %arg7[%c0_78, %c0_79] : memref<104x128xf32, #tpu.memory_space<vmem>>, vector<80x128xf32>
    %135 = arith.truncf %134 : vector<80x128xf32> to vector<80x128xbf16>
    %c1_80 = arith.constant 1 : index
    %c0_81 = arith.constant 0 : index
    %c0_82 = arith.constant 0 : index
    %c0_83 = arith.constant 0 : index
    %136 = vector.load %arg2[%c1_80, %c0_81, %c0_82, %c0_83] : memref<5x9x128x128xbf16, #tpu.memory_space<vmem>>, vector<1x1x128x128xbf16>
    %137 = vector.shape_cast %136 : vector<1x1x128x128xbf16> to vector<128x128xbf16>
    %cst_84 = arith.constant dense<0.000000e+00> : vector<80x128xf32>
    %138 = tpu.matmul %135, %137, %cst_84 {dimension_numbers = #tpu.dot_dimension_numbers<[1], [0], [0], [1], [0, 0, 1, 1], [], []>} : vector<80x128xbf16>, vector<128x128xbf16>, vector<80x128xf32> -> vector<80x128xf32>
    %139 = arith.addf %133, %138 : vector<80x128xf32>
    %c1_85 = arith.constant 1 : index
    %c0_86 = arith.constant 0 : index
    %140 = vector.load %arg7[%c1_85, %c0_86] : memref<104x128xf32, #tpu.memory_space<vmem>>, vector<80x128xf32>
    %141 = arith.truncf %140 : vector<80x128xf32> to vector<80x128xbf16>
    %c1_87 = arith.constant 1 : index
    %c1_88 = arith.constant 1 : index
    %c0_89 = arith.constant 0 : index
    %c0_90 = arith.constant 0 : index
    %142 = vector.load %arg2[%c1_87, %c1_88, %c0_89, %c0_90] : memref<5x9x128x128xbf16, #tpu.memory_space<vmem>>, vector<1x1x128x128xbf16>
    %143 = vector.shape_cast %142 : vector<1x1x128x128xbf16> to vector<128x128xbf16>
    %cst_91 = arith.constant dense<0.000000e+00> : vector<80x128xf32>
    %144 = tpu.matmul %141, %143, %cst_91 {dimension_numbers = #tpu.dot_dimension_numbers<[1], [0], [0], [1], [0, 0, 1, 1], [], []>} : vector<80x128xbf16>, vector<128x128xbf16>, vector<80x128xf32> -> vector<80x128xf32>
    %145 = arith.addf %139, %144 : vector<80x128xf32>
    %c2_92 = arith.constant 2 : index
    %c0_93 = arith.constant 0 : index
    %146 = vector.load %arg7[%c2_92, %c0_93] : memref<104x128xf32, #tpu.memory_space<vmem>>, vector<80x128xf32>
    %147 = arith.truncf %146 : vector<80x128xf32> to vector<80x128xbf16>
    %c1_94 = arith.constant 1 : index
    %c2_95 = arith.constant 2 : index
    %c0_96 = arith.constant 0 : index
    %c0_97 = arith.constant 0 : index
    %148 = vector.load %arg2[%c1_94, %c2_95, %c0_96, %c0_97] : memref<5x9x128x128xbf16, #tpu.memory_space<vmem>>, vector<1x1x128x128xbf16>
    %149 = vector.shape_cast %148 : vector<1x1x128x128xbf16> to vector<128x128xbf16>
    %cst_98 = arith.constant dense<0.000000e+00> : vector<80x128xf32>
    %150 = tpu.matmul %147, %149, %cst_98 {dimension_numbers = #tpu.dot_dimension_numbers<[1], [0], [0], [1], [0, 0, 1, 1], [], []>} : vector<80x128xbf16>, vector<128x128xbf16>, vector<80x128xf32> -> vector<80x128xf32>
    %151 = arith.addf %145, %150 : vector<80x128xf32>
    %c10 = arith.constant 10 : index
    %c0_99 = arith.constant 0 : index
    %152 = vector.load %arg7[%c10, %c0_99] : memref<104x128xf32, #tpu.memory_space<vmem>>, vector<80x128xf32>
    %153 = arith.truncf %152 : vector<80x128xf32> to vector<80x128xbf16>
    %c1_100 = arith.constant 1 : index
    %c3_101 = arith.constant 3 : index
    %c0_102 = arith.constant 0 : index
    %c0_103 = arith.constant 0 : index
    %154 = vector.load %arg2[%c1_100, %c3_101, %c0_102, %c0_103] : memref<5x9x128x128xbf16, #tpu.memory_space<vmem>>, vector<1x1x128x128xbf16>
    %155 = vector.shape_cast %154 : vector<1x1x128x128xbf16> to vector<128x128xbf16>
    %cst_104 = arith.constant dense<0.000000e+00> : vector<80x128xf32>
    %156 = tpu.matmul %153, %155, %cst_104 {dimension_numbers = #tpu.dot_dimension_numbers<[1], [0], [0], [1], [0, 0, 1, 1], [], []>} : vector<80x128xbf16>, vector<128x128xbf16>, vector<80x128xf32> -> vector<80x128xf32>
    %157 = arith.addf %151, %156 : vector<80x128xf32>
    %c11_105 = arith.constant 11 : index
    %c0_106 = arith.constant 0 : index
    %158 = vector.load %arg7[%c11_105, %c0_106] : memref<104x128xf32, #tpu.memory_space<vmem>>, vector<80x128xf32>
    %159 = arith.truncf %158 : vector<80x128xf32> to vector<80x128xbf16>
    %c1_107 = arith.constant 1 : index
    %c4_108 = arith.constant 4 : index
    %c0_109 = arith.constant 0 : index
    %c0_110 = arith.constant 0 : index
    %160 = vector.load %arg2[%c1_107, %c4_108, %c0_109, %c0_110] : memref<5x9x128x128xbf16, #tpu.memory_space<vmem>>, vector<1x1x128x128xbf16>
    %161 = vector.shape_cast %160 : vector<1x1x128x128xbf16> to vector<128x128xbf16>
    %cst_111 = arith.constant dense<0.000000e+00> : vector<80x128xf32>
    %162 = tpu.matmul %159, %161, %cst_111 {dimension_numbers = #tpu.dot_dimension_numbers<[1], [0], [0], [1], [0, 0, 1, 1], [], []>} : vector<80x128xbf16>, vector<128x128xbf16>, vector<80x128xf32> -> vector<80x128xf32>
    %163 = arith.addf %157, %162 : vector<80x128xf32>
    %c12 = arith.constant 12 : index
    %c0_112 = arith.constant 0 : index
    %164 = vector.load %arg7[%c12, %c0_112] : memref<104x128xf32, #tpu.memory_space<vmem>>, vector<80x128xf32>
    %165 = arith.truncf %164 : vector<80x128xf32> to vector<80x128xbf16>
    %c1_113 = arith.constant 1 : index
    %c5_114 = arith.constant 5 : index
    %c0_115 = arith.constant 0 : index
    %c0_116 = arith.constant 0 : index
    %166 = vector.load %arg2[%c1_113, %c5_114, %c0_115, %c0_116] : memref<5x9x128x128xbf16, #tpu.memory_space<vmem>>, vector<1x1x128x128xbf16>
    %167 = vector.shape_cast %166 : vector<1x1x128x128xbf16> to vector<128x128xbf16>
    %cst_117 = arith.constant dense<0.000000e+00> : vector<80x128xf32>
    %168 = tpu.matmul %165, %167, %cst_117 {dimension_numbers = #tpu.dot_dimension_numbers<[1], [0], [0], [1], [0, 0, 1, 1], [], []>} : vector<80x128xbf16>, vector<128x128xbf16>, vector<80x128xf32> -> vector<80x128xf32>
    %169 = arith.addf %163, %168 : vector<80x128xf32>
    %c20_118 = arith.constant 20 : index
    %c0_119 = arith.constant 0 : index
    %170 = vector.load %arg7[%c20_118, %c0_119] : memref<104x128xf32, #tpu.memory_space<vmem>>, vector<80x128xf32>
    %171 = arith.truncf %170 : vector<80x128xf32> to vector<80x128xbf16>
    %c1_120 = arith.constant 1 : index
    %c6_121 = arith.constant 6 : index
    %c0_122 = arith.constant 0 : index
    %c0_123 = arith.constant 0 : index
    %172 = vector.load %arg2[%c1_120, %c6_121, %c0_122, %c0_123] : memref<5x9x128x128xbf16, #tpu.memory_space<vmem>>, vector<1x1x128x128xbf16>
    %173 = vector.shape_cast %172 : vector<1x1x128x128xbf16> to vector<128x128xbf16>
    %cst_124 = arith.constant dense<0.000000e+00> : vector<80x128xf32>
    %174 = tpu.matmul %171, %173, %cst_124 {dimension_numbers = #tpu.dot_dimension_numbers<[1], [0], [0], [1], [0, 0, 1, 1], [], []>} : vector<80x128xbf16>, vector<128x128xbf16>, vector<80x128xf32> -> vector<80x128xf32>
    %175 = arith.addf %169, %174 : vector<80x128xf32>
    %c21_125 = arith.constant 21 : index
    %c0_126 = arith.constant 0 : index
    %176 = vector.load %arg7[%c21_125, %c0_126] : memref<104x128xf32, #tpu.memory_space<vmem>>, vector<80x128xf32>
    %177 = arith.truncf %176 : vector<80x128xf32> to vector<80x128xbf16>
    %c1_127 = arith.constant 1 : index
    %c7_128 = arith.constant 7 : index
    %c0_129 = arith.constant 0 : index
    %c0_130 = arith.constant 0 : index
    %178 = vector.load %arg2[%c1_127, %c7_128, %c0_129, %c0_130] : memref<5x9x128x128xbf16, #tpu.memory_space<vmem>>, vector<1x1x128x128xbf16>
    %179 = vector.shape_cast %178 : vector<1x1x128x128xbf16> to vector<128x128xbf16>
    %cst_131 = arith.constant dense<0.000000e+00> : vector<80x128xf32>
    %180 = tpu.matmul %177, %179, %cst_131 {dimension_numbers = #tpu.dot_dimension_numbers<[1], [0], [0], [1], [0, 0, 1, 1], [], []>} : vector<80x128xbf16>, vector<128x128xbf16>, vector<80x128xf32> -> vector<80x128xf32>
    %181 = arith.addf %175, %180 : vector<80x128xf32>
    %c22 = arith.constant 22 : index
    %c0_132 = arith.constant 0 : index
    %182 = vector.load %arg7[%c22, %c0_132] : memref<104x128xf32, #tpu.memory_space<vmem>>, vector<80x128xf32>
    %183 = arith.truncf %182 : vector<80x128xf32> to vector<80x128xbf16>
    %c1_133 = arith.constant 1 : index
    %c8_134 = arith.constant 8 : index
    %c0_135 = arith.constant 0 : index
    %c0_136 = arith.constant 0 : index
    %184 = vector.load %arg2[%c1_133, %c8_134, %c0_135, %c0_136] : memref<5x9x128x128xbf16, #tpu.memory_space<vmem>>, vector<1x1x128x128xbf16>
    %185 = vector.shape_cast %184 : vector<1x1x128x128xbf16> to vector<128x128xbf16>
    %cst_137 = arith.constant dense<0.000000e+00> : vector<80x128xf32>
    %186 = tpu.matmul %183, %185, %cst_137 {dimension_numbers = #tpu.dot_dimension_numbers<[1], [0], [0], [1], [0, 0, 1, 1], [], []>} : vector<80x128xbf16>, vector<128x128xbf16>, vector<80x128xf32> -> vector<80x128xf32>
    %187 = arith.addf %181, %186 : vector<80x128xf32>
    %188 = vector.extract_strided_slice %4 {offsets = [1, 0], sizes = [1, 128], strides = [1, 1]} : vector<5x128xf32> to vector<1x128xf32>
    %189 = vector.broadcast %188 : vector<1x128xf32> to vector<80x128xf32>
    %190 = arith.addf %187, %189 : vector<80x128xf32>
    %cst_138 = arith.constant 0.000000e+00 : f32
    %191 = vector.broadcast %cst_138 : f32 to vector<80x128xf32>
    %192 = arith.maximumf %190, %191 : vector<80x128xf32>
    %193 = arith.mulf %192, %132 : vector<80x128xf32>
    %c11_139 = arith.constant 11 : index
    %c0_140 = arith.constant 0 : index
    %194 = vector.load %arg8[%c11_139, %c0_140] : memref<104x128xf32, #tpu.memory_space<vmem>>, vector<80x128xf32>
    tpu.vector_store %arg8[%c11_139, %c0_140], %193 {strides = array<i32>} : memref<104x128xf32, #tpu.memory_space<vmem>>, vector<80x128xf32>,
    %cst_141 = arith.constant 0.000000e+00 : f32
    %195 = vector.broadcast %cst_141 : f32 to vector<80x128xf32>
    %c0_142 = arith.constant 0 : index
    %c0_143 = arith.constant 0 : index
    %196 = vector.load %arg8[%c0_142, %c0_143] : memref<104x128xf32, #tpu.memory_space<vmem>>, vector<80x128xf32>
    %197 = arith.truncf %196 : vector<80x128xf32> to vector<80x128xbf16>
    %c2_144 = arith.constant 2 : index
    %c0_145 = arith.constant 0 : index
    %c0_146 = arith.constant 0 : index
    %c0_147 = arith.constant 0 : index
    %198 = vector.load %arg2[%c2_144, %c0_145, %c0_146, %c0_147] : memref<5x9x128x128xbf16, #tpu.memory_space<vmem>>, vector<1x1x128x128xbf16>
    %199 = vector.shape_cast %198 : vector<1x1x128x128xbf16> to vector<128x128xbf16>
    %cst_148 = arith.constant dense<0.000000e+00> : vector<80x128xf32>
    %200 = tpu.matmul %197, %199, %cst_148 {dimension_numbers = #tpu.dot_dimension_numbers<[1], [0], [0], [1], [0, 0, 1, 1], [], []>} : vector<80x128xbf16>, vector<128x128xbf16>, vector<80x128xf32> -> vector<80x128xf32>
    %201 = arith.addf %195, %200 : vector<80x128xf32>
    %c1_149 = arith.constant 1 : index
    %c0_150 = arith.constant 0 : index
    %202 = vector.load %arg8[%c1_149, %c0_150] : memref<104x128xf32, #tpu.memory_space<vmem>>, vector<80x128xf32>
    %203 = arith.truncf %202 : vector<80x128xf32> to vector<80x128xbf16>
    %c2_151 = arith.constant 2 : index
    %c1_152 = arith.constant 1 : index
    %c0_153 = arith.constant 0 : index
    %c0_154 = arith.constant 0 : index
    %204 = vector.load %arg2[%c2_151, %c1_152, %c0_153, %c0_154] : memref<5x9x128x128xbf16, #tpu.memory_space<vmem>>, vector<1x1x128x128xbf16>
    %205 = vector.shape_cast %204 : vector<1x1x128x128xbf16> to vector<128x128xbf16>
    %cst_155 = arith.constant dense<0.000000e+00> : vector<80x128xf32>
    %206 = tpu.matmul %203, %205, %cst_155 {dimension_numbers = #tpu.dot_dimension_numbers<[1], [0], [0], [1], [0, 0, 1, 1], [], []>} : vector<80x128xbf16>, vector<128x128xbf16>, vector<80x128xf32> -> vector<80x128xf32>
    %207 = arith.addf %201, %206 : vector<80x128xf32>
    %c2_156 = arith.constant 2 : index
    %c0_157 = arith.constant 0 : index
    %208 = vector.load %arg8[%c2_156, %c0_157] : memref<104x128xf32, #tpu.memory_space<vmem>>, vector<80x128xf32>
    %209 = arith.truncf %208 : vector<80x128xf32> to vector<80x128xbf16>
    %c2_158 = arith.constant 2 : index
    %c2_159 = arith.constant 2 : index
    %c0_160 = arith.constant 0 : index
    %c0_161 = arith.constant 0 : index
    %210 = vector.load %arg2[%c2_158, %c2_159, %c0_160, %c0_161] : memref<5x9x128x128xbf16, #tpu.memory_space<vmem>>, vector<1x1x128x128xbf16>
    %211 = vector.shape_cast %210 : vector<1x1x128x128xbf16> to vector<128x128xbf16>
    %cst_162 = arith.constant dense<0.000000e+00> : vector<80x128xf32>
    %212 = tpu.matmul %209, %211, %cst_162 {dimension_numbers = #tpu.dot_dimension_numbers<[1], [0], [0], [1], [0, 0, 1, 1], [], []>} : vector<80x128xbf16>, vector<128x128xbf16>, vector<80x128xf32> -> vector<80x128xf32>
    %213 = arith.addf %207, %212 : vector<80x128xf32>
    %c10_163 = arith.constant 10 : index
    %c0_164 = arith.constant 0 : index
    %214 = vector.load %arg8[%c10_163, %c0_164] : memref<104x128xf32, #tpu.memory_space<vmem>>, vector<80x128xf32>
    %215 = arith.truncf %214 : vector<80x128xf32> to vector<80x128xbf16>
    %c2_165 = arith.constant 2 : index
    %c3_166 = arith.constant 3 : index
    %c0_167 = arith.constant 0 : index
    %c0_168 = arith.constant 0 : index
    %216 = vector.load %arg2[%c2_165, %c3_166, %c0_167, %c0_168] : memref<5x9x128x128xbf16, #tpu.memory_space<vmem>>, vector<1x1x128x128xbf16>
    %217 = vector.shape_cast %216 : vector<1x1x128x128xbf16> to vector<128x128xbf16>
    %cst_169 = arith.constant dense<0.000000e+00> : vector<80x128xf32>
    %218 = tpu.matmul %215, %217, %cst_169 {dimension_numbers = #tpu.dot_dimension_numbers<[1], [0], [0], [1], [0, 0, 1, 1], [], []>} : vector<80x128xbf16>, vector<128x128xbf16>, vector<80x128xf32> -> vector<80x128xf32>
    %219 = arith.addf %213, %218 : vector<80x128xf32>
    %c11_170 = arith.constant 11 : index
    %c0_171 = arith.constant 0 : index
    %220 = vector.load %arg8[%c11_170, %c0_171] : memref<104x128xf32, #tpu.memory_space<vmem>>, vector<80x128xf32>
    %221 = arith.truncf %220 : vector<80x128xf32> to vector<80x128xbf16>
    %c2_172 = arith.constant 2 : index
    %c4_173 = arith.constant 4 : index
    %c0_174 = arith.constant 0 : index
    %c0_175 = arith.constant 0 : index
    %222 = vector.load %arg2[%c2_172, %c4_173, %c0_174, %c0_175] : memref<5x9x128x128xbf16, #tpu.memory_space<vmem>>, vector<1x1x128x128xbf16>
    %223 = vector.shape_cast %222 : vector<1x1x128x128xbf16> to vector<128x128xbf16>
    %cst_176 = arith.constant dense<0.000000e+00> : vector<80x128xf32>
    %224 = tpu.matmul %221, %223, %cst_176 {dimension_numbers = #tpu.dot_dimension_numbers<[1], [0], [0], [1], [0, 0, 1, 1], [], []>} : vector<80x128xbf16>, vector<128x128xbf16>, vector<80x128xf32> -> vector<80x128xf32>
    %225 = arith.addf %219, %224 : vector<80x128xf32>
    %c12_177 = arith.constant 12 : index
    %c0_178 = arith.constant 0 : index
    %226 = vector.load %arg8[%c12_177, %c0_178] : memref<104x128xf32, #tpu.memory_space<vmem>>, vector<80x128xf32>
    %227 = arith.truncf %226 : vector<80x128xf32> to vector<80x128xbf16>
    %c2_179 = arith.constant 2 : index
    %c5_180 = arith.constant 5 : index
    %c0_181 = arith.constant 0 : index
    %c0_182 = arith.constant 0 : index
    %228 = vector.load %arg2[%c2_179, %c5_180, %c0_181, %c0_182] : memref<5x9x128x128xbf16, #tpu.memory_space<vmem>>, vector<1x1x128x128xbf16>
    %229 = vector.shape_cast %228 : vector<1x1x128x128xbf16> to vector<128x128xbf16>
    %cst_183 = arith.constant dense<0.000000e+00> : vector<80x128xf32>
    %230 = tpu.matmul %227, %229, %cst_183 {dimension_numbers = #tpu.dot_dimension_numbers<[1], [0], [0], [1], [0, 0, 1, 1], [], []>} : vector<80x128xbf16>, vector<128x128xbf16>, vector<80x128xf32> -> vector<80x128xf32>
    %231 = arith.addf %225, %230 : vector<80x128xf32>
    %c20_184 = arith.constant 20 : index
    %c0_185 = arith.constant 0 : index
    %232 = vector.load %arg8[%c20_184, %c0_185] : memref<104x128xf32, #tpu.memory_space<vmem>>, vector<80x128xf32>
    %233 = arith.truncf %232 : vector<80x128xf32> to vector<80x128xbf16>
    %c2_186 = arith.constant 2 : index
    %c6_187 = arith.constant 6 : index
    %c0_188 = arith.constant 0 : index
    %c0_189 = arith.constant 0 : index
    %234 = vector.load %arg2[%c2_186, %c6_187, %c0_188, %c0_189] : memref<5x9x128x128xbf16, #tpu.memory_space<vmem>>, vector<1x1x128x128xbf16>
    %235 = vector.shape_cast %234 : vector<1x1x128x128xbf16> to vector<128x128xbf16>
    %cst_190 = arith.constant dense<0.000000e+00> : vector<80x128xf32>
    %236 = tpu.matmul %233, %235, %cst_190 {dimension_numbers = #tpu.dot_dimension_numbers<[1], [0], [0], [1], [0, 0, 1, 1], [], []>} : vector<80x128xbf16>, vector<128x128xbf16>, vector<80x128xf32> -> vector<80x128xf32>
    %237 = arith.addf %231, %236 : vector<80x128xf32>
    %c21_191 = arith.constant 21 : index
    %c0_192 = arith.constant 0 : index
    %238 = vector.load %arg8[%c21_191, %c0_192] : memref<104x128xf32, #tpu.memory_space<vmem>>, vector<80x128xf32>
    %239 = arith.truncf %238 : vector<80x128xf32> to vector<80x128xbf16>
    %c2_193 = arith.constant 2 : index
    %c7_194 = arith.constant 7 : index
    %c0_195 = arith.constant 0 : index
    %c0_196 = arith.constant 0 : index
    %240 = vector.load %arg2[%c2_193, %c7_194, %c0_195, %c0_196] : memref<5x9x128x128xbf16, #tpu.memory_space<vmem>>, vector<1x1x128x128xbf16>
    %241 = vector.shape_cast %240 : vector<1x1x128x128xbf16> to vector<128x128xbf16>
    %cst_197 = arith.constant dense<0.000000e+00> : vector<80x128xf32>
    %242 = tpu.matmul %239, %241, %cst_197 {dimension_numbers = #tpu.dot_dimension_numbers<[1], [0], [0], [1], [0, 0, 1, 1], [], []>} : vector<80x128xbf16>, vector<128x128xbf16>, vector<80x128xf32> -> vector<80x128xf32>
    %243 = arith.addf %237, %242 : vector<80x128xf32>
    %c22_198 = arith.constant 22 : index
    %c0_199 = arith.constant 0 : index
    %244 = vector.load %arg8[%c22_198, %c0_199] : memref<104x128xf32, #tpu.memory_space<vmem>>, vector<80x128xf32>
    %245 = arith.truncf %244 : vector<80x128xf32> to vector<80x128xbf16>
    %c2_200 = arith.constant 2 : index
    %c8_201 = arith.constant 8 : index
    %c0_202 = arith.constant 0 : index
    %c0_203 = arith.constant 0 : index
    %246 = vector.load %arg2[%c2_200, %c8_201, %c0_202, %c0_203] : memref<5x9x128x128xbf16, #tpu.memory_space<vmem>>, vector<1x1x128x128xbf16>
    %247 = vector.shape_cast %246 : vector<1x1x128x128xbf16> to vector<128x128xbf16>
    %cst_204 = arith.constant dense<0.000000e+00> : vector<80x128xf32>
    %248 = tpu.matmul %245, %247, %cst_204 {dimension_numbers = #tpu.dot_dimension_numbers<[1], [0], [0], [1], [0, 0, 1, 1], [], []>} : vector<80x128xbf16>, vector<128x128xbf16>, vector<80x128xf32> -> vector<80x128xf32>
    %249 = arith.addf %243, %248 : vector<80x128xf32>
    %250 = vector.extract_strided_slice %4 {offsets = [2, 0], sizes = [1, 128], strides = [1, 1]} : vector<5x128xf32> to vector<1x128xf32>
    %251 = vector.broadcast %250 : vector<1x128xf32> to vector<80x128xf32>
    %252 = arith.addf %249, %251 : vector<80x128xf32>
    %cst_205 = arith.constant 0.000000e+00 : f32
    %253 = vector.broadcast %cst_205 : f32 to vector<80x128xf32>
    %254 = arith.maximumf %252, %253 : vector<80x128xf32>
    %255 = arith.mulf %254, %132 : vector<80x128xf32>
    %c11_206 = arith.constant 11 : index
    %c0_207 = arith.constant 0 : index
    %256 = vector.load %arg7[%c11_206, %c0_207] : memref<104x128xf32, #tpu.memory_space<vmem>>, vector<80x128xf32>
    tpu.vector_store %arg7[%c11_206, %c0_207], %255 {strides = array<i32>} : memref<104x128xf32, #tpu.memory_space<vmem>>, vector<80x128xf32>,
    %cst_208 = arith.constant 0.000000e+00 : f32
    %257 = vector.broadcast %cst_208 : f32 to vector<80x128xf32>
    %c0_209 = arith.constant 0 : index
    %c0_210 = arith.constant 0 : index
    %258 = vector.load %arg7[%c0_209, %c0_210] : memref<104x128xf32, #tpu.memory_space<vmem>>, vector<80x128xf32>
    %259 = arith.truncf %258 : vector<80x128xf32> to vector<80x128xbf16>
    %c3_211 = arith.constant 3 : index
    %c0_212 = arith.constant 0 : index
    %c0_213 = arith.constant 0 : index
    %c0_214 = arith.constant 0 : index
    %260 = vector.load %arg2[%c3_211, %c0_212, %c0_213, %c0_214] : memref<5x9x128x128xbf16, #tpu.memory_space<vmem>>, vector<1x1x128x128xbf16>
    %261 = vector.shape_cast %260 : vector<1x1x128x128xbf16> to vector<128x128xbf16>
    %cst_215 = arith.constant dense<0.000000e+00> : vector<80x128xf32>
    %262 = tpu.matmul %259, %261, %cst_215 {dimension_numbers = #tpu.dot_dimension_numbers<[1], [0], [0], [1], [0, 0, 1, 1], [], []>} : vector<80x128xbf16>, vector<128x128xbf16>, vector<80x128xf32> -> vector<80x128xf32>
    %263 = arith.addf %257, %262 : vector<80x128xf32>
    %c1_216 = arith.constant 1 : index
    %c0_217 = arith.constant 0 : index
    %264 = vector.load %arg7[%c1_216, %c0_217] : memref<104x128xf32, #tpu.memory_space<vmem>>, vector<80x128xf32>
    %265 = arith.truncf %264 : vector<80x128xf32> to vector<80x128xbf16>
    %c3_218 = arith.constant 3 : index
    %c1_219 = arith.constant 1 : index
    %c0_220 = arith.constant 0 : index
    %c0_221 = arith.constant 0 : index
    %266 = vector.load %arg2[%c3_218, %c1_219, %c0_220, %c0_221] : memref<5x9x128x128xbf16, #tpu.memory_space<vmem>>, vector<1x1x128x128xbf16>
    %267 = vector.shape_cast %266 : vector<1x1x128x128xbf16> to vector<128x128xbf16>
    %cst_222 = arith.constant dense<0.000000e+00> : vector<80x128xf32>
    %268 = tpu.matmul %265, %267, %cst_222 {dimension_numbers = #tpu.dot_dimension_numbers<[1], [0], [0], [1], [0, 0, 1, 1], [], []>} : vector<80x128xbf16>, vector<128x128xbf16>, vector<80x128xf32> -> vector<80x128xf32>
    %269 = arith.addf %263, %268 : vector<80x128xf32>
    %c2_223 = arith.constant 2 : index
    %c0_224 = arith.constant 0 : index
    %270 = vector.load %arg7[%c2_223, %c0_224] : memref<104x128xf32, #tpu.memory_space<vmem>>, vector<80x128xf32>
    %271 = arith.truncf %270 : vector<80x128xf32> to vector<80x128xbf16>
    %c3_225 = arith.constant 3 : index
    %c2_226 = arith.constant 2 : index
    %c0_227 = arith.constant 0 : index
    %c0_228 = arith.constant 0 : index
    %272 = vector.load %arg2[%c3_225, %c2_226, %c0_227, %c0_228] : memref<5x9x128x128xbf16, #tpu.memory_space<vmem>>, vector<1x1x128x128xbf16>
    %273 = vector.shape_cast %272 : vector<1x1x128x128xbf16> to vector<128x128xbf16>
    %cst_229 = arith.constant dense<0.000000e+00> : vector<80x128xf32>
    %274 = tpu.matmul %271, %273, %cst_229 {dimension_numbers = #tpu.dot_dimension_numbers<[1], [0], [0], [1], [0, 0, 1, 1], [], []>} : vector<80x128xbf16>, vector<128x128xbf16>, vector<80x128xf32> -> vector<80x128xf32>
    %275 = arith.addf %269, %274 : vector<80x128xf32>
    %c10_230 = arith.constant 10 : index
    %c0_231 = arith.constant 0 : index
    %276 = vector.load %arg7[%c10_230, %c0_231] : memref<104x128xf32, #tpu.memory_space<vmem>>, vector<80x128xf32>
    %277 = arith.truncf %276 : vector<80x128xf32> to vector<80x128xbf16>
    %c3_232 = arith.constant 3 : index
    %c3_233 = arith.constant 3 : index
    %c0_234 = arith.constant 0 : index
    %c0_235 = arith.constant 0 : index
    %278 = vector.load %arg2[%c3_232, %c3_233, %c0_234, %c0_235] : memref<5x9x128x128xbf16, #tpu.memory_space<vmem>>, vector<1x1x128x128xbf16>
    %279 = vector.shape_cast %278 : vector<1x1x128x128xbf16> to vector<128x128xbf16>
    %cst_236 = arith.constant dense<0.000000e+00> : vector<80x128xf32>
    %280 = tpu.matmul %277, %279, %cst_236 {dimension_numbers = #tpu.dot_dimension_numbers<[1], [0], [0], [1], [0, 0, 1, 1], [], []>} : vector<80x128xbf16>, vector<128x128xbf16>, vector<80x128xf32> -> vector<80x128xf32>
    %281 = arith.addf %275, %280 : vector<80x128xf32>
    %c11_237 = arith.constant 11 : index
    %c0_238 = arith.constant 0 : index
    %282 = vector.load %arg7[%c11_237, %c0_238] : memref<104x128xf32, #tpu.memory_space<vmem>>, vector<80x128xf32>
    %283 = arith.truncf %282 : vector<80x128xf32> to vector<80x128xbf16>
    %c3_239 = arith.constant 3 : index
    %c4_240 = arith.constant 4 : index
    %c0_241 = arith.constant 0 : index
    %c0_242 = arith.constant 0 : index
    %284 = vector.load %arg2[%c3_239, %c4_240, %c0_241, %c0_242] : memref<5x9x128x128xbf16, #tpu.memory_space<vmem>>, vector<1x1x128x128xbf16>
    %285 = vector.shape_cast %284 : vector<1x1x128x128xbf16> to vector<128x128xbf16>
    %cst_243 = arith.constant dense<0.000000e+00> : vector<80x128xf32>
    %286 = tpu.matmul %283, %285, %cst_243 {dimension_numbers = #tpu.dot_dimension_numbers<[1], [0], [0], [1], [0, 0, 1, 1], [], []>} : vector<80x128xbf16>, vector<128x128xbf16>, vector<80x128xf32> -> vector<80x128xf32>
    %287 = arith.addf %281, %286 : vector<80x128xf32>
    %c12_244 = arith.constant 12 : index
    %c0_245 = arith.constant 0 : index
    %288 = vector.load %arg7[%c12_244, %c0_245] : memref<104x128xf32, #tpu.memory_space<vmem>>, vector<80x128xf32>
    %289 = arith.truncf %288 : vector<80x128xf32> to vector<80x128xbf16>
    %c3_246 = arith.constant 3 : index
    %c5_247 = arith.constant 5 : index
    %c0_248 = arith.constant 0 : index
    %c0_249 = arith.constant 0 : index
    %290 = vector.load %arg2[%c3_246, %c5_247, %c0_248, %c0_249] : memref<5x9x128x128xbf16, #tpu.memory_space<vmem>>, vector<1x1x128x128xbf16>
    %291 = vector.shape_cast %290 : vector<1x1x128x128xbf16> to vector<128x128xbf16>
    %cst_250 = arith.constant dense<0.000000e+00> : vector<80x128xf32>
    %292 = tpu.matmul %289, %291, %cst_250 {dimension_numbers = #tpu.dot_dimension_numbers<[1], [0], [0], [1], [0, 0, 1, 1], [], []>} : vector<80x128xbf16>, vector<128x128xbf16>, vector<80x128xf32> -> vector<80x128xf32>
    %293 = arith.addf %287, %292 : vector<80x128xf32>
    %c20_251 = arith.constant 20 : index
    %c0_252 = arith.constant 0 : index
    %294 = vector.load %arg7[%c20_251, %c0_252] : memref<104x128xf32, #tpu.memory_space<vmem>>, vector<80x128xf32>
    %295 = arith.truncf %294 : vector<80x128xf32> to vector<80x128xbf16>
    %c3_253 = arith.constant 3 : index
    %c6_254 = arith.constant 6 : index
    %c0_255 = arith.constant 0 : index
    %c0_256 = arith.constant 0 : index
    %296 = vector.load %arg2[%c3_253, %c6_254, %c0_255, %c0_256] : memref<5x9x128x128xbf16, #tpu.memory_space<vmem>>, vector<1x1x128x128xbf16>
    %297 = vector.shape_cast %296 : vector<1x1x128x128xbf16> to vector<128x128xbf16>
    %cst_257 = arith.constant dense<0.000000e+00> : vector<80x128xf32>
    %298 = tpu.matmul %295, %297, %cst_257 {dimension_numbers = #tpu.dot_dimension_numbers<[1], [0], [0], [1], [0, 0, 1, 1], [], []>} : vector<80x128xbf16>, vector<128x128xbf16>, vector<80x128xf32> -> vector<80x128xf32>
    %299 = arith.addf %293, %298 : vector<80x128xf32>
    %c21_258 = arith.constant 21 : index
    %c0_259 = arith.constant 0 : index
    %300 = vector.load %arg7[%c21_258, %c0_259] : memref<104x128xf32, #tpu.memory_space<vmem>>, vector<80x128xf32>
    %301 = arith.truncf %300 : vector<80x128xf32> to vector<80x128xbf16>
    %c3_260 = arith.constant 3 : index
    %c7_261 = arith.constant 7 : index
    %c0_262 = arith.constant 0 : index
    %c0_263 = arith.constant 0 : index
    %302 = vector.load %arg2[%c3_260, %c7_261, %c0_262, %c0_263] : memref<5x9x128x128xbf16, #tpu.memory_space<vmem>>, vector<1x1x128x128xbf16>
    %303 = vector.shape_cast %302 : vector<1x1x128x128xbf16> to vector<128x128xbf16>
    %cst_264 = arith.constant dense<0.000000e+00> : vector<80x128xf32>
    %304 = tpu.matmul %301, %303, %cst_264 {dimension_numbers = #tpu.dot_dimension_numbers<[1], [0], [0], [1], [0, 0, 1, 1], [], []>} : vector<80x128xbf16>, vector<128x128xbf16>, vector<80x128xf32> -> vector<80x128xf32>
    %305 = arith.addf %299, %304 : vector<80x128xf32>
    %c22_265 = arith.constant 22 : index
    %c0_266 = arith.constant 0 : index
    %306 = vector.load %arg7[%c22_265, %c0_266] : memref<104x128xf32, #tpu.memory_space<vmem>>, vector<80x128xf32>
    %307 = arith.truncf %306 : vector<80x128xf32> to vector<80x128xbf16>
    %c3_267 = arith.constant 3 : index
    %c8_268 = arith.constant 8 : index
    %c0_269 = arith.constant 0 : index
    %c0_270 = arith.constant 0 : index
    %308 = vector.load %arg2[%c3_267, %c8_268, %c0_269, %c0_270] : memref<5x9x128x128xbf16, #tpu.memory_space<vmem>>, vector<1x1x128x128xbf16>
    %309 = vector.shape_cast %308 : vector<1x1x128x128xbf16> to vector<128x128xbf16>
    %cst_271 = arith.constant dense<0.000000e+00> : vector<80x128xf32>
    %310 = tpu.matmul %307, %309, %cst_271 {dimension_numbers = #tpu.dot_dimension_numbers<[1], [0], [0], [1], [0, 0, 1, 1], [], []>} : vector<80x128xbf16>, vector<128x128xbf16>, vector<80x128xf32> -> vector<80x128xf32>
    %311 = arith.addf %305, %310 : vector<80x128xf32>
    %312 = vector.extract_strided_slice %4 {offsets = [3, 0], sizes = [1, 128], strides = [1, 1]} : vector<5x128xf32> to vector<1x128xf32>
    %313 = vector.broadcast %312 : vector<1x128xf32> to vector<80x128xf32>
    %314 = arith.addf %311, %313 : vector<80x128xf32>
    %cst_272 = arith.constant 0.000000e+00 : f32
    %315 = vector.broadcast %cst_272 : f32 to vector<80x128xf32>
    %316 = arith.maximumf %314, %315 : vector<80x128xf32>
    %317 = arith.mulf %316, %132 : vector<80x128xf32>
    %c11_273 = arith.constant 11 : index
    %c0_274 = arith.constant 0 : index
    %318 = vector.load %arg8[%c11_273, %c0_274] : memref<104x128xf32, #tpu.memory_space<vmem>>, vector<80x128xf32>
    tpu.vector_store %arg8[%c11_273, %c0_274], %317 {strides = array<i32>} : memref<104x128xf32, #tpu.memory_space<vmem>>, vector<80x128xf32>,
    %cst_275 = arith.constant 0.000000e+00 : f32
    %319 = vector.broadcast %cst_275 : f32 to vector<80x128xf32>
    %c0_276 = arith.constant 0 : index
    %c0_277 = arith.constant 0 : index
    %320 = vector.load %arg8[%c0_276, %c0_277] : memref<104x128xf32, #tpu.memory_space<vmem>>, vector<80x128xf32>
    %321 = arith.truncf %320 : vector<80x128xf32> to vector<80x128xbf16>
    %c4_278 = arith.constant 4 : index
    %c0_279 = arith.constant 0 : index
    %c0_280 = arith.constant 0 : index
    %c0_281 = arith.constant 0 : index
    %322 = vector.load %arg2[%c4_278, %c0_279, %c0_280, %c0_281] : memref<5x9x128x128xbf16, #tpu.memory_space<vmem>>, vector<1x1x128x128xbf16>
    %323 = vector.shape_cast %322 : vector<1x1x128x128xbf16> to vector<128x128xbf16>
    %cst_282 = arith.constant dense<0.000000e+00> : vector<80x128xf32>
    %324 = tpu.matmul %321, %323, %cst_282 {dimension_numbers = #tpu.dot_dimension_numbers<[1], [0], [0], [1], [0, 0, 1, 1], [], []>} : vector<80x128xbf16>, vector<128x128xbf16>, vector<80x128xf32> -> vector<80x128xf32>
    %325 = arith.addf %319, %324 : vector<80x128xf32>
    %c1_283 = arith.constant 1 : index
    %c0_284 = arith.constant 0 : index
    %326 = vector.load %arg8[%c1_283, %c0_284] : memref<104x128xf32, #tpu.memory_space<vmem>>, vector<80x128xf32>
    %327 = arith.truncf %326 : vector<80x128xf32> to vector<80x128xbf16>
    %c4_285 = arith.constant 4 : index
    %c1_286 = arith.constant 1 : index
    %c0_287 = arith.constant 0 : index
    %c0_288 = arith.constant 0 : index
    %328 = vector.load %arg2[%c4_285, %c1_286, %c0_287, %c0_288] : memref<5x9x128x128xbf16, #tpu.memory_space<vmem>>, vector<1x1x128x128xbf16>
    %329 = vector.shape_cast %328 : vector<1x1x128x128xbf16> to vector<128x128xbf16>
    %cst_289 = arith.constant dense<0.000000e+00> : vector<80x128xf32>
    %330 = tpu.matmul %327, %329, %cst_289 {dimension_numbers = #tpu.dot_dimension_numbers<[1], [0], [0], [1], [0, 0, 1, 1], [], []>} : vector<80x128xbf16>, vector<128x128xbf16>, vector<80x128xf32> -> vector<80x128xf32>
    %331 = arith.addf %325, %330 : vector<80x128xf32>
    %c2_290 = arith.constant 2 : index
    %c0_291 = arith.constant 0 : index
    %332 = vector.load %arg8[%c2_290, %c0_291] : memref<104x128xf32, #tpu.memory_space<vmem>>, vector<80x128xf32>
    %333 = arith.truncf %332 : vector<80x128xf32> to vector<80x128xbf16>
    %c4_292 = arith.constant 4 : index
    %c2_293 = arith.constant 2 : index
    %c0_294 = arith.constant 0 : index
    %c0_295 = arith.constant 0 : index
    %334 = vector.load %arg2[%c4_292, %c2_293, %c0_294, %c0_295] : memref<5x9x128x128xbf16, #tpu.memory_space<vmem>>, vector<1x1x128x128xbf16>
    %335 = vector.shape_cast %334 : vector<1x1x128x128xbf16> to vector<128x128xbf16>
    %cst_296 = arith.constant dense<0.000000e+00> : vector<80x128xf32>
    %336 = tpu.matmul %333, %335, %cst_296 {dimension_numbers = #tpu.dot_dimension_numbers<[1], [0], [0], [1], [0, 0, 1, 1], [], []>} : vector<80x128xbf16>, vector<128x128xbf16>, vector<80x128xf32> -> vector<80x128xf32>
    %337 = arith.addf %331, %336 : vector<80x128xf32>
    %c10_297 = arith.constant 10 : index
    %c0_298 = arith.constant 0 : index
    %338 = vector.load %arg8[%c10_297, %c0_298] : memref<104x128xf32, #tpu.memory_space<vmem>>, vector<80x128xf32>
    %339 = arith.truncf %338 : vector<80x128xf32> to vector<80x128xbf16>
    %c4_299 = arith.constant 4 : index
    %c3_300 = arith.constant 3 : index
    %c0_301 = arith.constant 0 : index
    %c0_302 = arith.constant 0 : index
    %340 = vector.load %arg2[%c4_299, %c3_300, %c0_301, %c0_302] : memref<5x9x128x128xbf16, #tpu.memory_space<vmem>>, vector<1x1x128x128xbf16>
    %341 = vector.shape_cast %340 : vector<1x1x128x128xbf16> to vector<128x128xbf16>
    %cst_303 = arith.constant dense<0.000000e+00> : vector<80x128xf32>
    %342 = tpu.matmul %339, %341, %cst_303 {dimension_numbers = #tpu.dot_dimension_numbers<[1], [0], [0], [1], [0, 0, 1, 1], [], []>} : vector<80x128xbf16>, vector<128x128xbf16>, vector<80x128xf32> -> vector<80x128xf32>
    %343 = arith.addf %337, %342 : vector<80x128xf32>
    %c11_304 = arith.constant 11 : index
    %c0_305 = arith.constant 0 : index
    %344 = vector.load %arg8[%c11_304, %c0_305] : memref<104x128xf32, #tpu.memory_space<vmem>>, vector<80x128xf32>
    %345 = arith.truncf %344 : vector<80x128xf32> to vector<80x128xbf16>
    %c4_306 = arith.constant 4 : index
    %c4_307 = arith.constant 4 : index
    %c0_308 = arith.constant 0 : index
    %c0_309 = arith.constant 0 : index
    %346 = vector.load %arg2[%c4_306, %c4_307, %c0_308, %c0_309] : memref<5x9x128x128xbf16, #tpu.memory_space<vmem>>, vector<1x1x128x128xbf16>
    %347 = vector.shape_cast %346 : vector<1x1x128x128xbf16> to vector<128x128xbf16>
    %cst_310 = arith.constant dense<0.000000e+00> : vector<80x128xf32>
    %348 = tpu.matmul %345, %347, %cst_310 {dimension_numbers = #tpu.dot_dimension_numbers<[1], [0], [0], [1], [0, 0, 1, 1], [], []>} : vector<80x128xbf16>, vector<128x128xbf16>, vector<80x128xf32> -> vector<80x128xf32>
    %349 = arith.addf %343, %348 : vector<80x128xf32>
    %c12_311 = arith.constant 12 : index
    %c0_312 = arith.constant 0 : index
    %350 = vector.load %arg8[%c12_311, %c0_312] : memref<104x128xf32, #tpu.memory_space<vmem>>, vector<80x128xf32>
    %351 = arith.truncf %350 : vector<80x128xf32> to vector<80x128xbf16>
    %c4_313 = arith.constant 4 : index
    %c5_314 = arith.constant 5 : index
    %c0_315 = arith.constant 0 : index
    %c0_316 = arith.constant 0 : index
    %352 = vector.load %arg2[%c4_313, %c5_314, %c0_315, %c0_316] : memref<5x9x128x128xbf16, #tpu.memory_space<vmem>>, vector<1x1x128x128xbf16>
    %353 = vector.shape_cast %352 : vector<1x1x128x128xbf16> to vector<128x128xbf16>
    %cst_317 = arith.constant dense<0.000000e+00> : vector<80x128xf32>
    %354 = tpu.matmul %351, %353, %cst_317 {dimension_numbers = #tpu.dot_dimension_numbers<[1], [0], [0], [1], [0, 0, 1, 1], [], []>} : vector<80x128xbf16>, vector<128x128xbf16>, vector<80x128xf32> -> vector<80x128xf32>
    %355 = arith.addf %349, %354 : vector<80x128xf32>
    %c20_318 = arith.constant 20 : index
    %c0_319 = arith.constant 0 : index
    %356 = vector.load %arg8[%c20_318, %c0_319] : memref<104x128xf32, #tpu.memory_space<vmem>>, vector<80x128xf32>
    %357 = arith.truncf %356 : vector<80x128xf32> to vector<80x128xbf16>
    %c4_320 = arith.constant 4 : index
    %c6_321 = arith.constant 6 : index
    %c0_322 = arith.constant 0 : index
    %c0_323 = arith.constant 0 : index
    %358 = vector.load %arg2[%c4_320, %c6_321, %c0_322, %c0_323] : memref<5x9x128x128xbf16, #tpu.memory_space<vmem>>, vector<1x1x128x128xbf16>
    %359 = vector.shape_cast %358 : vector<1x1x128x128xbf16> to vector<128x128xbf16>
    %cst_324 = arith.constant dense<0.000000e+00> : vector<80x128xf32>
    %360 = tpu.matmul %357, %359, %cst_324 {dimension_numbers = #tpu.dot_dimension_numbers<[1], [0], [0], [1], [0, 0, 1, 1], [], []>} : vector<80x128xbf16>, vector<128x128xbf16>, vector<80x128xf32> -> vector<80x128xf32>
    %361 = arith.addf %355, %360 : vector<80x128xf32>
    %c21_325 = arith.constant 21 : index
    %c0_326 = arith.constant 0 : index
    %362 = vector.load %arg8[%c21_325, %c0_326] : memref<104x128xf32, #tpu.memory_space<vmem>>, vector<80x128xf32>
    %363 = arith.truncf %362 : vector<80x128xf32> to vector<80x128xbf16>
    %c4_327 = arith.constant 4 : index
    %c7_328 = arith.constant 7 : index
    %c0_329 = arith.constant 0 : index
    %c0_330 = arith.constant 0 : index
    %364 = vector.load %arg2[%c4_327, %c7_328, %c0_329, %c0_330] : memref<5x9x128x128xbf16, #tpu.memory_space<vmem>>, vector<1x1x128x128xbf16>
    %365 = vector.shape_cast %364 : vector<1x1x128x128xbf16> to vector<128x128xbf16>
    %cst_331 = arith.constant dense<0.000000e+00> : vector<80x128xf32>
    %366 = tpu.matmul %363, %365, %cst_331 {dimension_numbers = #tpu.dot_dimension_numbers<[1], [0], [0], [1], [0, 0, 1, 1], [], []>} : vector<80x128xbf16>, vector<128x128xbf16>, vector<80x128xf32> -> vector<80x128xf32>
    %367 = arith.addf %361, %366 : vector<80x128xf32>
    %c22_332 = arith.constant 22 : index
    %c0_333 = arith.constant 0 : index
    %368 = vector.load %arg8[%c22_332, %c0_333] : memref<104x128xf32, #tpu.memory_space<vmem>>, vector<80x128xf32>
    %369 = arith.truncf %368 : vector<80x128xf32> to vector<80x128xbf16>
    %c4_334 = arith.constant 4 : index
    %c8_335 = arith.constant 8 : index
    %c0_336 = arith.constant 0 : index
    %c0_337 = arith.constant 0 : index
    %370 = vector.load %arg2[%c4_334, %c8_335, %c0_336, %c0_337] : memref<5x9x128x128xbf16, #tpu.memory_space<vmem>>, vector<1x1x128x128xbf16>
    %371 = vector.shape_cast %370 : vector<1x1x128x128xbf16> to vector<128x128xbf16>
    %cst_338 = arith.constant dense<0.000000e+00> : vector<80x128xf32>
    %372 = tpu.matmul %369, %371, %cst_338 {dimension_numbers = #tpu.dot_dimension_numbers<[1], [0], [0], [1], [0, 0, 1, 1], [], []>} : vector<80x128xbf16>, vector<128x128xbf16>, vector<80x128xf32> -> vector<80x128xf32>
    %373 = arith.addf %367, %372 : vector<80x128xf32>
    %374 = vector.extract_strided_slice %4 {offsets = [4, 0], sizes = [1, 128], strides = [1, 1]} : vector<5x128xf32> to vector<1x128xf32>
    %375 = vector.broadcast %374 : vector<1x128xf32> to vector<80x128xf32>
    %376 = arith.addf %373, %375 : vector<80x128xf32>
    %cst_339 = arith.constant 0.000000e+00 : f32
    %377 = vector.broadcast %cst_339 : f32 to vector<80x128xf32>
    %378 = arith.maximumf %376, %377 : vector<80x128xf32>
    %379 = arith.mulf %378, %132 : vector<80x128xf32>
    %cst_340 = arith.constant dense<0.000000e+00> : vector<128xf32>
    %380 = vector.multi_reduction <add>, %379, %cst_340 [0] : vector<80x128xf32> to vector<128xf32>
    %381 = vector.shape_cast %380 : vector<128xf32> to vector<1x128xf32>
    %cst_341 = arith.constant 1.562500e-02 : f32
    %382 = vector.broadcast %cst_341 : f32 to vector<1x128xf32>
    %383 = arith.mulf %381, %382 : vector<1x128xf32>
    %c0_342 = arith.constant 0 : index
    %c0_343 = arith.constant 0 : index
    %384 = vector.load %arg4[%c0_342, %c0_343] : memref<128x128xf32, #tpu.memory_space<vmem>>, vector<128x128xf32>
    %cst_344 = arith.constant dense<0.000000e+00> : vector<1x128xf32>
    %385 = tpu.matmul %383, %384, %cst_344 {dimension_numbers = #tpu.dot_dimension_numbers<[1], [0], [0], [1], [0, 0, 1, 1], [], []>} : vector<1x128xf32>, vector<128x128xf32>, vector<1x128xf32> -> vector<1x128xf32>
    %c0_345 = arith.constant 0 : index
    %c0_346 = arith.constant 0 : index
    %386 = vector.load %arg5[%c0_345, %c0_346] : memref<1x128xf32, #tpu.memory_space<vmem>>, vector<1x128xf32>
    %387 = arith.addf %385, %386 : vector<1x128xf32>
    %c0_347 = arith.constant 0 : index
    %c0_348 = arith.constant 0 : index
    %c0_349 = arith.constant 0 : index
    %388 = vector.load %arg6[%c0_347, %c0_348, %c0_349] : memref<1x1x128xf32, #tpu.memory_space<vmem>>, vector<1x1x128xf32>
    %389 = vector.shape_cast %388 : vector<1x1x128xf32> to vector<1x128xf32>
    %390 = vector.shape_cast %387 : vector<1x128xf32> to vector<1x1x128xf32>
    tpu.vector_store %arg6[%c0_347, %c0_348, %c0_349], %390 {strides = array<i32>} : memref<1x1x128xf32, #tpu.memory_space<vmem>>, vector<1x1x128xf32>,
    return
  }
  func.func @transform_0(%arg0: i32) -> (i32, i32, i32) {
    %c0_i32 = arith.constant 0 : i32
    %c0_i32_0 = arith.constant 0 : i32
    %c0_i32_1 = arith.constant 0 : i32
    return %arg0, %c0_i32, %c0_i32_0 : i32, i32, i32
  }
  func.func @transform_1(%arg0: i32) -> (i32, i32, i32, i32) {
    %c0_i32 = arith.constant 0 : i32
    %c0_i32_0 = arith.constant 0 : i32
    %c0_i32_1 = arith.constant 0 : i32
    %c0_i32_2 = arith.constant 0 : i32
    %c0_i32_3 = arith.constant 0 : i32
    return %c0_i32, %c0_i32_0, %c0_i32_1, %c0_i32_2 : i32, i32, i32, i32
  }
  func.func @transform_2(%arg0: i32) -> (i32, i32) {
    %c0_i32 = arith.constant 0 : i32
    %c0_i32_0 = arith.constant 0 : i32
    %c0_i32_1 = arith.constant 0 : i32
    return %c0_i32, %c0_i32_0 : i32, i32
  }
  func.func @transform_3(%arg0: i32) -> (i32, i32) {
    %c0_i32 = arith.constant 0 : i32
    %c0_i32_0 = arith.constant 0 : i32
    %c0_i32_1 = arith.constant 0 : i32
    return %c0_i32, %c0_i32_0 : i32, i32
  }
  func.func @transform_4(%arg0: i32) -> (i32, i32) {
    %c0_i32 = arith.constant 0 : i32
    %c0_i32_0 = arith.constant 0 : i32
    %c0_i32_1 = arith.constant 0 : i32
    return %c0_i32, %c0_i32_0 : i32, i32
  }
  func.func @transform_5(%arg0: i32) -> (i32, i32, i32) {
    %c0_i32 = arith.constant 0 : i32
    %c0_i32_0 = arith.constant 0 : i32
    %c0_i32_1 = arith.constant 0 : i32
    return %arg0, %c0_i32, %c0_i32_0 : i32, i32, i32
  }
}

</mosaic_0001>

<bundles_post_ra>
// kernel: activation_map_extractor_forward.1
= control target key start
LH: loop header
LB: loop body
LE: loop exit
PB: predicated region body
PF: predicated region fallthrough
CT: control target
= control target key end

     0   :  { %10 = vsyncpa [#allocation5], 0  ;;  %s19630_s0 = inlined_call_operand.vmem [shape: f32[2,328,128], index: 0, kind: input, shape index: {}]   ;;  %s19631_s1 = inlined_call_operand.vmem [shape: bf16[5,9,128,128], index: 1, kind: input, shape index: {}]   ;;  %s19632_s2 = inlined_call_operand.vmem [shape: f32[5,128], index: 2, kind: input, shape index: {}]   ;;  %s19633_s3 = inlined_call_operand.vmem [shape: f32[128,128], index: 3, kind: input, shape index: {}]   ;;  %s19634_s4 = inlined_call_operand.vmem [shape: f32[1,128], index: 4, kind: input, shape index: {}]   ;;  %s19635_s5 = inlined_call_operand.hbm [shape: f32[2,1,128], index: 5, kind: output, shape index: {}]  }
   0x1   :  { %12 = vsyncpa [#allocation5 + $0x1], 0  ;;  %s15884_s18 = smov 0   ;;  %s15886_s19 = smov 0  }
   0x2   :  { %s15888_s20 = smov 0   ;;  %s15890_s21 = smov 0  }
   0x3 LB: > { %s15905_s22 = sadd.s32 4294967295, %s15847_s21   ;;  %s11311_s23 = sadd.s32 4294967294, %s15847_s21   ;;  %s15847_s21 = sphi %s15890_s21, %s19675_s21   ;;  %s15843_s20 = sphi %s15888_s20, %s19674_s20   ;;  %s15839_s19 = sphi %s15886_s19, %s19673_s19   ;;  %s15835_s18 = sphi %s15884_s18, %s19672_s18  }
   0x4   : > { %s15909_s24 = sadd.s32 1, %s15847_s21   ;;  %s135_s25 = sadd.s32 1, %s15843_s20 }
   0x5   : > { %s132_s26 = ssub.s32 %s15847_s21, %s15909_s24  ;;  %p145_p0 = scmp.ne.s32.totalorder %s15843_s20, %s15839_s19 }
   0x6   : > { %p133_p1 = scmp.eq.s32.totalorder %s132_s26, 0  ;;  %p146_p2 = scmp.eq.s32.totalorder %s15905_s22, 1 }
   0x7   : > { %p151_p3 = scmp.ne.s32.totalorder %s15839_s19, %s15835_s18  ;;  %p152_p4 = scmp.eq.s32.totalorder %s11311_s23, 1 }
   0x8   : > { %s15920_s27 = scalar_select %p133_p1, %s15843_s20, %s135_s25  }
   0x9   : > { %p15922_p5 = por %p146_p2, %p145_p0  ;;  %p15926_p6 = por %p152_p4, %p151_p3 }
   0xa   : > { %p11314_p7 = scmp.ge.s32.totalorder %s15847_s21, 1  ;;  %p190_p8 = scmp.lt.s32.totalorder %s15847_s21, 3 }
   0xc   : > { %p191_p9 = pnand %p11314_p7, %p190_p8 }
   0xd   : > { %v15415_v0 = vld [vmem:[%s19631_s1 + $0x40] sm:$0xff] (!%p191_p9)   ;;  %p217_p10 = scmp.lt.s32.totalorder (!%p191_p9), %s15905_s22, 1  ;;  %v15416_v1 = vld [vmem:[%s19631_s1 + $0x48] sm:$0xff] (!%p191_p9)   ;;  %v15417_v2 = vld [vmem:[%s19631_s1 + $0x50] sm:$0xff] (!%p191_p9)   ;;  %vm15850_vm0 = vmmov (!%p191_p9), 0   ;;  %vm4625_vm1 = vcmask (!%p191_p9), 1041409  }
   0xe   : > { %194 = sbr.rel (%p191_p9) target bundleno = 3088 (0xc10), region = 40  ;;  %13240 = vmatprep.subr.bf16.mxu0 (!%p191_p9), %v15415_v0  ;;  %v15418_v3 = vld [vmem:[%s19631_s1 + $0x58] sm:$0xff] (!%p191_p9)   ;;  %v15419_v7 = vld [vmem:[%s19631_s1 + $0x60] sm:$0xff] (!%p191_p9)   ;;  %v15420_v8 = vld [vmem:[%s19631_s1 + $0x68] sm:$0xff] (!%p191_p9)   ;;  %vm4627_vm2 = vcmask (!%p191_p9), 1042434   ;;  %vm4629_vm3 = vcmask (!%p191_p9), 1043459  }
   0xf   : > { %13241 = vmatpush3.bf16.msra.mxu0 (!%p191_p9), %v15415_v0  ;;  %v15421_v9 = vld [vmem:[%s19631_s1 + $0x70] sm:$0xff] (!%p191_p9)   ;;  %v15422_v10 = vld [vmem:[%s19631_s1 + $0x78] sm:$0xff] (!%p191_p9)   ;;  %v15423_v13 = vld [vmem:[%s19631_s1] sm:$0xff] (!%p191_p9)   ;;  %vm4631_vm4 = vcmask (!%p191_p9), 1044484   ;;  %vm4633_vm5 = vcmask (!%p191_p9), 1045509   ;;  %vm4635_vm6 = vcmask (!%p191_p9), 1046534  }
  0x10   : > { %13242 = vmatprep.subr.bf16.mxu0 (!%p191_p9), %v15416_v1  ;;  %v15424_v18 = vld [vmem:[%s19631_s1 + $0x8] sm:$0xff] (!%p191_p9)   ;;  %v15425_v23 = vld [vmem:[%s19631_s1 + $0x10] sm:$0xff] (!%p191_p9)   ;;  %v15426_v26 = vld [vmem:[%s19631_s1 + $0x18] sm:$0xff] (!%p191_p9)   ;;  %vm4637_vm7 = vcmask (!%p191_p9), 1047559   ;;  %s12518_s16 = sshll.u32 (!%p191_p9), %s15905_s22, 4 }
  0x11   : > { %v15427_v31 = vld [vmem:[%s19631_s1 + $0x20] sm:$0xff] (!%p191_p9)   ;;  %v15428_v34 = vld [vmem:[%s19631_s1 + $0x28] sm:$0xff] (!%p191_p9)   ;;  %v15429_v39 = vld [vmem:[%s19631_s1 + $0x30] sm:$0xff] (!%p191_p9)  }
  0x12   : > { %v15430_v41 = vld [vmem:[%s19631_s1 + $0x38] sm:$0xff] (!%p191_p9)   ;;  %v15431_v47 = vld [vmem:[%s19631_s1 + $0x80] sm:$0xff] (!%p191_p9)  }
  0x13   : > { %13243 = vmatpush3.bf16.msra.mxu0 (!%p191_p9), %v15416_v1 }
  0x14   : > { %13244 = vmatprep.subr.bf16.mxu0 (!%p191_p9), %v15417_v2 }
  0x15   : > { %s218_s9 = scalar_select %p217_p10, %s15905_s22, 1 }
  0x16   : > { %s15853_s22 = smov [#allocation4]  }
  0x17   : > { %s15351_s12 = smul.u32 328, %s218_s9  ;;  %13245 = vmatpush3.bf16.msra.mxu0 %v15417_v2  ;;  %s15789_s7 = sshll.u32 %s15853_s22, 4  ;;  %s15790_s7 = int_to_ptr.vmem [resolvable:$false] %s15789_s7 }
  0x18   : > { %13246 = vmatprep.subr.bf16.mxu0 %v15418_v3  ;;  %s15791_s8 = scalar_lea.vmem %s15790_s7, 32 }
  0x19   : > { %s15946_s15 = scalar_lea.vmem %s19630_s0, %s15351_s12  ;;  %s215_s12 = sand.u32 1, %s15839_s19  }
  0x1a   : > { %v320_v4 = vld [vmem:[%s15946_s15 + $0x1] sm:$0xff]  ;;  %v321_v5 = vld [vmem:[%s15946_s15 + $0x9] sm:$0xff]  ;;  %v322_v11 = vld [vmem:[%s15946_s15 + $0x11] sm:$0xff]  ;;  %s216_s17 = scalar_lea.vmem [#allocation4], %s215_s12  ;;  %s11244_s30 = scalar_lea.sflag [#allocation5], %s215_s12 }
  0x1b   : > { %v356_v6 = vpack.c.bf16 %v321_v5, %v320_v4  ;;  %13247 = vmatpush3.bf16.msra.mxu0 %v15418_v3  ;;  %v323_v12 = vld [vmem:[%s15946_s15 + $0x19] sm:$0xff]  ;;  %v324_v14 = vld [vmem:[%s15946_s15 + $0x21] sm:$0xff]  ;;  %v325_v15 = vld [vmem:[%s15946_s15 + $0x29] sm:$0xff]  ;;  %s11256_s23 = sshll.u32 %s216_s17, 4  ;;  %s19590_s23 = int_to_ptr.vmem [resolvable:$true] %s11256_s23 }
  0x1c   : > { %13248 = vmatprep.subr.bf16.mxu0 %v15419_v7  ;;  %v357_v16 = vpack.c.bf16 %v323_v12, %v322_v11  ;;  %v358_v17 = vpack.c.bf16 %v325_v15, %v324_v14  ;;  %v326_v19 = vld [vmem:[%s15946_s15 + $0x31] sm:$0xff]  ;;  %v327_v20 = vld [vmem:[%s15946_s15 + $0x39] sm:$0xff]  ;;  %v328_v21 = vld [vmem:[%s15946_s15 + $0x41] sm:$0xff]  ;;  %s15785_s6 = scalar_lea.vmem %s19590_s23, 16  ;;  %p15792_p0 = scmp.lt.s32.totalorder %s19590_s23, %s15790_s7 }
  0x1d   : > { %13256 = vmatprep.mubr.bf16.mxu0 %v356_v6  ;;  %v329_v22 = vld [vmem:[%s15946_s15 + $0x49] sm:$0xff]  ;;  %v359_v24 = vpack.c.bf16 %v327_v20, %v326_v19  ;;  %v330_v27 = vld [vmem:[%s15946_s15 + $0x51] sm:$0xff]  ;;  %v331_v28 = vld [vmem:[%s15946_s15 + $0x59] sm:$0xff]  ;;  %p15786_p11 = scmp.ne.s32.totalorder %s19590_s23, %s15785_s6  ;;  %p15793_p1 = scmp.lt.s32.totalorder %s15791_s8, %s15785_s6 }
  0x1e   : > { %v360_v25 = vpack.c.bf16 %v329_v22, %v328_v21  ;;  %v332_v29 = vld [vmem:[%s15946_s15 + $0x61] sm:$0xff]  ;;  %v333_v30 = vld [vmem:[%s15946_s15 + $0x69] sm:$0xff]  ;;  %v361_v32 = vpack.c.bf16 %v331_v28, %v330_v27  ;;  %v334_v35 = vld [vmem:[%s15946_s15 + $0x71] sm:$0xff] }
  0x1f   : > { %13249 = vmatpush3.bf16.msra.mxu0 %v15419_v7  ;;  %v362_v33 = vpack.c.bf16 %v333_v30, %v332_v29  ;;  %v335_v36 = vld [vmem:[%s15946_s15 + $0x79] sm:$0xff]  ;;  %v336_v37 = vld [vmem:[%s15946_s15 + $0x81] sm:$0xff]  ;;  %v337_v38 = vld [vmem:[%s15946_s15 + $0x89] sm:$0xff]  ;;  %p15787_p12 = pnand %p15786_p11, %p15922_p5  ;;  %p15794_p2 = por %p15793_p1, %p15792_p0 }
  0x20   : > { %13250 = vmatprep.subr.bf16.mxu0 %v15420_v8  ;;  %v363_v40 = vpack.c.bf16 %v335_v36, %v334_v35  ;;  %v364_v42 = vpack.c.bf16 %v337_v38, %v336_v37  ;;  %v338_v43 = vld [vmem:[%s15946_s15 + $0x91] sm:$0xff]  ;;  %v339_v44 = vld [vmem:[%s15946_s15 + $0x99] sm:$0xff]  ;;  %v340_v45 = vld [vmem:[%s15946_s15 + $0xa1] sm:$0xff] }
  0x21   : > { %v341_v46 = vld [vmem:[%s15946_s15 + $0xa9] sm:$0xff]  ;;  %v365_v48 = vpack.c.bf16 %v339_v44, %v338_v43  ;;  %v342_v50 = vld [vmem:[%s15946_s15 + $0xb1] sm:$0xff]  ;;  %v343_v51 = vld [vmem:[%s15946_s15 + $0xb9] sm:$0xff]  ;;  %p15788_p13 = pneg %p15787_p12 }
  0x22   : > { %v366_v49 = vpack.c.bf16 %v341_v46, %v340_v45  ;;  %v344_v52 = vld [vmem:[%s15946_s15 + $0xc1] sm:$0xff]  ;;  %v345_v53 = vld [vmem:[%s15946_s15 + $0xc9] sm:$0xff]  ;;  %v367_v54 = vpack.c.bf16 %v343_v51, %v342_v50  ;;  %v346_v56 = vld [vmem:[%s15946_s15 + $0xd1] sm:$0xff] }
  0x23   : > { %13251 = vmatpush3.bf16.msra.mxu0 %v15420_v8  ;;  %v368_v55 = vpack.c.bf16 %v345_v53, %v344_v52  ;;  %v347_v57 = vld [vmem:[%s15946_s15 + $0xd9] sm:$0xff]  ;;  %v348_v58 = vld [vmem:[%s15946_s15 + $0xe1] sm:$0xff]  ;;  %v349_v59 = vld [vmem:[%s15946_s15 + $0xe9] sm:$0xff]  ;;  %p15795_p3 = pnand %p15794_p2, %p15788_p13 }
  0x24   : > { %13252 = vmatprep.subr.bf16.mxu0 %v15421_v9  ;;  %v369_v60 = vpack.c.bf16 %v347_v57, %v346_v56  ;;  %v370_v61 = vpack.c.bf16 %v349_v59, %v348_v58  ;;  %v350_v62 = vld [vmem:[%s15946_s15 + $0xf1] sm:$0xff]  ;;  %v351_v63 = vld [vmem:[%s15946_s15 + $0xf9] sm:$0xff]  ;;  %v352_v0 = vld [vmem:[%s15946_s15 + $0x101] sm:$0xff] }
  0x25   : > { %v353_v1 = vld [vmem:[%s15946_s15 + $0x109] sm:$0xff]  ;;  %v371_v2 = vpack.c.bf16 %v351_v63, %v350_v62  ;;  %v354_v4 = vld [vmem:[%s15946_s15 + $0x111] sm:$0xff]  ;;  %v355_v5 = vld [vmem:[%s15946_s15 + $0x119] sm:$0xff] }
  0x26   : > { %v372_v3 = vpack.c.bf16 %v353_v1, %v352_v0  ;;  %v250_v6 = vld [vmem:[%s15946_s15] sm:$0xff]  ;;  %v251_v7 = vld [vmem:[%s15946_s15 + $0x8] sm:$0xff]  ;;  %v373_v8 = vpack.c.bf16 %v355_v5, %v354_v4  ;;  %v253_v11 = vld [vmem:[%s15946_s15 + $0x18] sm:$0xff] }
  0x27   : > { %13253 = vmatpush3.bf16.msra.mxu0 %v15421_v9  ;;  %v286_v9 = vpack.c.bf16 %v251_v7, %v250_v6  ;;  %v254_v12 = vld [vmem:[%s15946_s15 + $0x20] sm:$0xff]  ;;  %v15432_v15 = vld [vmem:[%s19631_s1 + $0x88] sm:$0xff]   ;;  %v15433_v21 = vld [vmem:[%s19631_s1 + $0x90] sm:$0xff]  }
  0x28   : > { %13254 = vmatprep.subr.bf16.mxu0 %v15422_v10  ;;  %v258_v19 = vld [vmem:[%s15946_s15 + $0x40] sm:$0xff]  ;;  %v259_v20 = vld [vmem:[%s15946_s15 + $0x48] sm:$0xff]  ;;  %v15437_v37 = vld [vmem:[%s19631_s1 + $0xb0] sm:$0xff]  }
  0x29   : > { %v262_v27 = vld [vmem:[%s15946_s15 + $0x60] sm:$0xff]  ;;  %v263_v28 = vld [vmem:[%s15946_s15 + $0x68] sm:$0xff] }
  0x2a   : > { %v15435_v29 = vld [vmem:[%s19631_s1 + $0xa0] sm:$0xff]   ;;  %v267_v36 = vld [vmem:[%s15946_s15 + $0x88] sm:$0xff] }
  0x2b   : > { %13255 = vmatpush3.bf16.msra.mxu0 %v15422_v10  ;;  %v252_v10 = vld [vmem:[%s15946_s15 + $0x10] sm:$0xff]  ;;  %v266_v35 = vld [vmem:[%s15946_s15 + $0x80] sm:$0xff]  ;;  %v271_v44 = vld [vmem:[%s15946_s15 + $0xa8] sm:$0xff] }
  0x2c   : > { %13292 = vmatprep.subr.bf16.mxu0 %v15423_v13  ;;  %v287_v14 = vpack.c.bf16 %v253_v11, %v252_v10  ;;  %v270_v43 = vld [vmem:[%s15946_s15 + $0xa0] sm:$0xff]  ;;  %v275_v51 = vld [vmem:[%s15946_s15 + $0xc8] sm:$0xff] }
  0x2d   : > { %v15439_v45 = vld [vmem:[%s19631_s1 + $0xc0] sm:$0xff]   ;;  %v279_v57 = vld [vmem:[%s15946_s15 + $0xe8] sm:$0xff] }
  0x2e   : > { %13257 = vmatmul.mubr.bf16.vlgmr.msra.gmra.mrb[0].mxu0 %v357_v16  ;;  %v274_v50 = vld [vmem:[%s15946_s15 + $0xc0] sm:$0xff]  ;;  %v283_v63 = vld [vmem:[%s15946_s15 + $0x108] sm:$0xff] }
  0x2f   : > { %13293 = vmatpush3.bf16.msra.mxu0 %v15423_v13  ;;  %13260 = vmatprep.mubr.bf16.mxu0 %v358_v17  ;;  %v255_v13 = vld [vmem:[%s15946_s15 + $0x28] sm:$0xff]  ;;  %v256_v17 = vld [vmem:[%s15946_s15 + $0x30] sm:$0xff]  ;;  %v298_v53 = vpack.c.bf16 %v275_v51, %v274_v50  ;;  %v278_v56 = vld [vmem:[%s15946_s15 + $0xe0] sm:$0xff] }
  0x30   : > { %13294 = vmatprep.subr.bf16.mxu0 %v15424_v18  ;;  %v288_v16 = vpack.c.bf16 %v255_v13, %v254_v12  ;;  %v300_v59 = vpack.c.bf16 %v279_v57, %v278_v56  ;;  %v282_v62 = vld [vmem:[%s15946_s15 + $0x100] sm:$0xff]  ;;  %v842_v5 = vld [vmem:[%s15946_s15 + $0xa] sm:$0xff] }
  0x31   : > { %v302_v1 = vpack.c.bf16 %v283_v63, %v282_v62  ;;  %v841_v4 = vld [vmem:[%s15946_s15 + $0x2] sm:$0xff]  ;;  %v846_v11 = vld [vmem:[%s15946_s15 + $0x2a] sm:$0xff] }
  0x32   : > { %v877_v7 = vpack.c.bf16 %v842_v5, %v841_v4  ;;  %v845_v10 = vld [vmem:[%s15946_s15 + $0x22] sm:$0xff]  ;;  %v15449_v4 = vld [vmem:[%s19631_s1 + $0x110] sm:$0xff]   ;;  %v15450_v5 = vld [vmem:[%s19631_s1 + $0x118] sm:$0xff]  }
  0x33   : > { %13295 = vmatpush3.bf16.msra.mxu0 %v15424_v18  ;;  %v257_v18 = vld [vmem:[%s15946_s15 + $0x38] sm:$0xff]  ;;  %v15440_v13 = vld [vmem:[%s19631_s1 + $0xc8] sm:$0xff]  }
  0x34   : > { %13296 = vmatprep.subr.bf16.mxu0 %v15425_v23  ;;  %v289_v22 = vpack.c.bf16 %v257_v18, %v256_v17  ;;  %v849_v17 = vld [vmem:[%s15946_s15 + $0x42] sm:$0xff]  ;;  %v850_v18 = vld [vmem:[%s15946_s15 + $0x4a] sm:$0xff] }
  0x36   : > { %13261 = vmatmul.mubr.bf16.gmra.mrb[4].mxu0 %v359_v24  ;;  %v290_v24 = vpack.c.bf16 %v259_v20, %v258_v19  ;;  %v15441_v19 = vld [vmem:[%s19631_s1 + $0xd0] sm:$0xff]  }
  0x37   : > { %13264 = vmatprep.mubr.bf16.mxu0 %v360_v25  ;;  %13297 = vmatpush3.bf16.msra.mxu0 %v15425_v23  ;;  %v15434_v23 = vld [vmem:[%s19631_s1 + $0x98] sm:$0xff]   ;;  %v260_v25 = vld [vmem:[%s15946_s15 + $0x50] sm:$0xff] }
  0x38   : > { %13298 = vmatprep.subr.bf16.mxu0 %v15426_v26 }
  0x3b   : > { %13299 = vmatpush3.bf16.msra.mxu0 %v15426_v26  ;;  %v261_v26 = vld [vmem:[%s15946_s15 + $0x58] sm:$0xff] }
  0x3c   : > { %13300 = vmatprep.subr.bf16.mxu0 %v15427_v31  ;;  %v291_v30 = vpack.c.bf16 %v261_v26, %v260_v25  ;;  %v853_v25 = vld [vmem:[%s15946_s15 + $0x62] sm:$0xff]  ;;  %v854_v26 = vld [vmem:[%s15946_s15 + $0x6a] sm:$0xff] }
  0x3e   : > { %13265 = vmatmul.mubr.bf16.gmra.mrb[8].mxu0 %v361_v32  ;;  %v292_v32 = vpack.c.bf16 %v263_v28, %v262_v27  ;;  %v15443_v27 = vld [vmem:[%s19631_s1 + $0xe0] sm:$0xff]  }
  0x3f   : > { %13268 = vmatprep.mubr.bf16.mxu0 %v362_v33  ;;  %13301 = vmatpush3.bf16.msra.mxu0 %v15427_v31  ;;  %v15436_v31 = vld [vmem:[%s19631_s1 + $0xa8] sm:$0xff]   ;;  %v264_v33 = vld [vmem:[%s15946_s15 + $0x70] sm:$0xff] }
  0x40   : > { %13302 = vmatprep.subr.bf16.mxu0 %v15428_v34 }
  0x43   : > { %13303 = vmatpush3.bf16.msra.mxu0 %v15428_v34  ;;  %v265_v34 = vld [vmem:[%s15946_s15 + $0x78] sm:$0xff] }
  0x44   : > { %13304 = vmatprep.subr.bf16.mxu0 %v15429_v39  ;;  %v293_v38 = vpack.c.bf16 %v265_v34, %v264_v33  ;;  %v857_v33 = vld [vmem:[%s15946_s15 + $0x82] sm:$0xff]  ;;  %v858_v34 = vld [vmem:[%s15946_s15 + $0x8a] sm:$0xff] }
  0x46   : > { %13269 = vmatmul.mubr.bf16.gmra.mrb[12].mxu0 %v363_v40  ;;  %v294_v40 = vpack.c.bf16 %v267_v36, %v266_v35  ;;  %v15445_v35 = vld [vmem:[%s19631_s1 + $0xf0] sm:$0xff]  }
  0x47   : > { %13272 = vmatprep.mubr.bf16.mxu0 %v364_v42  ;;  %13305 = vmatpush3.bf16.msra.mxu0 %v15429_v39  ;;  %v15438_v39 = vld [vmem:[%s19631_s1 + $0xb8] sm:$0xff]  }
  0x48   : > { %13306 = vmatprep.subr.bf16.mxu0 %v15430_v41  ;;  %v269_v42 = vld [vmem:[%s15946_s15 + $0x98] sm:$0xff] }
  0x4b   : > { %13307 = vmatpush3.bf16.msra.mxu0 %v15430_v41  ;;  %v268_v41 = vld [vmem:[%s15946_s15 + $0x90] sm:$0xff] }
  0x4c   : > { %13344 = vmatprep.subr.bf16.mxu0 %v15431_v47  ;;  %v295_v46 = vpack.c.bf16 %v269_v42, %v268_v41  ;;  %v861_v41 = vld [vmem:[%s15946_s15 + $0xa2] sm:$0xff]  ;;  %v862_v42 = vld [vmem:[%s15946_s15 + $0xaa] sm:$0xff] }
  0x4e   : > { %13273 = vmatmul.mubr.bf16.gmra.mrb[16].mxu0 %v365_v48  ;;  %v272_v48 = vld [vmem:[%s15946_s15 + $0xb0] sm:$0xff] }
  0x4f   : > { %13276 = vmatprep.mubr.bf16.mxu0 %v366_v49  ;;  %v273_v49 = vld [vmem:[%s15946_s15 + $0xb8] sm:$0xff] }
  0x50   : > { %v297_v52 = vpack.c.bf16 %v273_v49, %v272_v48  ;;  %v865_v48 = vld [vmem:[%s15946_s15 + $0xc2] sm:$0xff]  ;;  %v866_v49 = vld [vmem:[%s15946_s15 + $0xca] sm:$0xff] }
  0x51   : > { %v889_v51 = vpack.c.bf16 %v866_v49, %v865_v48  ;;  %v1523_v48 = vld [vmem:[%s15946_s15 + $0xa3] sm:$0xff]  ;;  %v1524_v49 = vld [vmem:[%s15946_s15 + $0xab] sm:$0xff] }
  0x56   : > { %13277 = vmatmul.mubr.bf16.gmra.mrb[20].mxu0 %v367_v54  ;;  %v276_v54 = vld [vmem:[%s15946_s15 + $0xd0] sm:$0xff] }
  0x57   : > { %13280 = vmatprep.mubr.bf16.mxu0 %v368_v55  ;;  %v277_v55 = vld [vmem:[%s15946_s15 + $0xd8] sm:$0xff] }
  0x58   : > { %v299_v58 = vpack.c.bf16 %v277_v55, %v276_v54  ;;  %v869_v54 = vld [vmem:[%s15946_s15 + $0xe2] sm:$0xff]  ;;  %v870_v55 = vld [vmem:[%s15946_s15 + $0xea] sm:$0xff] }
  0x59   : > { %v891_v57 = vpack.c.bf16 %v870_v55, %v869_v54  ;;  %v1527_v55 = vld [vmem:[%s15946_s15 + $0xc3] sm:$0xff] }
  0x5e   : > { %13281 = vmatmul.mubr.bf16.gmra.mrb[24].mxu0 %v369_v60  ;;  %v280_v60 = vld [vmem:[%s15946_s15 + $0xf0] sm:$0xff] }
  0x5f   : > { %13284 = vmatprep.mubr.bf16.mxu0 %v370_v61  ;;  %v281_v61 = vld [vmem:[%s15946_s15 + $0xf8] sm:$0xff] }
  0x60   : > { %v301_v0 = vpack.c.bf16 %v281_v61, %v280_v60  ;;  %v873_v60 = vld [vmem:[%s15946_s15 + $0x102] sm:$0xff]  ;;  %v874_v61 = vld [vmem:[%s15946_s15 + $0x10a] sm:$0xff] }
  0x61   : > { %v893_v63 = vpack.c.bf16 %v874_v61, %v873_v60  ;;  %v1531_v61 = vld [vmem:[%s15946_s15 + $0xe3] sm:$0xff] }
  0x66   : > { %13285 = vmatmul.mubr.bf16.gmra.mrb[28].mxu0 %v371_v2  ;;  %v284_v2 = vld [vmem:[%s15946_s15 + $0x110] sm:$0xff] }
  0x67   : > { %13288 = vmatprep.mubr.bf16.mxu0 %v372_v3  ;;  %v285_v3 = vld [vmem:[%s15946_s15 + $0x118] sm:$0xff] }
  0x68   : > { %v303_v6 = vpack.c.bf16 %v285_v3, %v284_v2  ;;  %v15448_v3 = vld [vmem:[%s19631_s1 + $0x108] sm:$0xff]  }
  0x6e   : > { %13289 = vmatmul.mubr.bf16.gmra.mrb[32].mxu0 %v373_v8  ;;  %v843_v8 = vld [vmem:[%s15946_s15 + $0x12] sm:$0xff] }
  0x6f   : > { %13308 = vmatprep.mubr.bf16.mxu0 %v286_v9  ;;  %v844_v9 = vld [vmem:[%s15946_s15 + $0x1a] sm:$0xff] }
  0x70   : > { %v16092_v12 = vpack.c.bf16 %v844_v9, %v843_v8  ;;  %v15453_v8 = vld [vmem:[%s19631_s1 + $0x130] sm:$0xff]   ;;  %v15454_v9 = vld [vmem:[%s19631_s1 + $0x138] sm:$0xff]  }
  0x76   : > { %13309 = vmatmul.mubr.bf16.vlgmr.msra.gmra.mrb[0].mxu0 %v287_v14  ;;  %v16097_v14 = vpack.c.bf16 %v846_v11, %v845_v10  ;;  %v15455_v10 = vld [vmem:[%s19631_s1 + $0x140] sm:$0xff]  }
  0x77   : > { %13345 = vmatpush3.bf16.msra.mxu0 %v15431_v47  ;;  %13312 = vmatprep.mubr.bf16.mxu0 %v288_v16  ;;  %v296_v47 = vpack.c.bf16 %v271_v44, %v270_v43  ;;  %v848_v16 = vld [vmem:[%s15946_s15 + $0x3a] sm:$0xff]  ;;  %v1207_v11 = vld [vmem:[%s15946_s15 + $0x122] sm:$0xff] }
  0x78   : > { %13346 = vmatprep.subr.bf16.mxu0 %v15432_v15  ;;  %v15447_v43 = vld [vmem:[%s19631_s1 + $0x100] sm:$0xff]  }
  0x7b   : > { %13347 = vmatpush3.bf16.msra.mxu0 %v15432_v15  ;;  %v847_v15 = vld [vmem:[%s15946_s15 + $0x32] sm:$0xff] }
  0x7c   : > { %13348 = vmatprep.subr.bf16.mxu0 %v15433_v21  ;;  %v16108_v20 = vpack.c.bf16 %v848_v16, %v847_v15 }
  0x7e   : > { %13313 = vmatmul.mubr.bf16.gmra.mrb[4].mxu0 %v289_v22  ;;  %v16113_v22 = vpack.c.bf16 %v850_v18, %v849_v17  ;;  %v1507_v17 = vld [vmem:[%s15946_s15 + $0x23] sm:$0xff]  ;;  %v1508_v18 = vld [vmem:[%s15946_s15 + $0x2b] sm:$0xff] }
  0x7f   : > { %13316 = vmatprep.mubr.bf16.mxu0 %v290_v24  ;;  %13349 = vmatpush3.bf16.msra.mxu0 %v15433_v21  ;;  %v15442_v21 = vld [vmem:[%s19631_s1 + $0xd8] sm:$0xff]  }
  0x80   : > { %13350 = vmatprep.subr.bf16.mxu0 %v15434_v23  ;;  %v852_v24 = vld [vmem:[%s15946_s15 + $0x5a] sm:$0xff] }
  0x83   : > { %13351 = vmatpush3.bf16.msra.mxu0 %v15434_v23  ;;  %v851_v23 = vld [vmem:[%s15946_s15 + $0x52] sm:$0xff] }
  0x84   : > { %13352 = vmatprep.subr.bf16.mxu0 %v15435_v29  ;;  %v16124_v28 = vpack.c.bf16 %v852_v24, %v851_v23  ;;  %v15456_v23 = vld [vmem:[%s19631_s1 + $0x148] sm:$0xff]  }
  0x85   : > { %v1511_v24 = vld [vmem:[%s15946_s15 + $0x43] sm:$0xff] }
  0x86   : > { %13317 = vmatmul.mubr.bf16.gmra.mrb[8].mxu0 %v291_v30  ;;  %v16129_v30 = vpack.c.bf16 %v854_v26, %v853_v25  ;;  %v1512_v25 = vld [vmem:[%s15946_s15 + $0x4b] sm:$0xff]  ;;  %v1513_v26 = vld [vmem:[%s15946_s15 + $0x53] sm:$0xff] }
  0x87   : > { %13320 = vmatprep.mubr.bf16.mxu0 %v292_v32  ;;  %13353 = vmatpush3.bf16.msra.mxu0 %v15435_v29  ;;  %v15444_v29 = vld [vmem:[%s19631_s1 + $0xe8] sm:$0xff]   ;;  %v856_v32 = vld [vmem:[%s15946_s15 + $0x7a] sm:$0xff] }
  0x88   : > { %13354 = vmatprep.subr.bf16.mxu0 %v15436_v31 }
  0x8b   : > { %13355 = vmatpush3.bf16.msra.mxu0 %v15436_v31  ;;  %v855_v31 = vld [vmem:[%s15946_s15 + $0x72] sm:$0xff] }
  0x8c   : > { %13356 = vmatprep.subr.bf16.mxu0 %v15437_v37  ;;  %v16140_v36 = vpack.c.bf16 %v856_v32, %v855_v31  ;;  %v15458_v31 = vld [vmem:[%s19631_s1 + $0x158] sm:$0xff]   ;;  %v1515_v32 = vld [vmem:[%s15946_s15 + $0x63] sm:$0xff] }
  0x8e   : > { %13321 = vmatmul.mubr.bf16.gmra.mrb[12].mxu0 %v293_v38  ;;  %v16145_v38 = vpack.c.bf16 %v858_v34, %v857_v33  ;;  %v1516_v33 = vld [vmem:[%s15946_s15 + $0x6b] sm:$0xff]  ;;  %v1517_v34 = vld [vmem:[%s15946_s15 + $0x73] sm:$0xff] }
  0x8f   : > { %13324 = vmatprep.mubr.bf16.mxu0 %v294_v40  ;;  %13357 = vmatpush3.bf16.msra.mxu0 %v15437_v37  ;;  %v15446_v37 = vld [vmem:[%s19631_s1 + $0xf8] sm:$0xff]  }
  0x90   : > { %13358 = vmatprep.subr.bf16.mxu0 %v15438_v39  ;;  %v860_v40 = vld [vmem:[%s15946_s15 + $0x9a] sm:$0xff] }
  0x93   : > { %13359 = vmatpush3.bf16.msra.mxu0 %v15438_v39  ;;  %v859_v39 = vld [vmem:[%s15946_s15 + $0x92] sm:$0xff] }
  0x94   : > { %13396 = vmatprep.subr.bf16.mxu0 %v15439_v45  ;;  %v886_v44 = vpack.c.bf16 %v860_v40, %v859_v39  ;;  %v15460_v39 = vld [vmem:[%s19631_s1 + $0x168] sm:$0xff]  }
  0x95   : > { %v1519_v40 = vld [vmem:[%s15946_s15 + $0x83] sm:$0xff] }
  0x96   : > { %13325 = vmatmul.mubr.bf16.gmra.mrb[16].mxu0 %v295_v46  ;;  %v863_v46 = vld [vmem:[%s15946_s15 + $0xb2] sm:$0xff] }
  0x97   : > { %13328 = vmatprep.mubr.bf16.mxu0 %v296_v47  ;;  %v864_v47 = vld [vmem:[%s15946_s15 + $0xba] sm:$0xff] }
  0x98   : > { %v888_v50 = vpack.c.bf16 %v864_v47, %v863_v46  ;;  %v15462_v47 = vld [vmem:[%s19631_s1 + $0x178] sm:$0xff]  }
  0x9e   : > { %13329 = vmatmul.mubr.bf16.gmra.mrb[20].mxu0 %v297_v52  ;;  %v867_v52 = vld [vmem:[%s15946_s15 + $0xd2] sm:$0xff] }
  0x9f   : > { %13332 = vmatprep.mubr.bf16.mxu0 %v298_v53  ;;  %v868_v53 = vld [vmem:[%s15946_s15 + $0xda] sm:$0xff] }
  0xa0   : > { %v890_v56 = vpack.c.bf16 %v868_v53, %v867_v52  ;;  %v15463_v52 = vld [vmem:[%s19631_s1 + $0x180] sm:$0xff]   ;;  %v1550_v53 = vpack.c.bf16 %v1524_v49, %v1523_v48  ;;  %v1857_v48 = vld [vmem:[%s15946_s15 + $0xb4] sm:$0xff] }
  0xa1   : > { %v1858_v49 = vld [vmem:[%s15946_s15 + $0xbc] sm:$0xff] }
  0xa6   : > { %13333 = vmatmul.mubr.bf16.gmra.mrb[24].mxu0 %v299_v58  ;;  %v871_v58 = vld [vmem:[%s15946_s15 + $0xf2] sm:$0xff] }
  0xa7   : > { %13336 = vmatprep.mubr.bf16.mxu0 %v300_v59  ;;  %v872_v59 = vld [vmem:[%s15946_s15 + $0xfa] sm:$0xff] }
  0xa8   : > { %v892_v62 = vpack.c.bf16 %v872_v59, %v871_v58  ;;  %v1530_v58 = vld [vmem:[%s15946_s15 + $0xdb] sm:$0xff] }
  0xae   : > { %13337 = vmatmul.mubr.bf16.gmra.mrb[28].mxu0 %v301_v0  ;;  %v875_v0 = vld [vmem:[%s15946_s15 + $0x112] sm:$0xff] }
  0xaf   : > { %13340 = vmatprep.mubr.bf16.mxu0 %v302_v1  ;;  %v876_v1 = vld [vmem:[%s15946_s15 + $0x11a] sm:$0xff] }
  0xb0   : > { %v894_v2 = vpack.c.bf16 %v876_v1, %v875_v0  ;;  %v1534_v0 = vld [vmem:[%s15946_s15 + $0xfb] sm:$0xff] }
  0xb6   : > { %13341 = vmatmul.mubr.bf16.gmra.mrb[32].mxu0 %v303_v6  ;;  %v15451_v6 = vld [vmem:[%s19631_s1 + $0x120] sm:$0xff]  }
  0xb7   : > { %13360 = vmatprep.mubr.bf16.mxu0 %v877_v7  ;;  %v15452_v7 = vld [vmem:[%s19631_s1 + $0x128] sm:$0xff]  }
  0xbe   : > { %13361 = vmatmul.mubr.bf16.vlgmr.msra.gmra.mrb[0].mxu0 %v16092_v12 }
  0xbf   : > { %13397 = vmatpush3.bf16.msra.mxu0 %v15439_v45  ;;  %13364 = vmatprep.mubr.bf16.mxu0 %v16097_v14  ;;  %v16156_v45 = vpack.c.bf16 %v862_v42, %v861_v41  ;;  %v1520_v41 = vld [vmem:[%s15946_s15 + $0x8b] sm:$0xff]  ;;  %v1521_v42 = vld [vmem:[%s15946_s15 + $0x93] sm:$0xff] }
  0xc0   : > { %13398 = vmatprep.subr.bf16.mxu0 %v15440_v13 }
  0xc3   : > { %13399 = vmatpush3.bf16.msra.mxu0 %v15440_v13  ;;  %v1505_v13 = vld [vmem:[%s15946_s15 + $0x13] sm:$0xff] }
  0xc4   : > { %13400 = vmatprep.subr.bf16.mxu0 %v15441_v19 }
  0xc6   : > { %13365 = vmatmul.mubr.bf16.gmra.mrb[4].mxu0 %v16108_v20 }
  0xc7   : > { %13368 = vmatprep.mubr.bf16.mxu0 %v16113_v22  ;;  %13401 = vmatpush3.bf16.msra.mxu0 %v15441_v19  ;;  %v1509_v19 = vld [vmem:[%s15946_s15 + $0x33] sm:$0xff] }
  0xc8   : > { %13402 = vmatprep.subr.bf16.mxu0 %v15442_v21 }
  0xcb   : > { %13403 = vmatpush3.bf16.msra.mxu0 %v15442_v21  ;;  %v1542_v21 = vpack.c.bf16 %v1508_v18, %v1507_v17  ;;  %v1841_v17 = vld [vmem:[%s15946_s15 + $0x34] sm:$0xff]  ;;  %v1842_v18 = vld [vmem:[%s15946_s15 + $0x3c] sm:$0xff] }
  0xcc   : > { %13404 = vmatprep.subr.bf16.mxu0 %v15443_v27 }
  0xce   : > { %13369 = vmatmul.mubr.bf16.gmra.mrb[8].mxu0 %v16124_v28 }
  0xcf   : > { %13372 = vmatprep.mubr.bf16.mxu0 %v16129_v30  ;;  %13405 = vmatpush3.bf16.msra.mxu0 %v15443_v27  ;;  %v1514_v27 = vld [vmem:[%s15946_s15 + $0x5b] sm:$0xff] }
  0xd0   : > { %13406 = vmatprep.subr.bf16.mxu0 %v15444_v29 }
  0xd3   : > { %13407 = vmatpush3.bf16.msra.mxu0 %v15444_v29  ;;  %v1544_v29 = vpack.c.bf16 %v1512_v25, %v1511_v24  ;;  %v1845_v24 = vld [vmem:[%s15946_s15 + $0x54] sm:$0xff]  ;;  %v1846_v25 = vld [vmem:[%s15946_s15 + $0x5c] sm:$0xff] }
  0xd4   : > { %13408 = vmatprep.subr.bf16.mxu0 %v15445_v35 }
  0xd6   : > { %13373 = vmatmul.mubr.bf16.gmra.mrb[12].mxu0 %v16140_v36 }
  0xd7   : > { %13376 = vmatprep.mubr.bf16.mxu0 %v16145_v38  ;;  %13409 = vmatpush3.bf16.msra.mxu0 %v15445_v35  ;;  %v1518_v35 = vld [vmem:[%s15946_s15 + $0x7b] sm:$0xff] }
  0xd8   : > { %13410 = vmatprep.subr.bf16.mxu0 %v15446_v37 }
  0xdb   : > { %13411 = vmatpush3.bf16.msra.mxu0 %v15446_v37  ;;  %v1546_v37 = vpack.c.bf16 %v1516_v33, %v1515_v32  ;;  %v1849_v32 = vld [vmem:[%s15946_s15 + $0x74] sm:$0xff]  ;;  %v1850_v33 = vld [vmem:[%s15946_s15 + $0x7c] sm:$0xff] }
  0xdc   : > { %13448 = vmatprep.subr.bf16.mxu0 %v15447_v43 }
  0xde   : > { %13377 = vmatmul.mubr.bf16.gmra.mrb[16].mxu0 %v886_v44 }
  0xdf   : > { %13380 = vmatprep.mubr.bf16.mxu0 %v16156_v45 }
  0xe6   : > { %13381 = vmatmul.mubr.bf16.gmra.mrb[20].mxu0 %v888_v50 }
  0xe7   : > { %13384 = vmatprep.mubr.bf16.mxu0 %v889_v51 }
  0xee   : > { %13385 = vmatmul.mubr.bf16.gmra.mrb[24].mxu0 %v890_v56 }
  0xef   : > { %13388 = vmatprep.mubr.bf16.mxu0 %v891_v57 }
  0xf6   : > { %13389 = vmatmul.mubr.bf16.gmra.mrb[28].mxu0 %v892_v62 }
  0xf7   : > { %13392 = vmatprep.mubr.bf16.mxu0 %v893_v63 }
  0xfe   : > { %13393 = vmatmul.mubr.bf16.gmra.mrb[32].mxu0 %v894_v2 }
  0xff   : > { %13412 = vmatprep.mubr.bf16.mxu0 %v16092_v12  ;;  %v1208_v12 = vld [vmem:[%s15946_s15 + $0x12a] sm:$0xff] }
 0x100   : > { %v1226_v15 = vpack.c.bf16 %v1208_v12, %v1207_v11  ;;  %v1837_v11 = vld [vmem:[%s15946_s15 + $0x14] sm:$0xff]  ;;  %v1838_v12 = vld [vmem:[%s15946_s15 + $0x1c] sm:$0xff] }
 0x106   : > { %13413 = vmatmul.mubr.bf16.vlgmr.msra.gmra.mrb[0].mxu0 %v16097_v14  ;;  %v1506_v14 = vld [vmem:[%s15946_s15 + $0x1b] sm:$0xff] }
 0x107   : > { %13449 = vmatpush3.bf16.msra.mxu0 %v15447_v43  ;;  %13416 = vmatprep.mubr.bf16.mxu0 %v16108_v20  ;;  %v1541_v16 = vpack.c.bf16 %v1506_v14, %v1505_v13  ;;  %v1510_v20 = vld [vmem:[%s15946_s15 + $0x3b] sm:$0xff]  ;;  %v1873_v14 = vpack.c.bf16 %v1838_v12, %v1837_v11  ;;  %v15473_v11 = vld [vmem:[%s19631_s1 + $0x1d0] sm:$0xff]  }
 0x108   : > { %13450 = vmatprep.subr.bf16.mxu0 %v15448_v3  ;;  %v1522_v43 = vld [vmem:[%s15946_s15 + $0x9b] sm:$0xff] }
 0x109   : > { %v1549_v46 = vpack.c.bf16 %v1522_v43, %v1521_v42  ;;  %v15469_v42 = vld [vmem:[%s19631_s1 + $0x1b0] sm:$0xff]   ;;  %v15474_v12 = vld [vmem:[%s19631_s1 + $0x1d8] sm:$0xff]  }
 0x10b   : > { %13451 = vmatpush3.bf16.msra.mxu0 %v15448_v3  ;;  %v1535_v3 = vld [vmem:[%s15946_s15 + $0x103] sm:$0xff] }
 0x10c   : > { %13452 = vmatprep.subr.bf16.mxu0 %v15449_v4 }
 0x10e   : > { %13417 = vmatmul.mubr.bf16.gmra.mrb[4].mxu0 %v16113_v22  ;;  %v1543_v22 = vpack.c.bf16 %v1510_v20, %v1509_v19  ;;  %v16276_v20 = vpack.c.bf16 %v1842_v18, %v1841_v17  ;;  %v15479_v17 = vld [vmem:[%s19631_s1 + $0x200] sm:$0xff]   ;;  %v2203_v18 = vld [vmem:[%s15946_s15 + $0x134] sm:$0xff] }
 0x10f   : > { %13420 = vmatprep.mubr.bf16.mxu0 %v16124_v28  ;;  %13453 = vmatpush3.bf16.msra.mxu0 %v15449_v4  ;;  %v15457_v28 = vld [vmem:[%s19631_s1 + $0x150] sm:$0xff]  }
 0x110   : > { %13454 = vmatprep.subr.bf16.mxu0 %v15450_v5  ;;  %v1536_v4 = vld [vmem:[%s15946_s15 + $0x10b] sm:$0xff] }
 0x113   : > { %13455 = vmatpush3.bf16.msra.mxu0 %v15450_v5  ;;  %v1537_v5 = vld [vmem:[%s15946_s15 + $0x113] sm:$0xff] }
 0x114   : > { %13456 = vmatprep.subr.bf16.mxu0 %v15451_v6 }
 0x116   : > { %13421 = vmatmul.mubr.bf16.gmra.mrb[8].mxu0 %v16129_v30  ;;  %v1545_v30 = vpack.c.bf16 %v1514_v27, %v1513_v26  ;;  %v15465_v26 = vld [vmem:[%s19631_s1 + $0x190] sm:$0xff]  }
 0x117   : > { %13424 = vmatprep.mubr.bf16.mxu0 %v16140_v36  ;;  %13457 = vmatpush3.bf16.msra.mxu0 %v15451_v6  ;;  %v15459_v36 = vld [vmem:[%s19631_s1 + $0x160] sm:$0xff]  }
 0x118   : > { %13458 = vmatprep.subr.bf16.mxu0 %v15452_v7  ;;  %v1538_v6 = vld [vmem:[%s15946_s15 + $0x11b] sm:$0xff] }
 0x11b   : > { %13459 = vmatpush3.bf16.msra.mxu0 %v15452_v7  ;;  %v1556_v7 = vpack.c.bf16 %v1536_v4, %v1535_v3  ;;  %v1869_v3 = vld [vmem:[%s15946_s15 + $0x114] sm:$0xff]  ;;  %v1870_v4 = vld [vmem:[%s15946_s15 + $0x11c] sm:$0xff] }
 0x11c   : > { %13460 = vmatprep.subr.bf16.mxu0 %v15453_v8 }
 0x11e   : > { %13425 = vmatmul.mubr.bf16.gmra.mrb[12].mxu0 %v16145_v38  ;;  %v1547_v38 = vpack.c.bf16 %v1518_v35, %v1517_v34  ;;  %v15467_v34 = vld [vmem:[%s19631_s1 + $0x1a0] sm:$0xff]  }
 0x11f   : > { %13428 = vmatprep.mubr.bf16.mxu0 %v886_v44  ;;  %13461 = vmatpush3.bf16.msra.mxu0 %v15453_v8  ;;  %v15461_v44 = vld [vmem:[%s19631_s1 + $0x170] sm:$0xff]   ;;  %v1557_v8 = vpack.c.bf16 %v1538_v6, %v1537_v5  ;;  %v1889_v6 = vpack.c.bf16 %v1870_v4, %v1869_v3  ;;  %v2528_v4 = vld [vmem:[%s15946_s15 + $0xfd] sm:$0xff] }
 0x120   : > { %13462 = vmatprep.subr.bf16.mxu0 %v15454_v9  ;;  %v2527_v3 = vld [vmem:[%s15946_s15 + $0xf5] sm:$0xff] }
 0x123   : > { %13463 = vmatpush3.bf16.msra.mxu0 %v15454_v9  ;;  %v1539_v9 = vld [vmem:[%s15946_s15 + $0x123] sm:$0xff] }
 0x124   : > { %13500 = vmatprep.subr.bf16.mxu0 %v15455_v10 }
 0x126   : > { %13429 = vmatmul.mubr.bf16.gmra.mrb[16].mxu0 %v16156_v45  ;;  %v1548_v45 = vpack.c.bf16 %v1520_v41, %v1519_v40  ;;  %v1853_v40 = vld [vmem:[%s15946_s15 + $0x94] sm:$0xff]  ;;  %v1854_v41 = vld [vmem:[%s15946_s15 + $0x9c] sm:$0xff] }
 0x127   : > { %13432 = vmatprep.mubr.bf16.mxu0 %v888_v50  ;;  %v1525_v50 = vld [vmem:[%s15946_s15 + $0xb3] sm:$0xff] }
 0x12e   : > { %13433 = vmatmul.mubr.bf16.gmra.mrb[20].mxu0 %v889_v51  ;;  %v1526_v51 = vld [vmem:[%s15946_s15 + $0xbb] sm:$0xff] }
 0x12f   : > { %13436 = vmatprep.mubr.bf16.mxu0 %v890_v56  ;;  %v1551_v54 = vpack.c.bf16 %v1526_v51, %v1525_v50  ;;  %v1528_v56 = vld [vmem:[%s15946_s15 + $0xcb] sm:$0xff]  ;;  %v15471_v50 = vld [vmem:[%s19631_s1 + $0x1c0] sm:$0xff]  }
 0x130   : > { %v1552_v59 = vpack.c.bf16 %v1528_v56, %v1527_v55  ;;  %v1861_v55 = vld [vmem:[%s15946_s15 + $0xd4] sm:$0xff]  ;;  %v1862_v56 = vld [vmem:[%s15946_s15 + $0xdc] sm:$0xff] }
 0x136   : > { %13437 = vmatmul.mubr.bf16.gmra.mrb[24].mxu0 %v891_v57  ;;  %v1529_v57 = vld [vmem:[%s15946_s15 + $0xd3] sm:$0xff] }
 0x137   : > { %13440 = vmatprep.mubr.bf16.mxu0 %v892_v62  ;;  %v1553_v60 = vpack.c.bf16 %v1530_v58, %v1529_v57  ;;  %v1532_v62 = vld [vmem:[%s15946_s15 + $0xeb] sm:$0xff]  ;;  %v1885_v58 = vpack.c.bf16 %v1862_v56, %v1861_v55  ;;  %v2519_v55 = vld [vmem:[%s15946_s15 + $0xb5] sm:$0xff]  ;;  %v2520_v56 = vld [vmem:[%s15946_s15 + $0xbd] sm:$0xff] }
 0x138   : > { %v1554_v1 = vpack.c.bf16 %v1532_v62, %v1531_v61  ;;  %v1865_v61 = vld [vmem:[%s15946_s15 + $0xf4] sm:$0xff]  ;;  %v1866_v62 = vld [vmem:[%s15946_s15 + $0xfc] sm:$0xff] }
 0x13e   : > { %13441 = vmatmul.mubr.bf16.gmra.mrb[28].mxu0 %v893_v63  ;;  %v1533_v63 = vld [vmem:[%s15946_s15 + $0xf3] sm:$0xff] }
 0x13f   : > { %13444 = vmatprep.mubr.bf16.mxu0 %v894_v2  ;;  %v1555_v2 = vpack.c.bf16 %v1534_v0, %v1533_v63  ;;  %v1887_v0 = vpack.c.bf16 %v1866_v62, %v1865_v61  ;;  %v2523_v61 = vld [vmem:[%s15946_s15 + $0xd5] sm:$0xff]  ;;  %v2524_v62 = vld [vmem:[%s15946_s15 + $0xdd] sm:$0xff] }
 0x146   : > { %13445 = vmatmul.mubr.bf16.gmra.mrb[32].mxu0 %v1226_v15  ;;  %v1839_v15 = vld [vmem:[%s15946_s15 + $0x24] sm:$0xff] }
 0x147   : > { %13464 = vmatprep.mubr.bf16.mxu0 %v1541_v16  ;;  %v1840_v16 = vld [vmem:[%s15946_s15 + $0x2c] sm:$0xff] }
 0x148   : > { %v16274_v19 = vpack.c.bf16 %v1840_v16, %v1839_v15  ;;  %v15477_v15 = vld [vmem:[%s19631_s1 + $0x1f0] sm:$0xff]   ;;  %v15478_v16 = vld [vmem:[%s19631_s1 + $0x1f8] sm:$0xff]  }
 0x14e   : > { %13465 = vmatmul.mubr.bf16.vlgmr.msra.gmra.mrb[0].mxu0 %v1542_v21  ;;  %v15464_v21 = vld [vmem:[%s19631_s1 + $0x188] sm:$0xff]  }
 0x14f   : > { %13501 = vmatpush3.bf16.msra.mxu0 %v15455_v10  ;;  %13468 = vmatprep.mubr.bf16.mxu0 %v1543_v22  ;;  %v1540_v10 = vld [vmem:[%s15946_s15 + $0x12b] sm:$0xff] }
 0x150   : > { %13502 = vmatprep.subr.bf16.mxu0 %v15456_v23  ;;  %v1558_v13 = vpack.c.bf16 %v1540_v10, %v1539_v9  ;;  %v1843_v22 = vld [vmem:[%s15946_s15 + $0x44] sm:$0xff] }
 0x151   : > { %v15472_v10 = vld [vmem:[%s19631_s1 + $0x1c8] sm:$0xff]  }
 0x153   : > { %13503 = vmatpush3.bf16.msra.mxu0 %v15456_v23  ;;  %v1844_v23 = vld [vmem:[%s15946_s15 + $0x4c] sm:$0xff] }
 0x154   : > { %13504 = vmatprep.subr.bf16.mxu0 %v15457_v28  ;;  %v16290_v27 = vpack.c.bf16 %v1844_v23, %v1843_v22 }
 0x156   : > { %13469 = vmatmul.mubr.bf16.gmra.mrb[4].mxu0 %v1544_v29  ;;  %v15466_v29 = vld [vmem:[%s19631_s1 + $0x198] sm:$0xff]  }
 0x157   : > { %13472 = vmatprep.mubr.bf16.mxu0 %v1545_v30  ;;  %13505 = vmatpush3.bf16.msra.mxu0 %v15457_v28  ;;  %v16292_v28 = vpack.c.bf16 %v1846_v25, %v1845_v24  ;;  %v1847_v30 = vld [vmem:[%s15946_s15 + $0x64] sm:$0xff]  ;;  %v2503_v24 = vld [vmem:[%s15946_s15 + $0x35] sm:$0xff] }
 0x158   : > { %13506 = vmatprep.subr.bf16.mxu0 %v15458_v31  ;;  %v2504_v25 = vld [vmem:[%s15946_s15 + $0x3d] sm:$0xff] }
 0x15b   : > { %13507 = vmatpush3.bf16.msra.mxu0 %v15458_v31  ;;  %v1848_v31 = vld [vmem:[%s15946_s15 + $0x6c] sm:$0xff] }
 0x15c   : > { %13508 = vmatprep.subr.bf16.mxu0 %v15459_v36  ;;  %v16306_v35 = vpack.c.bf16 %v1848_v31, %v1847_v30  ;;  %v15480_v30 = vld [vmem:[%s19631_s1 + $0x208] sm:$0xff]   ;;  %v2507_v31 = vld [vmem:[%s15946_s15 + $0x55] sm:$0xff] }
 0x15e   : > { %13473 = vmatmul.mubr.bf16.gmra.mrb[8].mxu0 %v1546_v37  ;;  %v15468_v37 = vld [vmem:[%s19631_s1 + $0x1a8] sm:$0xff]  }
 0x15f   : > { %13476 = vmatprep.mubr.bf16.mxu0 %v1547_v38  ;;  %13509 = vmatpush3.bf16.msra.mxu0 %v15459_v36  ;;  %v16308_v36 = vpack.c.bf16 %v1850_v33, %v1849_v32  ;;  %v1851_v38 = vld [vmem:[%s15946_s15 + $0x84] sm:$0xff] }
 0x160   : > { %13510 = vmatprep.subr.bf16.mxu0 %v15460_v39  ;;  %v2508_v32 = vld [vmem:[%s15946_s15 + $0x5d] sm:$0xff]  ;;  %v2509_v33 = vld [vmem:[%s15946_s15 + $0x65] sm:$0xff] }
 0x163   : > { %13511 = vmatpush3.bf16.msra.mxu0 %v15460_v39  ;;  %v1852_v39 = vld [vmem:[%s15946_s15 + $0x8c] sm:$0xff] }
 0x164   : > { %13512 = vmatprep.subr.bf16.mxu0 %v15461_v44  ;;  %v16322_v43 = vpack.c.bf16 %v1852_v39, %v1851_v38  ;;  %v15482_v38 = vld [vmem:[%s19631_s1 + $0x218] sm:$0xff]  }
 0x165   : > { %v2511_v39 = vld [vmem:[%s15946_s15 + $0x75] sm:$0xff] }
 0x166   : > { %13477 = vmatmul.mubr.bf16.gmra.mrb[12].mxu0 %v1548_v45  ;;  %v15470_v45 = vld [vmem:[%s19631_s1 + $0x1b8] sm:$0xff]  }
 0x167   : > { %13480 = vmatprep.mubr.bf16.mxu0 %v1549_v46  ;;  %13513 = vmatpush3.bf16.msra.mxu0 %v15461_v44  ;;  %v16324_v44 = vpack.c.bf16 %v1854_v41, %v1853_v40  ;;  %v1855_v46 = vld [vmem:[%s15946_s15 + $0xa4] sm:$0xff] }
 0x168   : > { %13514 = vmatprep.subr.bf16.mxu0 %v15462_v47  ;;  %v2512_v40 = vld [vmem:[%s15946_s15 + $0x7d] sm:$0xff]  ;;  %v2513_v41 = vld [vmem:[%s15946_s15 + $0x85] sm:$0xff] }
 0x16b   : > { %13515 = vmatpush3.bf16.msra.mxu0 %v15462_v47  ;;  %v1856_v47 = vld [vmem:[%s15946_s15 + $0xac] sm:$0xff] }
 0x16c   : > { %13552 = vmatprep.subr.bf16.mxu0 %v15463_v52  ;;  %v1882_v51 = vpack.c.bf16 %v1856_v47, %v1855_v46  ;;  %v15484_v46 = vld [vmem:[%s19631_s1 + $0x228] sm:$0xff]   ;;  %v2515_v47 = vld [vmem:[%s15946_s15 + $0x95] sm:$0xff] }
 0x16e   : > { %13481 = vmatmul.mubr.bf16.gmra.mrb[16].mxu0 %v1550_v53  ;;  %v1859_v53 = vld [vmem:[%s15946_s15 + $0xc4] sm:$0xff] }
 0x16f   : > { %13484 = vmatprep.mubr.bf16.mxu0 %v1551_v54  ;;  %v1860_v54 = vld [vmem:[%s15946_s15 + $0xcc] sm:$0xff] }
 0x170   : > { %v1884_v57 = vpack.c.bf16 %v1860_v54, %v1859_v53  ;;  %v15486_v54 = vld [vmem:[%s19631_s1 + $0x238] sm:$0xff]  }
 0x176   : > { %13485 = vmatmul.mubr.bf16.gmra.mrb[20].mxu0 %v1552_v59  ;;  %v1863_v59 = vld [vmem:[%s15946_s15 + $0xe4] sm:$0xff] }
 0x177   : > { %13488 = vmatprep.mubr.bf16.mxu0 %v1553_v60  ;;  %v1864_v60 = vld [vmem:[%s15946_s15 + $0xec] sm:$0xff] }
 0x178   : > { %v1886_v63 = vpack.c.bf16 %v1864_v60, %v1863_v59  ;;  %v2546_v59 = vpack.c.bf16 %v2520_v56, %v2519_v55 }
 0x17e   : > { %13489 = vmatmul.mubr.bf16.gmra.mrb[24].mxu0 %v1554_v1  ;;  %v1867_v1 = vld [vmem:[%s15946_s15 + $0x104] sm:$0xff] }
 0x17f   : > { %13492 = vmatprep.mubr.bf16.mxu0 %v1555_v2  ;;  %v1868_v2 = vld [vmem:[%s15946_s15 + $0x10c] sm:$0xff] }
 0x180   : > { %v1888_v5 = vpack.c.bf16 %v1868_v2, %v1867_v1  ;;  %v2548_v1 = vpack.c.bf16 %v2524_v62, %v2523_v61 }
 0x186   : > { %13493 = vmatmul.mubr.bf16.gmra.mrb[28].mxu0 %v1556_v7  ;;  %v1871_v7 = vld [vmem:[%s15946_s15 + $0x124] sm:$0xff] }
 0x187   : > { %13496 = vmatprep.mubr.bf16.mxu0 %v1557_v8  ;;  %v1872_v8 = vld [vmem:[%s15946_s15 + $0x12c] sm:$0xff] }
 0x188   : > { %v1890_v9 = vpack.c.bf16 %v1872_v8, %v1871_v7  ;;  %v2550_v7 = vpack.c.bf16 %v2528_v4, %v2527_v3 }
 0x18e   : > { %13497 = vmatmul.mubr.bf16.gmra.mrb[32].mxu0 %v1558_v13  ;;  %v15475_v13 = vld [vmem:[%s19631_s1 + $0x1e0] sm:$0xff]  }
 0x18f   : > { %13516 = vmatprep.mubr.bf16.mxu0 %v1873_v14  ;;  %v15476_v14 = vld [vmem:[%s19631_s1 + $0x1e8] sm:$0xff]  }
 0x196   : > { %13517 = vmatmul.mubr.bf16.vlgmr.msra.gmra.mrb[0].mxu0 %v16274_v19 }
 0x197   : > { %13553 = vmatpush3.bf16.msra.mxu0 %v15463_v52  ;;  %13520 = vmatprep.mubr.bf16.mxu0 %v16276_v20  ;;  %v16338_v52 = vpack.c.bf16 %v1858_v49, %v1857_v48  ;;  %v2516_v48 = vld [vmem:[%s15946_s15 + $0x9d] sm:$0xff]  ;;  %v2517_v49 = vld [vmem:[%s15946_s15 + $0xa5] sm:$0xff] }
 0x198   : > { %13554 = vmatprep.subr.bf16.mxu0 %v15464_v21 }
 0x19b   : > { %13555 = vmatpush3.bf16.msra.mxu0 %v15464_v21  ;;  %v2502_v21 = vld [vmem:[%s15946_s15 + $0x2d] sm:$0xff] }
 0x19c   : > { %13556 = vmatprep.subr.bf16.mxu0 %v15465_v26 }
 0x19e   : > { %13521 = vmatmul.mubr.bf16.gmra.mrb[4].mxu0 %v16290_v27 }
 0x19f   : > { %13524 = vmatprep.mubr.bf16.mxu0 %v16292_v28  ;;  %13557 = vmatpush3.bf16.msra.mxu0 %v15465_v26  ;;  %v2505_v26 = vld [vmem:[%s15946_s15 + $0x45] sm:$0xff] }
 0x1a0   : > { %13558 = vmatprep.subr.bf16.mxu0 %v15466_v29 }
 0x1a3   : > { %13559 = vmatpush3.bf16.msra.mxu0 %v15466_v29 }
 0x1a4   : > { %13560 = vmatprep.subr.bf16.mxu0 %v15467_v34 }
 0x1a6   : > { %13525 = vmatmul.mubr.bf16.gmra.mrb[8].mxu0 %v16306_v35 }
 0x1a7   : > { %13528 = vmatprep.mubr.bf16.mxu0 %v16308_v36  ;;  %13561 = vmatpush3.bf16.msra.mxu0 %v15467_v34  ;;  %v2510_v34 = vld [vmem:[%s15946_s15 + $0x6d] sm:$0xff] }
 0x1a8   : > { %13562 = vmatprep.subr.bf16.mxu0 %v15468_v37 }
 0x1ab   : > { %13563 = vmatpush3.bf16.msra.mxu0 %v15468_v37  ;;  %v2541_v37 = vpack.c.bf16 %v2510_v34, %v2509_v33  ;;  %v2843_v33 = vld [vmem:[%s15946_s15 + $0x76] sm:$0xff]  ;;  %v2844_v34 = vld [vmem:[%s15946_s15 + $0x7e] sm:$0xff] }
 0x1ac   : > { %13564 = vmatprep.subr.bf16.mxu0 %v15469_v42 }
 0x1ae   : > { %13529 = vmatmul.mubr.bf16.gmra.mrb[12].mxu0 %v16322_v43 }
 0x1af   : > { %13532 = vmatprep.mubr.bf16.mxu0 %v16324_v44  ;;  %13565 = vmatpush3.bf16.msra.mxu0 %v15469_v42  ;;  %v2514_v42 = vld [vmem:[%s15946_s15 + $0x8d] sm:$0xff] }
 0x1b0   : > { %13566 = vmatprep.subr.bf16.mxu0 %v15470_v45 }
 0x1b3   : > { %13567 = vmatpush3.bf16.msra.mxu0 %v15470_v45  ;;  %v2543_v45 = vpack.c.bf16 %v2514_v42, %v2513_v41  ;;  %v2849_v41 = vld [vmem:[%s15946_s15 + $0xa6] sm:$0xff]  ;;  %v2850_v42 = vld [vmem:[%s15946_s15 + $0xae] sm:$0xff] }
 0x1b4   : > { %13604 = vmatprep.subr.bf16.mxu0 %v15471_v50 }
 0x1b6   : > { %13533 = vmatmul.mubr.bf16.gmra.mrb[16].mxu0 %v1882_v51 }
 0x1b7   : > { %13536 = vmatprep.mubr.bf16.mxu0 %v16338_v52 }
 0x1be   : > { %13537 = vmatmul.mubr.bf16.gmra.mrb[20].mxu0 %v1884_v57 }
 0x1bf   : > { %13540 = vmatprep.mubr.bf16.mxu0 %v1885_v58 }
 0x1c6   : > { %13541 = vmatmul.mubr.bf16.gmra.mrb[24].mxu0 %v1886_v63 }
 0x1c7   : > { %13544 = vmatprep.mubr.bf16.mxu0 %v1887_v0 }
 0x1ce   : > { %13545 = vmatmul.mubr.bf16.gmra.mrb[28].mxu0 %v1888_v5 }
 0x1cf   : > { %13548 = vmatprep.mubr.bf16.mxu0 %v1889_v6 }
 0x1d6   : > { %13549 = vmatmul.mubr.bf16.gmra.mrb[32].mxu0 %v1890_v9 }
 0x1d7   : > { %13568 = vmatprep.mubr.bf16.mxu0 %v16274_v19  ;;  %v2204_v19 = vld [vmem:[%s15946_s15 + $0x13c] sm:$0xff] }
 0x1d8   : > { %v2222_v22 = vpack.c.bf16 %v2204_v19, %v2203_v18  ;;  %v2834_v18 = vld [vmem:[%s15946_s15 + $0x2e] sm:$0xff] }
 0x1de   : > { %13569 = vmatmul.mubr.bf16.vlgmr.msra.gmra.mrb[0].mxu0 %v16276_v20  ;;  %v2501_v20 = vld [vmem:[%s15946_s15 + $0x25] sm:$0xff] }
 0x1df   : > { %13605 = vmatpush3.bf16.msra.mxu0 %v15471_v50  ;;  %13572 = vmatprep.mubr.bf16.mxu0 %v16290_v27  ;;  %v2537_v23 = vpack.c.bf16 %v2502_v21, %v2501_v20  ;;  %v2506_v27 = vld [vmem:[%s15946_s15 + $0x4d] sm:$0xff]  ;;  %v2835_v21 = vld [vmem:[%s15946_s15 + $0x36] sm:$0xff] }
 0x1e0   : > { %13606 = vmatprep.subr.bf16.mxu0 %v15472_v10  ;;  %v2539_v29 = vpack.c.bf16 %v2506_v27, %v2505_v26  ;;  %v2518_v50 = vld [vmem:[%s15946_s15 + $0xad] sm:$0xff]  ;;  %v2839_v27 = vld [vmem:[%s15946_s15 + $0x56] sm:$0xff] }
 0x1e1   : > { %v2545_v53 = vpack.c.bf16 %v2518_v50, %v2517_v49 }
 0x1e3   : > { %13607 = vmatpush3.bf16.msra.mxu0 %v15472_v10  ;;  %v2532_v10 = vld [vmem:[%s15946_s15 + $0x11d] sm:$0xff] }
 0x1e4   : > { %13608 = vmatprep.subr.bf16.mxu0 %v15473_v11 }
 0x1e6   : > { %13573 = vmatmul.mubr.bf16.gmra.mrb[4].mxu0 %v16292_v28  ;;  %v2538_v28 = vpack.c.bf16 %v2504_v25, %v2503_v24  ;;  %v2838_v24 = vld [vmem:[%s15946_s15 + $0x4e] sm:$0xff] }
 0x1e7   : > { %13576 = vmatprep.mubr.bf16.mxu0 %v16306_v35  ;;  %13609 = vmatpush3.bf16.msra.mxu0 %v15473_v11  ;;  %v15481_v35 = vld [vmem:[%s19631_s1 + $0x210] sm:$0xff]   ;;  %v2533_v11 = vld [vmem:[%s15946_s15 + $0x125] sm:$0xff] }
 0x1e8   : > { %13610 = vmatprep.subr.bf16.mxu0 %v15474_v12 }
 0x1eb   : > { %13611 = vmatpush3.bf16.msra.mxu0 %v15474_v12  ;;  %v2534_v12 = vld [vmem:[%s15946_s15 + $0x12d] sm:$0xff] }
 0x1ec   : > { %13612 = vmatprep.subr.bf16.mxu0 %v15475_v13 }
 0x1ee   : > { %13577 = vmatmul.mubr.bf16.gmra.mrb[8].mxu0 %v16308_v36  ;;  %v2540_v36 = vpack.c.bf16 %v2508_v32, %v2507_v31 }
 0x1ef   : > { %13580 = vmatprep.mubr.bf16.mxu0 %v16322_v43  ;;  %13613 = vmatpush3.bf16.msra.mxu0 %v15475_v13  ;;  %v15483_v43 = vld [vmem:[%s19631_s1 + $0x220] sm:$0xff]  }
 0x1f0   : > { %13614 = vmatprep.subr.bf16.mxu0 %v15476_v14 }
 0x1f3   : > { %13615 = vmatpush3.bf16.msra.mxu0 %v15476_v14  ;;  %v2553_v14 = vpack.c.bf16 %v2534_v12, %v2533_v11  ;;  %v15489_v11 = vld [vmem:[%s19631_s1 + $0x290] sm:$0xff]   ;;  %v15490_v12 = vld [vmem:[%s19631_s1 + $0x298] sm:$0xff]  }
 0x1f4   : > { %13616 = vmatprep.subr.bf16.mxu0 %v15477_v15 }
 0x1f6   : > { %13581 = vmatmul.mubr.bf16.gmra.mrb[12].mxu0 %v16324_v44  ;;  %v2542_v44 = vpack.c.bf16 %v2512_v40, %v2511_v39  ;;  %v2847_v39 = vld [vmem:[%s15946_s15 + $0x96] sm:$0xff]  ;;  %v2848_v40 = vld [vmem:[%s15946_s15 + $0x9e] sm:$0xff] }
 0x1f7   : > { %13584 = vmatprep.mubr.bf16.mxu0 %v1882_v51  ;;  %13617 = vmatpush3.bf16.msra.mxu0 %v15477_v15  ;;  %v15485_v51 = vld [vmem:[%s19631_s1 + $0x230] sm:$0xff]  }
 0x1f8   : > { %13618 = vmatprep.subr.bf16.mxu0 %v15478_v16  ;;  %v2535_v15 = vld [vmem:[%s15946_s15 + $0x135] sm:$0xff] }
 0x1fb   : > { %13619 = vmatpush3.bf16.msra.mxu0 %v15478_v16  ;;  %v2536_v16 = vld [vmem:[%s15946_s15 + $0x13d] sm:$0xff] }
 0x1fc   : > { %13656 = vmatprep.subr.bf16.mxu0 %v15479_v17  ;;  %v2554_v19 = vpack.c.bf16 %v2536_v16, %v2535_v15  ;;  %v15493_v15 = vld [vmem:[%s19631_s1 + $0x2b0] sm:$0xff]   ;;  %v15494_v16 = vld [vmem:[%s19631_s1 + $0x2b8] sm:$0xff]  }
 0x1fe   : > { %13585 = vmatmul.mubr.bf16.gmra.mrb[16].mxu0 %v16338_v52  ;;  %v2544_v52 = vpack.c.bf16 %v2516_v48, %v2515_v47  ;;  %v2853_v47 = vld [vmem:[%s15946_s15 + $0xc6] sm:$0xff]  ;;  %v2854_v48 = vld [vmem:[%s15946_s15 + $0xce] sm:$0xff] }
 0x1ff   : > { %13588 = vmatprep.mubr.bf16.mxu0 %v1884_v57  ;;  %v2521_v57 = vld [vmem:[%s15946_s15 + $0xc5] sm:$0xff]  ;;  %v2879_v50 = vpack.c.bf16 %v2854_v48, %v2853_v47 }
 0x206   : > { %13589 = vmatmul.mubr.bf16.gmra.mrb[20].mxu0 %v1885_v58  ;;  %v2522_v58 = vld [vmem:[%s15946_s15 + $0xcd] sm:$0xff] }
 0x207   : > { %13592 = vmatprep.mubr.bf16.mxu0 %v1886_v63  ;;  %v2547_v60 = vpack.c.bf16 %v2522_v58, %v2521_v57  ;;  %v2525_v63 = vld [vmem:[%s15946_s15 + $0xe5] sm:$0xff]  ;;  %v2859_v57 = vld [vmem:[%s15946_s15 + $0xf6] sm:$0xff] }
 0x208   : > { %v2860_v58 = vld [vmem:[%s15946_s15 + $0xfe] sm:$0xff] }
 0x209   : > { %v2882_v61 = vpack.c.bf16 %v2860_v58, %v2859_v57 }
 0x20e   : > { %13593 = vmatmul.mubr.bf16.gmra.mrb[24].mxu0 %v1887_v0  ;;  %v2526_v0 = vld [vmem:[%s15946_s15 + $0xed] sm:$0xff] }
 0x20f   : > { %13596 = vmatprep.mubr.bf16.mxu0 %v1888_v5  ;;  %v2549_v2 = vpack.c.bf16 %v2526_v0, %v2525_v63  ;;  %v2529_v5 = vld [vmem:[%s15946_s15 + $0x105] sm:$0xff]  ;;  %v2863_v63 = vld [vmem:[%s15946_s15 + $0x116] sm:$0xff] }
 0x210   : > { %v2864_v0 = vld [vmem:[%s15946_s15 + $0x11e] sm:$0xff] }
 0x211   : > { %v2884_v3 = vpack.c.bf16 %v2864_v0, %v2863_v63 }
 0x216   : > { %13597 = vmatmul.mubr.bf16.gmra.mrb[28].mxu0 %v1889_v6  ;;  %v2530_v6 = vld [vmem:[%s15946_s15 + $0x10d] sm:$0xff] }
 0x217   : > { %13600 = vmatprep.mubr.bf16.mxu0 %v1890_v9  ;;  %v2551_v8 = vpack.c.bf16 %v2530_v6, %v2529_v5  ;;  %v2531_v9 = vld [vmem:[%s15946_s15 + $0x115] sm:$0xff]  ;;  %v2868_v6 = vld [vmem:[%s15946_s15 + $0x13e] sm:$0xff] }
 0x218   : > { %v2552_v13 = vpack.c.bf16 %v2532_v10, %v2531_v9  ;;  %v2867_v5 = vld [vmem:[%s15946_s15 + $0x136] sm:$0xff]  ;;  %v15849_v9 = vmov 0.0   ;;  %v15488_v10 = vld [vmem:[%s19631_s1 + $0x288] sm:$0xff]  }
 0x219   : > { %13708 = vmatprep.subr.bf16.mxu1 %v15849_v9  ;;  %223 = vst [vmem:[#allocation2] sm:$0xff] %v15849_v9  ;;  %224 = vst [vmem:[#allocation2 + $0x8] sm:$0xff] %v15849_v9  ;;  %13724 = vmatprep.mubr.msk.bf16.mxu1 %vm15850_vm0, %v15849_v9 }
 0x21a   : > { %225 = vst [vmem:[#allocation2 + $0x10] sm:$0xff] %v15849_v9  ;;  %226 = vst [vmem:[#allocation2 + $0x18] sm:$0xff] %v15849_v9 }
 0x21b   : > { %227 = vst [vmem:[#allocation2 + $0x20] sm:$0xff] %v15849_v9  ;;  %228 = vst [vmem:[#allocation2 + $0x28] sm:$0xff] %v15849_v9 }
 0x21c   : > { %229 = vst [vmem:[#allocation2 + $0x30] sm:$0xff] %v15849_v9  ;;  %230 = vst [vmem:[#allocation2 + $0x38] sm:$0xff] %v15849_v9 }
 0x21d   : > { %231 = vst [vmem:[#allocation2 + $0x40] sm:$0xff] %v15849_v9  ;;  %232 = vst [vmem:[#allocation2 + $0x48] sm:$0xff] %v15849_v9 }
 0x21e   : > { %13601 = vmatmul.mubr.bf16.gmra.mrb[32].mxu0 %v2222_v22  ;;  %v2836_v22 = vld [vmem:[%s15946_s15 + $0x3e] sm:$0xff]  ;;  %233 = vst [vmem:[#allocation2 + $0x50] sm:$0xff] %v15849_v9  ;;  %234 = vst [vmem:[#allocation2 + $0x58] sm:$0xff] %v15849_v9 }
 0x21f   : > { %13620 = vmatprep.mubr.bf16.mxu0 %v2537_v23  ;;  %v2837_v23 = vld [vmem:[%s15946_s15 + $0x46] sm:$0xff]  ;;  %v2870_v25 = vpack.c.bf16 %v2836_v22, %v2835_v21  ;;  %235 = vst [vmem:[#allocation2 + $0x60] sm:$0xff] %v15849_v9  ;;  %236 = vst [vmem:[#allocation3] sm:$0xff] %v15849_v9  ;;  %v249_v22 = vld [vmem:[%s19632_s2] sm:$0x1f] }
 0x220   : > { %v2871_v26 = vpack.c.bf16 %v2838_v24, %v2837_v23  ;;  %237 = vst [vmem:[#allocation3 + $0x8] sm:$0xff] %v15849_v9  ;;  %238 = vst [vmem:[#allocation3 + $0x10] sm:$0xff] %v15849_v9 }
 0x221   : > { %239 = vst [vmem:[#allocation3 + $0x18] sm:$0xff] %v15849_v9  ;;  %240 = vst [vmem:[#allocation3 + $0x20] sm:$0xff] %v15849_v9 }
 0x222   : > { %241 = vst [vmem:[#allocation3 + $0x28] sm:$0xff] %v15849_v9  ;;  %242 = vst [vmem:[#allocation3 + $0x30] sm:$0xff] %v15849_v9 }
 0x223   : > { %243 = vst [vmem:[#allocation3 + $0x38] sm:$0xff] %v15849_v9  ;;  %244 = vst [vmem:[#allocation3 + $0x40] sm:$0xff] %v15849_v9 }
 0x224   : > { %245 = vst [vmem:[#allocation3 + $0x48] sm:$0xff] %v15849_v9  ;;  %246 = vst [vmem:[#allocation3 + $0x50] sm:$0xff] %v15849_v9 }
 0x225   : > { %247 = vst [vmem:[#allocation3 + $0x58] sm:$0xff] %v15849_v9  ;;  %248 = vst [vmem:[#allocation3 + $0x60] sm:$0xff] %v15849_v9 }
 0x226   : > { %13621 = vmatmul.mubr.bf16.vlgmr.msra.gmra.mrb[0].mxu0 %v2538_v28  ;;  %v2840_v28 = vld [vmem:[%s15946_s15 + $0x5e] sm:$0xff] }
 0x227   : > { %13657 = vmatpush3.bf16.msra.mxu0 %v15479_v17  ;;  %13624 = vmatprep.mubr.bf16.mxu0 %v2539_v29  ;;  %v2833_v17 = vld [vmem:[%s15946_s15 + $0x26] sm:$0xff]  ;;  %v2872_v31 = vpack.c.bf16 %v2840_v28, %v2839_v27 }
 0x228   : > { %13658 = vmatprep.subr.bf16.mxu0 %v15480_v30  ;;  %v2869_v20 = vpack.c.bf16 %v2834_v18, %v2833_v17  ;;  %v2841_v29 = vld [vmem:[%s15946_s15 + $0x66] sm:$0xff]  ;;  %v3165_v17 = vlaneseq }
 0x22a   : > { %v16547_v18 = vshrl.u32 %v3165_v17, 7 }
 0x22b   : > { %13659 = vmatpush3.bf16.msra.mxu0 %v15480_v30  ;;  %v2842_v30 = vld [vmem:[%s15946_s15 + $0x6e] sm:$0xff] }
 0x22c   : > { %13660 = vmatprep.subr.bf16.mxu0 %v15481_v35  ;;  %v2873_v32 = vpack.c.bf16 %v2842_v30, %v2841_v29 }
 0x22e   : > { %13625 = vmatmul.mubr.bf16.gmra.mrb[4].mxu0 %v2540_v36  ;;  %v2846_v36 = vld [vmem:[%s15946_s15 + $0x8e] sm:$0xff] }
 0x22f   : > { %13628 = vmatprep.mubr.bf16.mxu0 %v2541_v37  ;;  %13661 = vmatpush3.bf16.msra.mxu0 %v15481_v35  ;;  %v2845_v35 = vld [vmem:[%s15946_s15 + $0x86] sm:$0xff]  ;;  %v2874_v37 = vpack.c.bf16 %v2844_v34, %v2843_v33 }
 0x230   : > { %13662 = vmatprep.subr.bf16.mxu0 %v15482_v38 }
 0x233   : > { %13663 = vmatpush3.bf16.msra.mxu0 %v15482_v38  ;;  %v2875_v38 = vpack.c.bf16 %v2846_v36, %v2845_v35 }
 0x234   : > { %13664 = vmatprep.subr.bf16.mxu0 %v15483_v43 }
 0x236   : > { %13629 = vmatmul.mubr.bf16.gmra.mrb[8].mxu0 %v2542_v44  ;;  %v2877_v44 = vpack.c.bf16 %v2850_v42, %v2849_v41 }
 0x237   : > { %13632 = vmatprep.mubr.bf16.mxu0 %v2543_v45  ;;  %13665 = vmatpush3.bf16.msra.mxu0 %v15483_v43  ;;  %v2876_v43 = vpack.c.bf16 %v2848_v40, %v2847_v39  ;;  %v2851_v45 = vld [vmem:[%s15946_s15 + $0xb6] sm:$0xff] }
 0x238   : > { %13666 = vmatprep.subr.bf16.mxu0 %v15484_v46 }
 0x23b   : > { %13667 = vmatpush3.bf16.msra.mxu0 %v15484_v46  ;;  %v2852_v46 = vld [vmem:[%s15946_s15 + $0xbe] sm:$0xff] }
 0x23c   : > { %13668 = vmatprep.subr.bf16.mxu0 %v15485_v51  ;;  %v2878_v49 = vpack.c.bf16 %v2852_v46, %v2851_v45 }
 0x23e   : > { %13633 = vmatmul.mubr.bf16.gmra.mrb[12].mxu0 %v2544_v52  ;;  %v2856_v52 = vld [vmem:[%s15946_s15 + $0xde] sm:$0xff] }
 0x23f   : > { %13636 = vmatprep.mubr.bf16.mxu0 %v2545_v53  ;;  %13669 = vmatpush3.bf16.msra.mxu0 %v15485_v51  ;;  %v2855_v51 = vld [vmem:[%s15946_s15 + $0xd6] sm:$0xff]  ;;  %v2857_v53 = vld [vmem:[%s15946_s15 + $0xe6] sm:$0xff] }
 0x240   : > { %13670 = vmatprep.subr.bf16.mxu0 %v15486_v54  ;;  %v2880_v55 = vpack.c.bf16 %v2856_v52, %v2855_v51 }
 0x243   : > { %13671 = vmatpush3.bf16.msra.mxu0 %v15486_v54  ;;  %v2858_v54 = vld [vmem:[%s15946_s15 + $0xee] sm:$0xff] }
 0x244   : > { %v2881_v56 = vpack.c.bf16 %v2858_v54, %v2857_v53  ;;  %14320 = vmatprep.subr.bf16.mxu0 %v15849_v9 }
 0x246   : > { %13637 = vmatmul.mubr.bf16.gmra.mrb[16].mxu0 %v2546_v59  ;;  %v2861_v59 = vld [vmem:[%s15946_s15 + $0x106] sm:$0xff] }
 0x247   : > { %13640 = vmatprep.mubr.bf16.mxu0 %v2547_v60  ;;  %v2862_v60 = vld [vmem:[%s15946_s15 + $0x10e] sm:$0xff] }
 0x248   : > { %v2883_v62 = vpack.c.bf16 %v2862_v60, %v2861_v59 }
 0x24e   : > { %13641 = vmatmul.mubr.bf16.gmra.mrb[20].mxu0 %v2548_v1  ;;  %v2865_v1 = vld [vmem:[%s15946_s15 + $0x126] sm:$0xff] }
 0x24f   : > { %13644 = vmatprep.mubr.bf16.mxu0 %v2549_v2  ;;  %v2866_v2 = vld [vmem:[%s15946_s15 + $0x12e] sm:$0xff]  ;;  %s19588_s15 = scalar_lea.hbm %s19635_s5, %s12518_s16 }
 0x250   : > { %v2885_v4 = vpack.c.bf16 %v2866_v2, %v2865_v1 }
 0x256   : > { %13645 = vmatmul.mubr.bf16.gmra.mrb[24].mxu0 %v2550_v7  ;;  %v2886_v7 = vpack.c.bf16 %v2868_v6, %v2867_v5 }
 0x257   : > { %13648 = vmatprep.mubr.bf16.mxu0 %v2551_v8  ;;  %v15487_v8 = vld [vmem:[%s19631_s1 + $0x280] sm:$0xff]  }
 0x258   : > { %13709 = vmatpush3.bf16.msra.mxu1 %v15487_v8 }
 0x259   : > { %13710 = vmatprep.subr.bf16.mxu1 %v15849_v9 }
 0x25c   : > { %13711 = vmatpush3.bf16.msra.mxu1 %v15488_v10 }
 0x25d   : > { %13712 = vmatprep.subr.bf16.mxu1 %v15849_v9 }
 0x25e   : > { %13649 = vmatmul.mubr.bf16.gmra.mrb[28].mxu0 %v2552_v13  ;;  %v15491_v13 = vld [vmem:[%s19631_s1 + $0x2a0] sm:$0xff]  }
 0x25f   : > { %13652 = vmatprep.mubr.bf16.mxu0 %v2553_v14  ;;  %v15492_v14 = vld [vmem:[%s19631_s1 + $0x2a8] sm:$0xff]  }
 0x260   : > { %13713 = vmatpush3.bf16.msra.mxu1 %v15489_v11 }
 0x261   : > { %13714 = vmatprep.subr.bf16.mxu1 %v15849_v9 }
 0x264   : > { %13715 = vmatpush3.bf16.msra.mxu1 %v15490_v12 }
 0x265   : > { %13716 = vmatprep.subr.bf16.mxu1 %v15849_v9 }
 0x266   : > { %13653 = vmatmul.mubr.bf16.gmra.mrb[32].mxu0 %v2554_v19  ;;  %v16550_v19 = vsub.s32 0, %v16547_v18 }
 0x267   : > { %13672 = vmatprep.mubr.bf16.mxu0 %v2869_v20  ;;  %v15851_v20 = vmov 1983009808  }
 0x268   : > { %13717 = vmatpush3.bf16.msra.mxu1 %v15491_v13  ;;  %v3279_v21 = vunpack.c.l.s4 %v15851_v20  ;;  %v16556_v23 = vrot.slane %v249_v22, %v16550_v19 }
 0x269   : > { %13718 = vmatprep.subr.bf16.mxu1 %v15849_v9 }
 0x26a   : > { %v3280_v24 = vunpack.c.0.s8 %v3279_v21 }
 0x26c   : > { %13719 = vmatpush3.bf16.msra.mxu1 %v15492_v14  ;;  %v16560_v27 = vsub.s32 %v3280_v24, %v16547_v18 }
 0x26d   : > { %13720 = vmatprep.subr.bf16.mxu1 %v15849_v9 }
 0x26e   : > { %13673 = vmatmul.mubr.bf16.vlgmr.msra.gmra.mrb[0].mxu0 %v2870_v25 }
 0x26f   : > { %13676 = vmatprep.mubr.bf16.mxu0 %v2871_v26 }
 0x270   : > { %13721 = vmatpush3.bf16.msra.mxu1 %v15493_v15 }
 0x271   : > { %13722 = vmatprep.subr.bf16.mxu1 %v15849_v9 }
 0x274   : > { %13723 = vmatpush3.bf16.msra.mxu1 %v15494_v16 }
 0x275   : > { %13744 = vmatprep.subr.bf16.mxu1 %v15849_v9 }
 0x276   : > { %13677 = vmatmul.mubr.bf16.gmra.mrb[4].mxu0 %v2872_v31 }
 0x277   : > { %13680 = vmatprep.mubr.bf16.mxu0 %v2873_v32 }
 0x27e   : > { %13681 = vmatmul.mubr.bf16.gmra.mrb[8].mxu0 %v2874_v37 }
 0x27f   : > { %13684 = vmatprep.mubr.bf16.mxu0 %v2875_v38 }
 0x286   : > { %13685 = vmatmul.mubr.bf16.gmra.mrb[12].mxu0 %v2876_v43 }
 0x287   : > { %13688 = vmatprep.mubr.bf16.mxu0 %v2877_v44 }
 0x28e   : > { %13689 = vmatmul.mubr.bf16.gmra.mrb[16].mxu0 %v2878_v49 }
 0x28f   : > { %13692 = vmatprep.mubr.bf16.mxu0 %v2879_v50 }
 0x296   : > { %13693 = vmatmul.mubr.bf16.gmra.mrb[20].mxu0 %v2880_v55 }
 0x297   : > { %13696 = vmatprep.mubr.bf16.mxu0 %v2881_v56 }
 0x29e   : > { %13697 = vmatmul.mubr.bf16.gmra.mrb[24].mxu0 %v2882_v61 }
 0x29f   : > { %13700 = vmatprep.mubr.bf16.mxu0 %v2883_v62 }
 0x2a6   : > { %13701 = vmatmul.mubr.bf16.gmra.mrb[28].mxu0 %v2884_v3 }
 0x2a7   : > { %13704 = vmatprep.mubr.bf16.mxu0 %v2885_v4 }
 0x2ae   : > { %13705 = vmatmul.mubr.bf16.gmra.mrb[32].mxu0 %v2886_v7 }
 0x2af   : > { %14336 = vmatprep.mubr.msk.bf16.mxu0 %vm15850_vm0, %v15849_v9 }
 0x341   : > { %v13674_v25 = vpop.f32.mrb[0].mxu0 }
 0x342   : > { %v3171_v26 = vadd.f32 %v13674_v25, %v16556_v23  ;;  %v2986_v28 = vpop.f32.mrb[1].mxu0 }
 0x343   : > { %v3169_v29 = vadd.f32 %v16556_v23, %v2986_v28  ;;  %v13675_v30 = vpop.f32.mrb[2].mxu0 }
 0x344   : > { %v3207_v31 = vmax.f32 %v3171_v26, 0.0  ;;  %v3172_v32 = vadd.f32 %v13675_v30, %v16556_v23  ;;  %v2989_v33 = vpop.f32.mrb[3].mxu0 }
 0x345   : > { %v3205_v34 = vmax.f32 %v3169_v29, 0.0  ;;  %v3170_v35 = vadd.f32 %v16556_v23, %v2989_v33 }
 0x346   : > { %v3311_v36 = vcombine.high %v3207_v31, %v3207_v31  ;;  %v3318_v37 = vrot.slane %v3207_v31, %v16560_v27  ;;  %v3208_v38 = vmax.f32 %v3172_v32, 0.0 }
 0x347   : > { %v3277_v39 = vcombine.high %v3205_v34, %v3205_v34  ;;  %v3284_v40 = vrot.slane %v3205_v34, %v16560_v27  ;;  %v3206_v41 = vmax.f32 %v3170_v35, 0.0 }
 0x348   : > { %v3325_v42 = vrot.slane %v3311_v36, %v16560_v27  ;;  %v3326_v43 = vcombine.high %v3318_v37, %v3318_v37  ;;  %v3328_v44 = vcombine.high %v3208_v38, %v3208_v38  ;;  %v3335_v45 = vrot.slane %v3208_v38, %v16560_v27 }
 0x349   : > { %v3291_v46 = vrot.slane %v3277_v39, %v16560_v27  ;;  %v3292_v47 = vcombine.high %v3284_v40, %v3284_v40  ;;  %v11516_v48 = vrot.slane %v3284_v40, 9  ;;  %v3294_v49 = vcombine.high %v3206_v41, %v3206_v41  ;;  %v13678_v50 = vpop.f32.mrb[4].mxu0 }
 0x34a   : > { %v3327_v51 = vcombine.high %v3325_v42, %v3325_v42  ;;  %v11524_v52 = vrot.slane %v3326_v43, 9  ;;  %v11525_v53 = vrot.slane %v3325_v42, 9  ;;  %v3342_v54 = vrot.slane %v3328_v44, %v16560_v27  ;;  %v3002_v55 = vpop.f32.mrb[5].mxu0 }
 0x34b   : > { %v3293_v56 = vcombine.high %v3291_v46, %v3291_v46  ;;  %v11517_v57 = vrot.slane %v3292_v47, 9  ;;  %v11518_v58 = vrot.slane %v3291_v46, 9  ;;  %v4393_v59 = vmax.f32 %v3284_v40, %v11516_v48  ;;  %v13679_v60 = vpop.f32.mrb[6].mxu0 }
 0x34c   : > { %v11526_v61 = vrot.slane %v3327_v51, 9  ;;  %v4401_v62 = vmax.f32 %v3326_v43, %v11524_v52  ;;  %v4402_v63 = vmax.f32 %v3325_v42, %v11525_v53  ;;  %v3343_v0 = vcombine.high %v3335_v45, %v3335_v45  ;;  %v16571_v1 = vpop.f32.mrb[7].mxu0 }
 0x34d   : > { %v11519_v2 = vrot.slane %v3293_v56, 9  ;;  %v4394_v3 = vmax.f32 %v3292_v47, %v11517_v57  ;;  %v4395_v4 = vmax.f32 %v3291_v46, %v11518_v58  ;;  %v3344_v5 = vcombine.high %v3342_v54, %v3342_v54 }
 0x34e   : > { %v4403_v6 = vmax.f32 %v3327_v51, %v11526_v61  ;;  %v4521_v7 = vmax.f32 %v4393_v59, %v4401_v62  ;;  %v11527_v8 = vrot.slane %v3335_v45, 9  ;;  %v11528_v10 = vrot.slane %v3343_v0, 9 }
 0x34f   : > { %v4522_v11 = vmax.f32 %v4394_v3, %v4402_v63  ;;  %v11529_v12 = vrot.slane %v3342_v54, 9  ;;  %v11530_v13 = vrot.slane %v3344_v5, 9  ;;  %v4396_v14 = vmax.f32 %v3293_v56, %v11519_v2 }
 0x350   : > { %v4523_v15 = vmax.f32 %v4395_v4, %v4403_v6  ;;  %v4596_v16 = vrot.slane %v4521_v7, %v16550_v19  ;;  %v4404_v17 = vmax.f32 %v3335_v45, %v11527_v8  ;;  %v4405_v20 = vmax.f32 %v3343_v0, %v11528_v10 }
 0x351   : > { %v4600_v21 = vrot.slane %v4522_v11, %v16550_v19  ;;  %v4406_v22 = vmax.f32 %v3342_v54, %v11529_v12  ;;  %v4407_v24 = vmax.f32 %v3344_v5, %v11530_v13  ;;  %v3301_v25 = vrot.slane %v3206_v41, %v16560_v27  ;;  %v16576_v26 = vpop.f32.mrb[8].mxu0 }
 0x352   : > { %v4604_v28 = vrot.slane %v4523_v15, %v16550_v19  ;;  %v4524_v29 = vmax.f32 %v4396_v14, %v4404_v17  ;;  %v3308_v30 = vrot.slane %v3294_v49, %v16560_v27  ;;  %v3175_v31 = vadd.f32 %v13678_v50, %v16556_v23  ;;  %v3018_v32 = vpop.f32.mrb[9].mxu0 }
 0x353   : > { %v4626_v33 = vsel %vm4625_vm1, %v4600_v21, %v4596_v16  ;;  %v3309_v34 = vcombine.high %v3301_v25, %v3301_v25  ;;  %v11520_v35 = vrot.slane %v3301_v25, 9  ;;  %v3173_v36 = vadd.f32 %v16556_v23, %v3002_v55  ;;  %v16583_v37 = vpop.f32.mrb[10].mxu0 }
 0x354   : > { %v4628_v38 = vsel %vm4627_vm2, %v4604_v28, %v4626_v33  ;;  %v4608_v39 = vrot.slane %v4524_v29, %v16550_v19  ;;  %v3310_v40 = vcombine.high %v3308_v30, %v3308_v30  ;;  %v11522_v41 = vrot.slane %v3308_v30, 9  ;;  %v16587_v42 = vpop.f32.mrb[11].mxu0 }
 0x355   : > { %v11521_v43 = vrot.slane %v3309_v34, 9  ;;  %v4397_v44 = vmax.f32 %v3301_v25, %v11520_v35  ;;  %v3211_v45 = vmax.f32 %v3175_v31, 0.0  ;;  %v3209_v46 = vmax.f32 %v3173_v36, 0.0 }
 0x356   : > { %v4630_v47 = vsel %vm4629_vm3, %v4608_v39, %v4628_v38  ;;  %v4399_v48 = vmax.f32 %v3308_v30, %v11522_v41  ;;  %v11523_v49 = vrot.slane %v3310_v40, 9  ;;  %v3176_v61 = vadd.f32 %v13679_v60, %v16556_v23 }
 0x357   : > { %v4398_v50 = vmax.f32 %v3309_v34, %v11521_v43  ;;  %v4525_v51 = vmax.f32 %v4397_v44, %v4405_v20  ;;  %v3378_v52 = vcombine.high %v3211_v45, %v3211_v45  ;;  %v16591_v53 = vrot.slane %v3211_v45, %v16560_v27 }
 0x358   : > { %v4527_v54 = vmax.f32 %v4399_v48, %v4407_v24  ;;  %v3345_v55 = vcombine.high %v3209_v46, %v3209_v46  ;;  %v3352_v56 = vrot.slane %v3209_v46, %v16560_v27  ;;  %v4400_v2 = vmax.f32 %v3310_v40, %v11523_v49 }
 0x359   : > { %v4526_v57 = vmax.f32 %v4398_v50, %v4406_v22  ;;  %v4612_v58 = vrot.slane %v4525_v51, %v16550_v19  ;;  %v3392_v59 = vrot.slane %v3378_v52, %v16560_v27  ;;  %v16597_v62 = vpop.f32.mrb[12].mxu0  ;;  %v3393_v6 = vcombine.high %v16591_v53, %v16591_v53 }
 0x35a   : > { %v3359_v63 = vrot.slane %v3345_v55, %v16560_v27  ;;  %v11531_v0 = vrot.slane %v3352_v56, 9  ;;  %v16600_v3 = vpop.f32.mrb[13].mxu0  ;;  %v4620_v60 = vrot.slane %v4527_v54, %v16550_v19  ;;  %v11538_v14 = vrot.slane %v16591_v53, 9 }
 0x35b   : > { %v4616_v4 = vrot.slane %v4526_v57, %v16550_v19  ;;  %v4632_v5 = vsel %vm4631_vm4, %v4612_v58, %v4630_v47  ;;  %v3394_v7 = vcombine.high %v3392_v59, %v3392_v59  ;;  %v16606_v8 = vpop.f32.mrb[14].mxu0  ;;  %v3212_v17 = vmax.f32 %v3176_v61, 0.0 }
 0x35c   : > { %v3360_v10 = vcombine.high %v3359_v63, %v3359_v63  ;;  %v11532_v11 = vrot.slane %v3359_v63, 9  ;;  %v4408_v12 = vmax.f32 %v3352_v56, %v11531_v0  ;;  %v16609_v13 = vpop.f32.mrb[15].mxu0  ;;  %v3174_v30 = vadd.f32 %v16556_v23, %v16571_v1 }
 0x35d   : > { %v11540_v15 = vrot.slane %v3394_v7, 9  ;;  %v4634_v16 = vsel %vm4633_vm5, %v4616_v4, %v4632_v5  ;;  %v3395_v28 = vcombine.high %v3212_v17, %v3212_v17  ;;  %v3402_v29 = vrot.slane %v3212_v17, %v16560_v27 }
 0x35e   : > { %v11533_v20 = vrot.slane %v3360_v10, 9  ;;  %v4409_v21 = vmax.f32 %v3359_v63, %v11532_v11  ;;  %v4528_v22 = vmax.f32 %v4400_v2, %v4408_v12  ;;  %v4636_v24 = vsel %vm4635_vm6, %v4620_v60, %v4634_v16 }
 0x35f   : > { %v4417_v25 = vmax.f32 %v3394_v7, %v11540_v15  ;;  %v11539_v31 = vrot.slane %v3393_v6, 9  ;;  %v3179_v34 = vadd.f32 %v16576_v26, %v16556_v23  ;;  %v3177_v35 = vadd.f32 %v16556_v23, %v3018_v32 }
 0x360   : > { %v4624_v33 = vrot.slane %v4528_v22, %v16550_v19  ;;  %v3409_v38 = vrot.slane %v3395_v28, %v16560_v27  ;;  %v3410_v39 = vcombine.high %v3402_v29, %v3402_v29  ;;  %v11541_v40 = vrot.slane %v3402_v29, 9 }
 0x361   : > { %v4529_v36 = vmax.f32 %v4409_v21, %v4417_v25  ;;  %v16622_v41 = vpop.f32.mrb[16].mxu0  ;;  %v4410_v44 = vmax.f32 %v3360_v10, %v11533_v20  ;;  %v3210_v45 = vmax.f32 %v3174_v30, 0.0  ;;  %v3215_v1 = vmax.f32 %v3179_v34, 0.0 }
 0x362   : > { %v4638_v43 = vsel %vm4637_vm7, %v4624_v33, %v4636_v24  ;;  %v16625_v46 = vpop.f32.mrb[17].mxu0  ;;  %v3411_v47 = vcombine.high %v3409_v38, %v3409_v38  ;;  %v11542_v48 = vrot.slane %v3410_v39, 9  ;;  %v11543_v26 = vrot.slane %v3409_v38, 9 }
 0x363   : > { %4640 = vst [vmem:[#allocation2 + $0xb] sm:$0xff] %v4638_v43  ;;  %v3213_v49 = vmax.f32 %v3177_v35, 0.0  ;;  %v16627_v32 = vpop.f32.mrb[18].mxu0  ;;  %v4418_v50 = vmax.f32 %v3402_v29, %v11541_v40  ;;  %v3361_v51 = vcombine.high %v3210_v45, %v3210_v45  ;;  %v3368_v52 = vrot.slane %v3210_v45, %v16560_v27 }
 0x364   : > { %v3445_v54 = vcombine.high %v3215_v1, %v3215_v1  ;;  %v16630_v55 = vpop.f32.mrb[19].mxu0  ;;  %v4652_v56 = vrot.slane %v4529_v36, %v16550_v19  ;;  %v11544_v57 = vrot.slane %v3411_v47, 9  ;;  %v4419_v58 = vmax.f32 %v3410_v39, %v11542_v48 }
 0x365   : > { %v16634_v59 = vrot.slane %v3215_v1, %v16560_v27  ;;  %v4530_v61 = vmax.f32 %v4410_v44, %v4418_v50  ;;  %v3375_v63 = vrot.slane %v3361_v51, %v16560_v27  ;;  %v3376_v0 = vcombine.high %v3368_v52, %v3368_v52 }
 0x366   : > { %v11534_v2 = vrot.slane %v3368_v52, 9  ;;  %v4420_v4 = vmax.f32 %v3409_v38, %v11543_v26  ;;  %v4421_v5 = vmax.f32 %v3411_v47, %v11544_v57  ;;  %v16638_v7 = vrot.slane %v3445_v54, %v16560_v27 }
 0x367   : > { %v16642_v60 = vcombine.high %v16634_v59, %v16634_v59  ;;  %v4656_v10 = vrot.slane %v4530_v61, %v16550_v19  ;;  %v3377_v11 = vcombine.high %v3375_v63, %v3375_v63  ;;  %v11535_v12 = vrot.slane %v3376_v0, 9 }
 0x368   : > { %v11536_v15 = vrot.slane %v3375_v63, 9  ;;  %v4415_v16 = vmax.f32 %v16591_v53, %v11538_v14  ;;  %v4416_v17 = vmax.f32 %v3393_v6, %v11539_v31  ;;  %v4411_v20 = vmax.f32 %v3368_v52, %v11534_v2 }
 0x369   : > { %v16646_v21 = vpop.f32.mrb[20].mxu0  ;;  %v4681_v22 = vsel %vm4625_vm1, %v4656_v10, %v4652_v56  ;;  %v11537_v24 = vrot.slane %v3377_v11, 9  ;;  %v4412_v25 = vmax.f32 %v3376_v0, %v11535_v12  ;;  %v11552_v33 = vrot.slane %v16634_v59, 9 }
 0x36a   : > { %v4413_v28 = vmax.f32 %v3375_v63, %v11536_v15  ;;  %v16649_v29 = vpop.f32.mrb[21].mxu0  ;;  %v4531_v30 = vmax.f32 %v4411_v20, %v4419_v58  ;;  %v11553_v34 = vrot.slane %v16642_v60, 9  ;;  %v11554_v35 = vrot.slane %v16638_v7, 9 }
 0x36b   : > { %v16654_v36 = vpop.f32.mrb[22].mxu0  ;;  %v4532_v53 = vmax.f32 %v4412_v25, %v4420_v4  ;;  %v3412_v14 = vcombine.high %v3213_v49, %v3213_v49  ;;  %v3419_v31 = vrot.slane %v3213_v49, %v16560_v27  ;;  %v4414_v40 = vmax.f32 %v3377_v11, %v11537_v24 }
 0x36c   : > { %v4533_v6 = vmax.f32 %v4413_v28, %v4421_v5  ;;  %v16657_v38 = vpop.f32.mrb[23].mxu0  ;;  %v4660_v39 = vrot.slane %v4531_v30, %v16550_v19  ;;  %v3180_v43 = vadd.f32 %v16583_v37, %v16556_v23  ;;  %v3178_v44 = vadd.f32 %v16556_v23, %v16587_v42 }
 0x36d   : > { %v4664_v45 = vrot.slane %v4532_v53, %v16550_v19  ;;  %v3426_v47 = vrot.slane %v3412_v14, %v16560_v27  ;;  %v3427_v48 = vcombine.high %v3419_v31, %v3419_v31  ;;  %v11545_v49 = vrot.slane %v3419_v31, 9 }
 0x36e   : > { %v4668_v1 = vrot.slane %v4533_v6, %v16550_v19  ;;  %v4682_v26 = vsel %vm4627_vm2, %v4660_v39, %v4681_v22  ;;  %v3216_v50 = vmax.f32 %v3180_v43, 0.0  ;;  %v3214_v51 = vmax.f32 %v3178_v44, 0.0 }
 0x36f   : > { %v4683_v52 = vsel %vm4629_vm3, %v4664_v45, %v4682_v26  ;;  %v11546_v54 = vrot.slane %v3427_v48, 9  ;;  %v11547_v56 = vrot.slane %v3426_v47, 9  ;;  %v3183_v37 = vadd.f32 %v16597_v62, %v16556_v23 }
 0x370   : > { %v4684_v42 = vsel %vm4631_vm4, %v4668_v1, %v4683_v52  ;;  %v4422_v57 = vmax.f32 %v3419_v31, %v11545_v49  ;;  %v3462_v58 = vcombine.high %v3216_v50, %v3216_v50  ;;  %v3469_v61 = vrot.slane %v3216_v50, %v16560_v27 }
 0x371   : > { %v16673_v63 = vpop.f32.mrb[24].mxu0  ;;  %v4423_v0 = vmax.f32 %v3427_v48, %v11546_v54  ;;  %v4424_v2 = vmax.f32 %v3426_v47, %v11547_v56  ;;  %v3428_v4 = vcombine.high %v3214_v51, %v3214_v51  ;;  %v3435_v5 = vrot.slane %v3214_v51, %v16560_v27 }
 0x372   : > { %v16676_v10 = vpop.f32.mrb[25].mxu0  ;;  %v4534_v11 = vmax.f32 %v4414_v40, %v4422_v57  ;;  %v3476_v12 = vrot.slane %v3462_v58, %v16560_v27  ;;  %v3477_v15 = vcombine.high %v3469_v61, %v3469_v61  ;;  %v3219_v62 = vmax.f32 %v3183_v37, 0.0 }
 0x373   : > { %v16679_v20 = vpop.f32.mrb[26].mxu0  ;;  %v4535_v22 = vmax.f32 %v4415_v16, %v4423_v0  ;;  %v4536_v24 = vmax.f32 %v4416_v17, %v4424_v2  ;;  %v3442_v25 = vrot.slane %v3428_v4, %v16560_v27  ;;  %v3443_v28 = vcombine.high %v3435_v5, %v3435_v5 }
 0x374   : > { %v16682_v30 = vpop.f32.mrb[27].mxu0  ;;  %v4672_v53 = vrot.slane %v4534_v11, %v16550_v19  ;;  %v3478_v6 = vcombine.high %v3476_v12, %v3476_v12  ;;  %v11556_v14 = vrot.slane %v3477_v15, 9  ;;  %v11557_v31 = vrot.slane %v3476_v12, 9 }
 0x375   : > { %v4676_v39 = vrot.slane %v4535_v22, %v16550_v19  ;;  %v4680_v40 = vrot.slane %v4536_v24, %v16550_v19  ;;  %v3444_v43 = vcombine.high %v3442_v25, %v3442_v25  ;;  %v11548_v44 = vrot.slane %v3435_v5, 9 }
 0x376   : > { %v4685_v45 = vsel %vm4633_vm5, %v4672_v53, %v4684_v42  ;;  %v11558_v16 = vrot.slane %v3478_v6, 9  ;;  %v4433_v17 = vmax.f32 %v3477_v15, %v11556_v14  ;;  %v4434_v1 = vmax.f32 %v3476_v12, %v11557_v31 }
 0x377   : > { %v4686_v47 = vsel %vm4635_vm6, %v4676_v39, %v4685_v45  ;;  %v11549_v48 = vrot.slane %v3443_v28, 9  ;;  %v11550_v26 = vrot.slane %v3442_v25, 9  ;;  %v11551_v49 = vrot.slane %v3444_v43, 9 }
 0x378   : > { %v4687_v50 = vsel %vm4637_vm7, %v4680_v40, %v4686_v47  ;;  %v4435_v51 = vmax.f32 %v3478_v6, %v11558_v16  ;;  %v4425_v52 = vmax.f32 %v3435_v5, %v11548_v44  ;;  %v3512_v54 = vcombine.high %v3219_v62, %v3219_v62 }
 0x379   : > { %v16690_v56 = vpop.f32.mrb[28].mxu0  ;;  %4689 = vst [vmem:[#allocation2 + $0x15] sm:$0xff] %v4687_v50  ;;  %v4426_v37 = vmax.f32 %v3443_v28, %v11549_v48  ;;  %v4427_v57 = vmax.f32 %v3442_v25, %v11550_v26  ;;  %v3519_v42 = vrot.slane %v3219_v62, %v16560_v27  ;;  %v3181_v58 = vadd.f32 %v16556_v23, %v16600_v3 }
 0x37a   : > { %v16695_v61 = vpop.f32.mrb[29].mxu0  ;;  %v16699_v0 = vcombine.high %v16638_v7, %v16638_v7  ;;  %v16704_v2 = vmax.f32 %v16634_v59, %v11552_v33  ;;  %v4537_v4 = vmax.f32 %v4425_v52, %v4433_v17  ;;  %v3526_v5 = vrot.slane %v3512_v54, %v16560_v27 }
 0x37b   : > { %v16707_v11 = vpop.f32.mrb[30].mxu0  ;;  %v4538_v12 = vmax.f32 %v4426_v37, %v4434_v1  ;;  %v4539_v15 = vmax.f32 %v4427_v57, %v4435_v51  ;;  %v16709_v62 = vcombine.high %v3519_v42, %v3519_v42  ;;  %v3184_v3 = vadd.f32 %v16606_v8, %v16556_v23 }
 0x37c   : > { %v16713_v22 = vpop.f32.mrb[31].mxu0  ;;  %v4430_v24 = vmax.f32 %v16642_v60, %v11553_v34  ;;  %v4431_v59 = vmax.f32 %v16638_v7, %v11554_v35  ;;  %v4701_v33 = vrot.slane %v4537_v4, %v16550_v19  ;;  %v3217_v25 = vmax.f32 %v3181_v58, 0.0 }
 0x37d   : > { %v4705_v28 = vrot.slane %v4538_v12, %v16550_v19  ;;  %v4709_v53 = vrot.slane %v4539_v15, %v16550_v19  ;;  %v11566_v6 = vrot.slane %v3519_v42, 9  ;;  %v4428_v14 = vmax.f32 %v3444_v43, %v11551_v49 }
 0x37e   : > { %v16724_v8 = vcombine.high %v3526_v5, %v3526_v5  ;;  %v11568_v31 = vrot.slane %v3526_v5, 9  ;;  %v3479_v39 = vcombine.high %v3217_v25, %v3217_v25  ;;  %v3486_v40 = vrot.slane %v3217_v25, %v16560_v27 }
 0x37f   : > { %v4730_v60 = vsel %vm4625_vm1, %v4705_v28, %v4701_v33  ;;  %v11567_v34 = vrot.slane %v16709_v62, 9  ;;  %v3220_v7 = vmax.f32 %v3184_v3, 0.0  ;;  %v3182_v35 = vadd.f32 %v16556_v23, %v16609_v13 }
 0x380   : > { %v4731_v44 = vsel %vm4627_vm2, %v4709_v53, %v4730_v60  ;;  %v3493_v45 = vrot.slane %v3479_v39, %v16560_v27  ;;  %v3494_v16 = vcombine.high %v3486_v40, %v3486_v40  ;;  %v11559_v43 = vrot.slane %v3486_v40, 9 }
 0x381   : > { %v16733_v17 = vpop.f32.mrb[32].mxu0  ;;  %v16735_v1 = vmax.f32 %v3519_v42, %v11566_v6  ;;  %v3529_v47 = vcombine.high %v3220_v7, %v3220_v7  ;;  %v3536_v48 = vrot.slane %v3220_v7, %v16560_v27  ;;  %v3218_v26 = vmax.f32 %v3182_v35, 0.0 }
 0x382   : > { %v16738_v49 = vpop.f32.mrb[33].mxu0  ;;  %v3495_v50 = vcombine.high %v3493_v45, %v3493_v45  ;;  %v11560_v51 = vrot.slane %v3494_v16, 9  ;;  %v11561_v52 = vrot.slane %v3493_v45, 9  ;;  %v4436_v13 = vmax.f32 %v3486_v40, %v11559_v43 }
 0x383   : > { %v16740_v54 = vpop.f32.mrb[34].mxu0  ;;  %v11569_v37 = vrot.slane %v16724_v8, 9  ;;  %v16743_v57 = vmax.f32 %v3526_v5, %v11568_v31  ;;  %v3543_v58 = vrot.slane %v3529_v47, %v16560_v27  ;;  %v3496_v42 = vcombine.high %v3218_v26, %v3218_v26 }
 0x384   : > { %v16746_v4 = vpop.f32.mrb[35].mxu0  ;;  %v11562_v12 = vrot.slane %v3495_v50, 9  ;;  %v4437_v15 = vmax.f32 %v3494_v16, %v11560_v51  ;;  %v4438_v3 = vmax.f32 %v3493_v45, %v11561_v52  ;;  %v4540_v33 = vmax.f32 %v4428_v14, %v4436_v13 }
 0x385   : > { %v3544_v25 = vcombine.high %v3536_v48, %v3536_v48  ;;  %v3545_v28 = vcombine.high %v3543_v58, %v3543_v58  ;;  %v3503_v53 = vrot.slane %v3218_v26, %v16560_v27  ;;  %v11555_v6 = vrot.slane %v16699_v0, 9 }
 0x386   : > { %v4439_v39 = vmax.f32 %v3495_v50, %v11562_v12  ;;  %v4541_v40 = vmax.f32 %v16704_v2, %v4437_v15  ;;  %v4542_v5 = vmax.f32 %v4430_v24, %v4438_v3  ;;  %v4713_v31 = vrot.slane %v4540_v33, %v16550_v19 }
 0x387   : > { %v11570_v60 = vrot.slane %v3536_v48, 9  ;;  %v11572_v7 = vrot.slane %v3545_v28, 9  ;;  %v3510_v35 = vrot.slane %v3496_v42, %v16560_v27  ;;  %v11563_v43 = vrot.slane %v3503_v53, 9 }
 0x388   : > { %v4543_v16 = vmax.f32 %v4431_v59, %v4439_v39  ;;  %v4717_v14 = vrot.slane %v4541_v40, %v16550_v19  ;;  %v4721_v45 = vrot.slane %v4542_v5, %v16550_v19  ;;  %v4732_v47 = vsel %vm4629_vm3, %v4713_v31, %v4731_v44 }
 0x389   : > { %v4449_v26 = vmax.f32 %v3545_v28, %v11572_v7  ;;  %v3511_v51 = vcombine.high %v3510_v35, %v3510_v35  ;;  %v11564_v50 = vrot.slane %v3510_v35, 9  ;;  %v4432_v2 = vmax.f32 %v16699_v0, %v11555_v6 }
 0x38a   : > { %v4725_v24 = vrot.slane %v4543_v16, %v16550_v19  ;;  %v4733_v52 = vsel %vm4631_vm4, %v4717_v14, %v4732_v47  ;;  %v4440_v13 = vmax.f32 %v3503_v53, %v11563_v43  ;;  %v3187_v58 = vadd.f32 %v16622_v41, %v16556_v23 }
 0x38b   : > { %v11571_v59 = vrot.slane %v3544_v25, 9  ;;  %v4441_v42 = vmax.f32 %v3510_v35, %v11564_v50  ;;  %v4734_v12 = vsel %vm4633_vm5, %v4721_v45, %v4733_v52  ;;  %v3185_v44 = vadd.f32 %v16556_v23, %v16625_v46 }
 0x38c   : > { %v4544_v15 = vmax.f32 %v4432_v2, %v4440_v13  ;;  %v4735_v3 = vsel %vm4635_vm6, %v4725_v24, %v4734_v12  ;;  %v3223_v33 = vmax.f32 %v3187_v58, 0.0  ;;  %v3188_v0 = vadd.f32 %v16627_v32, %v16556_v23 }
 0x38d   : > { %v11565_v28 = vrot.slane %v3511_v51, 9  ;;  %v4545_v6 = vmax.f32 %v4441_v42, %v4449_v26  ;;  %v3221_v53 = vmax.f32 %v3185_v44, 0.0  ;;  %v3186_v41 = vadd.f32 %v16556_v23, %v16630_v55 }
 0x38e   : > { %v4729_v39 = vrot.slane %v4544_v15, %v16550_v19  ;;  %v3579_v40 = vcombine.high %v3223_v33, %v3223_v33  ;;  %v3586_v5 = vrot.slane %v3223_v33, %v16560_v27  ;;  %v3224_v31 = vmax.f32 %v3188_v0, 0.0 }
 0x38f   : > { %v4444_v46 = vmax.f32 %v16709_v62, %v11567_v34  ;;  %v16774_v7 = vmax.f32 %v3536_v48, %v11570_v60  ;;  %v3546_v35 = vcombine.high %v3221_v53, %v3221_v53  ;;  %v3553_v32 = vrot.slane %v3221_v53, %v16560_v27 }
 0x390   : > { %v16777_v43 = vmax.f32 %v3544_v25, %v11571_v59  ;;  %v4736_v16 = vsel %vm4637_vm7, %v4729_v39, %v4735_v3  ;;  %v3593_v55 = vrot.slane %v3579_v40, %v16560_v27  ;;  %v3594_v14 = vcombine.high %v3586_v5, %v3586_v5 }
 0x391   : > { %4738 = vst [vmem:[#allocation2 + $0x1f] sm:$0xff] %v4736_v16  ;;  %v3560_v45 = vrot.slane %v3546_v35, %v16560_v27  ;;  %v3561_v47 = vcombine.high %v3553_v32, %v3553_v32  ;;  %v11573_v26 = vrot.slane %v3553_v32, 9  ;;  %v4442_v50 = vmax.f32 %v3511_v51, %v11565_v28  ;;  %v5218_v16 = vld [vmem:[#allocation2 + $0x9] sm:$0xff] }
 0x392   : > { %v4750_v62 = vrot.slane %v4545_v6, %v16550_v19  ;;  %v11580_v34 = vrot.slane %v3586_v5, 9  ;;  %v3596_v48 = vcombine.high %v3224_v31, %v3224_v31  ;;  %v3222_v60 = vmax.f32 %v3186_v41, 0.0 }
 0x393   : > { %v3562_v2 = vcombine.high %v3560_v45, %v3560_v45  ;;  %v11574_v24 = vrot.slane %v3561_v47, 9  ;;  %v11575_v25 = vrot.slane %v3560_v45, 9  ;;  %v4450_v52 = vmax.f32 %v3553_v32, %v11573_v26  ;;  %v5217_v32 = vld [vmem:[#allocation2 + $0x1] sm:$0xff] }
 0x394   : > { %v16783_v13 = vcombine.high %v3593_v55, %v3593_v55  ;;  %v11581_v58 = vrot.slane %v3594_v14, 9  ;;  %v11582_v59 = vrot.slane %v3593_v55, 9  ;;  %v16786_v42 = vrot.slane %v3224_v31, %v16560_v27 }
 0x395   : > { %v11576_v12 = vrot.slane %v3562_v2, 9  ;;  %v4451_v44 = vmax.f32 %v3561_v47, %v11574_v24  ;;  %v4452_v15 = vmax.f32 %v3560_v45, %v11575_v25  ;;  %v4546_v51 = vmax.f32 %v4442_v50, %v4450_v52 }
 0x396   : > { %v16788_v3 = vmax.f32 %v3586_v5, %v11580_v34  ;;  %v16791_v33 = vrot.slane %v3596_v48, %v16560_v27  ;;  %v16795_v0 = vcombine.high %v16786_v42, %v16786_v42  ;;  %v3563_v28 = vcombine.high %v3222_v60, %v3222_v60  ;;  %v15495_v34 = vld [vmem:[%s19631_s1 + $0x240] sm:$0xff]  }
 0x397   : > { %v4453_v6 = vmax.f32 %v3562_v2, %v11576_v12  ;;  %v4547_v53 = vmax.f32 %v16735_v1, %v4451_v44  ;;  %v4548_v41 = vmax.f32 %v4444_v46, %v4452_v15  ;;  %v4754_v39 = vrot.slane %v4546_v51, %v16550_v19 }
 0x398   : > { %v11583_v40 = vrot.slane %v16783_v13, 9  ;;  %v16800_v31 = vmax.f32 %v3594_v14, %v11581_v58  ;;  %v16802_v5 = vmax.f32 %v3593_v55, %v11582_v59  ;;  %v3612_v35 = vcombine.high %v16791_v33, %v16791_v33 }
 0x399   : > { %v4549_v45 = vmax.f32 %v16743_v57, %v4453_v6  ;;  %v4758_v47 = vrot.slane %v4547_v53, %v16550_v19  ;;  %v4762_v1 = vrot.slane %v4548_v41, %v16550_v19  ;;  %v4779_v46 = vsel %vm4625_vm1, %v4754_v39, %v4750_v62 }
 0x39a   : > { %v11584_v26 = vrot.slane %v16786_v42, 9  ;;  %v11585_v14 = vrot.slane %v16795_v0, 9  ;;  %v3570_v55 = vrot.slane %v3222_v60, %v16560_v27  ;;  %v3577_v50 = vrot.slane %v3563_v28, %v16560_v27 }
 0x39b   : > { %v4766_v57 = vrot.slane %v4549_v45, %v16550_v19  ;;  %v4780_v48 = vsel %vm4627_vm2, %v4758_v47, %v4779_v46  ;;  %v4446_v62 = vmax.f32 %v16724_v8, %v11569_v37  ;;  %v5227_v2 = vpack.c.bf16 %v5218_v16, %v5217_v32  ;;  %v15496_v37 = vld [vmem:[%s19631_s1 + $0x248] sm:$0xff]  }
 0x39c   : > { %v4781_v24 = vsel %vm4629_vm3, %v4762_v1, %v4780_v48  ;;  %v3578_v25 = vcombine.high %v3570_v55, %v3570_v55  ;;  %v11577_v52 = vrot.slane %v3570_v55, 9  ;;  %v11579_v60 = vrot.slane %v3577_v50, 9 }
 0x39d   : > { %v4782_v58 = vsel %vm4631_vm4, %v4766_v57, %v4781_v24  ;;  %13725 = vmatmul.mubr.bf16.vlgmr.msra.gmra.mrb[0].mxu1 %v5227_v2  ;;  %v3191_v59 = vadd.f32 %v16646_v21, %v16556_v23  ;;  %v11587_v12 = vrot.slane %v3612_v35, 9  ;;  %v3189_v44 = vadd.f32 %v16556_v23, %v16649_v29 }
 0x39e   : > { %v11578_v15 = vrot.slane %v3578_v25, 9  ;;  %v4454_v51 = vmax.f32 %v3570_v55, %v11577_v52  ;;  %v4456_v28 = vmax.f32 %v3577_v50, %v11579_v60  ;;  %v3192_v8 = vadd.f32 %v16654_v36, %v16556_v23  ;;  %13728 = vmatprep.mubr.msk.bf16.mxu1 %vm15850_vm0, %v15849_v9  ;;  %13745 = vmatpush3.bf16.msra.mxu1 %v15495_v34  ;;  %v15497_v34 = vld [vmem:[%s19631_s1 + $0x250] sm:$0xff]  }
 0x39f   : > { %v11586_v21 = vrot.slane %v16791_v33, 9  ;;  %v3227_v6 = vmax.f32 %v3191_v59, 0.0  ;;  %v4464_v53 = vmax.f32 %v3612_v35, %v11587_v12  ;;  %v3225_v41 = vmax.f32 %v3189_v44, 0.0  ;;  %13746 = vmatprep.subr.bf16.mxu1 %v15849_v9 }
 0x3a0   : > { %v4455_v29 = vmax.f32 %v3578_v25, %v11578_v15  ;;  %v4550_v39 = vmax.f32 %v4446_v62, %v4454_v51  ;;  %v4552_v32 = vmax.f32 %v16777_v43, %v4456_v28  ;;  %v3228_v36 = vmax.f32 %v3192_v8, 0.0 }
 0x3a1   : > { %v3647_v16 = vcombine.high %v3227_v6, %v3227_v6  ;;  %v3654_v45 = vrot.slane %v3227_v6, %v16560_v27  ;;  %v3613_v47 = vcombine.high %v3225_v41, %v3225_v41  ;;  %v3620_v1 = vrot.slane %v3225_v41, %v16560_v27 }
 0x3a2   : > { %v4551_v46 = vmax.f32 %v16774_v7, %v4455_v29  ;;  %v4770_v55 = vrot.slane %v4550_v39, %v16550_v19  ;;  %v4778_v35 = vrot.slane %v4552_v32, %v16550_v19  ;;  %v3663_v50 = vcombine.high %v3228_v36, %v3228_v36  ;;  %13747 = vmatpush3.bf16.msra.mxu1 %v15496_v37 }
 0x3a3   : > { %v3661_v43 = vrot.slane %v3647_v16, %v16560_v27  ;;  %v11595_v57 = vrot.slane %v3654_v45, 9  ;;  %v3627_v48 = vrot.slane %v3613_v47, %v16560_v27  ;;  %v3628_v62 = vcombine.high %v3620_v1, %v3620_v1  ;;  %13748 = vmatprep.subr.bf16.mxu1 %v15849_v9 }
 0x3a4   : > { %v4774_v7 = vrot.slane %v4551_v46, %v16550_v19  ;;  %v4783_v2 = vsel %vm4633_vm5, %v4770_v55, %v4782_v58  ;;  %v16852_v24 = vrot.slane %v3228_v36, %v16560_v27  ;;  %v16855_v25 = vrot.slane %v3663_v50, %v16560_v27  ;;  %v15498_v58 = vld [vmem:[%s19631_s1 + $0x258] sm:$0xff]   ;;  %v15499_v46 = vld [vmem:[%s19631_s1 + $0x260] sm:$0xff]  }
 0x3a5   : > { %v16857_v52 = vcombine.high %v3661_v43, %v3661_v43  ;;  %v11596_v60 = vrot.slane %v3661_v43, 9  ;;  %v4472_v59 = vmax.f32 %v3654_v45, %v11595_v57  ;;  %v3629_v12 = vcombine.high %v3627_v48, %v3627_v48 }
 0x3a6   : > { %v16860_v44 = vmax.f32 %v16786_v42, %v11584_v26  ;;  %v4784_v9 = vsel %vm4635_vm6, %v4774_v7, %v4783_v2  ;;  %v11588_v15 = vrot.slane %v3628_v62, 9  ;;  %v11589_v51 = vrot.slane %v3627_v48, 9  ;;  %13749 = vmatpush3.bf16.msra.mxu1 %v15497_v34  ;;  %v16875_v26 = vld [vmem:[#allocation2] sm:$0xff] }
 0x3a7   : > { %v16867_v28 = vsel %vm4637_vm7, %v4778_v35, %v4784_v9  ;;  %v4560_v8 = vmax.f32 %v4464_v53, %v4472_v59  ;;  %v16871_v37 = vcombine.high %v16852_v24, %v16852_v24  ;;  %v3190_v42 = vadd.f32 %v16556_v23, %v16657_v38  ;;  %13750 = vmatprep.subr.bf16.mxu1 %v16875_v26 }
 0x3a8   : > { %4787 = vst [vmem:[#allocation2 + $0x29] sm:$0xff] %v16867_v28  ;;  %v11590_v6 = vrot.slane %v3629_v12, 9  ;;  %v4465_v41 = vmax.f32 %v3628_v62, %v11588_v15  ;;  %v4466_v29 = vmax.f32 %v3627_v48, %v11589_v51  ;;  %v3679_v39 = vcombine.high %v16855_v25, %v16855_v25 }
 0x3a9   : > { %v16884_v53 = vmax.f32 %v16795_v0, %v11585_v14  ;;  %v16887_v32 = vmax.f32 %v16791_v33, %v11586_v21  ;;  %v11597_v38 = vrot.slane %v16857_v52, 9  ;;  %v16890_v36 = vmax.f32 %v3661_v43, %v11596_v60 }
 0x3aa   : > { %v4467_v16 = vmax.f32 %v3629_v12, %v11590_v6  ;;  %v4553_v45 = vmax.f32 %v16788_v3, %v4465_v41  ;;  %v4554_v47 = vmax.f32 %v16800_v31, %v4466_v29  ;;  %v11601_v1 = vrot.slane %v3679_v39, 9  ;;  %13751 = vmatpush3.bf16.msra.mxu1 %v15498_v58  ;;  %v15501_v29 = vld [vmem:[%s19631_s1 + $0x270] sm:$0xff]  }
 0x3ab   : > { %v16898_v0 = vrot.slane %v4560_v8, %v16550_v19  ;;  %v11598_v33 = vrot.slane %v16852_v24, 9  ;;  %v11599_v14 = vrot.slane %v16871_v37, 9  ;;  %v3226_v21 = vmax.f32 %v3190_v42, 0.0  ;;  %13752 = vmatprep.subr.bf16.mxu1 %v16875_v26 }
 0x3ac   : > { %v4555_v3 = vmax.f32 %v16802_v5, %v4467_v16  ;;  %v4799_v31 = vrot.slane %v4553_v45, %v16550_v19  ;;  %v4803_v55 = vrot.slane %v4554_v47, %v16550_v19  ;;  %v4460_v35 = vmax.f32 %v16783_v13, %v11583_v40  ;;  %v15500_v13 = vld [vmem:[%s19631_s1 + $0x268] sm:$0xff]  }
 0x3ad   : > { %v3630_v50 = vcombine.high %v3226_v21, %v3226_v21  ;;  %v3637_v34 = vrot.slane %v3226_v21, %v16560_v27  ;;  %v3195_v43 = vadd.f32 %v16673_v63, %v16556_v23  ;;  %v16912_v57 = vmax.f32 %v3679_v39, %v11601_v1 }
 0x3ae   : > { %v4807_v48 = vrot.slane %v4555_v3, %v16550_v19  ;;  %v4828_v5 = vsel %vm4625_vm1, %v4803_v55, %v4799_v31  ;;  %v3193_v62 = vadd.f32 %v16556_v23, %v16676_v10  ;;  %v3196_v7 = vadd.f32 %v16679_v20, %v16556_v23  ;;  %13753 = vmatpush3.bf16.msra.mxu1 %v15499_v46 }
 0x3af   : > { %v3644_v40 = vrot.slane %v3630_v50, %v16560_v27  ;;  %v3645_v63 = vcombine.high %v3637_v34, %v3637_v34  ;;  %v11591_v2 = vrot.slane %v3637_v34, 9  ;;  %v3231_v60 = vmax.f32 %v3195_v43, 0.0  ;;  %13754 = vmatprep.subr.bf16.mxu1 %v16875_v26 }
 0x3b0   : > { %v4829_v59 = vsel %vm4627_vm2, %v4807_v48, %v4828_v5  ;;  %v3229_v12 = vmax.f32 %v3193_v62, 0.0  ;;  %v3232_v9 = vmax.f32 %v3196_v7, 0.0  ;;  %v3194_v10 = vadd.f32 %v16556_v23, %v16682_v30 }
 0x3b1   : > { %v3646_v20 = vcombine.high %v3644_v40, %v3644_v40  ;;  %v11592_v15 = vrot.slane %v3645_v63, 9  ;;  %v11593_v51 = vrot.slane %v3644_v40, 9  ;;  %v4468_v58 = vmax.f32 %v3637_v34, %v11591_v2 }
 0x3b2   : > { %v3714_v8 = vcombine.high %v3231_v60, %v3231_v60  ;;  %v3721_v42 = vrot.slane %v3231_v60, %v16560_v27  ;;  %v3680_v6 = vcombine.high %v3229_v12, %v3229_v12  ;;  %v3687_v41 = vrot.slane %v3229_v12, %v16560_v27  ;;  %13755 = vmatpush3.bf16.msra.mxu1 %v15500_v13 }
 0x3b3   : > { %v11594_v39 = vrot.slane %v3646_v20, 9  ;;  %v4469_v16 = vmax.f32 %v3645_v63, %v11592_v15  ;;  %v4470_v45 = vmax.f32 %v3644_v40, %v11593_v51  ;;  %v4556_v47 = vmax.f32 %v4460_v35, %v4468_v58  ;;  %13756 = vmatprep.subr.bf16.mxu1 %v16875_v26  ;;  %v15502_v35 = vld [vmem:[%s19631_s1 + $0x278] sm:$0xff]  }
 0x3b4   : > { %v3728_v30 = vrot.slane %v3714_v8, %v16560_v27  ;;  %v3729_v1 = vcombine.high %v3721_v42, %v3721_v42  ;;  %v11609_v46 = vrot.slane %v3721_v42, 9  ;;  %v3694_v21 = vrot.slane %v3680_v6, %v16560_v27 }
 0x3b5   : > { %v4471_v3 = vmax.f32 %v3646_v20, %v11594_v39  ;;  %v4557_v31 = vmax.f32 %v16860_v44, %v4469_v16  ;;  %v4558_v55 = vmax.f32 %v16884_v53, %v4470_v45  ;;  %v4811_v50 = vrot.slane %v4556_v47, %v16550_v19 }
 0x3b6   : > { %v11610_v34 = vrot.slane %v3729_v1, 9  ;;  %v11611_v43 = vrot.slane %v3728_v30, 9  ;;  %v4486_v48 = vmax.f32 %v3721_v42, %v11609_v46  ;;  %v3695_v5 = vcombine.high %v3687_v41, %v3687_v41  ;;  %13757 = vmatpush3.bf16.msra.mxu1 %v15501_v29 }
 0x3b7   : > { %v4559_v62 = vmax.f32 %v16887_v32, %v4471_v3  ;;  %v4815_v7 = vrot.slane %v4557_v31, %v16550_v19  ;;  %v4819_v13 = vrot.slane %v4558_v55, %v16550_v19  ;;  %v4830_v44 = vsel %vm4629_vm3, %v4811_v50, %v4829_v59  ;;  %13758 = vmatprep.subr.bf16.mxu1 %v16875_v26  ;;  %v5220_v31 = vld [vmem:[#allocation2 + $0x19] sm:$0xff] }
 0x3b8   : > { %v4487_v53 = vmax.f32 %v3729_v1, %v11610_v34  ;;  %v4488_v40 = vmax.f32 %v3728_v30, %v11611_v43  ;;  %v4566_v63 = vmax.f32 %v16912_v57, %v4486_v48  ;;  %v3696_v2 = vcombine.high %v3694_v21, %v3694_v21  ;;  %v5219_v48 = vld [vmem:[#allocation2 + $0x11] sm:$0xff] }
 0x3b9   : > { %v4823_v60 = vrot.slane %v4559_v62, %v16550_v19  ;;  %v4831_v12 = vsel %vm4631_vm4, %v4815_v7, %v4830_v44  ;;  %v11602_v20 = vrot.slane %v3687_v41, 9  ;;  %v11603_v15 = vrot.slane %v3695_v5, 9 }
 0x3ba   : > { %v11600_v32 = vrot.slane %v16855_v25, 9  ;;  %v4832_v51 = vsel %vm4633_vm5, %v4819_v13, %v4831_v12  ;;  %v11604_v58 = vrot.slane %v3696_v2, 9  ;;  %v3730_v8 = vcombine.high %v3232_v9, %v3232_v9  ;;  %13759 = vmatpush3.bf16.msra.mxu1 %v15502_v35 }
 0x3bb   : > { %v4833_v59 = vsel %vm4635_vm6, %v4823_v60, %v4832_v51  ;;  %v4479_v42 = vmax.f32 %v3687_v41, %v11602_v20  ;;  %v4480_v6 = vmax.f32 %v3695_v5, %v11603_v15  ;;  %v16954_v57 = vrot.slane %v3232_v9, %v16560_v27  ;;  %13780 = vmatprep.subr.bf16.mxu1 %v16875_v26 }
 0x3bc   : > { %v4834_v29 = vsel %vm4637_vm7, %v16898_v0, %v4833_v59  ;;  %v4481_v39 = vmax.f32 %v3696_v2, %v11604_v58  ;;  %v16960_v16 = vrot.slane %v3730_v8, %v16560_v27  ;;  %v3230_v45 = vmax.f32 %v3194_v10, 0.0 }
 0x3bd   : > { %v4475_v47 = vmax.f32 %v16852_v24, %v11598_v33  ;;  %4836 = vst [vmem:[#allocation2 + $0x33] sm:$0xff] %v4834_v29  ;;  %v4567_v41 = vmax.f32 %v4479_v42, %v4487_v53  ;;  %v4568_v30 = vmax.f32 %v4480_v6, %v4488_v40  ;;  %v16967_v9 = vcombine.high %v16954_v57, %v16954_v57 }
 0x3be   : > { %v4476_v0 = vmax.f32 %v16871_v37, %v11599_v14  ;;  %v4561_v1 = vmax.f32 %v16890_v36, %v4481_v39  ;;  %v3746_v10 = vcombine.high %v16960_v16, %v16960_v16  ;;  %v3697_v46 = vcombine.high %v3230_v45, %v3230_v45 }
 0x3bf   : > { %v4477_v21 = vmax.f32 %v16855_v25, %v11600_v32  ;;  %v16977_v24 = vrot.slane %v4566_v63, %v16550_v19  ;;  %v11612_v33 = vrot.slane %v16954_v57, 9  ;;  %v11614_v3 = vrot.slane %v16960_v16, 9 }
 0x3c0   : > { %v16982_v55 = vrot.slane %v4567_v41, %v16550_v19  ;;  %v16985_v37 = vrot.slane %v4568_v30, %v16550_v19  ;;  %v11615_v36 = vrot.slane %v3746_v10, 9  ;;  %v3704_v14 = vrot.slane %v3230_v45, %v16560_v27 }
 0x3c1   : > { %v4848_v50 = vrot.slane %v4561_v1, %v16550_v19  ;;  %v11613_v25 = vrot.slane %v16967_v9, 9  ;;  %v3711_v34 = vrot.slane %v3697_v46, %v16560_v27  ;;  %v3199_v43 = vadd.f32 %v16690_v56, %v16556_v23 }
 0x3c2   : > { %v3712_v5 = vcombine.high %v3704_v14, %v3704_v14  ;;  %v11605_v35 = vrot.slane %v3704_v14, 9  ;;  %v4474_v62 = vmax.f32 %v16857_v52, %v11597_v38  ;;  %v5228_v7 = vpack.c.bf16 %v5220_v31, %v5219_v48 }
 0x3c3   : > { %v3713_v13 = vcombine.high %v3711_v34, %v3711_v34  ;;  %v11607_v44 = vrot.slane %v3711_v34, 9  ;;  %v3235_v53 = vmax.f32 %v3199_v43, 0.0  ;;  %v3197_v40 = vadd.f32 %v16556_v23, %v16695_v61 }
 0x3c4   : > { %v11606_v63 = vrot.slane %v3712_v5, 9  ;;  %v4482_v2 = vmax.f32 %v3704_v14, %v11605_v35  ;;  %v16998_v60 = vmax.f32 %v3746_v10, %v11615_v36  ;;  %13729 = vmatmul.mubr.bf16.gmra.mrb[4].mxu1 %v5228_v7  ;;  %v3200_v56 = vadd.f32 %v16707_v11, %v16556_v23 }
 0x3c5   : > { %v11608_v12 = vrot.slane %v3713_v13, 9  ;;  %v4484_v20 = vmax.f32 %v3711_v34, %v11607_v44  ;;  %v3781_v15 = vcombine.high %v3235_v53, %v3235_v53  ;;  %v3788_v52 = vrot.slane %v3235_v53, %v16560_v27  ;;  %13732 = vmatprep.mubr.msk.bf16.mxu1 %vm15850_vm0, %v16875_v26 }
 0x3c6   : > { %v4483_v38 = vmax.f32 %v3712_v5, %v11606_v63  ;;  %v4562_v32 = vmax.f32 %v4474_v62, %v4482_v2  ;;  %v3233_v51 = vmax.f32 %v3197_v40, 0.0  ;;  %v3198_v61 = vadd.f32 %v16556_v23, %v16713_v22 }
 0x3c7   : > { %v4485_v58 = vmax.f32 %v3713_v13, %v11608_v12  ;;  %v4564_v8 = vmax.f32 %v4476_v0, %v4484_v20  ;;  %v3795_v59 = vrot.slane %v3781_v15, %v16560_v27  ;;  %v3796_v42 = vcombine.high %v3788_v52, %v3788_v52 }
 0x3c8   : > { %v4563_v11 = vmax.f32 %v4475_v47, %v4483_v38  ;;  %v4852_v6 = vrot.slane %v4562_v32, %v16550_v19  ;;  %v11623_v29 = vrot.slane %v3788_v52, 9  ;;  %v3747_v39 = vcombine.high %v3233_v51, %v3233_v51 }
 0x3c9   : > { %v4565_v45 = vmax.f32 %v4477_v21, %v4485_v58  ;;  %v3797_v41 = vcombine.high %v3795_v59, %v3795_v59  ;;  %v11624_v30 = vrot.slane %v3796_v42, 9  ;;  %v3236_v1 = vmax.f32 %v3200_v56, 0.0 }
 0x3ca   : > { %v4856_v10 = vrot.slane %v4563_v11, %v16550_v19  ;;  %v4877_v46 = vsel %vm4625_vm1, %v4852_v6, %v4848_v50  ;;  %v11625_v31 = vrot.slane %v3795_v59, 9  ;;  %v4500_v22 = vmax.f32 %v3788_v52, %v11623_v29 }
 0x3cb   : > { %v4860_v0 = vrot.slane %v4564_v8, %v16550_v19  ;;  %v4864_v36 = vrot.slane %v4565_v45, %v16550_v19  ;;  %v11626_v14 = vrot.slane %v3797_v41, 9  ;;  %v3754_v47 = vrot.slane %v3233_v51, %v16560_v27 }
 0x3cc   : > { %v4878_v34 = vsel %vm4627_vm2, %v4856_v10, %v4877_v46  ;;  %v4501_v43 = vmax.f32 %v3796_v42, %v11624_v30  ;;  %v4572_v21 = vmax.f32 %v16998_v60, %v4500_v22  ;;  %v3761_v48 = vrot.slane %v3747_v39, %v16560_v27 }
 0x3cd   : > { %v4879_v5 = vsel %vm4629_vm3, %v4860_v0, %v4878_v34  ;;  %v4502_v35 = vmax.f32 %v3795_v59, %v11625_v31  ;;  %v3762_v50 = vcombine.high %v3754_v47, %v3754_v47  ;;  %v11616_v62 = vrot.slane %v3754_v47, 9 }
 0x3ce   : > { %v4880_v7 = vsel %vm4631_vm4, %v4864_v36, %v4879_v5  ;;  %v4503_v13 = vmax.f32 %v3797_v41, %v11626_v14  ;;  %v3763_v44 = vcombine.high %v3761_v48, %v3761_v48  ;;  %v11618_v53 = vrot.slane %v3761_v48, 9 }
 0x3cf   : > { %v4881_v40 = vsel %vm4633_vm5, %v16977_v24, %v4880_v7  ;;  %v11617_v63 = vrot.slane %v3762_v50, 9  ;;  %v4493_v2 = vmax.f32 %v3754_v47, %v11616_v62  ;;  %v3798_v56 = vcombine.high %v3236_v1, %v3236_v1 }
 0x3d0   : > { %v4882_v60 = vsel %vm4635_vm6, %v16982_v55, %v4881_v40  ;;  %v4495_v12 = vmax.f32 %v3761_v48, %v11618_v53  ;;  %v3805_v20 = vrot.slane %v3236_v1, %v16560_v27  ;;  %v11619_v15 = vrot.slane %v3763_v44, 9 }
 0x3d1   : > { %v4883_v52 = vsel %vm4637_vm7, %v16985_v37, %v4882_v60  ;;  %v4494_v38 = vmax.f32 %v3762_v50, %v11617_v63  ;;  %v4573_v32 = vmax.f32 %v4493_v2, %v4501_v43  ;;  %v17027_v51 = vrot.slane %v3798_v56, %v16560_v27 }
 0x3d2   : > { %4885 = vst [vmem:[#allocation2 + $0x3d] sm:$0xff] %v4883_v52  ;;  %v4575_v24 = vmax.f32 %v4495_v12, %v4503_v13  ;;  %v11627_v58 = vrot.slane %v3805_v20, 9  ;;  %v4496_v8 = vmax.f32 %v3763_v44, %v11619_v15  ;;  %v3234_v59 = vmax.f32 %v3198_v61, 0.0 }
 0x3d3   : > { %v4489_v55 = vmax.f32 %v16954_v57, %v11612_v33  ;;  %v4491_v42 = vmax.f32 %v16960_v16, %v11614_v3  ;;  %v4574_v11 = vmax.f32 %v4494_v38, %v4502_v35  ;;  %v3813_v37 = vcombine.high %v17027_v51, %v17027_v51 }
 0x3d4   : > { %v4490_v6 = vmax.f32 %v16967_v9, %v11613_v25  ;;  %v4504_v29 = vmax.f32 %v3805_v20, %v11627_v58  ;;  %v3764_v39 = vcombine.high %v3234_v59, %v3234_v59  ;;  %v3771_v61 = vrot.slane %v3234_v59, %v16560_v27  ;;  %v5221_v25 = vld [vmem:[#allocation2 + $0x21] sm:$0xff] }
 0x3d5   : > { %v4909_v45 = vrot.slane %v4572_v21, %v16550_v19  ;;  %v17043_v57 = vrot.slane %v4573_v32, %v16550_v19  ;;  %v11629_v33 = vrot.slane %v3813_v37, 9  ;;  %v3203_v16 = vadd.f32 %v16733_v17, %v16556_v23 }
 0x3d6   : > { %v4576_v3 = vmax.f32 %v4496_v8, %v4504_v29  ;;  %v3778_v41 = vrot.slane %v3764_v39, %v16560_v27  ;;  %v3779_v30 = vcombine.high %v3771_v61, %v3771_v61  ;;  %v3201_v9 = vadd.f32 %v16556_v23, %v16738_v49 }
 0x3d7   : > { %v17051_v1 = vrot.slane %v4575_v24, %v16550_v19  ;;  %v3239_v10 = vmax.f32 %v3203_v16, 0.0  ;;  %v3204_v46 = vadd.f32 %v16740_v54, %v16556_v23  ;;  %v5229_v31 = vpack.c.bf16 %v16867_v28, %v5221_v25 }
 0x3d8   : > { %v4917_v22 = vrot.slane %v4574_v11, %v16550_v19  ;;  %v3780_v17 = vcombine.high %v3778_v41, %v3778_v41  ;;  %v11620_v0 = vrot.slane %v3779_v30, 9  ;;  %v11621_v36 = vrot.slane %v3778_v41, 9 }
 0x3d9   : > { %v3848_v14 = vcombine.high %v3239_v10, %v3239_v10  ;;  %v3855_v47 = vrot.slane %v3239_v10, %v16560_v27  ;;  %v17058_v34 = vmax.f32 %v3813_v37, %v11629_v33  ;;  %v3237_v49 = vmax.f32 %v3201_v9, 0.0  ;;  %13733 = vmatmul.mubr.bf16.gmra.mrb[8].mxu1 %v5229_v31 }
 0x3da   : > { %v11622_v43 = vrot.slane %v3780_v17, 9  ;;  %v4497_v21 = vmax.f32 %v3779_v30, %v11620_v0  ;;  %v4498_v48 = vmax.f32 %v3778_v41, %v11621_v36  ;;  %v3240_v5 = vmax.f32 %v3204_v46, 0.0  ;;  %13736 = vmatprep.mubr.msk.bf16.mxu1 %vm15850_vm0, %v16875_v26 }
 0x3db   : > { %v3862_v54 = vrot.slane %v3848_v14, %v16560_v27  ;;  %v3863_v28 = vcombine.high %v3855_v47, %v3855_v47  ;;  %v11637_v35 = vrot.slane %v3855_v47, 9  ;;  %v3814_v50 = vcombine.high %v3237_v49, %v3237_v49 }
 0x3dc   : > { %v4499_v62 = vmax.f32 %v3780_v17, %v11622_v43  ;;  %v4569_v7 = vmax.f32 %v4489_v55, %v4497_v21  ;;  %v4570_v13 = vmax.f32 %v4490_v6, %v4498_v48  ;;  %v3821_v44 = vrot.slane %v3237_v49, %v16560_v27 }
 0x3dd   : > { %v3864_v53 = vcombine.high %v3862_v54, %v3862_v54  ;;  %v11638_v40 = vrot.slane %v3863_v28, 9  ;;  %v11639_v63 = vrot.slane %v3862_v54, 9  ;;  %v17064_v2 = vmax.f32 %v3855_v47, %v11637_v35  ;;  %v5224_v47 = vld [vmem:[#allocation2 + $0x39] sm:$0xff] }
 0x3de   : > { %v4571_v56 = vmax.f32 %v4491_v42, %v4499_v62  ;;  %v4897_v60 = vrot.slane %v4569_v7, %v16550_v19  ;;  %v4901_v12 = vrot.slane %v4570_v13, %v16550_v19  ;;  %v3828_v20 = vrot.slane %v3814_v50, %v16560_v27 }
 0x3df   : > { %v4925_v15 = vrot.slane %v4576_v3, %v16550_v19  ;;  %v11640_v52 = vrot.slane %v3864_v53, 9  ;;  %v17070_v38 = vmax.f32 %v3863_v28, %v11638_v40  ;;  %v4578_v32 = vmax.f32 %v17058_v34, %v17064_v2 }
 0x3e0   : > { %v4905_v24 = vrot.slane %v4571_v56, %v16550_v19  ;;  %v4926_v58 = vsel %vm4625_vm1, %v4901_v12, %v4897_v60  ;;  %v3829_v8 = vcombine.high %v3821_v44, %v3821_v44  ;;  %v3830_v59 = vcombine.high %v3828_v20, %v3828_v20 }
 0x3e1   : > { %v17076_v55 = vmax.f32 %v3862_v54, %v11639_v63  ;;  %v17078_v42 = vmax.f32 %v3864_v53, %v11640_v52  ;;  %v11630_v11 = vrot.slane %v3821_v44, 9  ;;  %v11632_v37 = vrot.slane %v3828_v20, 9 }
 0x3e2   : > { %v4927_v6 = vsel %vm4627_vm2, %v4905_v24, %v4926_v58  ;;  %v11631_v29 = vrot.slane %v3829_v8, 9  ;;  %v11633_v39 = vrot.slane %v3830_v59, 9  ;;  %v3865_v61 = vcombine.high %v3240_v5, %v3240_v5 }
 0x3e3   : > { %v4928_v33 = vsel %vm4629_vm3, %v4909_v45, %v4927_v6  ;;  %v4507_v16 = vmax.f32 %v3821_v44, %v11630_v11  ;;  %v4509_v3 = vmax.f32 %v3828_v20, %v11632_v37  ;;  %v3872_v41 = vrot.slane %v3240_v5, %v16560_v27  ;;  %v15503_v11 = vld [vmem:[%s19631_s1 + $0x2c0] sm:$0xff]  }
 0x3e4   : > { %v4929_v30 = vsel %vm4631_vm4, %v17043_v57, %v4928_v33  ;;  %v4508_v9 = vmax.f32 %v3829_v8, %v11631_v29  ;;  %v3879_v25 = vrot.slane %v3865_v61, %v16560_v27  ;;  %v3202_v10 = vadd.f32 %v16556_v23, %v16746_v4 }
 0x3e5   : > { %v4930_v46 = vsel %vm4633_vm5, %v4917_v22, %v4929_v30  ;;  %v4579_v31 = vmax.f32 %v4507_v16, %v17070_v38  ;;  %v4581_v17 = vmax.f32 %v4509_v3, %v17078_v42  ;;  %v3880_v45 = vcombine.high %v3872_v41, %v3872_v41  ;;  %v5223_v22 = vld [vmem:[#allocation2 + $0x31] sm:$0xff]  ;;  %v15504_v16 = vld [vmem:[%s19631_s1 + $0x2c8] sm:$0xff]  }
 0x3e6   : > { %v4931_v0 = vsel %vm4635_vm6, %v17051_v1, %v4930_v46  ;;  %v4580_v36 = vmax.f32 %v4508_v9, %v17076_v55  ;;  %v11641_v14 = vrot.slane %v3872_v41, 9  ;;  %v4510_v57 = vmax.f32 %v3830_v59, %v11633_v39  ;;  %v5186_v59 = vld [vmem:[#allocation2 + $0x8] sm:$0xff]  ;;  %v5188_v30 = vld [vmem:[#allocation2 + $0x18] sm:$0xff]  ;;  %v15505_v9 = vld [vmem:[%s19631_s1 + $0x2d0] sm:$0xff]  }
 0x3e7   : > { %v4932_v49 = vsel %vm4637_vm7, %v4925_v15, %v4931_v0  ;;  %v11642_v43 = vrot.slane %v3880_v45, 9  ;;  %v3238_v4 = vmax.f32 %v3202_v10, 0.0  ;;  %v5230_v21 = vpack.c.bf16 %v5224_v47, %v5223_v22  ;;  %v15506_v10 = vld [vmem:[%s19631_s1 + $0x2d8] sm:$0xff]   ;;  %v5190_v46 = vld [vmem:[#allocation2 + $0x28] sm:$0xff] }
 0x3e8   : > { %4934 = vst [vmem:[#allocation2 + $0x47] sm:$0xff] %v4932_v49  ;;  %v4518_v23 = vmax.f32 %v3872_v41, %v11641_v14  ;;  %v11643_v48 = vrot.slane %v3879_v25, 9  ;;  %v11628_v7 = vrot.slane %v17027_v51, 9  ;;  %v4950_v58 = vrot.slane %v4578_v32, %v16550_v19  ;;  %v15508_v0 = vld [vmem:[%s19631_s1 + $0x2e8] sm:$0xff]   ;;  %v5191_v14 = vld [vmem:[#allocation2 + $0x30] sm:$0xff]  ;;  %v15510_v49 = vld [vmem:[%s19631_s1 + $0x2f8] sm:$0xff]  }
 0x3e9   : > { %v3831_v54 = vcombine.high %v3238_v4, %v3238_v4  ;;  %v3838_v28 = vrot.slane %v3238_v4, %v16560_v27  ;;  %13737 = vmatmul.mubr.bf16.gmra.mrb[12].mxu1 %v5230_v21  ;;  %v4519_v1 = vmax.f32 %v3880_v45, %v11642_v43  ;;  %v4954_v55 = vrot.slane %v4579_v31, %v16550_v19  ;;  %v5189_v31 = vld [vmem:[#allocation2 + $0x20] sm:$0xff]  ;;  %v5492_v21 = vld [vmem:[#allocation2 + $0xa] sm:$0xff] }
 0x3ea   : > { %v4582_v5 = vmax.f32 %v4510_v57, %v4518_v23  ;;  %13740 = vmatprep.mubr.msk.bf16.mxu1 %vm15850_vm0, %v16875_v26  ;;  %v4520_v13 = vmax.f32 %v3879_v25, %v11643_v48  ;;  %v4505_v52 = vmax.f32 %v17027_v51, %v11628_v7  ;;  %v4958_v42 = vrot.slane %v4580_v36, %v16550_v19  ;;  %v5192_v36 = vld [vmem:[#allocation2 + $0x38] sm:$0xff]  ;;  %v15509_v57 = vld [vmem:[%s19631_s1 + $0x2f0] sm:$0xff]   ;;  %v5491_v22 = vld [vmem:[#allocation2 + $0x2] sm:$0xff] }
 0x3eb   : > { %v3845_v35 = vrot.slane %v3831_v54, %v16560_v27  ;;  %v3846_v50 = vcombine.high %v3838_v28, %v3838_v28  ;;  %v11634_v62 = vrot.slane %v3838_v28, 9  ;;  %v4962_v37 = vrot.slane %v4581_v17, %v16550_v19  ;;  %v15507_v17 = vld [vmem:[%s19631_s1 + $0x2e0] sm:$0xff]   ;;  %v15512_v54 = vld [vmem:[%s19631_s1 + $0x308] sm:$0xff]  }
 0x3ec   : > { %v5195_v34 = vpack.c.bf16 %v5186_v59, %v16875_v26  ;;  %v4966_v2 = vrot.slane %v4582_v5, %v16550_v19  ;;  %v5197_v45 = vpack.c.bf16 %v5190_v46, %v5189_v31  ;;  %v5198_v47 = vpack.c.bf16 %v5192_v36, %v5191_v14  ;;  %v15511_v48 = vld [vmem:[%s19631_s1 + $0x300] sm:$0xff]   ;;  %v15530_v31 = vld [vmem:[%s19631_s1 + $0x398] sm:$0xff]   ;;  %v15532_v14 = vld [vmem:[%s19631_s1 + $0x3a8] sm:$0xff]  }
 0x3ed   : > { %v3847_v44 = vcombine.high %v3845_v35, %v3845_v35  ;;  %v11635_v53 = vrot.slane %v3846_v50, 9  ;;  %v4511_v40 = vmax.f32 %v3838_v28, %v11634_v62  ;;  %v5501_v5 = vpack.c.bf16 %v5492_v21, %v5491_v22  ;;  %v5494_v28 = vld [vmem:[#allocation2 + $0x1a] sm:$0xff]  ;;  %v15513_v35 = vld [vmem:[%s19631_s1 + $0x310] sm:$0xff]   ;;  %v5495_v7 = vld [vmem:[#allocation2 + $0x22] sm:$0xff] }
 0x3ee   : > { %v15514_v62 = vld [vmem:[%s19631_s1 + $0x318] sm:$0xff]   ;;  %v5665_v59 = vpack.c.bf16 %v5495_v7, %v5494_v28 }
 0x3ef   : > { %v5225_v63 = vld [vmem:[#allocation2 + $0x41] sm:$0xff]  ;;  %v5226_v56 = vld [vmem:[#allocation2 + $0x49] sm:$0xff]  ;;  %v11636_v60 = vrot.slane %v3847_v44, 9  ;;  %v4512_v12 = vmax.f32 %v3846_v50, %v11635_v53  ;;  %v4583_v20 = vmax.f32 %v4511_v40, %v4519_v1  ;;  %v5493_v1 = vld [vmem:[#allocation2 + $0x12] sm:$0xff] }
 0x3f0   : > { %v5231_v15 = vpack.c.bf16 %v5226_v56, %v5225_v63  ;;  %v5193_v43 = vld [vmem:[#allocation2 + $0x40] sm:$0xff]  ;;  %v5194_v23 = vld [vmem:[#allocation2 + $0x48] sm:$0xff]  ;;  %v5502_v50 = vpack.c.bf16 %v5494_v28, %v5493_v1  ;;  %v5497_v56 = vld [vmem:[#allocation2 + $0x32] sm:$0xff] }
 0x3f1   : > { %v4513_v27 = vmax.f32 %v3847_v44, %v11636_v60  ;;  %v4584_v38 = vmax.f32 %v4512_v12, %v4520_v13  ;;  %v4970_v29 = vrot.slane %v4583_v20, %v16550_v19  ;;  %v5199_v4 = vpack.c.bf16 %v5194_v23, %v5193_v43  ;;  %v5496_v13 = vld [vmem:[#allocation2 + $0x2a] sm:$0xff]  ;;  %v15515_v44 = vld [vmem:[%s19631_s1 + $0x320] sm:$0xff]   ;;  %v15518_v20 = vld [vmem:[%s19631_s1 + $0x338] sm:$0xff]  }
 0x3f2   : > { %13741 = vmatmul.mubr.bf16.gmra.mrb[16].mxu1 %v5231_v15  ;;  %v5503_v53 = vpack.c.bf16 %v5496_v13, %v5495_v7  ;;  %v15516_v40 = vld [vmem:[%s19631_s1 + $0x328] sm:$0xff]   ;;  %v5498_v63 = vld [vmem:[#allocation2 + $0x3a] sm:$0xff]  ;;  %v15517_v60 = vld [vmem:[%s19631_s1 + $0x330] sm:$0xff]  }
 0x3f3   : > { %v4577_v24 = vmax.f32 %v4505_v52, %v4513_v27  ;;  %13760 = vmatprep.mubr.msk.bf16.mxu1 %vm15850_vm0, %v16875_v26  ;;  %v4974_v61 = vrot.slane %v4584_v38, %v16550_v19  ;;  %v5504_v12 = vpack.c.bf16 %v5498_v63, %v5497_v56  ;;  %v5499_v52 = vld [vmem:[#allocation2 + $0x42] sm:$0xff]  ;;  %v15534_v23 = vld [vmem:[%s19631_s1 + $0x3b8] sm:$0xff]   ;;  %v5980_v28 = vld [vmem:[#allocation2 + $0xc] sm:$0xff] }
 0x3f4   : > { %v15519_v38 = vld [vmem:[%s19631_s1 + $0x340] sm:$0xff]   ;;  %v15536_v7 = vld [vmem:[%s19631_s1 + $0x3c8] sm:$0xff]  }
 0x3f5   : > { %v4946_v8 = vrot.slane %v4577_v24, %v16550_v19  ;;  %v5187_v19 = vld [vmem:[#allocation2 + $0x10] sm:$0xff]  ;;  %v5664_v24 = vpack.c.bf16 %v5493_v1, %v5492_v21 }
 0x3f6   : > { %v5196_v25 = vpack.c.bf16 %v5188_v30, %v5187_v19  ;;  %v15528_v19 = vld [vmem:[%s19631_s1 + $0x388] sm:$0xff]  }
 0x3f7   : > { %v4975_v51 = vsel %vm4625_vm1, %v4950_v58, %v4946_v8  ;;  %v15520_v58 = vld [vmem:[%s19631_s1 + $0x348] sm:$0xff]   ;;  %v15521_v8 = vld [vmem:[%s19631_s1 + $0x350] sm:$0xff]  }
 0x3f8   : > { %v4976_v6 = vsel %vm4627_vm2, %v4954_v55, %v4975_v51  ;;  %v15522_v55 = vld [vmem:[%s19631_s1 + $0x358] sm:$0xff]   ;;  %v5666_v51 = vpack.c.bf16 %v5497_v56, %v5496_v13  ;;  %v17312_v13 = vld [vmem:[#allocation2 + $0x24] sm:$0xff]  ;;  %v5984_v56 = vld [vmem:[#allocation2 + $0x2c] sm:$0xff] }
 0x3f9   : > { %v4977_v32 = vsel %vm4629_vm3, %v4958_v42, %v4976_v6  ;;  %v15523_v42 = vld [vmem:[%s19631_s1 + $0x360] sm:$0xff]   ;;  %v5667_v6 = vpack.c.bf16 %v5499_v52, %v5498_v63  ;;  %v15538_v63 = vld [vmem:[%s19631_s1 + $0x3d8] sm:$0xff]  }
 0x3fa   : > { %v4978_v39 = vsel %vm4631_vm4, %v4962_v37, %v4977_v32  ;;  %13761 = vmatmul.mubr.bf16.vlgmr.msra.gmra.mrb[20].mxu1 %v5195_v34  ;;  %v15525_v37 = vld [vmem:[%s19631_s1 + $0x370] sm:$0xff]   ;;  %v15526_v34 = vld [vmem:[%s19631_s1 + $0x378] sm:$0xff]  }
 0x3fb   : > { %v4979_v33 = vsel %vm4633_vm5, %v4966_v2, %v4978_v39  ;;  %13781 = vmatpush3.bf16.msra.mxu1 %v15503_v11  ;;  %13764 = vmatprep.mubr.msk.bf16.mxu1 %vm15850_vm0, %v16875_v26  ;;  %v15524_v11 = vld [vmem:[%s19631_s1 + $0x368] sm:$0xff]  }
 0x3fc   : > { %v4980_v3 = vsel %vm4635_vm6, %v4970_v29, %v4979_v33  ;;  %13782 = vmatprep.subr.bf16.mxu1 %v16875_v26  ;;  %v5818_v29 = vld [vmem:[#allocation2 + $0x13] sm:$0xff]  ;;  %v5817_v39 = vld [vmem:[#allocation2 + $0xb] sm:$0xff] }
 0x3fd   : > { %v4981_v41 = vsel %vm4637_vm7, %v4974_v61, %v4980_v3  ;;  %v15527_v61 = vld [vmem:[%s19631_s1 + $0x380] sm:$0xff]  }
 0x3fe   : > { %4983 = vst [vmem:[#allocation2 + $0x51] sm:$0xff] %v4981_v41 }
 0x3ff   : > { %13783 = vmatpush3.bf16.msra.mxu1 %v15504_v16  ;;  %v5827_v16 = vpack.c.bf16 %v5818_v29, %v5817_v39 }
 0x400   : > { %13784 = vmatprep.subr.bf16.mxu1 %v16875_v26 }
 0x402   : > { %13765 = vmatmul.mubr.bf16.gmra.mrb[24].mxu1 %v5196_v25  ;;  %v5819_v25 = vld [vmem:[#allocation2 + $0x1b] sm:$0xff] }
 0x403   : > { %13785 = vmatpush3.bf16.msra.mxu1 %v15505_v9  ;;  %13768 = vmatprep.mubr.msk.bf16.mxu1 %vm15850_vm0, %v16875_v26  ;;  %v5820_v9 = vld [vmem:[#allocation2 + $0x23] sm:$0xff] }
 0x404   : > { %13786 = vmatprep.subr.bf16.mxu1 %v16875_v26  ;;  %v5828_v46 = vpack.c.bf16 %v5820_v9, %v5819_v25  ;;  %v6154_v25 = vpack.c.bf16 %v5984_v56, %v17312_v13 }
 0x405   : > { %v5500_v15 = vld [vmem:[#allocation2 + $0x4a] sm:$0xff]  ;;  %v5663_v2 = vld [vmem:[#allocation2 + $0x52] sm:$0xff] }
 0x406   : > { %v5505_v27 = vpack.c.bf16 %v5500_v15, %v5499_v52  ;;  %v5668_v32 = vpack.c.bf16 %v5663_v2, %v5500_v15  ;;  %v5826_v22 = vld [vmem:[#allocation2 + $0x53] sm:$0xff]  ;;  %v15540_v52 = vld [vmem:[%s19631_s1 + $0x3e8] sm:$0xff]  }
 0x407   : > { %13787 = vmatpush3.bf16.msra.mxu1 %v15506_v10  ;;  %v15529_v10 = vld [vmem:[%s19631_s1 + $0x390] sm:$0xff]  }
 0x408   : > { %13788 = vmatprep.subr.bf16.mxu1 %v16875_v26 }
 0x40a   : > { %13769 = vmatmul.mubr.bf16.gmra.mrb[28].mxu1 %v5197_v45  ;;  %v5821_v45 = vld [vmem:[#allocation2 + $0x2b] sm:$0xff] }
 0x40b   : > { %13789 = vmatpush3.bf16.msra.mxu1 %v15507_v17  ;;  %13772 = vmatprep.mubr.msk.bf16.mxu1 %vm15850_vm0, %v16875_v26  ;;  %v5822_v17 = vld [vmem:[#allocation2 + $0x33] sm:$0xff] }
 0x40c   : > { %13790 = vmatprep.subr.bf16.mxu1 %v16875_v26  ;;  %v5829_v36 = vpack.c.bf16 %v5822_v17, %v5821_v45 }
 0x40f   : > { %13791 = vmatpush3.bf16.msra.mxu1 %v15508_v0  ;;  %v15531_v0 = vld [vmem:[%s19631_s1 + $0x3a0] sm:$0xff]  }
 0x410   : > { %13792 = vmatprep.subr.bf16.mxu1 %v16875_v26 }
 0x412   : > { %13773 = vmatmul.mubr.bf16.gmra.mrb[32].mxu1 %v5198_v47  ;;  %v5823_v47 = vld [vmem:[#allocation2 + $0x3b] sm:$0xff] }
 0x413   : > { %13776 = vmatprep.mubr.msk.bf16.mxu1 %vm15850_vm0, %v16875_v26  ;;  %13793 = vmatpush3.bf16.msra.mxu1 %v15509_v57  ;;  %v5824_v57 = vld [vmem:[#allocation2 + $0x43] sm:$0xff] }
 0x414   : > { %13794 = vmatprep.subr.bf16.mxu1 %v16875_v26  ;;  %v5830_v43 = vpack.c.bf16 %v5824_v57, %v5823_v47 }
 0x417   : > { %13795 = vmatpush3.bf16.msra.mxu1 %v15510_v49  ;;  %v15533_v49 = vld [vmem:[%s19631_s1 + $0x3b0] sm:$0xff]  }
 0x418   : > { %13816 = vmatprep.subr.bf16.mxu1 %v16875_v26 }
 0x41a   : > { %13777 = vmatmul.mubr.bf16.gmra.mrb[36].mxu1 %v5199_v4  ;;  %v5825_v4 = vld [vmem:[#allocation2 + $0x4b] sm:$0xff] }
 0x41b   : > { %13796 = vmatprep.mubr.msk.bf16.mxu1 %vm15850_vm0, %v16875_v26  ;;  %v5831_v21 = vpack.c.bf16 %v5826_v22, %v5825_v4 }
 0x422   : > { %13797 = vmatmul.mubr.bf16.vlgmr.msra.gmra.mrb[40].mxu1 %v5501_v5  ;;  %v17296_v5 = vld [vmem:[#allocation2 + $0x14] sm:$0xff] }
 0x423   : > { %13817 = vmatpush3.bf16.msra.mxu1 %v15511_v48  ;;  %13800 = vmatprep.mubr.msk.bf16.mxu1 %vm15850_vm0, %v16875_v26  ;;  %v17291_v48 = vld [vmem:[#allocation2] sm:$0xff] }
 0x424   : > { %13818 = vmatprep.subr.bf16.mxu1 %v16875_v26 }
 0x427   : > { %13819 = vmatpush3.bf16.msra.mxu1 %v15512_v54 }
 0x428   : > { %13820 = vmatprep.subr.bf16.mxu1 %v16875_v26 }
 0x42a   : > { %13801 = vmatmul.mubr.bf16.gmra.mrb[44].mxu1 %v5502_v50 }
 0x42b   : > { %13821 = vmatpush3.bf16.msra.mxu1 %v15513_v35  ;;  %13804 = vmatprep.mubr.msk.bf16.mxu1 %vm15850_vm0, %v16875_v26  ;;  %v5990_v35 = vpack.c.bf16 %v17296_v5, %v5980_v28  ;;  %v6152_v28 = vld [vmem:[#allocation2 + $0x5c] sm:$0xff] }
 0x42c   : > { %13822 = vmatprep.subr.bf16.mxu1 %v16875_v26 }
 0x42f   : > { %13823 = vmatpush3.bf16.msra.mxu1 %v15514_v62 }
 0x430   : > { %13824 = vmatprep.subr.bf16.mxu1 %v16875_v26 }
 0x432   : > { %13805 = vmatmul.mubr.bf16.gmra.mrb[48].mxu1 %v5503_v53  ;;  %v15537_v53 = vld [vmem:[%s19631_s1 + $0x3d0] sm:$0xff]  }
 0x433   : > { %13825 = vmatpush3.bf16.msra.mxu1 %v15515_v44  ;;  %13808 = vmatprep.mubr.msk.bf16.mxu1 %vm15850_vm0, %v16875_v26  ;;  %v5982_v44 = vld [vmem:[#allocation2 + $0x1c] sm:$0xff] }
 0x434   : > { %13826 = vmatprep.subr.bf16.mxu1 %v16875_v26  ;;  %v6153_v39 = vpack.c.bf16 %v5982_v44, %v17296_v5  ;;  %v15550_v5 = vld [vmem:[%s19631_s1 + $0x438] sm:$0xff]  }
 0x437   : > { %13827 = vmatpush3.bf16.msra.mxu1 %v15516_v40  ;;  %v5991_v40 = vpack.c.bf16 %v17312_v13, %v5982_v44  ;;  %v6307_v44 = vld [vmem:[#allocation2 + $0x1d] sm:$0xff] }
 0x438   : > { %13828 = vmatprep.subr.bf16.mxu1 %v16875_v26 }
 0x43a   : > { %13809 = vmatmul.mubr.bf16.gmra.mrb[52].mxu1 %v5504_v12  ;;  %v15539_v12 = vld [vmem:[%s19631_s1 + $0x3e0] sm:$0xff]  }
 0x43b   : > { %13812 = vmatprep.mubr.msk.bf16.mxu1 %vm15850_vm0, %v16875_v26  ;;  %13829 = vmatpush3.bf16.msra.mxu1 %v15517_v60  ;;  %v17325_v60 = vld [vmem:[#allocation2 + $0x34] sm:$0xff] }
 0x43c   : > { %13830 = vmatprep.subr.bf16.mxu1 %v16875_v26 }
 0x43f   : > { %13831 = vmatpush3.bf16.msra.mxu1 %v15518_v20  ;;  %v5992_v20 = vpack.c.bf16 %v17325_v60, %v5984_v56  ;;  %v6306_v56 = vld [vmem:[#allocation2 + $0x15] sm:$0xff] }
 0x440   : > { %13852 = vmatprep.subr.bf16.mxu1 %v16875_v26 }
 0x442   : > { %13813 = vmatmul.mubr.bf16.gmra.mrb[56].mxu1 %v5505_v27 }
 0x443   : > { %13832 = vmatprep.mubr.msk.bf16.mxu1 %vm15850_vm0, %v16875_v26 }
 0x44a   : > { %13833 = vmatmul.mubr.bf16.vlgmr.msra.gmra.mrb[60].mxu1 %v5664_v24  ;;  %v17342_v24 = vld [vmem:[#allocation2 + $0x44] sm:$0xff] }
 0x44b   : > { %13853 = vmatpush3.bf16.msra.mxu1 %v15519_v38  ;;  %13836 = vmatprep.mubr.msk.bf16.mxu1 %vm15850_vm0, %v16875_v26 }
 0x44c   : > { %13854 = vmatprep.subr.bf16.mxu1 %v16875_v26 }
 0x44f   : > { %13855 = vmatpush3.bf16.msra.mxu1 %v15520_v58 }
 0x450   : > { %13856 = vmatprep.subr.bf16.mxu1 %v16875_v26 }
 0x452   : > { %13837 = vmatmul.mubr.bf16.gmra.mrb[64].mxu1 %v5665_v59  ;;  %v15541_v59 = vld [vmem:[%s19631_s1 + $0x3f0] sm:$0xff]  }
 0x453   : > { %13857 = vmatpush3.bf16.msra.mxu1 %v15521_v8  ;;  %13840 = vmatprep.mubr.msk.bf16.mxu1 %vm15850_vm0, %v16875_v26  ;;  %v5986_v8 = vld [vmem:[#allocation2 + $0x3c] sm:$0xff] }
 0x454   : > { %13858 = vmatprep.subr.bf16.mxu1 %v16875_v26  ;;  %v6155_v57 = vpack.c.bf16 %v5986_v8, %v17325_v60  ;;  %v15551_v60 = vld [vmem:[%s19631_s1 + $0x440] sm:$0xff]  }
 0x457   : > { %13859 = vmatpush3.bf16.msra.mxu1 %v15522_v55  ;;  %v5993_v55 = vpack.c.bf16 %v17342_v24, %v5986_v8 }
 0x458   : > { %13860 = vmatprep.subr.bf16.mxu1 %v16875_v26 }
 0x45a   : > { %13841 = vmatmul.mubr.bf16.gmra.mrb[68].mxu1 %v5666_v51  ;;  %v5988_v51 = vld [vmem:[#allocation2 + $0x4c] sm:$0xff] }
 0x45b   : > { %13861 = vmatpush3.bf16.msra.mxu1 %v15523_v42  ;;  %13844 = vmatprep.mubr.msk.bf16.mxu1 %vm15850_vm0, %v16875_v26  ;;  %v15542_v42 = vld [vmem:[%s19631_s1 + $0x3f8] sm:$0xff]  }
 0x45c   : > { %13862 = vmatprep.subr.bf16.mxu1 %v16875_v26 }
 0x45f   : > { %13863 = vmatpush3.bf16.msra.mxu1 %v15524_v11  ;;  %v17355_v11 = vld [vmem:[#allocation2 + $0x54] sm:$0xff] }
 0x460   : > { %13864 = vmatprep.subr.bf16.mxu1 %v16875_v26 }
 0x462   : > { %13845 = vmatmul.mubr.bf16.gmra.mrb[72].mxu1 %v5667_v6 }
 0x463   : > { %13848 = vmatprep.mubr.msk.bf16.mxu1 %vm15850_vm0, %v16875_v26  ;;  %13865 = vmatpush3.bf16.msra.mxu1 %v15525_v37  ;;  %v5994_v37 = vpack.c.bf16 %v17355_v11, %v5988_v51 }
 0x464   : > { %13866 = vmatprep.subr.bf16.mxu1 %v16875_v26 }
 0x467   : > { %13867 = vmatpush3.bf16.msra.mxu1 %v15526_v34 }
 0x468   : > { %13888 = vmatprep.subr.bf16.mxu1 %v16875_v26 }
 0x46a   : > { %13849 = vmatmul.mubr.bf16.gmra.mrb[76].mxu1 %v5668_v32  ;;  %v15543_v32 = vld [vmem:[%s19631_s1 + $0x400] sm:$0xff]  }
 0x46b   : > { %13868 = vmatprep.mubr.msk.bf16.mxu1 %vm15850_vm0, %v16875_v26 }
 0x470   : > { %v17251_v33 = vpop.f32.mrb[0].mxu1 }
 0x471   : > { %v13726_v3 = vpop.f32.mrb[1].mxu1 }
 0x472   : > { %v17253_v41 = vpop.f32.mrb[2].mxu1  ;;  %13869 = vmatmul.mubr.bf16.vlgmr.msra.gmra.mrb[80].mxu1 %v5827_v16 }
 0x473   : > { %v13727_v30 = vpop.f32.mrb[3].mxu1  ;;  %13889 = vmatpush3.bf16.msra.mxu1 %v15527_v61  ;;  %13872 = vmatprep.mubr.msk.bf16.mxu1 %vm15850_vm0, %v16875_v26  ;;  %v15544_v61 = vld [vmem:[%s19631_s1 + $0x408] sm:$0xff]  }
 0x474   : > { %13890 = vmatprep.subr.bf16.mxu1 %v16875_v26 }
 0x477   : > { %13891 = vmatpush3.bf16.msra.mxu1 %v15528_v19  ;;  %v15545_v19 = vld [vmem:[%s19631_s1 + $0x410] sm:$0xff]  }
 0x478   : > { %13892 = vmatprep.subr.bf16.mxu1 %v16875_v26 }
 0x47a   : > { %13873 = vmatmul.mubr.bf16.gmra.mrb[84].mxu1 %v5828_v46 }
 0x47b   : > { %13893 = vmatpush3.bf16.msra.mxu1 %v15529_v10  ;;  %13876 = vmatprep.mubr.msk.bf16.mxu1 %vm15850_vm0, %v16875_v26  ;;  %v15546_v10 = vld [vmem:[%s19631_s1 + $0x418] sm:$0xff]  }
 0x47c   : > { %13894 = vmatprep.subr.bf16.mxu1 %v16875_v26 }
 0x47f   : > { %13895 = vmatpush3.bf16.msra.mxu1 %v15530_v31 }
 0x480   : > { %13896 = vmatprep.subr.bf16.mxu1 %v16875_v26 }
 0x482   : > { %13877 = vmatmul.mubr.bf16.gmra.mrb[88].mxu1 %v5829_v36 }
 0x483   : > { %13897 = vmatpush3.bf16.msra.mxu1 %v15531_v0  ;;  %13880 = vmatprep.mubr.msk.bf16.mxu1 %vm15850_vm0, %v16875_v26  ;;  %v15547_v0 = vld [vmem:[%s19631_s1 + $0x420] sm:$0xff]  }
 0x484   : > { %13898 = vmatprep.subr.bf16.mxu1 %v16875_v26 }
 0x487   : > { %13899 = vmatpush3.bf16.msra.mxu1 %v15532_v14 }
 0x488   : > { %13900 = vmatprep.subr.bf16.mxu1 %v16875_v26 }
 0x48a   : > { %13881 = vmatmul.mubr.bf16.gmra.mrb[92].mxu1 %v5830_v43 }
 0x48b   : > { %13884 = vmatprep.mubr.msk.bf16.mxu1 %vm15850_vm0, %v16875_v26  ;;  %13901 = vmatpush3.bf16.msra.mxu1 %v15533_v49 }
 0x48c   : > { %13902 = vmatprep.subr.bf16.mxu1 %v16875_v26  ;;  %v15535_v26 = vld [vmem:[%s19631_s1 + $0x3c0] sm:$0xff]  }
 0x48f   : > { %13903 = vmatpush3.bf16.msra.mxu1 %v15534_v23  ;;  %v15549_v23 = vld [vmem:[%s19631_s1 + $0x430] sm:$0xff]  }
 0x490   : > { %13924 = vmatprep.subr.bf16.mxu1 %v17291_v48 }
 0x492   : > { %13885 = vmatmul.mubr.bf16.gmra.mrb[96].mxu1 %v5831_v21  ;;  %v6156_v21 = vpack.c.bf16 %v5988_v51, %v17342_v24 }
 0x493   : > { %13904 = vmatprep.mubr.msk.bf16.mxu1 %vm15850_vm0, %v17291_v48 }
 0x497   : > { %v17298_v54 = vpop.f32.mrb[4].mxu1 }
 0x498   : > { %v13730_v1 = vpop.f32.mrb[5].mxu1 }
 0x499   : > { %v17304_v50 = vpop.f32.mrb[6].mxu1 }
 0x49a   : > { %v13731_v62 = vpop.f32.mrb[7].mxu1  ;;  %13905 = vmatmul.mubr.bf16.vlgmr.msra.gmra.mrb[100].mxu1 %v5990_v35 }
 0x49b   : > { %13925 = vmatpush3.bf16.msra.mxu1 %v15535_v26  ;;  %13908 = vmatprep.mubr.msk.bf16.mxu1 %vm15850_vm0, %v17291_v48 }
 0x49c   : > { %13926 = vmatprep.subr.bf16.mxu1 %v17291_v48 }
 0x49f   : > { %13927 = vmatpush3.bf16.msra.mxu1 %v15536_v7  ;;  %v6157_v7 = vpack.c.bf16 %v6152_v28, %v17355_v11 }
 0x4a0   : > { %13928 = vmatprep.subr.bf16.mxu1 %v17291_v48 }
 0x4a2   : > { %13909 = vmatmul.mubr.bf16.gmra.mrb[104].mxu1 %v5991_v40 }
 0x4a3   : > { %13929 = vmatpush3.bf16.msra.mxu1 %v15537_v53  ;;  %13912 = vmatprep.mubr.msk.bf16.mxu1 %vm15850_vm0, %v17291_v48 }
 0x4a4   : > { %13930 = vmatprep.subr.bf16.mxu1 %v17291_v48 }
 0x4a7   : > { %13931 = vmatpush3.bf16.msra.mxu1 %v15538_v63 }
 0x4a8   : > { %13932 = vmatprep.subr.bf16.mxu1 %v17291_v48 }
 0x4aa   : > { %13913 = vmatmul.mubr.bf16.gmra.mrb[108].mxu1 %v5992_v20 }
 0x4ab   : > { %13933 = vmatpush3.bf16.msra.mxu1 %v15539_v12  ;;  %13916 = vmatprep.mubr.msk.bf16.mxu1 %vm15850_vm0, %v17291_v48 }
 0x4ac   : > { %v17332_v15 = vpop.f32.mrb[8].mxu1  ;;  %13934 = vmatprep.subr.bf16.mxu1 %v17291_v48 }
 0x4ad   : > { %v13734_v27 = vpop.f32.mrb[9].mxu1 }
 0x4ae   : > { %v17340_v38 = vpop.f32.mrb[10].mxu1 }
 0x4af   : > { %v13735_v58 = vpop.f32.mrb[11].mxu1  ;;  %13935 = vmatpush3.bf16.msra.mxu1 %v15540_v52  ;;  %v15552_v52 = vld [vmem:[%s19631_s1 + $0x448] sm:$0xff]  }
 0x4b0   : > { %13936 = vmatprep.subr.bf16.mxu1 %v17291_v48 }
 0x4b2   : > { %13917 = vmatmul.mubr.bf16.gmra.mrb[112].mxu1 %v5993_v55  ;;  %v15553_v55 = vld [vmem:[%s19631_s1 + $0x450] sm:$0xff]  }
 0x4b3   : > { %13920 = vmatprep.mubr.msk.bf16.mxu1 %vm15850_vm0, %v17291_v48  ;;  %13937 = vmatpush3.bf16.msra.mxu1 %v15541_v59  ;;  %v6308_v59 = vld [vmem:[#allocation2 + $0x25] sm:$0xff] }
 0x4b4   : > { %13938 = vmatprep.subr.bf16.mxu1 %v17291_v48 }
 0x4b7   : > { %13939 = vmatpush3.bf16.msra.mxu1 %v15542_v42 }
 0x4b8   : > { %13960 = vmatprep.subr.bf16.mxu1 %v17291_v48 }
 0x4ba   : > { %13921 = vmatmul.mubr.bf16.gmra.mrb[116].mxu1 %v5994_v37  ;;  %v15554_v37 = vld [vmem:[%s19631_s1 + $0x458] sm:$0xff]  }
 0x4bb   : > { %13940 = vmatprep.mubr.msk.bf16.mxu1 %vm15850_vm0, %v17291_v48 }
 0x4bc   : > { %v17361_v6 = vpop.f32.mrb[12].mxu1 }
 0x4bd   : > { %v13738_v34 = vpop.f32.mrb[13].mxu1 }
 0x4be   : > { %v17363_v2 = vpop.f32.mrb[14].mxu1  ;;  %v6311_v34 = vld [vmem:[#allocation2 + $0x3d] sm:$0xff] }
 0x4bf   : > { %v13739_v29 = vpop.f32.mrb[15].mxu1 }
 0x4c2   : > { %13941 = vmatmul.mubr.bf16.vlgmr.msra.gmra.mrb[120].mxu1 %v6153_v39  ;;  %v6310_v39 = vld [vmem:[#allocation2 + $0x35] sm:$0xff] }
 0x4c3   : > { %13961 = vmatpush3.bf16.msra.mxu1 %v15543_v32  ;;  %13944 = vmatprep.mubr.msk.bf16.mxu1 %vm15850_vm0, %v17291_v48 }
 0x4c4   : > { %13962 = vmatprep.subr.bf16.mxu1 %v17291_v48 }
 0x4c5   : > { %v17375_v16 = vpop.f32.mrb[16].mxu1 }
 0x4c6   : > { %v13742_v3 = vpop.f32.mrb[17].mxu1 }
 0x4c7   : > { %v17377_v30 = vpop.f32.mrb[18].mxu1  ;;  %13963 = vmatpush3.bf16.msra.mxu1 %v15544_v61  ;;  %v15555_v61 = vld [vmem:[%s19631_s1 + $0x460] sm:$0xff]  }
 0x4c8   : > { %v13743_v9 = vpop.f32.mrb[19].mxu1  ;;  %13964 = vmatprep.subr.bf16.mxu1 %v17291_v48 }
 0x4ca   : > { %13945 = vmatmul.mubr.bf16.gmra.mrb[124].mxu1 %v6154_v25  ;;  %v6313_v25 = vld [vmem:[#allocation2 + $0x4d] sm:$0xff] }
 0x4cb   : > { %13965 = vmatpush3.bf16.msra.mxu1 %v15545_v19  ;;  %13948 = vmatprep.mubr.msk.bf16.mxu1 %vm15850_vm0, %v17291_v48  ;;  %v15556_v19 = vld [vmem:[%s19631_s1 + $0x468] sm:$0xff]  }
 0x4cc   : > { %13966 = vmatprep.subr.bf16.mxu1 %v17291_v48 }
 0x4cd   : > { %v5452_v46 = vpop.f32.mrb[20].mxu1 }
 0x4ce   : > { %v17391_v31 = vadd.f32 %v5452_v46, %v17251_v33  ;;  %v13762_v17 = vpop.f32.mrb[21].mxu1  ;;  %v15548_v33 = vld [vmem:[%s19631_s1 + $0x428] sm:$0xff]  }
 0x4cf   : > { %v5455_v45 = vpop.f32.mrb[22].mxu1  ;;  %13967 = vmatpush3.bf16.msra.mxu1 %v15546_v10  ;;  %v6312_v17 = vld [vmem:[#allocation2 + $0x45] sm:$0xff] }
 0x4d0   : > { %v17397_v36 = vadd.f32 %v5455_v45, %v17253_v41  ;;  %v13763_v14 = vpop.f32.mrb[23].mxu1  ;;  %13968 = vmatprep.subr.bf16.mxu1 %v17291_v48  ;;  %v15557_v45 = vld [vmem:[%s19631_s1 + $0x470] sm:$0xff]  }
 0x4d1   : > { %v6319_v14 = vpack.c.bf16 %v6313_v25, %v6312_v17 }
 0x4d2   : > { %13949 = vmatmul.mubr.bf16.gmra.mrb[128].mxu1 %v6155_v57  ;;  %v15558_v57 = vld [vmem:[%s19631_s1 + $0x478] sm:$0xff]  }
 0x4d3   : > { %13969 = vmatpush3.bf16.msra.mxu1 %v15547_v0  ;;  %13952 = vmatprep.mubr.msk.bf16.mxu1 %vm15850_vm0, %v17291_v48 }
 0x4d4   : > { %13970 = vmatprep.subr.bf16.mxu1 %v17291_v48 }
 0x4d5   : > { %v5460_v47 = vpop.f32.mrb[24].mxu1 }
 0x4d6   : > { %v17408_v41 = vadd.f32 %v5460_v47, %v17298_v54  ;;  %v13766_v49 = vpop.f32.mrb[25].mxu1  ;;  %v6314_v47 = vld [vmem:[#allocation2 + $0x55] sm:$0xff] }
 0x4d7   : > { %v5463_v43 = vpop.f32.mrb[26].mxu1  ;;  %13971 = vmatpush3.bf16.msra.mxu1 %v15548_v33 }
 0x4d8   : > { %v17414_v4 = vadd.f32 %v5463_v43, %v17304_v50  ;;  %v13767_v22 = vpop.f32.mrb[27].mxu1  ;;  %13972 = vmatprep.subr.bf16.mxu1 %v17291_v48 }
 0x4da   : > { %13953 = vmatmul.mubr.bf16.gmra.mrb[132].mxu1 %v6156_v21 }
 0x4db   : > { %13956 = vmatprep.mubr.msk.bf16.mxu1 %vm15850_vm0, %v17291_v48  ;;  %13973 = vmatpush3.bf16.msra.mxu1 %v15549_v23 }
 0x4dc   : > { %13974 = vmatprep.subr.bf16.mxu1 %v17291_v48 }
 0x4dd   : > { %v5468_v54 = vpop.f32.mrb[28].mxu1 }
 0x4de   : > { %v17425_v26 = vadd.f32 %v5468_v54, %v17332_v15  ;;  %v13770_v1 = vpop.f32.mrb[29].mxu1  ;;  %v6316_v15 = vpack.c.bf16 %v6307_v44, %v6306_v56  ;;  %v6470_v54 = vld [vmem:[#allocation2 + $0x1e] sm:$0xff]  ;;  %v6472_v44 = vld [vmem:[#allocation2 + $0x2e] sm:$0xff] }
 0x4df   : > { %v5471_v35 = vpop.f32.mrb[30].mxu1  ;;  %13975 = vmatpush3.bf16.msra.mxu1 %v15550_v5 }
 0x4e0   : > { %v17428_v50 = vadd.f32 %v5471_v35, %v17340_v38  ;;  %v13771_v62 = vpop.f32.mrb[31].mxu1  ;;  %13996 = vmatprep.subr.bf16.mxu1 %v17291_v48  ;;  %v6309_v38 = vld [vmem:[#allocation2 + $0x2d] sm:$0xff] }
 0x4e1   : > { %v6317_v11 = vpack.c.bf16 %v6309_v38, %v6308_v59 }
 0x4e2   : > { %13957 = vmatmul.mubr.bf16.gmra.mrb[136].mxu1 %v6157_v7 }
 0x4e3   : > { %13976 = vmatprep.mubr.msk.bf16.mxu1 %vm15850_vm0, %v17291_v48 }
 0x4e5   : > { %v5476_v13 = vpop.f32.mrb[32].mxu1 }
 0x4e6   : > { %v17435_v53 = vadd.f32 %v5476_v13, %v17361_v6  ;;  %v13774_v40 = vpop.f32.mrb[33].mxu1 }
 0x4e7   : > { %v5479_v63 = vpop.f32.mrb[34].mxu1 }
 0x4e8   : > { %v17441_v12 = vadd.f32 %v5479_v63, %v17363_v2  ;;  %v13775_v20 = vpop.f32.mrb[35].mxu1 }
 0x4ea   : > { %13977 = vmatmul.mubr.bf16.vlgmr.msra.gmra.mrb[140].mxu1 %v6316_v15 }
 0x4eb   : > { %13997 = vmatpush3.bf16.msra.mxu1 %v15551_v60  ;;  %13980 = vmatprep.mubr.msk.bf16.mxu1 %vm15850_vm0, %v17291_v48  ;;  %v6471_v60 = vld [vmem:[#allocation2 + $0x26] sm:$0xff] }
 0x4ec   : > { %13998 = vmatprep.subr.bf16.mxu1 %v17291_v48  ;;  %v6480_v15 = vpack.c.bf16 %v6472_v44, %v6471_v60 }
 0x4ed   : > { %v5484_v27 = vpop.f32.mrb[36].mxu1 }
 0x4ee   : > { %v17450_v24 = vadd.f32 %v5484_v27, %v17375_v16  ;;  %v13778_v58 = vpop.f32.mrb[37].mxu1  ;;  %v6474_v27 = vld [vmem:[#allocation2 + $0x3e] sm:$0xff] }
 0x4ef   : > { %v5487_v8 = vpop.f32.mrb[38].mxu1  ;;  %13999 = vmatpush3.bf16.msra.mxu1 %v15552_v52  ;;  %v6473_v52 = vld [vmem:[#allocation2 + $0x36] sm:$0xff] }
 0x4f0   : > { %v17456_v42 = vadd.f32 %v5487_v8, %v17377_v30  ;;  %v13779_v51 = vpop.f32.mrb[39].mxu1  ;;  %14000 = vmatprep.subr.bf16.mxu1 %v17291_v48  ;;  %v6318_v30 = vpack.c.bf16 %v6311_v34, %v6310_v39  ;;  %v6475_v34 = vld [vmem:[#allocation2 + $0x46] sm:$0xff] }
 0x4f1   : > { %v6476_v51 = vld [vmem:[#allocation2 + $0x4e] sm:$0xff] }
 0x4f2   : > { %13981 = vmatmul.mubr.bf16.gmra.mrb[144].mxu1 %v6317_v11 }
 0x4f3   : > { %14001 = vmatpush3.bf16.msra.mxu1 %v15553_v55  ;;  %13984 = vmatprep.mubr.msk.bf16.mxu1 %vm15850_vm0, %v17291_v48  ;;  %v6481_v55 = vpack.c.bf16 %v6474_v27, %v6473_v52 }
 0x4f4   : > { %14002 = vmatprep.subr.bf16.mxu1 %v17291_v48 }
 0x4f5   : > { %v5605_v6 = vpop.f32.mrb[40].mxu1 }
 0x4f6   : > { %v17466_v2 = vadd.f32 %v5605_v6, %v17391_v31  ;;  %v13798_v32 = vpop.f32.mrb[41].mxu1 }
 0x4f7   : > { %v5608_v29 = vpop.f32.mrb[42].mxu1  ;;  %14003 = vmatpush3.bf16.msra.mxu1 %v15554_v37 }
 0x4f8   : > { %v17472_v16 = vadd.f32 %v5608_v29, %v17397_v36  ;;  %v13799_v3 = vpop.f32.mrb[43].mxu1  ;;  %14004 = vmatprep.subr.bf16.mxu1 %v17291_v48 }
 0x4fa   : > { %13985 = vmatmul.mubr.bf16.gmra.mrb[148].mxu1 %v6318_v30 }
 0x4fb   : > { %14005 = vmatpush3.bf16.msra.mxu1 %v15555_v61  ;;  %13988 = vmatprep.mubr.msk.bf16.mxu1 %vm15850_vm0, %v17291_v48  ;;  %v6477_v61 = vld [vmem:[#allocation2 + $0x56] sm:$0xff] }
 0x4fc   : > { %14006 = vmatprep.subr.bf16.mxu1 %v17291_v48 }
 0x4fd   : > { %v5613_v9 = vpop.f32.mrb[44].mxu1 }
 0x4fe   : > { %v17482_v10 = vadd.f32 %v5613_v9, %v17408_v41  ;;  %v13802_v46 = vpop.f32.mrb[45].mxu1  ;;  %v6315_v41 = vld [vmem:[#allocation2 + $0x5d] sm:$0xff] }
 0x4ff   : > { %v5616_v31 = vpop.f32.mrb[46].mxu1  ;;  %14007 = vmatpush3.bf16.msra.mxu1 %v15556_v19  ;;  %v6320_v21 = vpack.c.bf16 %v6315_v41, %v6314_v47 }
 0x500   : > { %v5647_v0 = vadd.f32 %v5616_v31, %v17414_v4  ;;  %v13803_v36 = vpop.f32.mrb[47].mxu1  ;;  %14008 = vmatprep.subr.bf16.mxu1 %v17291_v48 }
 0x502   : > { %13989 = vmatmul.mubr.bf16.gmra.mrb[152].mxu1 %v6319_v14 }
 0x503   : > { %13992 = vmatprep.mubr.msk.bf16.mxu1 %vm15850_vm0, %v17291_v48  ;;  %14009 = vmatpush3.bf16.msra.mxu1 %v15557_v45 }
 0x504   : > { %14010 = vmatprep.subr.bf16.mxu1 %v17291_v48 }
 0x505   : > { %v5621_v33 = vpop.f32.mrb[48].mxu1 }
 0x506   : > { %v5648_v49 = vadd.f32 %v5621_v33, %v17425_v26  ;;  %v13806_v43 = vpop.f32.mrb[49].mxu1  ;;  %v6469_v26 = vld [vmem:[#allocation2 + $0x16] sm:$0xff] }
 0x507   : > { %v5624_v23 = vpop.f32.mrb[50].mxu1  ;;  %14011 = vmatpush3.bf16.msra.mxu1 %v15558_v57  ;;  %v6479_v13 = vpack.c.bf16 %v6470_v54, %v6469_v26 }
 0x508   : > { %v5649_v4 = vadd.f32 %v5624_v23, %v17428_v50  ;;  %v13807_v22 = vpop.f32.mrb[51].mxu1  ;;  %14032 = vmatprep.subr.bf16.mxu1 %v17291_v48 }
 0x50a   : > { %13993 = vmatmul.mubr.bf16.gmra.mrb[156].mxu1 %v6320_v21 }
 0x50b   : > { %14012 = vmatprep.mubr.msk.bf16.mxu1 %vm15850_vm0, %v17291_v48 }
 0x50d   : > { %v5629_v5 = vpop.f32.mrb[52].mxu1 }
 0x50e   : > { %v5650_v28 = vadd.f32 %v5629_v5, %v17435_v53  ;;  %v13810_v1 = vpop.f32.mrb[53].mxu1 }
 0x50f   : > { %v5632_v35 = vpop.f32.mrb[54].mxu1 }
 0x510   : > { %v5651_v62 = vadd.f32 %v5632_v35, %v17441_v12  ;;  %v13811_v7 = vpop.f32.mrb[55].mxu1 }
 0x512   : > { %14013 = vmatmul.mubr.bf16.vlgmr.msra.gmra.mrb[160].mxu1 %v6479_v13 }
 0x513   : > { %14016 = vmatprep.mubr.msk.bf16.mxu1 %vm15850_vm0, %v17291_v48 }
 0x515   : > { %v5637_v50 = vpop.f32.mrb[56].mxu1 }
 0x516   : > { %v5652_v40 = vadd.f32 %v5637_v50, %v17450_v24  ;;  %v13814_v63 = vpop.f32.mrb[57].mxu1 }
 0x517   : > { %v5640_v56 = vpop.f32.mrb[58].mxu1 }
 0x518   : > { %v5653_v53 = vadd.f32 %v5640_v56, %v17456_v42  ;;  %v13815_v20 = vpop.f32.mrb[59].mxu1 }
 0x51a   : > { %14017 = vmatmul.mubr.bf16.gmra.mrb[164].mxu1 %v6480_v15 }
 0x51b   : > { %14020 = vmatprep.mubr.msk.bf16.mxu1 %vm15850_vm0, %v17291_v48 }
 0x51d   : > { %v5768_v12 = vpop.f32.mrb[60].mxu1 }
 0x51e   : > { %v5807_v38 = vadd.f32 %v5768_v12, %v17466_v2  ;;  %v13834_v58 = vpop.f32.mrb[61].mxu1  ;;  %v6482_v2 = vpack.c.bf16 %v6476_v51, %v6475_v34 }
 0x51f   : > { %v5771_v8 = vpop.f32.mrb[62].mxu1  ;;  %v15562_v58 = vld [vmem:[%s19631_s1 + $0x4d8] sm:$0xff]  }
 0x520   : > { %v5808_v24 = vadd.f32 %v5771_v8, %v17472_v16  ;;  %v13835_v59 = vpop.f32.mrb[63].mxu1  ;;  %v6478_v16 = vld [vmem:[#allocation2 + $0x5e] sm:$0xff] }
 0x521   : > { %v6483_v46 = vpack.c.bf16 %v6478_v16, %v6477_v61  ;;  %v15563_v8 = vld [vmem:[%s19631_s1 + $0x680] sm:$0xff]   ;;  %v15565_v61 = vld [vmem:[%s19631_s1 + $0x688] sm:$0xff]  }
 0x522   : > { %14021 = vmatmul.mubr.bf16.gmra.mrb[168].mxu1 %v6481_v55  ;;  %14321 = vmatpush3.bf16.msra.mxu0 %v15563_v8  ;;  %v15566_v16 = vld [vmem:[%s19631_s1 + $0x4e8] sm:$0xff]  }
 0x523   : > { %14024 = vmatprep.mubr.msk.bf16.mxu1 %vm15850_vm0, %v17291_v48  ;;  %14322 = vmatprep.subr.bf16.mxu0 %v17291_v48 }
 0x525   : > { %v5776_v42 = vpop.f32.mrb[64].mxu1 }
 0x526   : > { %v5809_v11 = vadd.f32 %v5776_v42, %v17482_v10  ;;  %v13838_v37 = vpop.f32.mrb[65].mxu1  ;;  %14323 = vmatpush3.bf16.msra.mxu0 %v15565_v61 }
 0x527   : > { %v5779_v6 = vpop.f32.mrb[66].mxu1  ;;  %14324 = vmatprep.subr.bf16.mxu0 %v17291_v48 }
 0x528   : > { %v5810_v32 = vadd.f32 %v5779_v6, %v5647_v0  ;;  %v13839_v29 = vpop.f32.mrb[67].mxu1 }
 0x52a   : > { %14025 = vmatmul.mubr.bf16.gmra.mrb[172].mxu1 %v6482_v2 }
 0x52b   : > { %14028 = vmatprep.mubr.msk.bf16.mxu1 %vm15850_vm0, %v17291_v48 }
 0x52d   : > { %v5784_v39 = vpop.f32.mrb[68].mxu1 }
 0x52e   : > { %v5811_v3 = vadd.f32 %v5784_v39, %v5648_v49  ;;  %v13842_v30 = vpop.f32.mrb[69].mxu1 }
 0x52f   : > { %v5787_v19 = vpop.f32.mrb[70].mxu1 }
 0x530   : > { %v5812_v9 = vadd.f32 %v5787_v19, %v5649_v4  ;;  %v13843_v25 = vpop.f32.mrb[71].mxu1 }
 0x532   : > { %14029 = vmatmul.mubr.bf16.gmra.mrb[176].mxu1 %v6483_v46 }
 0x533   : > { %14048 = vmatprep.mubr.msk.bf16.mxu1 %vm15850_vm0, %v17291_v48 }
 0x535   : > { %v5792_v10 = vpop.f32.mrb[72].mxu1 }
 0x536   : > { %v5813_v31 = vadd.f32 %v5792_v10, %v5650_v28  ;;  %v13846_v17 = vpop.f32.mrb[73].mxu1 }
 0x537   : > { %v5795_v45 = vpop.f32.mrb[74].mxu1  ;;  %v15569_v17 = vld [vmem:[%s19631_s1 + $0x698] sm:$0xff]  }
 0x538   : > { %v5814_v0 = vadd.f32 %v5795_v45, %v5651_v62  ;;  %v13847_v36 = vpop.f32.mrb[75].mxu1  ;;  %v15559_v62 = vld [vmem:[%s19631_s1 + $0x4c0] sm:$0xff]  }
 0x539   : > { %14033 = vmatpush3.bf16.msra.mxu1 %v15559_v62  ;;  %v15570_v45 = vld [vmem:[%s19631_s1 + $0x6a0] sm:$0xff]  }
 0x53a   : > { %14034 = vmatprep.subr.bf16.mxu1 %v17291_v48 }
 0x53d   : > { %v5800_v14 = vpop.f32.mrb[76].mxu1 }
 0x53e   : > { %v5815_v57 = vadd.f32 %v5800_v14, %v5652_v40  ;;  %v13850_v33 = vpop.f32.mrb[77].mxu1  ;;  %v15560_v40 = vld [vmem:[%s19631_s1 + $0x4c8] sm:$0xff]  }
 0x53f   : > { %v5803_v47 = vpop.f32.mrb[78].mxu1  ;;  %14035 = vmatpush3.bf16.msra.mxu1 %v15560_v40 }
 0x540   : > { %v5816_v41 = vadd.f32 %v5803_v47, %v5653_v53  ;;  %v13851_v49 = vpop.f32.mrb[79].mxu1  ;;  %v15561_v53 = vld [vmem:[%s19631_s1 + $0x4d0] sm:$0xff]   ;;  %14036 = vmatprep.subr.bf16.mxu1 %v17291_v48 }
 0x541   : > { %v15572_v49 = vld [vmem:[%s19631_s1 + $0x6a8] sm:$0xff]  }
 0x543   : > { %14037 = vmatpush3.bf16.msra.mxu1 %v15561_v53 }
 0x544   : > { %14038 = vmatprep.subr.bf16.mxu1 %v17291_v48 }
 0x545   : > { %v5931_v43 = vpop.f32.mrb[80].mxu1 }
 0x546   : > { %v5970_v23 = vadd.f32 %v5931_v43, %v5807_v38  ;;  %v13870_v4 = vpop.f32.mrb[81].mxu1  ;;  %v15574_v43 = vld [vmem:[%s19631_s1 + $0x6b0] sm:$0xff]  }
 0x547   : > { %v5934_v22 = vpop.f32.mrb[82].mxu1  ;;  %14039 = vmatpush3.bf16.msra.mxu1 %v15562_v58 }
 0x548   : > { %v5971_v21 = vadd.f32 %v5934_v22, %v5808_v24  ;;  %v13871_v5 = vpop.f32.mrb[83].mxu1  ;;  %14040 = vmatprep.subr.bf16.mxu1 %v17291_v48 }
 0x54d   : > { %v5939_v54 = vpop.f32.mrb[84].mxu1 }
 0x54e   : > { %v5972_v1 = vadd.f32 %v5939_v54, %v5809_v11  ;;  %v13874_v35 = vpop.f32.mrb[85].mxu1 }
 0x54f   : > { %v5942_v28 = vpop.f32.mrb[86].mxu1 }
 0x550   : > { %v5973_v26 = vadd.f32 %v5942_v28, %v5810_v32  ;;  %v13875_v7 = vpop.f32.mrb[87].mxu1  ;;  %v15564_v32 = vld [vmem:[%s19631_s1 + $0x4e0] sm:$0xff]  }
 0x551   : > { %14041 = vmatpush3.bf16.msra.mxu1 %v15564_v32 }
 0x552   : > { %14042 = vmatprep.subr.bf16.mxu1 %v17291_v48 }
 0x555   : > { %v5947_v13 = vpop.f32.mrb[88].mxu1  ;;  %14043 = vmatpush3.bf16.msra.mxu1 %v15566_v16 }
 0x556   : > { %v5974_v50 = vadd.f32 %v5947_v13, %v5811_v3  ;;  %v13878_v44 = vpop.f32.mrb[89].mxu1  ;;  %v15567_v3 = vld [vmem:[%s19631_s1 + $0x690] sm:$0xff]   ;;  %14044 = vmatprep.subr.bf16.mxu1 %v17291_v48 }
 0x557   : > { %v5950_v63 = vpop.f32.mrb[90].mxu1  ;;  %14325 = vmatpush3.bf16.msra.mxu0 %v15567_v3 }
 0x558   : > { %v17524_v56 = vadd.f32 %v5950_v63, %v5812_v9  ;;  %v13879_v60 = vpop.f32.mrb[91].mxu1  ;;  %14326 = vmatprep.subr.bf16.mxu0 %v17291_v48 }
 0x55b   : > { %14327 = vmatpush3.bf16.msra.mxu0 %v15569_v17 }
 0x55c   : > { %14328 = vmatprep.subr.bf16.mxu0 %v17291_v48 }
 0x55d   : > { %v5955_v20 = vpop.f32.mrb[92].mxu1 }
 0x55e   : > { %v17531_v15 = vadd.f32 %v5955_v20, %v5813_v31  ;;  %v13882_v12 = vpop.f32.mrb[93].mxu1  ;;  %v15568_v31 = vld [vmem:[%s19631_s1 + $0x4f0] sm:$0xff]  }
 0x55f   : > { %v5958_v52 = vpop.f32.mrb[94].mxu1  ;;  %14045 = vmatpush3.bf16.msra.mxu1 %v15568_v31  ;;  %14329 = vmatpush3.bf16.msra.mxu0 %v15570_v45  ;;  %v4986_v45 = vadd.s32 8, %v16547_v18 }
 0x560   : > { %v17533_v27 = vadd.f32 %v5958_v52, %v5814_v0  ;;  %v13883_v38 = vpop.f32.mrb[95].mxu1  ;;  %v15571_v0 = vld [vmem:[%s19631_s1 + $0x4f8] sm:$0xff]   ;;  %14046 = vmatprep.subr.bf16.mxu1 %v17291_v48  ;;  %14330 = vmatprep.subr.bf16.mxu0 %v17291_v48 }
 0x563   : > { %14047 = vmatpush3.bf16.msra.mxu1 %v15571_v0  ;;  %14331 = vmatpush3.bf16.msra.mxu0 %v15572_v49 }
 0x564   : > { %14068 = vmatprep.subr.bf16.mxu1 %v17291_v48  ;;  %14332 = vmatprep.subr.bf16.mxu0 %v17291_v48 }
 0x565   : > { %v5963_v24 = vpop.f32.mrb[96].mxu1 }
 0x566   : > { %v17543_v59 = vadd.f32 %v5963_v24, %v5815_v57  ;;  %v13886_v55 = vpop.f32.mrb[97].mxu1 }
 0x567   : > { %v5966_v42 = vpop.f32.mrb[98].mxu1  ;;  %14333 = vmatpush3.bf16.msra.mxu0 %v15574_v43 }
 0x568   : > { %v17545_v51 = vadd.f32 %v5966_v42, %v5816_v41  ;;  %v13887_v11 = vpop.f32.mrb[99].mxu1  ;;  %14334 = vmatprep.subr.bf16.mxu0 %v17291_v48 }
 0x56d   : > { %v6094_v37 = vpop.f32.mrb[100].mxu1 }
 0x56e   : > { %v17547_v6 = vadd.f32 %v6094_v37, %v5970_v23  ;;  %v13906_v34 = vpop.f32.mrb[101].mxu1 }
 0x56f   : > { %v6097_v29 = vpop.f32.mrb[102].mxu1 }
 0x570   : > { %v6134_v2 = vadd.f32 %v6097_v29, %v5971_v21  ;;  %v13907_v39 = vpop.f32.mrb[103].mxu1 }
 0x575   : > { %v6102_v30 = vpop.f32.mrb[104].mxu1 }
 0x576   : > { %v6135_v19 = vadd.f32 %v6102_v30, %v5972_v1  ;;  %v13910_v9 = vpop.f32.mrb[105].mxu1  ;;  %v15576_v1 = vld [vmem:[%s19631_s1 + $0x6b8] sm:$0xff]  }
 0x577   : > { %v6105_v25 = vpop.f32.mrb[106].mxu1  ;;  %14335 = vmatpush3.bf16.msra.mxu0 %v15576_v1  ;;  %v4988_v1 = vadd.s32 24, %v16547_v18 }
 0x578   : > { %v6136_v46 = vadd.f32 %v6105_v25, %v5973_v26  ;;  %v13911_v10 = vpop.f32.mrb[107].mxu1  ;;  %14392 = vmatprep.subr.bf16.mxu0 %v17291_v48 }
 0x579   : > { %v17608_v10 = vmul.u32.u64.low 3435973837, %v16547_v18  ;;  %v17609_v31 = vmul.u32.u64.high 3435973837, %v16547_v18, %v17608_v10 }
 0x57b   : > { %v5001_v43 = vshrl.u32 %v17609_v31, 3 }
 0x57d   : > { %v6110_v36 = vpop.f32.mrb[108].mxu1 }
 0x57e   : > { %v6137_v14 = vadd.f32 %v6110_v36, %v5974_v50  ;;  %v13914_v57 = vpop.f32.mrb[109].mxu1 }
 0x57f   : > { %v6113_v33 = vpop.f32.mrb[110].mxu1 }
 0x580   : > { %v6138_v47 = vadd.f32 %v6113_v33, %v17524_v56  ;;  %v13915_v41 = vpop.f32.mrb[111].mxu1 }
 0x581   : > { %v17617_v41 = vmul.u32.u64.low 3435973837, %v4986_v45  ;;  %v17618_v49 = vmul.u32.u64.high 3435973837, %v4986_v45, %v17617_v41 }
 0x585   : > { %v6118_v23 = vpop.f32.mrb[112].mxu1 }
 0x586   : > { %v6139_v4 = vadd.f32 %v6118_v23, %v17531_v15  ;;  %v13918_v22 = vpop.f32.mrb[113].mxu1 }
 0x587   : > { %v6121_v21 = vpop.f32.mrb[114].mxu1 }
 0x588   : > { %v6140_v5 = vadd.f32 %v6121_v21, %v17533_v27  ;;  %v13919_v54 = vpop.f32.mrb[115].mxu1 }
 0x58d   : > { %v6126_v35 = vpop.f32.mrb[116].mxu1 }
 0x58e   : > { %v6141_v28 = vadd.f32 %v6126_v35, %v17543_v59  ;;  %v13922_v26 = vpop.f32.mrb[117].mxu1 }
 0x58f   : > { %v6129_v7 = vpop.f32.mrb[118].mxu1  ;;  %v5002_v26 = vmul.u32 10, %v5001_v43 }
 0x590   : > { %v6142_v62 = vadd.f32 %v6129_v7, %v17545_v51  ;;  %v13923_v13 = vpop.f32.mrb[119].mxu1  ;;  %v5012_v7 = vshrl.u32 %v17618_v49, 3 }
 0x595   : > { %v6257_v50 = vpop.f32.mrb[120].mxu1 }
 0x596   : > { %v6296_v44 = vadd.f32 %v6257_v50, %v17547_v6  ;;  %v13942_v40 = vpop.f32.mrb[121].mxu1  ;;  %v17634_v50 = vadd.s32 32, %v16547_v18 }
 0x597   : > { %v6260_v63 = vpop.f32.mrb[122].mxu1 }
 0x598   : > { %v6297_v56 = vadd.f32 %v6260_v63, %v6134_v2  ;;  %v13943_v60 = vpop.f32.mrb[123].mxu1 }
 0x59d   : > { %v6265_v53 = vpop.f32.mrb[124].mxu1 }
 0x59e   : > { %v6298_v20 = vadd.f32 %v6265_v53, %v6135_v19  ;;  %v13946_v15 = vpop.f32.mrb[125].mxu1 }
 0x59f   : > { %v6268_v12 = vpop.f32.mrb[126].mxu1 }
 0x5a0   : > { %v6299_v52 = vadd.f32 %v6268_v12, %v6136_v46  ;;  %v13947_v27 = vpop.f32.mrb[127].mxu1 }
 0x5a5   : > { %v6273_v38 = vpop.f32.mrb[128].mxu1 }
 0x5a6   : > { %v6300_v58 = vadd.f32 %v6273_v38, %v6137_v14  ;;  %v13950_v8 = vpop.f32.mrb[129].mxu1 }
 0x5a7   : > { %v6276_v24 = vpop.f32.mrb[130].mxu1 }
 0x5a8   : > { %v6301_v59 = vadd.f32 %v6276_v24, %v6138_v47  ;;  %v13951_v55 = vpop.f32.mrb[131].mxu1  ;;  %v4987_v47 = vadd.s32 16, %v16547_v18 }
 0x5ad   : > { %v6281_v42 = vpop.f32.mrb[132].mxu1 }
 0x5ae   : > { %v6302_v51 = vadd.f32 %v6281_v42, %v6139_v4  ;;  %v13954_v11 = vpop.f32.mrb[133].mxu1  ;;  %v17621_v23 = vmul.u32.u64.low 3435973837, %v4987_v47  ;;  %v17622_v4 = vmul.u32.u64.high 3435973837, %v4987_v47, %v17621_v23 }
 0x5af   : > { %v6284_v37 = vpop.f32.mrb[134].mxu1  ;;  %v17659_v11 = vadd.s32 48, %v16547_v18  ;;  %v15777_v23 = vld [vmem:[%s19632_s2] sm:$0x1f] }
 0x5b0   : > { %v6303_v6 = vadd.f32 %v6284_v37, %v6140_v5  ;;  %v13955_v34 = vpop.f32.mrb[135].mxu1  ;;  %v5023_v40 = vshrl.u32 %v17622_v4, 3 }
 0x5b1   : > { %v17664_v34 = vadd.s32 56, %v16547_v18 }
 0x5b5   : > { %v6289_v32 = vpop.f32.mrb[136].mxu1 }
 0x5b6   : > { %v17599_v29 = vadd.f32 %v6289_v32, %v6141_v28  ;;  %v13958_v2 = vpop.f32.mrb[137].mxu1 }
 0x5b7   : > { %v6292_v39 = vpop.f32.mrb[138].mxu1 }
 0x5b8   : > { %v17601_v61 = vadd.f32 %v6292_v39, %v6142_v62  ;;  %v13959_v16 = vpop.f32.mrb[139].mxu1  ;;  %v17630_v62 = vmul.u32.u64.low 3435973837, %v4988_v1  ;;  %v17631_v13 = vmul.u32.u64.high 3435973837, %v4988_v1, %v17630_v62 }
 0x5bd   : > { %v6420_v3 = vpop.f32.mrb[140].mxu1 }
 0x5be   : > { %v17603_v30 = vadd.f32 %v6420_v3, %v6296_v44  ;;  %v13978_v19 = vpop.f32.mrb[141].mxu1  ;;  %v5003_v44 = vsub.s32 %v16547_v18, %v5002_v26 }
 0x5bf   : > { %v6423_v9 = vpop.f32.mrb[142].mxu1 }
 0x5c0   : > { %v17605_v25 = vadd.f32 %v6423_v9, %v6297_v56  ;;  %v13979_v46 = vpop.f32.mrb[143].mxu1  ;;  %v5013_v56 = vmul.u32 10, %v5012_v7  ;;  %vm5105_vm8 = vcmp.ne.s32.totalorder %v5003_v44, 0  ;;  %vm5115_vm9 = vcmp.lt.s32.totalorder %v5003_v44, 0 }
 0x5c1   : > { %v5135_v24 = vadd.s32 10, %v5003_v44  ;;  %vm17653_vm10 = vmand %vm5115_vm9, %vm5105_vm8  ;;  %v17673_v46 = vmul.u32.u64.low 3435973837, %v17659_v11  ;;  %v17674_v10 = vmul.u32.u64.high 3435973837, %v17659_v11, %v17673_v46 }
 0x5c2   : > { %v5014_v8 = vsub.s32 %v4986_v45, %v5013_v56 }
 0x5c3   : > { %v5145_v39 = vsel %vm17653_vm10, %v5135_v24, %v5003_v44 }
 0x5c4   : > { %vm5106_vm11 = vcmp.ne.s32.totalorder %v5014_v8, 0  ;;  %vm5116_vm12 = vcmp.lt.s32.totalorder %v5014_v8, 0  ;;  %v5136_v16 = vadd.s32 10, %v5014_v8  ;;  %vm5155_vm1 = vcmp.lt.s32.totalorder %v5145_v39, 8 }
 0x5c5   : > { %v6428_v17 = vpop.f32.mrb[144].mxu1  ;;  %vm17681_vm13 = vmand %vm5116_vm12, %vm5106_vm11 }
 0x5c6   : > { %v17612_v0 = vadd.f32 %v6428_v17, %v6298_v20  ;;  %v13982_v36 = vpop.f32.mrb[145].mxu1  ;;  %v17641_v20 = vadd.s32 40, %v16547_v18 }
 0x5c7   : > { %v6431_v14 = vpop.f32.mrb[146].mxu1 }
 0x5c8   : > { %v17614_v57 = vadd.f32 %v6431_v14, %v6299_v52  ;;  %v13983_v33 = vpop.f32.mrb[147].mxu1  ;;  %v17644_v12 = vmul.u32.u64.low 3435973837, %v17634_v50  ;;  %v17645_v52 = vmul.u32.u64.high 3435973837, %v17634_v50, %v17644_v12 }
 0x5c9   : > { %v17688_v36 = vmul.u32.u64.low 3435973837, %v17664_v34  ;;  %v17689_v14 = vmul.u32.u64.high 3435973837, %v17664_v34, %v17688_v36 }
 0x5ca   : > { %v5045_v9 = vshrl.u32 %v17645_v52, 3 }
 0x5cb   : > { %v5078_v52 = vshrl.u32 %v17689_v14, 3 }
 0x5cc   : > { %v5046_v43 = vmul.u32 10, %v5045_v9 }
 0x5cd   : > { %v6436_v22 = vpop.f32.mrb[148].mxu1 }
 0x5ce   : > { %v17624_v21 = vadd.f32 %v6436_v22, %v6300_v58  ;;  %v13986_v5 = vpop.f32.mrb[149].mxu1  ;;  %v5024_v58 = vmul.u32 10, %v5023_v40  ;;  %v17705_v22 = vadd.s32 64, %v16547_v18  ;;  %v5067_v40 = vshrl.u32 %v17674_v10, 3 }
 0x5cf   : > { %v6439_v54 = vpop.f32.mrb[150].mxu1  ;;  %v17708_v5 = vsel %vm5155_vm1, 1.0, %v17291_v48  ;;  %v5047_v48 = vsub.s32 %v17634_v50, %v5046_v43  ;;  %v6708_v43 = vld [vmem:[#allocation3 + $0x1] sm:$0xff] }
 0x5d0   : > { %v17627_v35 = vadd.f32 %v6439_v54, %v6301_v59  ;;  %v13987_v28 = vpop.f32.mrb[151].mxu1  ;;  %v17650_v59 = vmul.u32.u64.low 3435973837, %v17641_v20  ;;  %v17651_v55 = vmul.u32.u64.high 3435973837, %v17641_v20, %v17650_v59  ;;  %v17661_v37 = vsub.s32 %v4987_v47, %v5024_v58 }
 0x5d1   : > { %v5146_v47 = vsel %vm17681_vm13, %v5136_v16, %v5014_v8  ;;  %v17711_v28 = vadd.s32 72, %v16547_v18  ;;  %v17740_v59 = vld [vmem:[#allocation2] sm:$0xff]  ;;  %vm5109_vm7 = vcmp.ne.s32.totalorder %v5047_v48, 0  ;;  %vm5119_vm8 = vcmp.lt.s32.totalorder %v5047_v48, 0 }
 0x5d2   : > { %vm5107_vm14 = vcmp.ne.s32.totalorder %v17661_v37, 0  ;;  %vm5117_vm15 = vcmp.lt.s32.totalorder %v17661_v37, 0  ;;  %v5056_v33 = vshrl.u32 %v17651_v55, 3  ;;  %vm17714_vm3 = vcmp.lt.s32.totalorder %v5146_v47, 8  ;;  %vm17756_vm10 = vmand %vm5119_vm8, %vm5109_vm7 }
 0x5d3   : > { %vm17695_vm2 = vmand %vm5117_vm15, %vm5107_vm14  ;;  %v17745_v55 = vsel %vm17714_vm3, 1.0, %v17740_v59  ;;  %v5068_v42 = vmul.u32 10, %v5067_v40  ;;  %v5139_v39 = vadd.s32 10, %v5047_v48 }
 0x5d5   : > { %v6444_v63 = vpop.f32.mrb[152].mxu1  ;;  %v5149_v14 = vsel %vm17756_vm10, %v5139_v39, %v5047_v48 }
 0x5d6   : > { %v17638_v60 = vadd.f32 %v6444_v63, %v6302_v51  ;;  %v13990_v53 = vpop.f32.mrb[153].mxu1  ;;  %v5034_v51 = vshrl.u32 %v17631_v13, 3  ;;  %v5057_v13 = vmul.u32 10, %v5056_v33 }
 0x5d7   : > { %v6447_v15 = vpop.f32.mrb[154].mxu1 }
 0x5d8   : > { %v17647_v27 = vadd.f32 %v6447_v15, %v6303_v6  ;;  %v13991_v38 = vpop.f32.mrb[155].mxu1  ;;  %v5035_v19 = vmul.u32 10, %v5034_v51  ;;  %v17726_v53 = vmul.u32.u64.low 3435973837, %v17705_v22  ;;  %v17727_v15 = vmul.u32.u64.high 3435973837, %v17705_v22, %v17726_v53 }
 0x5d9   : > { %v17731_v38 = vmul.u32.u64.low 3435973837, %v17711_v28  ;;  %v17732_v58 = vmul.u32.u64.high 3435973837, %v17711_v28, %v17731_v38 }
 0x5da   : > { %v5036_v49 = vsub.s32 %v4988_v1, %v5035_v19 }
 0x5db   : > { %v5100_v47 = vshrl.u32 %v17732_v58, 3 }
 0x5dc   : > { %vm5108_vm4 = vcmp.ne.s32.totalorder %v5036_v49, 0  ;;  %vm5118_vm5 = vcmp.lt.s32.totalorder %v5036_v49, 0  ;;  %v5138_v12 = vadd.s32 10, %v5036_v49 }
 0x5dd   : > { %v6452_v6 = vpop.f32.mrb[156].mxu1  ;;  %vm17735_vm6 = vmand %vm5118_vm5, %vm5108_vm4  ;;  %v5101_v48 = vmul.u32 10, %v5100_v47 }
 0x5de   : > { %v17667_v32 = vadd.f32 %v6452_v6, %v17599_v29  ;;  %v13994_v2 = vpop.f32.mrb[157].mxu1  ;;  %v6634_v29 = vsub.s32 1, %v16547_v18 }
 0x5df   : > { %v6455_v3 = vpop.f32.mrb[158].mxu1  ;;  %v5148_v2 = vsel %vm17735_vm6, %v5138_v12, %v5036_v49 }
 0x5e0   : > { %v17677_v31 = vadd.f32 %v6455_v3, %v17601_v61  ;;  %v13995_v17 = vpop.f32.mrb[159].mxu1  ;;  %v5137_v61 = vadd.s32 10, %v17661_v37  ;;  %v17702_v4 = vrot.slane %v15777_v23, %v6634_v29  ;;  %vm5158_vm13 = vcmp.lt.s32.totalorder %v5148_v2, 8 }
 0x5e1   : > { %v5069_v17 = vsub.s32 %v17659_v11, %v5068_v42  ;;  %v5089_v11 = vshrl.u32 %v17727_v15, 3 }
 0x5e2   : > { %v5147_v62 = vsel %vm17695_vm2, %v5137_v61, %v17661_v37  ;;  %vm17785_vm2 = vcmp.lt.s32.totalorder %v5149_v14, 8 }
 0x5e3   : > { %vm5157_vm9 = vcmp.lt.s32.totalorder %v5147_v62, 8  ;;  %vm5111_vm15 = vcmp.ne.s32.totalorder %v5069_v17, 0  ;;  %vm5121_vm1 = vcmp.lt.s32.totalorder %v5069_v17, 0 }
 0x5e4   : > { %v17761_v46 = vsel %vm5157_vm9, 1.0, %v17740_v59  ;;  %vm17802_vm4 = vmand %vm5121_vm1, %vm5111_vm15 }
 0x5e5   : > { %v6583_v54 = vpop.f32.mrb[160].mxu1 }
 0x5e6   : > { %v6622_v26 = vadd.f32 %v6583_v54, %v17603_v30  ;;  %v14014_v1 = vpop.f32.mrb[161].mxu1 }
 0x5e7   : > { %v6586_v44 = vpop.f32.mrb[162].mxu1  ;;  %v15573_v1 = vld [vmem:[%s19631_s1 + $0x480] sm:$0xff]  }
 0x5e8   : > { %v6636_v63 = vadd.f32 %v17702_v4, %v6622_v26  ;;  %v6623_v30 = vadd.f32 %v6586_v44, %v17605_v25  ;;  %v14015_v56 = vpop.f32.mrb[163].mxu1  ;;  %v5058_v25 = vsub.s32 %v17641_v20, %v5057_v13  ;;  %v5079_v20 = vmul.u32 10, %v5078_v52 }
 0x5e9   : > { %v5141_v13 = vadd.s32 10, %v5069_v17  ;;  %v5090_v44 = vmul.u32 10, %v5089_v11 }
 0x5ea   : > { %v6646_v8 = vmax.f32 %v6636_v63, 0.0  ;;  %v6637_v50 = vadd.f32 %v17702_v4, %v6623_v30  ;;  %vm5110_vm11 = vcmp.ne.s32.totalorder %v5058_v25, 0  ;;  %vm5120_vm12 = vcmp.lt.s32.totalorder %v5058_v25, 0 }
 0x5eb   : > { %v5140_v36 = vadd.s32 10, %v5058_v25  ;;  %vm17769_vm14 = vmand %vm5120_vm12, %vm5110_vm11  ;;  %v17774_v33 = vsub.s32 %v17664_v34, %v5079_v20  ;;  %v5151_v24 = vsel %vm17802_vm4, %v5141_v13, %v5069_v17  ;;  %v5091_v42 = vsub.s32 %v17705_v22, %v5090_v44 }
 0x5ec   : > { %v6656_v51 = vmul.f32 %v17708_v5, %v6646_v8  ;;  %v6647_v37 = vmax.f32 %v6637_v50, 0.0  ;;  %v17820_v50 = vsel %vm17785_vm2, 1.0, %v17740_v59  ;;  %vm17849_vm8 = vcmp.lt.s32.totalorder %v5151_v24, 8 }
 0x5ed   : > { %v6591_v6 = vpop.f32.mrb[164].mxu1  ;;  %v5150_v26 = vsel %vm17769_vm14, %v5140_v36, %v5058_v25  ;;  %vm5112_vm3 = vcmp.ne.s32.totalorder %v17774_v33, 0  ;;  %vm5122_vm5 = vcmp.lt.s32.totalorder %v17774_v33, 0  ;;  %v5142_v58 = vadd.s32 10, %v17774_v33 }
 0x5ee   : > { %6666 = vst [vmem:[#allocation3 + $0xb] sm:$0xff] %v6656_v51  ;;  %v17751_v16 = vmul.f32 %v17745_v55, %v6647_v37  ;;  %v6624_v3 = vadd.f32 %v6591_v6, %v17612_v0  ;;  %v14018_v19 = vpop.f32.mrb[165].mxu1  ;;  %vm17807_vm6 = vcmp.lt.s32.totalorder %v5150_v26, 8  ;;  %vm17829_vm7 = vmand %vm5122_vm5, %vm5112_vm3  ;;  %v17837_v51 = vsub.s32 %v17711_v28, %v5101_v48  ;;  %v15577_v28 = vld [vmem:[%s19631_s1 + $0x490] sm:$0xff]  }
 0x5ef   : > { %v6594_v10 = vpop.f32.mrb[166].mxu1  ;;  %v17844_v2 = vsel %vm17807_vm6, 1.0, %v17740_v59  ;;  %v5152_v22 = vsel %vm17829_vm7, %v5142_v58, %v17774_v33  ;;  %vm5113_vm9 = vcmp.ne.s32.totalorder %v5091_v42, 0  ;;  %vm5123_vm10 = vcmp.lt.s32.totalorder %v5091_v42, 0 }
 0x5f0   : > { %6667 = vst [vmem:[#allocation3 + $0x13] sm:$0xff] %v17751_v16  ;;  %v6638_v29 = vadd.f32 %v17702_v4, %v6624_v3  ;;  %v6625_v0 = vadd.f32 %v6594_v10, %v17614_v57  ;;  %v14019_v45 = vpop.f32.mrb[167].mxu1  ;;  %v17780_v57 = vsel %vm5158_vm13, 1.0, %v17740_v59  ;;  %vm5114_vm11 = vcmp.ne.s32.totalorder %v17837_v51, 0  ;;  %vm17877_vm14 = vmand %vm5123_vm10, %vm5113_vm9 }
 0x5f1   : > { %vm5124_vm12 = vcmp.lt.s32.totalorder %v17837_v51, 0  ;;  %vm17867_vm13 = vcmp.lt.s32.totalorder %v5152_v22, 8  ;;  %v5143_v11 = vadd.s32 10, %v5091_v42  ;;  %v5144_v47 = vadd.s32 10, %v17837_v51 }
 0x5f2   : > { %v6648_v41 = vmax.f32 %v6638_v29, 0.0  ;;  %v6639_v49 = vadd.f32 %v17702_v4, %v6625_v0  ;;  %v17886_v26 = vsel %vm17849_vm8, 1.0, %v17740_v59  ;;  %vm17892_vm15 = vmand %vm5124_vm12, %vm5114_vm11  ;;  %v17906_v13 = vsel %vm17867_vm13, 1.0, %v17740_v59 }
 0x5f3   : > { %v5153_v44 = vsel %vm17877_vm14, %v5143_v11, %v5091_v42 }
 0x5f4   : > { %v17783_v23 = vmul.f32 %v17761_v46, %v6648_v41  ;;  %v6649_v54 = vmax.f32 %v6639_v49, 0.0  ;;  %vm17925_vm1 = vcmp.lt.s32.totalorder %v5153_v44, 8 }
 0x5f5   : > { %v6599_v7 = vpop.f32.mrb[168].mxu1  ;;  %v6709_v62 = vld [vmem:[#allocation3 + $0x9] sm:$0xff]  ;;  %v17943_v22 = vsel %vm17925_vm1, 1.0, %v17740_v59 }
 0x5f6   : > { %6668 = vst [vmem:[#allocation3 + $0x1b] sm:$0xff] %v17783_v23  ;;  %v17797_v40 = vmul.f32 %v17780_v57, %v6649_v54  ;;  %v6626_v63 = vadd.f32 %v6599_v7, %v17624_v21  ;;  %v14022_v30 = vpop.f32.mrb[169].mxu1  ;;  %v6718_v56 = vpack.c.bf16 %v6709_v62, %v6708_v43 }
 0x5f7   : > { %v6602_v12 = vpop.f32.mrb[170].mxu1  ;;  %v6710_v9 = vld [vmem:[#allocation3 + $0x11] sm:$0xff]  ;;  %v5154_v30 = vsel %vm17892_vm15, %v5144_v47, %v17837_v51 }
 0x5f8   : > { %6669 = vst [vmem:[#allocation3 + $0x23] sm:$0xff] %v17797_v40  ;;  %v6640_v52 = vadd.f32 %v17702_v4, %v6626_v63  ;;  %v6627_v21 = vadd.f32 %v6602_v12, %v17627_v35  ;;  %v14023_v38 = vpop.f32.mrb[171].mxu1  ;;  %14049 = vmatmul.mubr.bf16.vlgmr.msra.gmra.mrb[180].mxu1 %v6718_v56  ;;  %v7319_v8 = vpack.c.bf16 %v17797_v40, %v17783_v23  ;;  %v15575_v35 = vld [vmem:[%s19631_s1 + $0x488] sm:$0xff]   ;;  %v15579_v12 = vld [vmem:[%s19631_s1 + $0x4a0] sm:$0xff]   ;;  %vm17931_vm2 = vcmp.lt.s32.totalorder %v5154_v30, 8  ;;  %v15613_v40 = vld [vmem:[%s19631_s1 + $0x5f0] sm:$0xff]  }
 0x5f9   : > { %14069 = vmatpush3.bf16.msra.mxu1 %v15573_v1  ;;  %14052 = vmatprep.mubr.msk.bf16.mxu1 %vm15850_vm0, %v17740_v59  ;;  %v15578_v1 = vld [vmem:[%s19631_s1 + $0x498] sm:$0xff]   ;;  %v15612_v23 = vld [vmem:[%s19631_s1 + $0x5e8] sm:$0xff]  }
 0x5fa   : > { %v6650_v37 = vmax.f32 %v6640_v52, 0.0  ;;  %v6641_v6 = vadd.f32 %v17702_v4, %v6627_v21  ;;  %14070 = vmatprep.subr.bf16.mxu1 %v17740_v59  ;;  %v15585_v21 = vld [vmem:[%s19631_s1 + $0x510] sm:$0xff]  }
 0x5fc   : > { %v17847_v39 = vmul.f32 %v17820_v50, %v6650_v37  ;;  %v6651_v20 = vmax.f32 %v6641_v6, 0.0 }
 0x5fd   : > { %v6607_v19 = vpop.f32.mrb[172].mxu1  ;;  %14071 = vmatpush3.bf16.msra.mxu1 %v15575_v35  ;;  %v6711_v10 = vld [vmem:[#allocation3 + $0x19] sm:$0xff] }
 0x5fe   : > { %6670 = vst [vmem:[#allocation3 + $0x2b] sm:$0xff] %v17847_v39  ;;  %v17862_v17 = vmul.f32 %v17844_v2, %v6651_v20  ;;  %v6628_v29 = vadd.f32 %v6607_v19, %v17638_v60  ;;  %v14026_v0 = vpop.f32.mrb[173].mxu1  ;;  %v6719_v45 = vpack.c.bf16 %v6711_v10, %v6710_v9  ;;  %14072 = vmatprep.subr.bf16.mxu1 %v17740_v59  ;;  %v7960_v61 = vld [vmem:[#allocation3 + $0x16] sm:$0xff]  ;;  %v17955_v9 = vsel %vm17931_vm2, 1.0, %v17740_v59 }
 0x5ff   : > { %v6610_v14 = vpop.f32.mrb[174].mxu1  ;;  %v7961_v33 = vld [vmem:[#allocation3 + $0x1e] sm:$0xff] }
 0x600   : > { %6671 = vst [vmem:[#allocation3 + $0x33] sm:$0xff] %v17862_v17  ;;  %v6642_v60 = vadd.f32 %v17702_v4, %v6628_v29  ;;  %v6629_v41 = vadd.f32 %v6610_v14, %v17647_v27  ;;  %v14027_v49 = vpop.f32.mrb[175].mxu1  ;;  %14053 = vmatmul.mubr.bf16.gmra.mrb[184].mxu1 %v6719_v45  ;;  %v7970_v43 = vpack.c.bf16 %v7961_v33, %v7960_v61  ;;  %v6712_v53 = vld [vmem:[#allocation3 + $0x21] sm:$0xff] }
 0x601   : > { %v7320_v34 = vpack.c.bf16 %v17862_v17, %v17847_v39  ;;  %14073 = vmatpush3.bf16.msra.mxu1 %v15577_v28  ;;  %14056 = vmatprep.mubr.msk.bf16.mxu1 %vm15850_vm0, %v17740_v59  ;;  %v15580_v28 = vld [vmem:[%s19631_s1 + $0x4a8] sm:$0xff]   ;;  %v18170_v39 = vld [vmem:[#allocation3 + $0x14] sm:$0xff]  ;;  %v7471_v17 = vld [vmem:[#allocation3 + $0xc] sm:$0xff] }
 0x602   : > { %v6652_v7 = vmax.f32 %v6642_v60, 0.0  ;;  %v6643_v62 = vadd.f32 %v17702_v4, %v6629_v41  ;;  %14337 = vmatmul.mubr.bf16.vlgmr.msra.gmra.mrb[36].mxu0 %v7970_v43  ;;  %14074 = vmatprep.subr.bf16.mxu1 %v17740_v59  ;;  %v15582_v60 = vld [vmem:[%s19631_s1 + $0x4b8] sm:$0xff]   ;;  %v6680_v35 = vld [vmem:[#allocation3 + $0x20] sm:$0xff] }
 0x603   : > { %14340 = vmatprep.mubr.msk.bf16.mxu0 %vm15850_vm0, %v17740_v59 }
 0x604   : > { %v17913_v48 = vmul.f32 %v17886_v26, %v6652_v7  ;;  %v6653_v63 = vmax.f32 %v6643_v62, 0.0  ;;  %v6677_v7 = vld [vmem:[#allocation3 + $0x8] sm:$0xff]  ;;  %v15583_v62 = vld [vmem:[%s19631_s1 + $0x500] sm:$0xff]  }
 0x605   : > { %v6615_v56 = vpop.f32.mrb[176].mxu1  ;;  %v6713_v15 = vld [vmem:[#allocation3 + $0x29] sm:$0xff]  ;;  %14075 = vmatpush3.bf16.msra.mxu1 %v15578_v1  ;;  %v6686_v30 = vpack.c.bf16 %v6677_v7, %v17740_v59  ;;  %v15596_v7 = vld [vmem:[%s19631_s1 + $0x568] sm:$0xff]  }
 0x606   : > { %6672 = vst [vmem:[#allocation3 + $0x3b] sm:$0xff] %v17913_v48  ;;  %v17923_v52 = vmul.f32 %v17906_v13, %v6653_v63  ;;  %v6630_v38 = vadd.f32 %v6615_v56, %v17667_v32  ;;  %v14030_v58 = vpop.f32.mrb[177].mxu1  ;;  %v6720_v24 = vpack.c.bf16 %v6713_v15, %v6712_v53  ;;  %14076 = vmatprep.subr.bf16.mxu1 %v17740_v59  ;;  %v7962_v42 = vld [vmem:[#allocation3 + $0x26] sm:$0xff]  ;;  %v7969_v63 = vld [vmem:[#allocation3 + $0x5e] sm:$0xff] }
 0x607   : > { %v6618_v25 = vpop.f32.mrb[178].mxu1  ;;  %v7963_v51 = vld [vmem:[#allocation3 + $0x2e] sm:$0xff]  ;;  %v15584_v53 = vld [vmem:[%s19631_s1 + $0x508] sm:$0xff]   ;;  %v6679_v15 = vld [vmem:[#allocation3 + $0x18] sm:$0xff] }
 0x608   : > { %6673 = vst [vmem:[#allocation3 + $0x43] sm:$0xff] %v17923_v52  ;;  %v6644_v37 = vadd.f32 %v17702_v4, %v6630_v38  ;;  %v6631_v6 = vadd.f32 %v6618_v25, %v17677_v31  ;;  %v14031_v20 = vpop.f32.mrb[179].mxu1  ;;  %14057 = vmatmul.mubr.bf16.gmra.mrb[188].mxu1 %v6720_v24  ;;  %v7971_v32 = vpack.c.bf16 %v7963_v51, %v7962_v42  ;;  %v6714_v0 = vld [vmem:[#allocation3 + $0x31] sm:$0xff]  ;;  %v6681_v24 = vld [vmem:[#allocation3 + $0x28] sm:$0xff]  ;;  %v15588_v51 = vld [vmem:[%s19631_s1 + $0x528] sm:$0xff]  }
 0x609   : > { %v7321_v3 = vpack.c.bf16 %v17923_v52, %v17913_v48  ;;  %14077 = vmatpush3.bf16.msra.mxu1 %v15579_v12  ;;  %14060 = vmatprep.mubr.msk.bf16.mxu1 %vm15850_vm0, %v17740_v59  ;;  %v6678_v12 = vld [vmem:[#allocation3 + $0x10] sm:$0xff]  ;;  %v15587_v25 = vld [vmem:[%s19631_s1 + $0x520] sm:$0xff]   ;;  %v6688_v42 = vpack.c.bf16 %v6681_v24, %v6680_v35  ;;  %v15589_v20 = vld [vmem:[%s19631_s1 + $0x530] sm:$0xff]   ;;  %v7481_v48 = vpack.c.bf16 %v18170_v39, %v7471_v17 }
 0x60a   : > { %v6654_v31 = vmax.f32 %v6644_v37, 0.0  ;;  %v6645_v19 = vadd.f32 %v17702_v4, %v6631_v6  ;;  %14341 = vmatmul.mubr.bf16.gmra.mrb[40].mxu0 %v7971_v32  ;;  %14078 = vmatprep.subr.bf16.mxu1 %v17740_v59  ;;  %v15581_v4 = vld [vmem:[%s19631_s1 + $0x4b0] sm:$0xff]   ;;  %v6687_v38 = vpack.c.bf16 %v6679_v15, %v6678_v12  ;;  %v15586_v58 = vld [vmem:[%s19631_s1 + $0x518] sm:$0xff]   ;;  %v15616_v52 = vld [vmem:[%s19631_s1 + $0x608] sm:$0xff]  }
 0x60b   : > { %14344 = vmatprep.mubr.msk.bf16.mxu0 %vm15850_vm0, %v17740_v59  ;;  %v6682_v6 = vld [vmem:[#allocation3 + $0x30] sm:$0xff]  ;;  %v15601_v24 = vld [vmem:[%s19631_s1 + $0x590] sm:$0xff]  }
 0x60c   : > { %v17960_v10 = vmul.f32 %v17943_v22, %v6654_v31  ;;  %v6655_v29 = vmax.f32 %v6645_v19, 0.0 }
 0x60d   : > { %v6715_v45 = vld [vmem:[#allocation3 + $0x39] sm:$0xff]  ;;  %14079 = vmatpush3.bf16.msra.mxu1 %v15580_v28  ;;  %v15590_v28 = vld [vmem:[%s19631_s1 + $0x538] sm:$0xff]  }
 0x60e   : > { %6674 = vst [vmem:[#allocation3 + $0x4b] sm:$0xff] %v17960_v10  ;;  %v17967_v36 = vmul.f32 %v17955_v9, %v6655_v29  ;;  %v6721_v14 = vpack.c.bf16 %v6715_v45, %v6714_v0  ;;  %14080 = vmatprep.subr.bf16.mxu1 %v17740_v59  ;;  %v7964_v61 = vld [vmem:[#allocation3 + $0x36] sm:$0xff]  ;;  %v6982_v0 = vld [vmem:[#allocation3 + $0x2] sm:$0xff]  ;;  %v6983_v45 = vld [vmem:[#allocation3 + $0xa] sm:$0xff] }
 0x60f   : > { %v7965_v33 = vld [vmem:[#allocation3 + $0x3e] sm:$0xff] }
 0x610   : > { %6675 = vst [vmem:[#allocation3 + $0x53] sm:$0xff] %v17967_v36  ;;  %14061 = vmatmul.mubr.bf16.gmra.mrb[192].mxu1 %v6721_v14  ;;  %v7972_v11 = vpack.c.bf16 %v7965_v33, %v7964_v61  ;;  %v7322_v47 = vpack.c.bf16 %v17967_v36, %v17960_v10  ;;  %v6716_v41 = vld [vmem:[#allocation3 + $0x41] sm:$0xff]  ;;  %v6683_v37 = vld [vmem:[#allocation3 + $0x38] sm:$0xff]  ;;  %v6992_v14 = vpack.c.bf16 %v6983_v45, %v6982_v0 }
 0x611   : > { %14064 = vmatprep.mubr.msk.bf16.mxu1 %vm15850_vm0, %v17740_v59  ;;  %14081 = vmatpush3.bf16.msra.mxu1 %v15581_v4  ;;  %v6689_v32 = vpack.c.bf16 %v6683_v37, %v6682_v6  ;;  %v6684_v19 = vld [vmem:[#allocation3 + $0x40] sm:$0xff]  ;;  %v15591_v4 = vld [vmem:[%s19631_s1 + $0x540] sm:$0xff]   ;;  %v15605_v6 = vld [vmem:[%s19631_s1 + $0x5b0] sm:$0xff]  }
 0x612   : > { %14345 = vmatmul.mubr.bf16.gmra.mrb[44].mxu0 %v7972_v11  ;;  %14082 = vmatprep.subr.bf16.mxu1 %v17740_v59  ;;  %v15592_v61 = vld [vmem:[%s19631_s1 + $0x548] sm:$0xff]   ;;  %v6984_v11 = vld [vmem:[#allocation3 + $0x12] sm:$0xff]  ;;  %v15617_v36 = vld [vmem:[%s19631_s1 + $0x610] sm:$0xff]  }
 0x613   : > { %14348 = vmatprep.mubr.msk.bf16.mxu0 %vm15850_vm0, %v17740_v59  ;;  %v6985_v33 = vld [vmem:[#allocation3 + $0x1a] sm:$0xff]  ;;  %v6990_v15 = vld [vmem:[#allocation3 + $0x42] sm:$0xff] }
 0x614   : > { %v15604_v37 = vld [vmem:[%s19631_s1 + $0x5a8] sm:$0xff]  }
 0x615   : > { %v6717_v49 = vld [vmem:[#allocation3 + $0x49] sm:$0xff]  ;;  %14083 = vmatpush3.bf16.msra.mxu1 %v15582_v60  ;;  %v18184_v10 = vld [vmem:[#allocation3 + $0x1c] sm:$0xff] }
 0x616   : > { %v6722_v43 = vpack.c.bf16 %v6717_v49, %v6716_v41  ;;  %14104 = vmatprep.subr.bf16.mxu1 %v17740_v59  ;;  %v7966_v54 = vld [vmem:[#allocation3 + $0x46] sm:$0xff]  ;;  %v6993_v41 = vpack.c.bf16 %v6985_v33, %v6984_v11  ;;  %v15594_v49 = vld [vmem:[%s19631_s1 + $0x558] sm:$0xff]  }
 0x617   : > { %v7967_v27 = vld [vmem:[#allocation3 + $0x4e] sm:$0xff]  ;;  %v7968_v44 = vld [vmem:[#allocation3 + $0x56] sm:$0xff] }
 0x618   : > { %14065 = vmatmul.mubr.bf16.gmra.mrb[196].mxu1 %v6722_v43  ;;  %v7973_v1 = vpack.c.bf16 %v7967_v27, %v7966_v54  ;;  %v7974_v56 = vpack.c.bf16 %v7969_v63, %v7968_v44  ;;  %v6685_v31 = vld [vmem:[#allocation3 + $0x48] sm:$0xff]  ;;  %v15595_v27 = vld [vmem:[%s19631_s1 + $0x560] sm:$0xff]  }
 0x619   : > { %14084 = vmatprep.mubr.msk.bf16.mxu1 %vm15850_vm0, %v17740_v59  ;;  %v6690_v29 = vpack.c.bf16 %v6685_v31, %v6684_v19  ;;  %v15593_v60 = vld [vmem:[%s19631_s1 + $0x550] sm:$0xff]   ;;  %v6988_v44 = vld [vmem:[#allocation3 + $0x32] sm:$0xff] }
 0x61a   : > { %14349 = vmatmul.mubr.bf16.gmra.mrb[48].mxu0 %v7973_v1  ;;  %v6987_v43 = vld [vmem:[#allocation3 + $0x2a] sm:$0xff]  ;;  %v6986_v54 = vld [vmem:[#allocation3 + $0x22] sm:$0xff] }
 0x61b   : > { %14352 = vmatprep.mubr.msk.bf16.mxu0 %vm15850_vm0, %v17740_v59  ;;  %v6994_v1 = vpack.c.bf16 %v6987_v43, %v6986_v54  ;;  %v15597_v63 = vld [vmem:[%s19631_s1 + $0x570] sm:$0xff]   ;;  %v7156_v35 = vpack.c.bf16 %v6986_v54, %v6985_v33 }
 0x61c   : > { %v7308_v19 = vld [vmem:[#allocation3 + $0xb] sm:$0xff] }
 0x61d   : > { %v7318_v0 = vpack.c.bf16 %v17751_v16, %v7308_v19  ;;  %v15610_v16 = vld [vmem:[%s19631_s1 + $0x5d8] sm:$0xff]  }
 0x620   : > { %14085 = vmatmul.mubr.bf16.vlgmr.msra.gmra.mrb[200].mxu1 %v6686_v30 }
 0x621   : > { %14105 = vmatpush3.bf16.msra.mxu1 %v15583_v62  ;;  %14088 = vmatprep.mubr.msk.bf16.mxu1 %vm15850_vm0, %v17740_v59  ;;  %v6989_v62 = vld [vmem:[#allocation3 + $0x3a] sm:$0xff] }
 0x622   : > { %14353 = vmatmul.mubr.bf16.gmra.mrb[52].mxu0 %v7974_v56  ;;  %14106 = vmatprep.subr.bf16.mxu1 %v17740_v59  ;;  %v6995_v30 = vpack.c.bf16 %v6989_v62, %v6988_v44  ;;  %v15598_v56 = vld [vmem:[%s19631_s1 + $0x578] sm:$0xff]  }
 0x623   : > { %14408 = vmatprep.mubr.msk.bf16.mxu0 %vm15850_vm0, %v17740_v59 }
 0x625   : > { %14107 = vmatpush3.bf16.msra.mxu1 %v15584_v53  ;;  %v6991_v53 = vld [vmem:[#allocation3 + $0x4a] sm:$0xff] }
 0x626   : > { %14108 = vmatprep.subr.bf16.mxu1 %v17740_v59  ;;  %v6996_v12 = vpack.c.bf16 %v6991_v53, %v6990_v15 }
 0x628   : > { %14089 = vmatmul.mubr.bf16.gmra.mrb[204].mxu1 %v6687_v38  ;;  %v7155_v38 = vpack.c.bf16 %v6984_v11, %v6983_v45  ;;  %v15608_v45 = vld [vmem:[%s19631_s1 + $0x5c8] sm:$0xff]   ;;  %v18200_v11 = vld [vmem:[#allocation3 + $0x34] sm:$0xff] }
 0x629   : > { %14109 = vmatpush3.bf16.msra.mxu1 %v15585_v21  ;;  %14092 = vmatprep.mubr.msk.bf16.mxu1 %vm15850_vm0, %v17740_v59  ;;  %v15599_v21 = vld [vmem:[%s19631_s1 + $0x580] sm:$0xff]  }
 0x62a   : > { %14110 = vmatprep.subr.bf16.mxu1 %v17740_v59 }
 0x62d   : > { %14111 = vmatpush3.bf16.msra.mxu1 %v15586_v58  ;;  %v15600_v58 = vld [vmem:[%s19631_s1 + $0x588] sm:$0xff]  }
 0x62e   : > { %14112 = vmatprep.subr.bf16.mxu1 %v17740_v59 }
 0x630   : > { %14093 = vmatmul.mubr.bf16.gmra.mrb[208].mxu1 %v6688_v42  ;;  %v15603_v42 = vld [vmem:[%s19631_s1 + $0x5a0] sm:$0xff]  }
 0x631   : > { %14113 = vmatpush3.bf16.msra.mxu1 %v15587_v25  ;;  %14096 = vmatprep.mubr.msk.bf16.mxu1 %vm15850_vm0, %v17740_v59  ;;  %v15602_v25 = vld [vmem:[%s19631_s1 + $0x598] sm:$0xff]  }
 0x632   : > { %14114 = vmatprep.subr.bf16.mxu1 %v17740_v59 }
 0x635   : > { %14115 = vmatpush3.bf16.msra.mxu1 %v15588_v51  ;;  %v7157_v51 = vpack.c.bf16 %v6988_v44, %v6987_v43  ;;  %v15619_v43 = vld [vmem:[%s19631_s1 + $0x620] sm:$0xff]  }
 0x636   : > { %14116 = vmatprep.subr.bf16.mxu1 %v17740_v59 }
 0x638   : > { %14097 = vmatmul.mubr.bf16.gmra.mrb[212].mxu1 %v6689_v32  ;;  %v15606_v32 = vld [vmem:[%s19631_s1 + $0x5b8] sm:$0xff]  }
 0x639   : > { %14100 = vmatprep.mubr.msk.bf16.mxu1 %vm15850_vm0, %v17740_v59  ;;  %14117 = vmatpush3.bf16.msra.mxu1 %v15589_v20  ;;  %v7158_v20 = vpack.c.bf16 %v6990_v15, %v6989_v62  ;;  %v18220_v62 = vld [vmem:[#allocation3 + $0x44] sm:$0xff] }
 0x63a   : > { %14118 = vmatprep.subr.bf16.mxu1 %v17740_v59 }
 0x63d   : > { %14119 = vmatpush3.bf16.msra.mxu1 %v15590_v28  ;;  %v7154_v28 = vld [vmem:[#allocation3 + $0x52] sm:$0xff] }
 0x63e   : > { %14140 = vmatprep.subr.bf16.mxu1 %v17740_v59  ;;  %v7159_v31 = vpack.c.bf16 %v7154_v28, %v6991_v53  ;;  %v15621_v53 = vld [vmem:[%s19631_s1 + $0x630] sm:$0xff]  }
 0x640   : > { %14101 = vmatmul.mubr.bf16.gmra.mrb[216].mxu1 %v6690_v29  ;;  %v15607_v29 = vld [vmem:[%s19631_s1 + $0x5c0] sm:$0xff]  }
 0x641   : > { %14120 = vmatprep.mubr.msk.bf16.mxu1 %vm15850_vm0, %v17740_v59 }
 0x648   : > { %14121 = vmatmul.mubr.bf16.vlgmr.msra.gmra.mrb[220].mxu1 %v6992_v14  ;;  %v15611_v14 = vld [vmem:[%s19631_s1 + $0x5e0] sm:$0xff]  }
 0x649   : > { %14141 = vmatpush3.bf16.msra.mxu1 %v15591_v4  ;;  %14124 = vmatprep.mubr.msk.bf16.mxu1 %vm15850_vm0, %v17740_v59  ;;  %v15609_v4 = vld [vmem:[%s19631_s1 + $0x5d0] sm:$0xff]  }
 0x64a   : > { %14142 = vmatprep.subr.bf16.mxu1 %v17740_v59 }
 0x64d   : > { %14143 = vmatpush3.bf16.msra.mxu1 %v15592_v61  ;;  %v15618_v61 = vld [vmem:[%s19631_s1 + $0x618] sm:$0xff]  }
 0x64e   : > { %14144 = vmatprep.subr.bf16.mxu1 %v17740_v59 }
 0x650   : > { %14125 = vmatmul.mubr.bf16.gmra.mrb[224].mxu1 %v6993_v41 }
 0x651   : > { %14145 = vmatpush3.bf16.msra.mxu1 %v15593_v60  ;;  %14128 = vmatprep.mubr.msk.bf16.mxu1 %vm15850_vm0, %v17740_v59 }
 0x652   : > { %14146 = vmatprep.subr.bf16.mxu1 %v17740_v59 }
 0x655   : > { %14147 = vmatpush3.bf16.msra.mxu1 %v15594_v49  ;;  %v18204_v49 = vld [vmem:[#allocation3 + $0x2c] sm:$0xff] }
 0x656   : > { %14148 = vmatprep.subr.bf16.mxu1 %v17740_v59 }
 0x658   : > { %14129 = vmatmul.mubr.bf16.gmra.mrb[228].mxu1 %v6994_v1  ;;  %v15620_v1 = vld [vmem:[%s19631_s1 + $0x628] sm:$0xff]  }
 0x659   : > { %14149 = vmatpush3.bf16.msra.mxu1 %v15595_v27  ;;  %14132 = vmatprep.mubr.msk.bf16.mxu1 %vm15850_vm0, %v17740_v59  ;;  %v7483_v27 = vpack.c.bf16 %v18200_v11, %v18204_v49 }
 0x65a   : > { %14150 = vmatprep.subr.bf16.mxu1 %v17740_v59 }
 0x65d   : > { %14151 = vmatpush3.bf16.msra.mxu1 %v15596_v7 }
 0x65e   : > { %14152 = vmatprep.subr.bf16.mxu1 %v17740_v59 }
 0x660   : > { %14133 = vmatmul.mubr.bf16.gmra.mrb[232].mxu1 %v6995_v30 }
 0x661   : > { %14136 = vmatprep.mubr.msk.bf16.mxu1 %vm15850_vm0, %v17740_v59  ;;  %14153 = vmatpush3.bf16.msra.mxu1 %v15597_v63 }
 0x662   : > { %14154 = vmatprep.subr.bf16.mxu1 %v17740_v59 }
 0x665   : > { %14155 = vmatpush3.bf16.msra.mxu1 %v15598_v56  ;;  %v18226_v56 = vld [vmem:[#allocation3 + $0x3c] sm:$0xff] }
 0x666   : > { %14176 = vmatprep.subr.bf16.mxu1 %v17740_v59 }
 0x668   : > { %14137 = vmatmul.mubr.bf16.gmra.mrb[236].mxu1 %v6996_v12 }
 0x669   : > { %14156 = vmatprep.mubr.msk.bf16.mxu1 %vm15850_vm0, %v17740_v59 }
 0x670   : > { %14157 = vmatmul.mubr.bf16.vlgmr.msra.gmra.mrb[240].mxu1 %v7155_v38 }
 0x671   : > { %14177 = vmatpush3.bf16.msra.mxu1 %v15599_v21  ;;  %14160 = vmatprep.mubr.msk.bf16.mxu1 %vm15850_vm0, %v17740_v59  ;;  %v7484_v21 = vpack.c.bf16 %v18220_v62, %v18226_v56 }
 0x672   : > { %14178 = vmatprep.subr.bf16.mxu1 %v17740_v59 }
 0x675   : > { %14179 = vmatpush3.bf16.msra.mxu1 %v15600_v58 }
 0x676   : > { %14180 = vmatprep.subr.bf16.mxu1 %v17740_v59 }
 0x678   : > { %14161 = vmatmul.mubr.bf16.gmra.mrb[244].mxu1 %v7156_v35 }
 0x679   : > { %14181 = vmatpush3.bf16.msra.mxu1 %v15601_v24  ;;  %14164 = vmatprep.mubr.msk.bf16.mxu1 %vm15850_vm0, %v17740_v59  ;;  %v15622_v24 = vld [vmem:[%s19631_s1 + $0x638] sm:$0xff]  }
 0x67a   : > { %14182 = vmatprep.subr.bf16.mxu1 %v17740_v59 }
 0x67d   : > { %14183 = vmatpush3.bf16.msra.mxu1 %v15602_v25  ;;  %v18244_v25 = vld [vmem:[#allocation3 + $0x4c] sm:$0xff] }
 0x67e   : > { %14184 = vmatprep.subr.bf16.mxu1 %v17740_v59 }
 0x680   : > { %14165 = vmatmul.mubr.bf16.gmra.mrb[248].mxu1 %v7157_v51 }
 0x681   : > { %14185 = vmatpush3.bf16.msra.mxu1 %v15603_v42  ;;  %14168 = vmatprep.mubr.msk.bf16.mxu1 %vm15850_vm0, %v17740_v59  ;;  %v18246_v42 = vld [vmem:[#allocation3 + $0x54] sm:$0xff] }
 0x682   : > { %14186 = vmatprep.subr.bf16.mxu1 %v17740_v59  ;;  %v7485_v28 = vpack.c.bf16 %v18246_v42, %v18244_v25 }
 0x685   : > { %14187 = vmatpush3.bf16.msra.mxu1 %v15604_v37 }
 0x686   : > { %14188 = vmatprep.subr.bf16.mxu1 %v17740_v59 }
 0x688   : > { %14169 = vmatmul.mubr.bf16.gmra.mrb[252].mxu1 %v7158_v20 }
 0x689   : > { %14172 = vmatprep.mubr.msk.bf16.mxu1 %vm15850_vm0, %v17740_v59  ;;  %14189 = vmatpush3.bf16.msra.mxu1 %v15605_v6 }
 0x68a   : > { %14190 = vmatprep.subr.bf16.mxu1 %v17740_v59 }
 0x68d   : > { %14191 = vmatpush3.bf16.msra.mxu1 %v15606_v32 }
 0x68e   : > { %14212 = vmatprep.subr.bf16.mxu1 %v17740_v59 }
 0x690   : > { %14173 = vmatmul.mubr.bf16.gmra.mrb[0].mxu1 %v7159_v31 }
 0x691   : > { %14192 = vmatprep.mubr.msk.bf16.mxu1 %vm15850_vm0, %v17740_v59 }
 0x698   : > { %14193 = vmatmul.mubr.bf16.vlgmr.msra.gmra.mrb[4].mxu1 %v7318_v0 }
 0x699   : > { %14213 = vmatpush3.bf16.msra.mxu1 %v15607_v29  ;;  %14196 = vmatprep.mubr.msk.bf16.mxu1 %vm15850_vm0, %v17740_v59 }
 0x69a   : > { %14214 = vmatprep.subr.bf16.mxu1 %v17740_v59 }
 0x69d   : > { %14215 = vmatpush3.bf16.msra.mxu1 %v15608_v45 }
 0x69e   : > { %14216 = vmatprep.subr.bf16.mxu1 %v17740_v59 }
 0x6a0   : > { %14197 = vmatmul.mubr.bf16.gmra.mrb[8].mxu1 %v7319_v8  ;;  %v15614_v8 = vld [vmem:[%s19631_s1 + $0x5f8] sm:$0xff]  }
 0x6a1   : > { %14217 = vmatpush3.bf16.msra.mxu1 %v15609_v4  ;;  %14200 = vmatprep.mubr.msk.bf16.mxu1 %vm15850_vm0, %v17740_v59 }
 0x6a2   : > { %14218 = vmatprep.subr.bf16.mxu1 %v17740_v59 }
 0x6a5   : > { %14219 = vmatpush3.bf16.msra.mxu1 %v15610_v16  ;;  %v15623_v16 = vld [vmem:[%s19631_s1 + $0x640] sm:$0xff]  }
 0x6a6   : > { %14220 = vmatprep.subr.bf16.mxu1 %v17740_v59 }
 0x6a8   : > { %14201 = vmatmul.mubr.bf16.gmra.mrb[12].mxu1 %v7320_v34  ;;  %v15615_v34 = vld [vmem:[%s19631_s1 + $0x600] sm:$0xff]  }
 0x6a9   : > { %14221 = vmatpush3.bf16.msra.mxu1 %v15611_v14  ;;  %14204 = vmatprep.mubr.msk.bf16.mxu1 %vm15850_vm0, %v17740_v59 }
 0x6aa   : > { %14222 = vmatprep.subr.bf16.mxu1 %v17740_v59 }
 0x6ad   : > { %14223 = vmatpush3.bf16.msra.mxu1 %v15612_v23 }
 0x6ae   : > { %14224 = vmatprep.subr.bf16.mxu1 %v17740_v59 }
 0x6b0   : > { %14205 = vmatmul.mubr.bf16.gmra.mrb[16].mxu1 %v7321_v3  ;;  %v18182_v3 = vld [vmem:[#allocation3 + $0x24] sm:$0xff] }
 0x6b1   : > { %14208 = vmatprep.mubr.msk.bf16.mxu1 %vm15850_vm0, %v17740_v59  ;;  %14225 = vmatpush3.bf16.msra.mxu1 %v15613_v40  ;;  %v7644_v40 = vpack.c.bf16 %v18184_v10, %v18170_v39 }
 0x6b2   : > { %14226 = vmatprep.subr.bf16.mxu1 %v17740_v59 }
 0x6b5   : > { %14227 = vmatpush3.bf16.msra.mxu1 %v15614_v8 }
 0x6b6   : > { %14248 = vmatprep.subr.bf16.mxu1 %v17740_v59 }
 0x6b8   : > { %14209 = vmatmul.mubr.bf16.gmra.mrb[20].mxu1 %v7322_v47  ;;  %v7482_v47 = vpack.c.bf16 %v18182_v3, %v18184_v10  ;;  %v15625_v10 = vld [vmem:[%s19631_s1 + $0x650] sm:$0xff]  }
 0x6b9   : > { %14228 = vmatprep.mubr.msk.bf16.mxu1 %vm15850_vm0, %v17740_v59 }
 0x6c0   : > { %14229 = vmatmul.mubr.bf16.vlgmr.msra.gmra.mrb[24].mxu1 %v7481_v48 }
 0x6c1   : > { %14249 = vmatpush3.bf16.msra.mxu1 %v15615_v34  ;;  %14232 = vmatprep.mubr.msk.bf16.mxu1 %vm15850_vm0, %v17740_v59  ;;  %v15624_v34 = vld [vmem:[%s19631_s1 + $0x648] sm:$0xff]  }
 0x6c2   : > { %14250 = vmatprep.subr.bf16.mxu1 %v17740_v59 }
 0x6c5   : > { %14251 = vmatpush3.bf16.msra.mxu1 %v15616_v52 }
 0x6c6   : > { %14252 = vmatprep.subr.bf16.mxu1 %v17740_v59 }
 0x6c8   : > { %14233 = vmatmul.mubr.bf16.gmra.mrb[28].mxu1 %v7482_v47 }
 0x6c9   : > { %14253 = vmatpush3.bf16.msra.mxu1 %v15617_v36  ;;  %14236 = vmatprep.mubr.msk.bf16.mxu1 %vm15850_vm0, %v17740_v59 }
 0x6ca   : > { %14254 = vmatprep.subr.bf16.mxu1 %v17740_v59 }
 0x6cb   : > { %v18198_v33 = vpop.f32.mrb[180].mxu1 }
 0x6cc   : > { %v14050_v60 = vpop.f32.mrb[181].mxu1 }
 0x6cd   : > { %v18202_v41 = vpop.f32.mrb[182].mxu1  ;;  %14255 = vmatpush3.bf16.msra.mxu1 %v15618_v61  ;;  %v7645_v60 = vpack.c.bf16 %v18204_v49, %v18182_v3 }
 0x6ce   : > { %v14051_v54 = vpop.f32.mrb[183].mxu1  ;;  %14256 = vmatprep.subr.bf16.mxu1 %v17740_v59 }
 0x6d0   : > { %14237 = vmatmul.mubr.bf16.gmra.mrb[32].mxu1 %v7483_v27  ;;  %v15626_v27 = vld [vmem:[%s19631_s1 + $0x658] sm:$0xff]  }
 0x6d1   : > { %14257 = vmatpush3.bf16.msra.mxu1 %v15619_v43  ;;  %14240 = vmatprep.mubr.msk.bf16.mxu1 %vm15850_vm0, %v17740_v59 }
 0x6d2   : > { %14258 = vmatprep.subr.bf16.mxu1 %v17740_v59 }
 0x6d3   : > { %v18218_v7 = vpop.f32.mrb[184].mxu1 }
 0x6d4   : > { %v14054_v44 = vpop.f32.mrb[185].mxu1 }
 0x6d5   : > { %v18222_v63 = vpop.f32.mrb[186].mxu1  ;;  %v18224_v30 = vpop.f32.mrb[36].mxu0  ;;  %14259 = vmatpush3.bf16.msra.mxu1 %v15620_v1 }
 0x6d6   : > { %v14055_v15 = vpop.f32.mrb[187].mxu1  ;;  %v14338_v12 = vpop.f32.mrb[37].mxu0  ;;  %14260 = vmatprep.subr.bf16.mxu1 %v17740_v59 }
 0x6d7   : > { %v18234_v38 = vpop.f32.mrb[38].mxu0  ;;  %v15627_v15 = vld [vmem:[%s19631_s1 + $0x660] sm:$0xff]  }
 0x6d8   : > { %14241 = vmatmul.mubr.bf16.gmra.mrb[36].mxu1 %v7484_v21  ;;  %v14339_v58 = vpop.f32.mrb[39].mxu0 }
 0x6d9   : > { %14244 = vmatprep.mubr.msk.bf16.mxu1 %vm15850_vm0, %v17740_v59  ;;  %14261 = vmatpush3.bf16.msra.mxu1 %v15621_v53 }
 0x6da   : > { %14262 = vmatprep.subr.bf16.mxu1 %v17740_v59 }
 0x6db   : > { %v18242_v35 = vpop.f32.mrb[188].mxu1 }
 0x6dc   : > { %v14058_v51 = vpop.f32.mrb[189].mxu1 }
 0x6dd   : > { %v18248_v37 = vpop.f32.mrb[190].mxu1  ;;  %v18250_v6 = vpop.f32.mrb[40].mxu0  ;;  %14263 = vmatpush3.bf16.msra.mxu1 %v15622_v24  ;;  %v7646_v24 = vpack.c.bf16 %v18226_v56, %v18200_v11 }
 0x6de   : > { %v14059_v20 = vpop.f32.mrb[191].mxu1  ;;  %v14342_v32 = vpop.f32.mrb[41].mxu0  ;;  %14284 = vmatprep.subr.bf16.mxu1 %v17740_v59 }
 0x6df   : > { %v18255_v31 = vpop.f32.mrb[42].mxu0 }
 0x6e0   : > { %14245 = vmatmul.mubr.bf16.gmra.mrb[40].mxu1 %v7485_v28  ;;  %v14343_v19 = vpop.f32.mrb[43].mxu0  ;;  %v15629_v28 = vld [vmem:[%s19631_s1 + $0x670] sm:$0xff]  }
 0x6e1   : > { %14264 = vmatprep.mubr.msk.bf16.mxu1 %vm15850_vm0, %v17740_v59 }
 0x6e3   : > { %v18259_v29 = vpop.f32.mrb[192].mxu1 }
 0x6e4   : > { %v14062_v0 = vpop.f32.mrb[193].mxu1 }
 0x6e5   : > { %v18261_v45 = vpop.f32.mrb[194].mxu1  ;;  %v18263_v4 = vpop.f32.mrb[44].mxu0 }
 0x6e6   : > { %v14063_v14 = vpop.f32.mrb[195].mxu1  ;;  %v14346_v23 = vpop.f32.mrb[45].mxu0 }
 0x6e7   : > { %v18270_v8 = vpop.f32.mrb[46].mxu0  ;;  %v7643_v23 = vld [vmem:[#allocation3 + $0x5c] sm:$0xff] }
 0x6e8   : > { %14265 = vmatmul.mubr.bf16.vlgmr.msra.gmra.mrb[44].mxu1 %v7644_v40  ;;  %v14347_v17 = vpop.f32.mrb[47].mxu0 }
 0x6e9   : > { %14285 = vmatpush3.bf16.msra.mxu1 %v15623_v16  ;;  %14268 = vmatprep.mubr.msk.bf16.mxu1 %vm15850_vm0, %v17740_v59  ;;  %v7647_v16 = vpack.c.bf16 %v18244_v25, %v18220_v62 }
 0x6ea   : > { %14286 = vmatprep.subr.bf16.mxu1 %v17740_v59 }
 0x6eb   : > { %v18278_v48 = vpop.f32.mrb[196].mxu1 }
 0x6ec   : > { %v14066_v52 = vpop.f32.mrb[197].mxu1 }
 0x6ed   : > { %v18280_v36 = vpop.f32.mrb[198].mxu1  ;;  %v18282_v39 = vpop.f32.mrb[48].mxu0  ;;  %14287 = vmatpush3.bf16.msra.mxu1 %v15624_v34  ;;  %v7648_v34 = vpack.c.bf16 %v7643_v23, %v18246_v42  ;;  %v18337_v52 = vld [vmem:[#allocation2] sm:$0xff] }
 0x6ee   : > { %v14067_v47 = vpop.f32.mrb[199].mxu1  ;;  %v14350_v61 = vpop.f32.mrb[49].mxu0  ;;  %14288 = vmatprep.subr.bf16.mxu1 %v17740_v59 }
 0x6ef   : > { %v18290_v43 = vpop.f32.mrb[50].mxu0 }
 0x6f0   : > { %14269 = vmatmul.mubr.bf16.gmra.mrb[48].mxu1 %v7645_v60  ;;  %v14351_v54 = vpop.f32.mrb[51].mxu0  ;;  %v7797_v60 = vld [vmem:[#allocation3 + $0x15] sm:$0xff] }
 0x6f1   : > { %14289 = vmatpush3.bf16.msra.mxu1 %v15625_v10  ;;  %14272 = vmatprep.mubr.msk.bf16.mxu1 %vm15850_vm0, %v17740_v59  ;;  %v7798_v10 = vld [vmem:[#allocation3 + $0x1d] sm:$0xff] }
 0x6f2   : > { %14290 = vmatprep.subr.bf16.mxu1 %v17740_v59 }
 0x6f3   : > { %v6943_v1 = vpop.f32.mrb[200].mxu1 }
 0x6f4   : > { %v18299_v44 = vadd.f32 %v6943_v1, %v18198_v33  ;;  %v14086_v3 = vpop.f32.mrb[201].mxu1  ;;  %v7800_v1 = vld [vmem:[#allocation3 + $0x2d] sm:$0xff] }
 0x6f5   : > { %v6946_v49 = vpop.f32.mrb[202].mxu1  ;;  %v18301_v53 = vpop.f32.mrb[52].mxu0  ;;  %14291 = vmatpush3.bf16.msra.mxu1 %v15626_v27  ;;  %v7807_v27 = vpack.c.bf16 %v7798_v10, %v7797_v60 }
 0x6f6   : > { %v18307_v12 = vadd.f32 %v6946_v49, %v18202_v41  ;;  %v14087_v21 = vpop.f32.mrb[203].mxu1  ;;  %v14354_v58 = vpop.f32.mrb[53].mxu0  ;;  %14292 = vmatprep.subr.bf16.mxu1 %v17740_v59  ;;  %v15628_v41 = vld [vmem:[%s19631_s1 + $0x668] sm:$0xff]  }
 0x6f7   : > { %v18312_v33 = vpop.f32.mrb[54].mxu0  ;;  %v7799_v21 = vld [vmem:[#allocation3 + $0x25] sm:$0xff] }
 0x6f8   : > { %14273 = vmatmul.mubr.bf16.gmra.mrb[52].mxu1 %v7646_v24  ;;  %v14355_v51 = vpop.f32.mrb[55].mxu0  ;;  %v7808_v24 = vpack.c.bf16 %v7800_v1, %v7799_v21 }
 0x6f9   : > { %14293 = vmatpush3.bf16.msra.mxu1 %v15627_v15  ;;  %14276 = vmatprep.mubr.msk.bf16.mxu1 %vm15850_vm0, %v17740_v59  ;;  %v7802_v51 = vld [vmem:[#allocation3 + $0x3d] sm:$0xff] }
 0x6fa   : > { %14294 = vmatprep.subr.bf16.mxu1 %v17740_v59 }
 0x6fb   : > { %v6951_v20 = vpop.f32.mrb[204].mxu1 }
 0x6fc   : > { %v6952_v32 = vadd.f32 %v6951_v20, %v18218_v7  ;;  %v14090_v11 = vpop.f32.mrb[205].mxu1  ;;  %v15630_v7 = vld [vmem:[%s19631_s1 + $0x678] sm:$0xff]  }
 0x6fd   : > { %v6954_v56 = vpop.f32.mrb[206].mxu1  ;;  %14295 = vmatpush3.bf16.msra.mxu1 %v15628_v41 }
 0x6fe   : > { %v6955_v19 = vadd.f32 %v6954_v56, %v18222_v63  ;;  %v14091_v0 = vpop.f32.mrb[207].mxu1  ;;  %14296 = vmatprep.subr.bf16.mxu1 %v17740_v59  ;;  %v7801_v56 = vld [vmem:[#allocation3 + $0x35] sm:$0xff] }
 0x6ff   : > { %v7809_v0 = vpack.c.bf16 %v7802_v51, %v7801_v56 }
 0x700   : > { %14277 = vmatmul.mubr.bf16.gmra.mrb[56].mxu1 %v7647_v16  ;;  %v7804_v16 = vld [vmem:[#allocation3 + $0x4d] sm:$0xff] }
 0x701   : > { %14280 = vmatprep.mubr.msk.bf16.mxu1 %vm15850_vm0, %v17740_v59  ;;  %14297 = vmatpush3.bf16.msra.mxu1 %v15629_v28 }
 0x702   : > { %14298 = vmatprep.subr.bf16.mxu1 %v17740_v59 }
 0x703   : > { %v6959_v14 = vpop.f32.mrb[208].mxu1 }
 0x704   : > { %v6960_v63 = vadd.f32 %v6959_v14, %v18242_v35  ;;  %v14094_v40 = vpop.f32.mrb[209].mxu1 }
 0x705   : > { %v6962_v17 = vpop.f32.mrb[210].mxu1  ;;  %14299 = vmatpush3.bf16.msra.mxu1 %v15630_v7  ;;  %v7803_v40 = vld [vmem:[#allocation3 + $0x45] sm:$0xff] }
 0x706   : > { %v6963_v62 = vadd.f32 %v6962_v17, %v18248_v37  ;;  %v14095_v25 = vpop.f32.mrb[211].mxu1  ;;  %14356 = vmatprep.subr.bf16.mxu1 %v18337_v52 }
 0x708   : > { %14281 = vmatmul.mubr.bf16.gmra.mrb[60].mxu1 %v7648_v34  ;;  %v7805_v34 = vld [vmem:[#allocation3 + $0x55] sm:$0xff] }
 0x709   : > { %14300 = vmatprep.mubr.msk.bf16.mxu1 %vm15850_vm0, %v18337_v52 }
 0x70b   : > { %v6967_v59 = vpop.f32.mrb[212].mxu1 }
 0x70c   : > { %v6968_v35 = vadd.f32 %v6967_v59, %v18259_v29  ;;  %v14098_v47 = vpop.f32.mrb[213].mxu1  ;;  %v7806_v59 = vld [vmem:[#allocation3 + $0x5d] sm:$0xff] }
 0x70d   : > { %v6970_v61 = vpop.f32.mrb[214].mxu1 }
 0x70e   : > { %v6971_v37 = vadd.f32 %v6970_v61, %v18261_v45  ;;  %v14099_v54 = vpop.f32.mrb[215].mxu1 }
 0x710   : > { %14301 = vmatmul.mubr.bf16.vlgmr.msra.gmra.mrb[64].mxu1 %v7807_v27  ;;  %v7811_v27 = vpack.c.bf16 %v7806_v59, %v7805_v34 }
 0x711   : > { %14304 = vmatprep.mubr.msk.bf16.mxu1 %vm15850_vm0, %v18337_v52 }
 0x713   : > { %v6975_v42 = vpop.f32.mrb[216].mxu1 }
 0x714   : > { %v6976_v3 = vadd.f32 %v6975_v42, %v18278_v48  ;;  %v14102_v49 = vpop.f32.mrb[217].mxu1 }
 0x715   : > { %v6978_v15 = vpop.f32.mrb[218].mxu1 }
 0x716   : > { %v6979_v29 = vadd.f32 %v6978_v15, %v18280_v36  ;;  %v14103_v58 = vpop.f32.mrb[219].mxu1 }
 0x718   : > { %14305 = vmatmul.mubr.bf16.gmra.mrb[68].mxu1 %v7808_v24 }
 0x719   : > { %14308 = vmatprep.mubr.msk.bf16.mxu1 %vm15850_vm0, %v18337_v52 }
 0x71b   : > { %v7096_v45 = vpop.f32.mrb[220].mxu1 }
 0x71c   : > { %v7135_v41 = vadd.f32 %v7096_v45, %v18299_v44  ;;  %v14122_v20 = vpop.f32.mrb[221].mxu1  ;;  %v7810_v44 = vpack.c.bf16 %v7804_v16, %v7803_v40 }
 0x71d   : > { %v7099_v11 = vpop.f32.mrb[222].mxu1 }
 0x71e   : > { %v7136_v48 = vadd.f32 %v7099_v11, %v18307_v12  ;;  %v14123_v28 = vpop.f32.mrb[223].mxu1 }
 0x720   : > { %14309 = vmatmul.mubr.bf16.gmra.mrb[72].mxu1 %v7809_v0 }
 0x721   : > { %14312 = vmatprep.mubr.msk.bf16.mxu1 %vm15850_vm0, %v18337_v52 }
 0x723   : > { %v7104_v36 = vpop.f32.mrb[224].mxu1 }
 0x724   : > { %v7137_v7 = vadd.f32 %v7104_v36, %v6952_v32  ;;  %v14126_v14 = vpop.f32.mrb[225].mxu1 }
 0x725   : > { %v7107_v23 = vpop.f32.mrb[226].mxu1 }
 0x726   : > { %v7138_v17 = vadd.f32 %v7107_v23, %v6955_v19  ;;  %v14127_v25 = vpop.f32.mrb[227].mxu1 }
 0x728   : > { %14313 = vmatmul.mubr.bf16.gmra.mrb[76].mxu1 %v7810_v44 }
 0x729   : > { %14316 = vmatprep.mubr.msk.bf16.mxu1 %vm15850_vm0, %v18337_v52 }
 0x72b   : > { %v7112_v12 = vpop.f32.mrb[228].mxu1 }
 0x72c   : > { %v7139_v10 = vadd.f32 %v7112_v12, %v6960_v63  ;;  %v14130_v47 = vpop.f32.mrb[229].mxu1 }
 0x72d   : > { %v7115_v61 = vpop.f32.mrb[230].mxu1 }
 0x72e   : > { %v7140_v60 = vadd.f32 %v7115_v61, %v6963_v62  ;;  %v14131_v54 = vpop.f32.mrb[231].mxu1 }
 0x72f   : > { %v15635_v54 = vld [vmem:[%s19631_s1 + $0x6c8] sm:$0xff]  }
 0x730   : > { %14317 = vmatmul.mubr.bf16.gmra.mrb[80].mxu1 %v7811_v27  ;;  %v15636_v27 = vld [vmem:[%s19631_s1 + $0x718] sm:$0xff]  }
 0x731   : > { %14372 = vmatprep.mubr.msk.bf16.mxu1 %vm15850_vm0, %v18337_v52 }
 0x733   : > { %v7120_v32 = vpop.f32.mrb[232].mxu1 }
 0x734   : > { %v7141_v19 = vadd.f32 %v7120_v32, %v6968_v35  ;;  %v14134_v42 = vpop.f32.mrb[233].mxu1  ;;  %v15637_v32 = vld [vmem:[%s19631_s1 + $0x6d0] sm:$0xff]  }
 0x735   : > { %v7123_v1 = vpop.f32.mrb[234].mxu1 }
 0x736   : > { %v7142_v49 = vadd.f32 %v7123_v1, %v6971_v37  ;;  %v14135_v15 = vpop.f32.mrb[235].mxu1  ;;  %v15631_v37 = vld [vmem:[%s19631_s1 + $0x700] sm:$0xff]  }
 0x737   : > { %14357 = vmatpush3.bf16.msra.mxu1 %v15631_v37 }
 0x738   : > { %14358 = vmatprep.subr.bf16.mxu1 %v18337_v52 }
 0x73b   : > { %v7128_v21 = vpop.f32.mrb[236].mxu1 }
 0x73c   : > { %v7143_v58 = vadd.f32 %v7128_v21, %v6976_v3  ;;  %v14138_v24 = vpop.f32.mrb[237].mxu1 }
 0x73d   : > { %v7131_v45 = vpop.f32.mrb[238].mxu1 }
 0x73e   : > { %v7144_v63 = vadd.f32 %v7131_v45, %v6979_v29  ;;  %v14139_v51 = vpop.f32.mrb[239].mxu1 }
 0x743   : > { %v7259_v20 = vpop.f32.mrb[240].mxu1 }
 0x744   : > { %v7298_v62 = vadd.f32 %v7259_v20, %v7135_v41  ;;  %v14158_v11 = vpop.f32.mrb[241].mxu1 }
 0x745   : > { %v7262_v56 = vpop.f32.mrb[242].mxu1 }
 0x746   : > { %v7299_v28 = vadd.f32 %v7262_v56, %v7136_v48  ;;  %v14159_v0 = vpop.f32.mrb[243].mxu1 }
 0x747   : > { %v15638_v0 = vld [vmem:[%s19631_s1 + $0x720] sm:$0xff]  }
 0x74b   : > { %v7267_v36 = vpop.f32.mrb[244].mxu1 }
 0x74c   : > { %v7300_v16 = vadd.f32 %v7267_v36, %v7137_v7  ;;  %v14162_v14 = vpop.f32.mrb[245].mxu1  ;;  %v15632_v7 = vld [vmem:[%s19631_s1 + $0x708] sm:$0xff]  }
 0x74d   : > { %v7270_v35 = vpop.f32.mrb[246].mxu1  ;;  %14359 = vmatpush3.bf16.msra.mxu1 %v15632_v7 }
 0x74e   : > { %v14163_v23 = vpop.f32.mrb[247].mxu1  ;;  %v7301_v40 = vadd.f32 %v7270_v35, %v7138_v17  ;;  %v15633_v17 = vld [vmem:[%s19631_s1 + $0x6c0] sm:$0xff]   ;;  %14360 = vmatprep.subr.bf16.mxu1 %v18337_v52 }
 0x74f   : > { %14393 = vmatpush3.bf16.msra.mxu0 %v15633_v17 }
 0x750   : > { %14394 = vmatprep.subr.bf16.mxu0 %v18337_v52 }
 0x753   : > { %v7275_v3 = vpop.f32.mrb[248].mxu1  ;;  %14395 = vmatpush3.bf16.msra.mxu0 %v15635_v54 }
 0x754   : > { %v14166_v29 = vpop.f32.mrb[249].mxu1  ;;  %v18362_v41 = vadd.f32 %v7275_v3, %v7139_v10  ;;  %v15634_v10 = vld [vmem:[%s19631_s1 + $0x710] sm:$0xff]   ;;  %14396 = vmatprep.subr.bf16.mxu0 %v18337_v52  ;;  %v15642_v3 = vld [vmem:[%s19631_s1 + $0x6e8] sm:$0xff]  }
 0x755   : > { %v7278_v25 = vpop.f32.mrb[250].mxu1  ;;  %14361 = vmatpush3.bf16.msra.mxu1 %v15634_v10  ;;  %v15643_v29 = vld [vmem:[%s19631_s1 + $0x730] sm:$0xff]   ;;  %v15646_v10 = vld [vmem:[%s19631_s1 + $0x6f8] sm:$0xff]  }
 0x756   : > { %v14167_v48 = vpop.f32.mrb[251].mxu1  ;;  %v18364_v44 = vadd.f32 %v7278_v25, %v7140_v60  ;;  %14362 = vmatprep.subr.bf16.mxu1 %v18337_v52 }
 0x757   : > { %14397 = vmatpush3.bf16.msra.mxu0 %v15637_v32 }
 0x758   : > { %14398 = vmatprep.subr.bf16.mxu0 %v18337_v52 }
 0x759   : > { %14363 = vmatpush3.bf16.msra.mxu1 %v15636_v27 }
 0x75a   : > { %14364 = vmatprep.subr.bf16.mxu1 %v18337_v52 }
 0x75b   : > { %v7283_v12 = vpop.f32.mrb[252].mxu1 }
 0x75c   : > { %v14170_v34 = vpop.f32.mrb[253].mxu1  ;;  %v18374_v59 = vadd.f32 %v7283_v12, %v7141_v19 }
 0x75d   : > { %v7286_v47 = vpop.f32.mrb[254].mxu1  ;;  %14365 = vmatpush3.bf16.msra.mxu1 %v15638_v0  ;;  %v15645_v34 = vld [vmem:[%s19631_s1 + $0x738] sm:$0xff]  }
 0x75e   : > { %v14171_v61 = vpop.f32.mrb[255].mxu1  ;;  %v18379_v60 = vadd.f32 %v7286_v47, %v7142_v49  ;;  %14366 = vmatprep.subr.bf16.mxu1 %v18337_v52 }
 0x763   : > { %v7291_v19 = vpop.f32.mrb[0].mxu1 }
 0x764   : > { %v14174_v42 = vpop.f32.mrb[1].mxu1  ;;  %v7306_v1 = vadd.f32 %v7291_v19, %v7143_v58  ;;  %v15639_v58 = vld [vmem:[%s19631_s1 + $0x6d8] sm:$0xff]  }
 0x765   : > { %v7294_v49 = vpop.f32.mrb[2].mxu1  ;;  %14399 = vmatpush3.bf16.msra.mxu0 %v15639_v58 }
 0x766   : > { %v14175_v15 = vpop.f32.mrb[3].mxu1  ;;  %v7307_v21 = vadd.f32 %v7294_v49, %v7144_v63  ;;  %v15640_v63 = vld [vmem:[%s19631_s1 + $0x6e0] sm:$0xff]   ;;  %14400 = vmatprep.subr.bf16.mxu0 %v18337_v52 }
 0x769   : > { %14401 = vmatpush3.bf16.msra.mxu0 %v15640_v63 }
 0x76a   : > { %14402 = vmatprep.subr.bf16.mxu0 %v18337_v52 }
 0x76b   : > { %v7422_v24 = vpop.f32.mrb[4].mxu1 }
 0x76c   : > { %v14194_v45 = vpop.f32.mrb[5].mxu1  ;;  %v7461_v51 = vadd.f32 %v7422_v24, %v7298_v62  ;;  %v15641_v62 = vld [vmem:[%s19631_s1 + $0x728] sm:$0xff]  }
 0x76d   : > { %v7425_v20 = vpop.f32.mrb[6].mxu1  ;;  %14367 = vmatpush3.bf16.msra.mxu1 %v15641_v62  ;;  %14403 = vmatpush3.bf16.msra.mxu0 %v15642_v3 }
 0x76e   : > { %v14195_v11 = vpop.f32.mrb[7].mxu1  ;;  %v7462_v56 = vadd.f32 %v7425_v20, %v7299_v28  ;;  %14368 = vmatprep.subr.bf16.mxu1 %v18337_v52  ;;  %14404 = vmatprep.subr.bf16.mxu0 %v18337_v52 }
 0x771   : > { %14369 = vmatpush3.bf16.msra.mxu1 %v15643_v29 }
 0x772   : > { %14370 = vmatprep.subr.bf16.mxu1 %v18337_v52 }
 0x773   : > { %v7430_v36 = vpop.f32.mrb[8].mxu1 }
 0x774   : > { %v14198_v28 = vpop.f32.mrb[9].mxu1  ;;  %v7463_v14 = vadd.f32 %v7430_v36, %v7300_v16  ;;  %v15644_v16 = vld [vmem:[%s19631_s1 + $0x6f0] sm:$0xff]  }
 0x775   : > { %v7433_v35 = vpop.f32.mrb[10].mxu1  ;;  %14405 = vmatpush3.bf16.msra.mxu0 %v15644_v16  ;;  %14371 = vmatpush3.bf16.msra.mxu1 %v15645_v34 }
 0x776   : > { %v7464_v23 = vadd.f32 %v7433_v35, %v7301_v40  ;;  %v14199_v37 = vpop.f32.mrb[11].mxu1  ;;  %14406 = vmatprep.subr.bf16.mxu0 %v18337_v52  ;;  %14428 = vmatprep.subr.bf16.mxu1 %v18337_v52 }
 0x779   : > { %14407 = vmatpush3.bf16.msra.mxu0 %v15646_v10 }
 0x77a   : > { %14464 = vmatprep.subr.bf16.mxu0 %v18337_v52 }
 0x77b   : > { %v7438_v40 = vpop.f32.mrb[12].mxu1 }
 0x77c   : > { %v7465_v25 = vadd.f32 %v7438_v40, %v18362_v41  ;;  %v14202_v48 = vpop.f32.mrb[13].mxu1 }
 0x77d   : > { %v7441_v7 = vpop.f32.mrb[14].mxu1 }
 0x77e   : > { %v7466_v17 = vadd.f32 %v7441_v7, %v18364_v44  ;;  %v14203_v12 = vpop.f32.mrb[15].mxu1 }
 0x783   : > { %v7446_v41 = vpop.f32.mrb[16].mxu1 }
 0x784   : > { %v7467_v44 = vadd.f32 %v7446_v41, %v18374_v59  ;;  %v14206_v47 = vpop.f32.mrb[17].mxu1 }
 0x785   : > { %v7449_v61 = vpop.f32.mrb[18].mxu1 }
 0x786   : > { %v7468_v54 = vadd.f32 %v7449_v61, %v18379_v60  ;;  %v14207_v27 = vpop.f32.mrb[19].mxu1 }
 0x78b   : > { %v7454_v32 = vpop.f32.mrb[20].mxu1 }
 0x78c   : > { %v7469_v19 = vadd.f32 %v7454_v32, %v7306_v1  ;;  %v14210_v42 = vpop.f32.mrb[21].mxu1 }
 0x78d   : > { %v7457_v49 = vpop.f32.mrb[22].mxu1 }
 0x78e   : > { %v7470_v15 = vadd.f32 %v7457_v49, %v7307_v21  ;;  %v14211_v24 = vpop.f32.mrb[23].mxu1 }
 0x793   : > { %v7585_v45 = vpop.f32.mrb[24].mxu1 }
 0x794   : > { %v7624_v20 = vadd.f32 %v7585_v45, %v7461_v51  ;;  %v14230_v11 = vpop.f32.mrb[25].mxu1 }
 0x795   : > { %v7588_v0 = vpop.f32.mrb[26].mxu1 }
 0x796   : > { %v7625_v58 = vadd.f32 %v7588_v0, %v7462_v56  ;;  %v14231_v63 = vpop.f32.mrb[27].mxu1 }
 0x79b   : > { %v7593_v62 = vpop.f32.mrb[28].mxu1 }
 0x79c   : > { %v7626_v36 = vadd.f32 %v7593_v62, %v7463_v14  ;;  %v14234_v59 = vpop.f32.mrb[29].mxu1 }
 0x79d   : > { %v7596_v28 = vpop.f32.mrb[30].mxu1 }
 0x79e   : > { %v7627_v35 = vadd.f32 %v7596_v28, %v7464_v23  ;;  %v14235_v37 = vpop.f32.mrb[31].mxu1 }
 0x7a3   : > { %v7601_v60 = vpop.f32.mrb[32].mxu1 }
 0x7a4   : > { %v7628_v3 = vadd.f32 %v7601_v60, %v7465_v25  ;;  %v14238_v29 = vpop.f32.mrb[33].mxu1 }
 0x7a5   : > { %v7604_v1 = vpop.f32.mrb[34].mxu1 }
 0x7a6   : > { %v7629_v16 = vadd.f32 %v7604_v1, %v7466_v17  ;;  %v14239_v40 = vpop.f32.mrb[35].mxu1 }
 0x7ab   : > { %v7609_v21 = vpop.f32.mrb[36].mxu1 }
 0x7ac   : > { %v7630_v48 = vadd.f32 %v7609_v21, %v7467_v44  ;;  %v14242_v7 = vpop.f32.mrb[37].mxu1 }
 0x7ad   : > { %v7612_v51 = vpop.f32.mrb[38].mxu1  ;;  %v8125_v7 = vsub.s32 2, %v16547_v18 }
 0x7ae   : > { %v7631_v12 = vadd.f32 %v7612_v51, %v7468_v54  ;;  %v14243_v34 = vpop.f32.mrb[39].mxu1 }
 0x7b3   : > { %v7617_v56 = vpop.f32.mrb[40].mxu1 }
 0x7b4   : > { %v7632_v10 = vadd.f32 %v7617_v56, %v7469_v19  ;;  %v14246_v41 = vpop.f32.mrb[41].mxu1 }
 0x7b5   : > { %v7620_v14 = vpop.f32.mrb[42].mxu1 }
 0x7b6   : > { %v7633_v47 = vadd.f32 %v7620_v14, %v7470_v15  ;;  %v14247_v61 = vpop.f32.mrb[43].mxu1 }
 0x7bb   : > { %v7748_v23 = vpop.f32.mrb[44].mxu1 }
 0x7bc   : > { %v7787_v27 = vadd.f32 %v7748_v23, %v7624_v20  ;;  %v14266_v32 = vpop.f32.mrb[45].mxu1 }
 0x7bd   : > { %v7751_v25 = vpop.f32.mrb[46].mxu1 }
 0x7be   : > { %v7788_v42 = vadd.f32 %v7751_v25, %v7625_v58  ;;  %v14267_v49 = vpop.f32.mrb[47].mxu1 }
 0x7c3   : > { %v7756_v17 = vpop.f32.mrb[48].mxu1 }
 0x7c4   : > { %v7789_v24 = vadd.f32 %v7756_v17, %v7626_v36  ;;  %v14270_v45 = vpop.f32.mrb[49].mxu1 }
 0x7c5   : > { %v7759_v44 = vpop.f32.mrb[50].mxu1 }
 0x7c6   : > { %v7790_v11 = vadd.f32 %v7759_v44, %v7627_v35  ;;  %v14271_v0 = vpop.f32.mrb[51].mxu1 }
 0x7cb   : > { %v7764_v54 = vpop.f32.mrb[52].mxu1 }
 0x7cc   : > { %v7791_v63 = vadd.f32 %v7764_v54, %v7628_v3  ;;  %v14274_v62 = vpop.f32.mrb[53].mxu1 }
 0x7cd   : > { %v7767_v19 = vpop.f32.mrb[54].mxu1 }
 0x7ce   : > { %v7792_v59 = vadd.f32 %v7767_v19, %v7629_v16  ;;  %v14275_v28 = vpop.f32.mrb[55].mxu1 }
 0x7d3   : > { %v7772_v15 = vpop.f32.mrb[56].mxu1 }
 0x7d4   : > { %v18434_v37 = vadd.f32 %v7772_v15, %v7630_v48  ;;  %v14278_v20 = vpop.f32.mrb[57].mxu1  ;;  %v15780_v48 = vld [vmem:[%s19632_s2] sm:$0x1f] }
 0x7d5   : > { %v7775_v60 = vpop.f32.mrb[58].mxu1  ;;  %v18446_v34 = vrot.slane %v15780_v48, %v8125_v7  ;;  %v8199_v20 = vld [vmem:[#allocation2 + $0x1] sm:$0xff] }
 0x7d6   : > { %v18436_v29 = vadd.f32 %v7775_v60, %v7631_v12  ;;  %v14279_v58 = vpop.f32.mrb[59].mxu1 }
 0x7db   : > { %v7780_v1 = vpop.f32.mrb[60].mxu1 }
 0x7dc   : > { %v18438_v36 = vadd.f32 %v7780_v1, %v7632_v10  ;;  %v14282_v40 = vpop.f32.mrb[61].mxu1 }
 0x7dd   : > { %v7783_v35 = vpop.f32.mrb[62].mxu1 }
 0x7de   : > { %v18440_v21 = vadd.f32 %v7783_v35, %v7633_v47  ;;  %v14283_v3 = vpop.f32.mrb[63].mxu1 }
 0x7e3   : > { %v7911_v16 = vpop.f32.mrb[64].mxu1 }
 0x7e4   : > { %v7950_v51 = vadd.f32 %v7911_v16, %v7787_v27  ;;  %v14302_v12 = vpop.f32.mrb[65].mxu1 }
 0x7e5   : > { %v7914_v56 = vpop.f32.mrb[66].mxu1  ;;  %v15649_v12 = vld [vmem:[%s19631_s1 + $0x780] sm:$0xff]  }
 0x7e6   : > { %v8113_v10 = vadd.f32 %v18224_v30, %v7950_v51  ;;  %v7951_v41 = vadd.f32 %v7914_v56, %v7788_v42  ;;  %v14303_v14 = vpop.f32.mrb[67].mxu1 }
 0x7e8   : > { %v8127_v47 = vadd.f32 %v18446_v34, %v8113_v10  ;;  %v8114_v61 = vadd.f32 %v18234_v38, %v7951_v41 }
 0x7ea   : > { %v8137_v23 = vmax.f32 %v8127_v47, 0.0  ;;  %v8128_v32 = vadd.f32 %v18446_v34, %v8114_v61 }
 0x7eb   : > { %v7919_v27 = vpop.f32.mrb[68].mxu1 }
 0x7ec   : > { %v18453_v25 = vmul.f32 %v17708_v5, %v8137_v23  ;;  %v8138_v49 = vmax.f32 %v8128_v32, 0.0  ;;  %v7952_v17 = vadd.f32 %v7919_v27, %v7789_v24  ;;  %v14306_v45 = vpop.f32.mrb[69].mxu1 }
 0x7ed   : > { %v7922_v44 = vpop.f32.mrb[70].mxu1 }
 0x7ee   : > { %8157 = vst [vmem:[#allocation2 + $0xb] sm:$0xff] %v18453_v25  ;;  %v18457_v30 = vmul.f32 %v17745_v55, %v8138_v49  ;;  %v8115_v42 = vadd.f32 %v18250_v6, %v7952_v17  ;;  %v7953_v0 = vadd.f32 %v7922_v44, %v7790_v11  ;;  %v14307_v38 = vpop.f32.mrb[71].mxu1  ;;  %v15650_v49 = vld [vmem:[%s19631_s1 + $0x750] sm:$0xff]  }
 0x7f0   : > { %8158 = vst [vmem:[#allocation2 + $0x13] sm:$0xff] %v18457_v30  ;;  %v8129_v54 = vadd.f32 %v18446_v34, %v8115_v42  ;;  %v8116_v62 = vadd.f32 %v18255_v31, %v7953_v0  ;;  %v8809_v24 = vpack.c.bf16 %v18457_v30, %v18453_v25  ;;  %v15647_v31 = vld [vmem:[%s19631_s1 + $0x740] sm:$0xff]   ;;  %v15683_v25 = vld [vmem:[%s19631_s1 + $0x888] sm:$0xff]  }
 0x7f2   : > { %v8139_v19 = vmax.f32 %v8129_v54, 0.0  ;;  %v8130_v28 = vadd.f32 %v18446_v34, %v8116_v62 }
 0x7f3   : > { %v7927_v15 = vpop.f32.mrb[72].mxu1 }
 0x7f4   : > { %v18467_v60 = vmul.f32 %v17761_v46, %v8139_v19  ;;  %v8140_v6 = vmax.f32 %v8130_v28, 0.0  ;;  %v7954_v11 = vadd.f32 %v7927_v15, %v7791_v63  ;;  %v14310_v58 = vpop.f32.mrb[73].mxu1  ;;  %v15653_v15 = vld [vmem:[%s19631_s1 + $0x790] sm:$0xff]  }
 0x7f5   : > { %v7930_v1 = vpop.f32.mrb[74].mxu1  ;;  %v8200_v40 = vld [vmem:[#allocation2 + $0x9] sm:$0xff] }
 0x7f6   : > { %v8168_v35 = vld [vmem:[#allocation2 + $0x8] sm:$0xff]  ;;  %8159 = vst [vmem:[#allocation2 + $0x1b] sm:$0xff] %v18467_v60  ;;  %v18474_v3 = vmul.f32 %v17780_v57, %v8140_v6  ;;  %v8117_v7 = vadd.f32 %v18263_v4, %v7954_v11  ;;  %v7955_v16 = vadd.f32 %v7930_v1, %v7792_v59  ;;  %v14311_v51 = vpop.f32.mrb[75].mxu1  ;;  %v8209_v48 = vpack.c.bf16 %v8200_v40, %v8199_v20  ;;  %v15655_v1 = vld [vmem:[%s19631_s1 + $0x798] sm:$0xff]  }
 0x7f7   : > { %v8177_v63 = vpack.c.bf16 %v8168_v35, %v18337_v52  ;;  %v15648_v4 = vld [vmem:[%s19631_s1 + $0x748] sm:$0xff]   ;;  %v8201_v45 = vld [vmem:[#allocation2 + $0x11] sm:$0xff] }
 0x7f8   : > { %8160 = vst [vmem:[#allocation2 + $0x23] sm:$0xff] %v18474_v3  ;;  %v8131_v56 = vadd.f32 %v18446_v34, %v8117_v7  ;;  %v8118_v10 = vadd.f32 %v18270_v8, %v7955_v16  ;;  %14373 = vmatmul.mubr.bf16.vlgmr.msra.gmra.mrb[84].mxu1 %v8209_v48  ;;  %v8810_v41 = vpack.c.bf16 %v18474_v3, %v18467_v60  ;;  %v15651_v8 = vld [vmem:[%s19631_s1 + $0x788] sm:$0xff]   ;;  %v8169_v19 = vld [vmem:[#allocation2 + $0x10] sm:$0xff]  ;;  %v15654_v16 = vld [vmem:[%s19631_s1 + $0x760] sm:$0xff]  }
 0x7f9   : > { %14409 = vmatmul.mubr.bf16.vlgmr.msra.gmra.mrb[56].mxu0 %v8177_v63  ;;  %14429 = vmatpush3.bf16.msra.mxu1 %v15647_v31  ;;  %v15687_v60 = vld [vmem:[%s19631_s1 + $0x898] sm:$0xff]  }
 0x7fa   : > { %v8141_v59 = vmax.f32 %v8131_v56, 0.0  ;;  %v8132_v14 = vadd.f32 %v18446_v34, %v8118_v10  ;;  %14430 = vmatprep.subr.bf16.mxu1 %v18337_v52  ;;  %14376 = vmatprep.mubr.msk.bf16.mxu1 %vm15850_vm0, %v18337_v52 }
 0x7fb   : > { %v7935_v47 = vpop.f32.mrb[76].mxu1  ;;  %14412 = vmatprep.mubr.msk.bf16.mxu0 %vm15850_vm0, %v18337_v52  ;;  %14465 = vmatpush3.bf16.msra.mxu0 %v15649_v12 }
 0x7fc   : > { %v18499_v61 = vmul.f32 %v17820_v50, %v8141_v59  ;;  %v8142_v23 = vmax.f32 %v8132_v14, 0.0  ;;  %v7956_v32 = vadd.f32 %v7935_v47, %v18434_v37  ;;  %v14314_v27 = vpop.f32.mrb[77].mxu1  ;;  %14466 = vmatprep.subr.bf16.mxu0 %v18337_v52 }
 0x7fd   : > { %v7938_v17 = vpop.f32.mrb[78].mxu1  ;;  %14431 = vmatpush3.bf16.msra.mxu1 %v15648_v4  ;;  %v8202_v44 = vld [vmem:[#allocation2 + $0x19] sm:$0xff] }
 0x7fe   : > { %v8170_v42 = vld [vmem:[#allocation2 + $0x18] sm:$0xff]  ;;  %8161 = vst [vmem:[#allocation2 + $0x2b] sm:$0xff] %v18499_v61  ;;  %v18508_v0 = vmul.f32 %v17844_v2, %v8142_v23  ;;  %v8119_v38 = vadd.f32 %v18282_v39, %v7956_v32  ;;  %v7957_v37 = vadd.f32 %v7938_v17, %v18436_v29  ;;  %v14315_v54 = vpop.f32.mrb[79].mxu1  ;;  %v8210_v62 = vpack.c.bf16 %v8202_v44, %v8201_v45 }
 0x7ff   : > { %14432 = vmatprep.subr.bf16.mxu1 %v18337_v52  ;;  %v8178_v28 = vpack.c.bf16 %v8170_v42, %v8169_v19  ;;  %14467 = vmatpush3.bf16.msra.mxu0 %v15651_v8  ;;  %v15652_v39 = vld [vmem:[%s19631_s1 + $0x758] sm:$0xff]   ;;  %v8203_v48 = vld [vmem:[#allocation2 + $0x21] sm:$0xff]  ;;  %v15659_v19 = vld [vmem:[%s19631_s1 + $0x770] sm:$0xff]  }
 0x800   : > { %8162 = vst [vmem:[#allocation2 + $0x33] sm:$0xff] %v18508_v0  ;;  %v8133_v20 = vadd.f32 %v18446_v34, %v8119_v38  ;;  %v8120_v6 = vadd.f32 %v18290_v43, %v7957_v37  ;;  %14377 = vmatmul.mubr.bf16.gmra.mrb[88].mxu1 %v8210_v62  ;;  %14468 = vmatprep.subr.bf16.mxu0 %v18337_v52  ;;  %v8171_v14 = vld [vmem:[#allocation2 + $0x20] sm:$0xff] }
 0x801   : > { %14413 = vmatmul.mubr.bf16.gmra.mrb[60].mxu0 %v8178_v28  ;;  %14433 = vmatpush3.bf16.msra.mxu1 %v15650_v49  ;;  %v8811_v29 = vpack.c.bf16 %v18508_v0, %v18499_v61  ;;  %v15656_v8 = vld [vmem:[%s19631_s1 + $0x7a0] sm:$0xff]   ;;  %v15660_v28 = vld [vmem:[%s19631_s1 + $0x7b0] sm:$0xff]   ;;  %v15690_v61 = vld [vmem:[%s19631_s1 + $0x8a8] sm:$0xff]  }
 0x802   : > { %v8143_v11 = vmax.f32 %v8133_v20, 0.0  ;;  %v8134_v58 = vadd.f32 %v18446_v34, %v8120_v6  ;;  %14380 = vmatprep.mubr.msk.bf16.mxu1 %vm15850_vm0, %v18337_v52  ;;  %14416 = vmatprep.mubr.msk.bf16.mxu0 %vm15850_vm0, %v18337_v52  ;;  %v15661_v20 = vld [vmem:[%s19631_s1 + $0x778] sm:$0xff]  }
 0x803   : > { %v7943_v43 = vpop.f32.mrb[80].mxu1  ;;  %14434 = vmatprep.subr.bf16.mxu1 %v18337_v52  ;;  %14469 = vmatpush3.bf16.msra.mxu0 %v15653_v15  ;;  %v15662_v6 = vld [vmem:[%s19631_s1 + $0x7b8] sm:$0xff]  }
 0x804   : > { %v18535_v40 = vmul.f32 %v17886_v26, %v8143_v11  ;;  %v8144_v35 = vmax.f32 %v8134_v58, 0.0  ;;  %v7958_v31 = vadd.f32 %v7943_v43, %v18438_v36  ;;  %v14318_v7 = vpop.f32.mrb[81].mxu1  ;;  %14470 = vmatprep.subr.bf16.mxu0 %v18337_v52 }
 0x805   : > { %v7946_v51 = vpop.f32.mrb[82].mxu1  ;;  %v8204_v63 = vld [vmem:[#allocation2 + $0x29] sm:$0xff]  ;;  %14435 = vmatpush3.bf16.msra.mxu1 %v15652_v39 }
 0x806   : > { %v8172_v12 = vld [vmem:[#allocation2 + $0x28] sm:$0xff]  ;;  %8163 = vst [vmem:[#allocation2 + $0x3b] sm:$0xff] %v18535_v40  ;;  %v18544_v56 = vmul.f32 %v17906_v13, %v8144_v35  ;;  %v8121_v10 = vadd.f32 %v18301_v53, %v7958_v31  ;;  %v7959_v36 = vadd.f32 %v7946_v51, %v18440_v21  ;;  %v14319_v4 = vpop.f32.mrb[83].mxu1  ;;  %v8211_v59 = vpack.c.bf16 %v8204_v63, %v8203_v48  ;;  %v15663_v51 = vld [vmem:[%s19631_s1 + $0x7c0] sm:$0xff]  }
 0x807   : > { %14436 = vmatprep.subr.bf16.mxu1 %v18337_v52  ;;  %v8179_v47 = vpack.c.bf16 %v8172_v12, %v8171_v14  ;;  %14471 = vmatpush3.bf16.msra.mxu0 %v15655_v1  ;;  %v15657_v53 = vld [vmem:[%s19631_s1 + $0x768] sm:$0xff]   ;;  %v8205_v44 = vld [vmem:[#allocation2 + $0x31] sm:$0xff]  ;;  %v15665_v12 = vld [vmem:[%s19631_s1 + $0x800] sm:$0xff]  }
 0x808   : > { %8164 = vst [vmem:[#allocation2 + $0x43] sm:$0xff] %v18544_v56  ;;  %v8135_v23 = vadd.f32 %v18446_v34, %v8121_v10  ;;  %v8122_v32 = vadd.f32 %v18312_v33, %v7959_v36  ;;  %14381 = vmatmul.mubr.bf16.gmra.mrb[92].mxu1 %v8211_v59  ;;  %14472 = vmatprep.subr.bf16.mxu0 %v18337_v52  ;;  %v15658_v33 = vld [vmem:[%s19631_s1 + $0x7a8] sm:$0xff]   ;;  %v8173_v42 = vld [vmem:[#allocation2 + $0x30] sm:$0xff]  ;;  %v8476_v36 = vld [vmem:[#allocation2 + $0x1a] sm:$0xff] }
 0x809   : > { %14417 = vmatmul.mubr.bf16.gmra.mrb[64].mxu0 %v8179_v47  ;;  %14437 = vmatpush3.bf16.msra.mxu1 %v15654_v16  ;;  %v8812_v21 = vpack.c.bf16 %v18544_v56, %v18535_v40  ;;  %v8473_v31 = vld [vmem:[#allocation2 + $0x2] sm:$0xff]  ;;  %v8474_v7 = vld [vmem:[#allocation2 + $0xa] sm:$0xff]  ;;  %v8637_v16 = vld [vmem:[#allocation2 + $0x12] sm:$0xff] }
 0x80a   : > { %v8145_v27 = vmax.f32 %v8135_v23, 0.0  ;;  %v8136_v49 = vadd.f32 %v18446_v34, %v8122_v32  ;;  %14384 = vmatprep.mubr.msk.bf16.mxu1 %vm15850_vm0, %v18337_v52  ;;  %14420 = vmatprep.mubr.msk.bf16.mxu0 %vm15850_vm0, %v18337_v52  ;;  %v8483_v48 = vpack.c.bf16 %v8474_v7, %v8473_v31  ;;  %v8646_v63 = vpack.c.bf16 %v8637_v16, %v8474_v7  ;;  %v15664_v10 = vld [vmem:[%s19631_s1 + $0x7c8] sm:$0xff]   ;;  %v15666_v14 = vld [vmem:[%s19631_s1 + $0x7d0] sm:$0xff]   ;;  %v15668_v32 = vld [vmem:[%s19631_s1 + $0x7d8] sm:$0xff]  }
 0x80b   : > { %14438 = vmatprep.subr.bf16.mxu1 %v18337_v52  ;;  %14473 = vmatpush3.bf16.msra.mxu0 %v15656_v8  ;;  %v15667_v4 = vld [vmem:[%s19631_s1 + $0x808] sm:$0xff]   ;;  %v8484_v47 = vpack.c.bf16 %v8476_v36, %v8637_v16  ;;  %v15669_v23 = vld [vmem:[%s19631_s1 + $0x810] sm:$0xff]   ;;  %v15679_v7 = vld [vmem:[%s19631_s1 + $0x840] sm:$0xff]  }
 0x80c   : > { %v18571_v17 = vmul.f32 %v17943_v22, %v8145_v27  ;;  %v8146_v45 = vmax.f32 %v8136_v49, 0.0  ;;  %14474 = vmatprep.subr.bf16.mxu0 %v18337_v52  ;;  %v8639_v59 = vld [vmem:[#allocation2 + $0x22] sm:$0xff]  ;;  %v15671_v27 = vld [vmem:[%s19631_s1 + $0x818] sm:$0xff]   ;;  %v8962_v16 = vld [vmem:[#allocation2 + $0xc] sm:$0xff] }
 0x80d   : > { %v8206_v34 = vld [vmem:[#allocation2 + $0x39] sm:$0xff]  ;;  %14439 = vmatpush3.bf16.msra.mxu1 %v15657_v53  ;;  %v8647_v8 = vpack.c.bf16 %v8639_v59, %v8476_v36  ;;  %v8478_v53 = vld [vmem:[#allocation2 + $0x2a] sm:$0xff] }
 0x80e   : > { %v8174_v38 = vld [vmem:[#allocation2 + $0x38] sm:$0xff]  ;;  %8165 = vst [vmem:[#allocation2 + $0x4b] sm:$0xff] %v18571_v17  ;;  %v18576_v37 = vmul.f32 %v17955_v9, %v8146_v45  ;;  %v8212_v54 = vpack.c.bf16 %v8206_v34, %v8205_v44  ;;  %14440 = vmatprep.subr.bf16.mxu1 %v18337_v52  ;;  %v8485_v45 = vpack.c.bf16 %v8478_v53, %v8639_v59  ;;  %v15672_v34 = vld [vmem:[%s19631_s1 + $0x820] sm:$0xff]   ;;  %v15685_v36 = vld [vmem:[%s19631_s1 + $0x890] sm:$0xff]  }
 0x80f   : > { %v8180_v62 = vpack.c.bf16 %v8174_v38, %v8173_v42  ;;  %14475 = vmatpush3.bf16.msra.mxu0 %v15658_v33  ;;  %v8207_v39 = vld [vmem:[#allocation2 + $0x41] sm:$0xff]  ;;  %v8641_v49 = vld [vmem:[#allocation2 + $0x32] sm:$0xff] }
 0x810   : > { %8166 = vst [vmem:[#allocation2 + $0x53] sm:$0xff] %v18576_v37  ;;  %14385 = vmatmul.mubr.bf16.gmra.mrb[96].mxu1 %v8212_v54  ;;  %14476 = vmatprep.subr.bf16.mxu0 %v18337_v52  ;;  %v8813_v15 = vpack.c.bf16 %v18576_v37, %v18571_v17  ;;  %v8175_v58 = vld [vmem:[#allocation2 + $0x40] sm:$0xff]  ;;  %v8648_v44 = vpack.c.bf16 %v8641_v49, %v8478_v53  ;;  %v15673_v42 = vld [vmem:[%s19631_s1 + $0x7e8] sm:$0xff]   ;;  %v18691_v31 = vld [vmem:[#allocation2 + $0x14] sm:$0xff] }
 0x811   : > { %14421 = vmatmul.mubr.bf16.gmra.mrb[68].mxu0 %v8180_v62  ;;  %14388 = vmatprep.mubr.msk.bf16.mxu1 %vm15850_vm0, %v18337_v52  ;;  %v15670_v33 = vld [vmem:[%s19631_s1 + $0x7e0] sm:$0xff]   ;;  %v15674_v54 = vld [vmem:[%s19631_s1 + $0x828] sm:$0xff]   ;;  %v18745_v3 = vld [vmem:[#allocation2 + $0x34] sm:$0xff] }
 0x812   : > { %14424 = vmatprep.mubr.msk.bf16.mxu0 %vm15850_vm0, %v18337_v52  ;;  %14441 = vmatpush3.bf16.msra.mxu1 %v15659_v19  ;;  %v8480_v38 = vld [vmem:[#allocation2 + $0x3a] sm:$0xff]  ;;  %v8643_v62 = vld [vmem:[#allocation2 + $0x42] sm:$0xff]  ;;  %v18751_v59 = vld [vmem:[#allocation2 + $0x2c] sm:$0xff] }
 0x813   : > { %14477 = vmatpush3.bf16.msra.mxu0 %v15660_v28  ;;  %14442 = vmatprep.subr.bf16.mxu1 %v18337_v52  ;;  %v8486_v19 = vpack.c.bf16 %v8480_v38, %v8641_v49  ;;  %v15675_v28 = vld [vmem:[%s19631_s1 + $0x7f0] sm:$0xff]   ;;  %v18716_v30 = vld [vmem:[#allocation2 + $0x24] sm:$0xff]  ;;  %v15694_v40 = vld [vmem:[%s19631_s1 + $0x8b8] sm:$0xff]  }
 0x814   : > { %14478 = vmatprep.subr.bf16.mxu0 %v18337_v52  ;;  %v15692_v53 = vld [vmem:[%s19631_s1 + $0x8b0] sm:$0xff]   ;;  %v15696_v37 = vld [vmem:[%s19631_s1 + $0x8c8] sm:$0xff]  }
 0x815   : > { %v8208_v11 = vld [vmem:[#allocation2 + $0x49] sm:$0xff] }
 0x816   : > { %v8176_v43 = vld [vmem:[#allocation2 + $0x48] sm:$0xff]  ;;  %v8213_v1 = vpack.c.bf16 %v8208_v11, %v8207_v39  ;;  %14443 = vmatpush3.bf16.msra.mxu1 %v15661_v20  ;;  %v8649_v20 = vpack.c.bf16 %v8643_v62, %v8480_v38  ;;  %v15677_v39 = vld [vmem:[%s19631_s1 + $0x7f8] sm:$0xff]   ;;  %v9136_v38 = vpack.c.bf16 %v18751_v59, %v18716_v30 }
 0x817   : > { %v8181_v35 = vpack.c.bf16 %v8176_v43, %v8175_v58  ;;  %14479 = vmatpush3.bf16.msra.mxu0 %v15662_v6  ;;  %14500 = vmatprep.subr.bf16.mxu1 %v18337_v52  ;;  %v15676_v6 = vld [vmem:[%s19631_s1 + $0x830] sm:$0xff]   ;;  %v15678_v58 = vld [vmem:[%s19631_s1 + $0x838] sm:$0xff]   ;;  %v18774_v0 = vld [vmem:[#allocation2 + $0x44] sm:$0xff] }
 0x818   : > { %14389 = vmatmul.mubr.bf16.gmra.mrb[100].mxu1 %v8213_v1  ;;  %14536 = vmatprep.subr.bf16.mxu0 %v18337_v52  ;;  %v8482_v11 = vld [vmem:[#allocation2 + $0x4a] sm:$0xff]  ;;  %v8645_v43 = vld [vmem:[#allocation2 + $0x52] sm:$0xff] }
 0x819   : > { %14425 = vmatmul.mubr.bf16.gmra.mrb[72].mxu0 %v8181_v35  ;;  %14444 = vmatprep.mubr.msk.bf16.mxu1 %vm15850_vm0, %v18337_v52  ;;  %v8487_v1 = vpack.c.bf16 %v8482_v11, %v8643_v62  ;;  %v8650_v35 = vpack.c.bf16 %v8645_v43, %v8482_v11  ;;  %v8970_v56 = vld [vmem:[#allocation2 + $0x4c] sm:$0xff] }
 0x81a   : > { %14480 = vmatprep.mubr.msk.bf16.mxu0 %vm15850_vm0, %v18337_v52  ;;  %v9295_v43 = vld [vmem:[#allocation2 + $0x4d] sm:$0xff] }
 0x820   : > { %14445 = vmatmul.mubr.bf16.vlgmr.msra.gmra.mrb[104].mxu1 %v8483_v48  ;;  %v15681_v48 = vld [vmem:[%s19631_s1 + $0x880] sm:$0xff]  }
 0x821   : > { %14481 = vmatmul.mubr.bf16.vlgmr.msra.gmra.mrb[76].mxu0 %v8646_v63  ;;  %14501 = vmatpush3.bf16.msra.mxu1 %v15663_v51  ;;  %v8972_v51 = vpack.c.bf16 %v18691_v31, %v8962_v16  ;;  %v18706_v63 = vld [vmem:[#allocation2] sm:$0xff]  ;;  %v15702_v16 = vld [vmem:[%s19631_s1 + $0x8f8] sm:$0xff]  }
 0x822   : > { %14502 = vmatprep.subr.bf16.mxu1 %v18337_v52  ;;  %14448 = vmatprep.mubr.msk.bf16.mxu1 %vm15850_vm0, %v18337_v52 }
 0x823   : > { %14484 = vmatprep.mubr.msk.bf16.mxu0 %vm15850_vm0, %v18337_v52  ;;  %14537 = vmatpush3.bf16.msra.mxu0 %v15665_v12  ;;  %v18722_v12 = vld [vmem:[#allocation2 + $0x1c] sm:$0xff] }
 0x824   : > { %14538 = vmatprep.subr.bf16.mxu0 %v18337_v52 }
 0x825   : > { %14503 = vmatpush3.bf16.msra.mxu1 %v15664_v10  ;;  %v8973_v10 = vpack.c.bf16 %v18716_v30, %v18722_v12 }
 0x826   : > { %14504 = vmatprep.subr.bf16.mxu1 %v18337_v52 }
 0x827   : > { %14539 = vmatpush3.bf16.msra.mxu0 %v15667_v4  ;;  %v15684_v4 = vld [vmem:[%s19631_s1 + $0x858] sm:$0xff]  }
 0x828   : > { %14449 = vmatmul.mubr.bf16.gmra.mrb[108].mxu1 %v8484_v47  ;;  %14540 = vmatprep.subr.bf16.mxu0 %v18337_v52  ;;  %v15688_v47 = vld [vmem:[%s19631_s1 + $0x8a0] sm:$0xff]  }
 0x829   : > { %14485 = vmatmul.mubr.bf16.gmra.mrb[80].mxu0 %v8647_v8  ;;  %14505 = vmatpush3.bf16.msra.mxu1 %v15666_v14  ;;  %v8974_v14 = vpack.c.bf16 %v18745_v3, %v18751_v59  ;;  %v15689_v8 = vld [vmem:[%s19631_s1 + $0x868] sm:$0xff]  }
 0x82a   : > { %14452 = vmatprep.mubr.msk.bf16.mxu1 %vm15850_vm0, %v18337_v52  ;;  %14488 = vmatprep.mubr.msk.bf16.mxu0 %vm15850_vm0, %v18337_v52 }
 0x82b   : > { %14506 = vmatprep.subr.bf16.mxu1 %v18337_v52  ;;  %14541 = vmatpush3.bf16.msra.mxu0 %v15669_v23  ;;  %v15691_v23 = vld [vmem:[%s19631_s1 + $0x870] sm:$0xff]  }
 0x82c   : > { %14542 = vmatprep.subr.bf16.mxu0 %v18337_v52 }
 0x82d   : > { %14507 = vmatpush3.bf16.msra.mxu1 %v15668_v32 }
 0x82e   : > { %14508 = vmatprep.subr.bf16.mxu1 %v18337_v52 }
 0x82f   : > { %14543 = vmatpush3.bf16.msra.mxu0 %v15671_v27  ;;  %v15693_v27 = vld [vmem:[%s19631_s1 + $0x878] sm:$0xff]  }
 0x830   : > { %14453 = vmatmul.mubr.bf16.gmra.mrb[112].mxu1 %v8485_v45  ;;  %14544 = vmatprep.subr.bf16.mxu0 %v18337_v52  ;;  %v15695_v45 = vld [vmem:[%s19631_s1 + $0x8c0] sm:$0xff]  }
 0x831   : > { %14489 = vmatmul.mubr.bf16.gmra.mrb[84].mxu0 %v8648_v44  ;;  %14509 = vmatpush3.bf16.msra.mxu1 %v15670_v33  ;;  %v9289_v33 = vld [vmem:[#allocation2 + $0x1d] sm:$0xff]  ;;  %v9135_v44 = vpack.c.bf16 %v18722_v12, %v18691_v31  ;;  %v15701_v31 = vld [vmem:[%s19631_s1 + $0x8f0] sm:$0xff]  }
 0x832   : > { %14456 = vmatprep.mubr.msk.bf16.mxu1 %vm15850_vm0, %v18337_v52  ;;  %14492 = vmatprep.mubr.msk.bf16.mxu0 %vm15850_vm0, %v18337_v52  ;;  %v9451_v12 = vld [vmem:[#allocation2 + $0x16] sm:$0xff] }
 0x833   : > { %14510 = vmatprep.subr.bf16.mxu1 %v18337_v52  ;;  %14545 = vmatpush3.bf16.msra.mxu0 %v15672_v34  ;;  %v9288_v34 = vld [vmem:[#allocation2 + $0x15] sm:$0xff] }
 0x834   : > { %14546 = vmatprep.subr.bf16.mxu0 %v18337_v52  ;;  %v9298_v17 = vpack.c.bf16 %v9289_v33, %v9288_v34 }
 0x835   : > { %14511 = vmatpush3.bf16.msra.mxu1 %v15673_v42  ;;  %v15697_v42 = vld [vmem:[%s19631_s1 + $0x8d0] sm:$0xff]  }
 0x836   : > { %14512 = vmatprep.subr.bf16.mxu1 %v18337_v52 }
 0x837   : > { %14547 = vmatpush3.bf16.msra.mxu0 %v15674_v54  ;;  %v9290_v54 = vld [vmem:[#allocation2 + $0x25] sm:$0xff] }
 0x838   : > { %14457 = vmatmul.mubr.bf16.gmra.mrb[116].mxu1 %v8486_v19  ;;  %14548 = vmatprep.subr.bf16.mxu0 %v18337_v52  ;;  %v15698_v19 = vld [vmem:[%s19631_s1 + $0x8d8] sm:$0xff]  }
 0x839   : > { %14493 = vmatmul.mubr.bf16.gmra.mrb[88].mxu0 %v8649_v20  ;;  %14460 = vmatprep.mubr.msk.bf16.mxu1 %vm15850_vm0, %v18337_v52  ;;  %v15699_v20 = vld [vmem:[%s19631_s1 + $0x8e0] sm:$0xff]  }
 0x83a   : > { %14496 = vmatprep.mubr.msk.bf16.mxu0 %vm15850_vm0, %v18337_v52  ;;  %14513 = vmatpush3.bf16.msra.mxu1 %v15675_v28  ;;  %v9293_v28 = vld [vmem:[#allocation2 + $0x3d] sm:$0xff] }
 0x83b   : > { %14549 = vmatpush3.bf16.msra.mxu0 %v15676_v6  ;;  %14514 = vmatprep.subr.bf16.mxu1 %v18337_v52 }
 0x83c   : > { %14550 = vmatprep.subr.bf16.mxu0 %v18337_v52 }
 0x83e   : > { %14515 = vmatpush3.bf16.msra.mxu1 %v15677_v39  ;;  %v9292_v39 = vld [vmem:[#allocation2 + $0x35] sm:$0xff] }
 0x83f   : > { %14551 = vmatpush3.bf16.msra.mxu0 %v15678_v58  ;;  %14572 = vmatprep.subr.bf16.mxu1 %v18337_v52  ;;  %v9300_v11 = vpack.c.bf16 %v9293_v28, %v9292_v39  ;;  %v15700_v58 = vld [vmem:[%s19631_s1 + $0x8e8] sm:$0xff]   ;;  %v15703_v28 = vld [vmem:[%s19631_s1 + $0x940] sm:$0xff]  }
 0x840   : > { %14461 = vmatmul.mubr.bf16.gmra.mrb[120].mxu1 %v8487_v1  ;;  %14608 = vmatprep.subr.bf16.mxu0 %v18337_v52  ;;  %v9138_v1 = vpack.c.bf16 %v8970_v56, %v18774_v0 }
 0x841   : > { %14497 = vmatmul.mubr.bf16.gmra.mrb[92].mxu0 %v8650_v35  ;;  %14516 = vmatprep.mubr.msk.bf16.mxu1 %vm15850_vm0, %v18337_v52  ;;  %v9294_v35 = vld [vmem:[#allocation2 + $0x45] sm:$0xff] }
 0x842   : > { %14552 = vmatprep.mubr.msk.bf16.mxu0 %vm15850_vm0, %v18337_v52  ;;  %v15680_v52 = vld [vmem:[%s19631_s1 + $0x848] sm:$0xff]  }
 0x848   : > { %14517 = vmatmul.mubr.bf16.vlgmr.msra.gmra.mrb[124].mxu1 %v8809_v24  ;;  %v15682_v24 = vld [vmem:[%s19631_s1 + $0x850] sm:$0xff]  }
 0x849   : > { %14553 = vmatmul.mubr.bf16.vlgmr.msra.gmra.mrb[96].mxu0 %v8972_v51  ;;  %14573 = vmatpush3.bf16.msra.mxu1 %v15679_v7  ;;  %v9301_v7 = vpack.c.bf16 %v9295_v43, %v9294_v35  ;;  %v9134_v51 = vld [vmem:[#allocation2 + $0x5c] sm:$0xff] }
 0x84a   : > { %14574 = vmatprep.subr.bf16.mxu1 %v18706_v63  ;;  %14520 = vmatprep.mubr.msk.bf16.mxu1 %vm15850_vm0, %v18706_v63 }
 0x84b   : > { %14556 = vmatprep.mubr.msk.bf16.mxu0 %vm15850_vm0, %v18706_v63  ;;  %14609 = vmatpush3.bf16.msra.mxu0 %v15681_v48  ;;  %v9296_v48 = vld [vmem:[#allocation2 + $0x55] sm:$0xff] }
 0x84c   : > { %14610 = vmatprep.subr.bf16.mxu0 %v18706_v63 }
 0x84d   : > { %14575 = vmatpush3.bf16.msra.mxu1 %v15680_v52  ;;  %v9297_v52 = vld [vmem:[#allocation2 + $0x5d] sm:$0xff] }
 0x84e   : > { %14576 = vmatprep.subr.bf16.mxu1 %v18706_v63  ;;  %v9302_v30 = vpack.c.bf16 %v9297_v52, %v9296_v48  ;;  %v15706_v48 = vld [vmem:[%s19631_s1 + $0x950] sm:$0xff]  }
 0x84f   : > { %14611 = vmatpush3.bf16.msra.mxu0 %v15683_v25 }
 0x850   : > { %14521 = vmatmul.mubr.bf16.gmra.mrb[128].mxu1 %v8810_v41  ;;  %14612 = vmatprep.subr.bf16.mxu0 %v18706_v63  ;;  %v15686_v41 = vld [vmem:[%s19631_s1 + $0x860] sm:$0xff]  }
 0x851   : > { %14557 = vmatmul.mubr.bf16.gmra.mrb[100].mxu0 %v8973_v10  ;;  %14577 = vmatpush3.bf16.msra.mxu1 %v15682_v24  ;;  %v9452_v24 = vld [vmem:[#allocation2 + $0x1e] sm:$0xff] }
 0x852   : > { %14524 = vmatprep.mubr.msk.bf16.mxu1 %vm15850_vm0, %v18706_v63  ;;  %14560 = vmatprep.mubr.msk.bf16.mxu0 %vm15850_vm0, %v18706_v63  ;;  %v9461_v10 = vpack.c.bf16 %v9452_v24, %v9451_v12 }
 0x853   : > { %14578 = vmatprep.subr.bf16.mxu1 %v18706_v63  ;;  %14613 = vmatpush3.bf16.msra.mxu0 %v15685_v36  ;;  %v9454_v36 = vld [vmem:[#allocation2 + $0x2e] sm:$0xff] }
 0x854   : > { %14614 = vmatprep.subr.bf16.mxu0 %v18706_v63 }
 0x855   : > { %14579 = vmatpush3.bf16.msra.mxu1 %v15684_v4  ;;  %v9453_v4 = vld [vmem:[#allocation2 + $0x26] sm:$0xff] }
 0x856   : > { %14580 = vmatprep.subr.bf16.mxu1 %v18706_v63 }
 0x857   : > { %14615 = vmatpush3.bf16.msra.mxu0 %v15687_v60  ;;  %v9462_v60 = vpack.c.bf16 %v9454_v36, %v9453_v4 }
 0x858   : > { %14525 = vmatmul.mubr.bf16.gmra.mrb[132].mxu1 %v8811_v29  ;;  %14616 = vmatprep.subr.bf16.mxu0 %v18706_v63  ;;  %v8968_v29 = vld [vmem:[#allocation2 + $0x3c] sm:$0xff] }
 0x859   : > { %14561 = vmatmul.mubr.bf16.gmra.mrb[104].mxu0 %v8974_v14  ;;  %14581 = vmatpush3.bf16.msra.mxu1 %v15686_v41  ;;  %v8975_v32 = vpack.c.bf16 %v18774_v0, %v8968_v29  ;;  %v9137_v6 = vpack.c.bf16 %v8968_v29, %v18745_v3  ;;  %v9456_v3 = vld [vmem:[#allocation2 + $0x3e] sm:$0xff]  ;;  %v9455_v41 = vld [vmem:[#allocation2 + $0x36] sm:$0xff]  ;;  %v9458_v14 = vld [vmem:[#allocation2 + $0x4e] sm:$0xff] }
 0x85a   : > { %14528 = vmatprep.mubr.msk.bf16.mxu1 %vm15850_vm0, %v18706_v63  ;;  %14564 = vmatprep.mubr.msk.bf16.mxu0 %vm15850_vm0, %v18706_v63  ;;  %v9463_v59 = vpack.c.bf16 %v9456_v3, %v9455_v41  ;;  %v9460_v0 = vld [vmem:[#allocation2 + $0x5e] sm:$0xff] }
 0x85b   : > { %14582 = vmatprep.subr.bf16.mxu1 %v18706_v63  ;;  %14617 = vmatpush3.bf16.msra.mxu0 %v15688_v47  ;;  %v9457_v47 = vld [vmem:[#allocation2 + $0x46] sm:$0xff] }
 0x85c   : > { %14618 = vmatprep.subr.bf16.mxu0 %v18706_v63 }
 0x85d   : > { %14583 = vmatpush3.bf16.msra.mxu1 %v15689_v8  ;;  %v9464_v8 = vpack.c.bf16 %v9458_v14, %v9457_v47  ;;  %v15709_v14 = vld [vmem:[%s19631_s1 + $0x910] sm:$0xff]  }
 0x85e   : > { %14584 = vmatprep.subr.bf16.mxu1 %v18706_v63 }
 0x85f   : > { %14619 = vmatpush3.bf16.msra.mxu0 %v15690_v61  ;;  %v9459_v61 = vld [vmem:[#allocation2 + $0x56] sm:$0xff] }
 0x860   : > { %14529 = vmatmul.mubr.bf16.gmra.mrb[136].mxu1 %v8812_v21  ;;  %14620 = vmatprep.subr.bf16.mxu0 %v18706_v63  ;;  %v18800_v21 = vld [vmem:[#allocation2 + $0x54] sm:$0xff]  ;;  %v9465_v29 = vpack.c.bf16 %v9460_v0, %v9459_v61 }
 0x861   : > { %14565 = vmatmul.mubr.bf16.gmra.mrb[108].mxu0 %v8975_v32  ;;  %14532 = vmatprep.mubr.msk.bf16.mxu1 %vm15850_vm0, %v18706_v63  ;;  %v8976_v49 = vpack.c.bf16 %v18800_v21, %v8970_v56  ;;  %v9139_v25 = vpack.c.bf16 %v9134_v51, %v18800_v21  ;;  %v15705_v51 = vld [vmem:[%s19631_s1 + $0x900] sm:$0xff]  }
 0x862   : > { %14568 = vmatprep.mubr.msk.bf16.mxu0 %vm15850_vm0, %v18706_v63  ;;  %14585 = vmatpush3.bf16.msra.mxu1 %v15691_v23 }
 0x863   : > { %14621 = vmatpush3.bf16.msra.mxu0 %v15692_v53  ;;  %14586 = vmatprep.subr.bf16.mxu1 %v18706_v63 }
 0x864   : > { %14622 = vmatprep.subr.bf16.mxu0 %v18706_v63 }
 0x866   : > { %14587 = vmatpush3.bf16.msra.mxu1 %v15693_v27 }
 0x867   : > { %14623 = vmatpush3.bf16.msra.mxu0 %v15694_v40  ;;  %14644 = vmatprep.subr.bf16.mxu1 %v18706_v63 }
 0x868   : > { %14533 = vmatmul.mubr.bf16.gmra.mrb[140].mxu1 %v8813_v15  ;;  %14680 = vmatprep.subr.bf16.mxu0 %v18706_v63  ;;  %v9291_v15 = vld [vmem:[#allocation2 + $0x2d] sm:$0xff] }
 0x869   : > { %14569 = vmatmul.mubr.bf16.gmra.mrb[112].mxu0 %v8976_v49  ;;  %14588 = vmatprep.mubr.msk.bf16.mxu1 %vm15850_vm0, %v18706_v63  ;;  %v9299_v62 = vpack.c.bf16 %v9291_v15, %v9290_v54 }
 0x86a   : > { %14624 = vmatprep.mubr.msk.bf16.mxu0 %vm15850_vm0, %v18706_v63 }
 0x870   : > { %14589 = vmatmul.mubr.bf16.vlgmr.msra.gmra.mrb[144].mxu1 %v9135_v44 }
 0x871   : > { %14625 = vmatmul.mubr.bf16.vlgmr.msra.gmra.mrb[116].mxu0 %v9298_v17  ;;  %14645 = vmatpush3.bf16.msra.mxu1 %v15695_v45 }
 0x872   : > { %14646 = vmatprep.subr.bf16.mxu1 %v18706_v63  ;;  %14592 = vmatprep.mubr.msk.bf16.mxu1 %vm15850_vm0, %v18706_v63 }
 0x873   : > { %14628 = vmatprep.mubr.msk.bf16.mxu0 %vm15850_vm0, %v18706_v63  ;;  %14681 = vmatpush3.bf16.msra.mxu0 %v15703_v28 }
 0x874   : > { %14682 = vmatprep.subr.bf16.mxu0 %v18706_v63 }
 0x875   : > { %14647 = vmatpush3.bf16.msra.mxu1 %v15696_v37 }
 0x876   : > { %14648 = vmatprep.subr.bf16.mxu1 %v18706_v63 }
 0x878   : > { %14593 = vmatmul.mubr.bf16.gmra.mrb[148].mxu1 %v9136_v38 }
 0x879   : > { %14629 = vmatmul.mubr.bf16.gmra.mrb[120].mxu0 %v9299_v62  ;;  %14649 = vmatpush3.bf16.msra.mxu1 %v15697_v42 }
 0x87a   : > { %14596 = vmatprep.mubr.msk.bf16.mxu1 %vm15850_vm0, %v18706_v63  ;;  %14632 = vmatprep.mubr.msk.bf16.mxu0 %vm15850_vm0, %v18706_v63 }
 0x87b   : > { %14650 = vmatprep.subr.bf16.mxu1 %v18706_v63 }
 0x87d   : > { %14651 = vmatpush3.bf16.msra.mxu1 %v15698_v19 }
 0x87e   : > { %14652 = vmatprep.subr.bf16.mxu1 %v18706_v63 }
 0x880   : > { %14597 = vmatmul.mubr.bf16.gmra.mrb[152].mxu1 %v9137_v6 }
 0x881   : > { %14633 = vmatmul.mubr.bf16.gmra.mrb[124].mxu0 %v9300_v11  ;;  %14653 = vmatpush3.bf16.msra.mxu1 %v15699_v20 }
 0x882   : > { %14600 = vmatprep.mubr.msk.bf16.mxu1 %vm15850_vm0, %v18706_v63  ;;  %14636 = vmatprep.mubr.msk.bf16.mxu0 %vm15850_vm0, %v18706_v63 }
 0x883   : > { %14654 = vmatprep.subr.bf16.mxu1 %v18706_v63 }
 0x885   : > { %14655 = vmatpush3.bf16.msra.mxu1 %v15700_v58 }
 0x886   : > { %14656 = vmatprep.subr.bf16.mxu1 %v18706_v63 }
 0x888   : > { %14601 = vmatmul.mubr.bf16.gmra.mrb[156].mxu1 %v9138_v1 }
 0x889   : > { %14637 = vmatmul.mubr.bf16.gmra.mrb[128].mxu0 %v9301_v7  ;;  %14604 = vmatprep.mubr.msk.bf16.mxu1 %vm15850_vm0, %v18706_v63 }
 0x88a   : > { %14640 = vmatprep.mubr.msk.bf16.mxu0 %vm15850_vm0, %v18706_v63  ;;  %14657 = vmatpush3.bf16.msra.mxu1 %v15701_v31  ;;  %v15704_v31 = vld [vmem:[%s19631_s1 + $0x948] sm:$0xff]  }
 0x88b   : > { %14658 = vmatprep.subr.bf16.mxu1 %v18706_v63  ;;  %14683 = vmatpush3.bf16.msra.mxu0 %v15704_v31 }
 0x88c   : > { %14684 = vmatprep.subr.bf16.mxu0 %v18706_v63 }
 0x88e   : > { %14659 = vmatpush3.bf16.msra.mxu1 %v15702_v16 }
 0x88f   : > { %14716 = vmatprep.subr.bf16.mxu1 %v18706_v63  ;;  %14685 = vmatpush3.bf16.msra.mxu0 %v15706_v48 }
 0x890   : > { %14605 = vmatmul.mubr.bf16.gmra.mrb[160].mxu1 %v9139_v25  ;;  %14686 = vmatprep.subr.bf16.mxu0 %v18706_v63 }
 0x891   : > { %14641 = vmatmul.mubr.bf16.gmra.mrb[132].mxu0 %v9302_v30  ;;  %14660 = vmatprep.mubr.msk.bf16.mxu1 %vm15850_vm0, %v18706_v63 }
 0x892   : > { %14696 = vmatprep.mubr.msk.bf16.mxu0 %vm15850_vm0, %v18706_v63 }
 0x898   : > { %14661 = vmatmul.mubr.bf16.vlgmr.msra.gmra.mrb[164].mxu1 %v9461_v10 }
 0x899   : > { %14664 = vmatprep.mubr.msk.bf16.mxu1 %vm15850_vm0, %v18706_v63  ;;  %14717 = vmatpush3.bf16.msra.mxu1 %v15705_v51 }
 0x89a   : > { %14718 = vmatprep.subr.bf16.mxu1 %v18706_v63 }
 0x8a0   : > { %14665 = vmatmul.mubr.bf16.gmra.mrb[168].mxu1 %v9462_v60  ;;  %v15707_v60 = vld [vmem:[%s19631_s1 + $0x908] sm:$0xff]  }
 0x8a1   : > { %14668 = vmatprep.mubr.msk.bf16.mxu1 %vm15850_vm0, %v18706_v63  ;;  %14719 = vmatpush3.bf16.msra.mxu1 %v15707_v60 }
 0x8a2   : > { %14720 = vmatprep.subr.bf16.mxu1 %v18706_v63 }
 0x8a5   : > { %14721 = vmatpush3.bf16.msra.mxu1 %v15709_v14 }
 0x8a6   : > { %14722 = vmatprep.subr.bf16.mxu1 %v18706_v63 }
 0x8a8   : > { %14669 = vmatmul.mubr.bf16.gmra.mrb[172].mxu1 %v9463_v59  ;;  %v15708_v59 = vld [vmem:[%s19631_s1 + $0x958] sm:$0xff]  }
 0x8a9   : > { %14672 = vmatprep.mubr.msk.bf16.mxu1 %vm15850_vm0, %v18706_v63  ;;  %14687 = vmatpush3.bf16.msra.mxu0 %v15708_v59  ;;  %v15718_v59 = vld [vmem:[%s19631_s1 + $0x938] sm:$0xff]  }
 0x8aa   : > { %14688 = vmatprep.subr.bf16.mxu0 %v18706_v63 }
 0x8b0   : > { %14673 = vmatmul.mubr.bf16.gmra.mrb[176].mxu1 %v9464_v8 }
 0x8b1   : > { %14676 = vmatprep.mubr.msk.bf16.mxu1 %vm15850_vm0, %v18706_v63 }
 0x8b8   : > { %14677 = vmatmul.mubr.bf16.gmra.mrb[180].mxu1 %v9465_v29 }
 0x8b9   : > { %14732 = vmatprep.mubr.msk.bf16.mxu1 %vm15850_vm0, %v18706_v63 }
 0x8cb   : > { %v8313_v23 = vpop.f32.mrb[84].mxu1 }
 0x8cc   : > { %v8434_v32 = vpop.f32.mrb[56].mxu0  ;;  %v14374_v53 = vpop.f32.mrb[85].mxu1 }
 0x8cd   : > { %v18882_v27 = vadd.f32 %v8434_v32, %v8313_v23  ;;  %v14410_v40 = vpop.f32.mrb[57].mxu0  ;;  %v8316_v56 = vpop.f32.mrb[86].mxu1 }
 0x8ce   : > { %v8437_v21 = vpop.f32.mrb[58].mxu0  ;;  %v14375_v49 = vpop.f32.mrb[87].mxu1 }
 0x8cf   : > { %v18884_v33 = vadd.f32 %v8437_v21, %v8316_v56  ;;  %v14411_v45 = vpop.f32.mrb[59].mxu0 }
 0x8d3   : > { %v8321_v44 = vpop.f32.mrb[88].mxu1 }
 0x8d4   : > { %v8442_v34 = vpop.f32.mrb[60].mxu0  ;;  %v14378_v17 = vpop.f32.mrb[89].mxu1 }
 0x8d5   : > { %v18886_v37 = vadd.f32 %v8442_v34, %v8321_v44  ;;  %v14414_v15 = vpop.f32.mrb[61].mxu0  ;;  %v8324_v42 = vpop.f32.mrb[90].mxu1  ;;  %v15710_v34 = vld [vmem:[%s19631_s1 + $0x960] sm:$0xff]   ;;  %v15711_v17 = vld [vmem:[%s19631_s1 + $0x918] sm:$0xff]  }
 0x8d6   : > { %v8445_v38 = vpop.f32.mrb[62].mxu0  ;;  %v14379_v54 = vpop.f32.mrb[91].mxu1  ;;  %14689 = vmatpush3.bf16.msra.mxu0 %v15710_v34  ;;  %14723 = vmatpush3.bf16.msra.mxu1 %v15711_v17 }
 0x8d7   : > { %v18888_v62 = vadd.f32 %v8445_v38, %v8324_v42  ;;  %v14415_v19 = vpop.f32.mrb[63].mxu0  ;;  %14724 = vmatprep.subr.bf16.mxu1 %v18706_v63  ;;  %14690 = vmatprep.subr.bf16.mxu0 %v18706_v63 }
 0x8db   : > { %v8329_v20 = vpop.f32.mrb[92].mxu1 }
 0x8dc   : > { %v8450_v6 = vpop.f32.mrb[64].mxu0  ;;  %v14382_v39 = vpop.f32.mrb[93].mxu1 }
 0x8dd   : > { %v18894_v11 = vadd.f32 %v8450_v6, %v8329_v20  ;;  %v14418_v58 = vpop.f32.mrb[65].mxu0  ;;  %v8332_v43 = vpop.f32.mrb[94].mxu1  ;;  %v15713_v20 = vld [vmem:[%s19631_s1 + $0x968] sm:$0xff]  }
 0x8de   : > { %v8453_v1 = vpop.f32.mrb[66].mxu0  ;;  %v14383_v35 = vpop.f32.mrb[95].mxu1  ;;  %14691 = vmatpush3.bf16.msra.mxu0 %v15713_v20 }
 0x8df   : > { %v18899_v7 = vadd.f32 %v8453_v1, %v8332_v43  ;;  %v14419_v16 = vpop.f32.mrb[67].mxu0  ;;  %14692 = vmatprep.subr.bf16.mxu0 %v18706_v63  ;;  %v15714_v35 = vld [vmem:[%s19631_s1 + $0x928] sm:$0xff]  }
 0x8e3   : > { %v8337_v52 = vpop.f32.mrb[96].mxu1 }
 0x8e4   : > { %v8458_v25 = vpop.f32.mrb[68].mxu0  ;;  %v14386_v30 = vpop.f32.mrb[97].mxu1 }
 0x8e5   : > { %v18909_v24 = vadd.f32 %v8458_v25, %v8337_v52  ;;  %v14422_v12 = vpop.f32.mrb[69].mxu0  ;;  %v8340_v10 = vpop.f32.mrb[98].mxu1  ;;  %v15715_v30 = vld [vmem:[%s19631_s1 + $0x970] sm:$0xff]  }
 0x8e6   : > { %v8461_v36 = vpop.f32.mrb[70].mxu0  ;;  %v14387_v4 = vpop.f32.mrb[99].mxu1  ;;  %14693 = vmatpush3.bf16.msra.mxu0 %v15715_v30 }
 0x8e7   : > { %v18915_v3 = vadd.f32 %v8461_v36, %v8340_v10  ;;  %v14423_v41 = vpop.f32.mrb[71].mxu0  ;;  %14694 = vmatprep.subr.bf16.mxu0 %v18706_v63 }
 0x8eb   : > { %v8345_v47 = vpop.f32.mrb[100].mxu1 }
 0x8ec   : > { %v8466_v8 = vpop.f32.mrb[72].mxu0  ;;  %v14390_v61 = vpop.f32.mrb[101].mxu1 }
 0x8ed   : > { %v18925_v0 = vadd.f32 %v8466_v8, %v8345_v47  ;;  %v14426_v29 = vpop.f32.mrb[73].mxu0  ;;  %v8348_v23 = vpop.f32.mrb[102].mxu1 }
 0x8ee   : > { %v8469_v32 = vpop.f32.mrb[74].mxu0  ;;  %v14391_v53 = vpop.f32.mrb[103].mxu1 }
 0x8ef   : > { %v18928_v40 = vadd.f32 %v8469_v32, %v8348_v23  ;;  %v14427_v56 = vpop.f32.mrb[75].mxu0 }
 0x8f3   : > { %v8587_v21 = vpop.f32.mrb[104].mxu1 }
 0x8f4   : > { %v8626_v49 = vadd.f32 %v8587_v21, %v18882_v27  ;;  %v8750_v45 = vpop.f32.mrb[76].mxu0  ;;  %v14446_v44 = vpop.f32.mrb[105].mxu1  ;;  %v15712_v27 = vld [vmem:[%s19631_s1 + $0x920] sm:$0xff]  }
 0x8f5   : > { %v14482_v15 = vpop.f32.mrb[77].mxu0  ;;  %v8590_v42 = vpop.f32.mrb[106].mxu1  ;;  %14725 = vmatpush3.bf16.msra.mxu1 %v15712_v27 }
 0x8f6   : > { %v18937_v38 = vadd.f32 %v8750_v45, %v8626_v49  ;;  %v8627_v54 = vadd.f32 %v8590_v42, %v18884_v33  ;;  %v8753_v19 = vpop.f32.mrb[78].mxu0  ;;  %v14447_v28 = vpop.f32.mrb[107].mxu1  ;;  %14726 = vmatprep.subr.bf16.mxu1 %v18706_v63 }
 0x8f7   : > { %v14483_v6 = vpop.f32.mrb[79].mxu0 }
 0x8f8   : > { %v18948_v39 = vadd.f32 %v8753_v19, %v8627_v54 }
 0x8f9   : > { %14727 = vmatpush3.bf16.msra.mxu1 %v15714_v35 }
 0x8fa   : > { %14728 = vmatprep.subr.bf16.mxu1 %v18706_v63 }
 0x8fb   : > { %v8595_v33 = vpop.f32.mrb[108].mxu1 }
 0x8fc   : > { %v8628_v58 = vadd.f32 %v8595_v33, %v18886_v37  ;;  %v8758_v43 = vpop.f32.mrb[80].mxu0  ;;  %v14450_v1 = vpop.f32.mrb[109].mxu1  ;;  %v15716_v37 = vld [vmem:[%s19631_s1 + $0x930] sm:$0xff]  }
 0x8fd   : > { %v14486_v31 = vpop.f32.mrb[81].mxu0  ;;  %v8598_v16 = vpop.f32.mrb[110].mxu1  ;;  %14729 = vmatpush3.bf16.msra.mxu1 %v15716_v37 }
 0x8fe   : > { %v18956_v51 = vadd.f32 %v8758_v43, %v8628_v58  ;;  %v8629_v48 = vadd.f32 %v8598_v16, %v18888_v62  ;;  %v8761_v52 = vpop.f32.mrb[82].mxu0  ;;  %v14451_v25 = vpop.f32.mrb[111].mxu1  ;;  %v15717_v62 = vld [vmem:[%s19631_s1 + $0x978] sm:$0xff]   ;;  %14730 = vmatprep.subr.bf16.mxu1 %v18706_v63 }
 0x8ff   : > { %v14487_v12 = vpop.f32.mrb[83].mxu0  ;;  %14695 = vmatpush3.bf16.msra.mxu0 %v15717_v62 }
 0x900   : > { %v18966_v10 = vadd.f32 %v8761_v52, %v8629_v48  ;;  %14752 = vmatprep.subr.bf16.mxu0 %v18706_v63 }
 0x901   : > { %14731 = vmatpush3.bf16.msra.mxu1 %v15718_v59 }
 0x902   : > { %14788 = vmatprep.subr.bf16.mxu1 %v18706_v63 }
 0x903   : > { %v8603_v36 = vpop.f32.mrb[112].mxu1 }
 0x904   : > { %v8630_v4 = vadd.f32 %v8603_v36, %v18894_v11  ;;  %v8766_v60 = vpop.f32.mrb[84].mxu0  ;;  %v14454_v41 = vpop.f32.mrb[113].mxu1 }
 0x905   : > { %v14490_v14 = vpop.f32.mrb[85].mxu0  ;;  %v8606_v47 = vpop.f32.mrb[114].mxu1 }
 0x906   : > { %v8793_v8 = vadd.f32 %v8766_v60, %v8630_v4  ;;  %v8631_v61 = vadd.f32 %v8606_v47, %v18899_v7  ;;  %v8769_v29 = vpop.f32.mrb[86].mxu0  ;;  %v14455_v23 = vpop.f32.mrb[115].mxu1 }
 0x907   : > { %v14491_v32 = vpop.f32.mrb[87].mxu0 }
 0x908   : > { %v8794_v11 = vadd.f32 %v8769_v29, %v8631_v61 }
 0x90b   : > { %v8611_v53 = vpop.f32.mrb[116].mxu1 }
 0x90c   : > { %v8632_v56 = vadd.f32 %v8611_v53, %v18909_v24  ;;  %v8774_v21 = vpop.f32.mrb[88].mxu0  ;;  %v14458_v49 = vpop.f32.mrb[117].mxu1 }
 0x90d   : > { %v14494_v45 = vpop.f32.mrb[89].mxu0  ;;  %v8614_v44 = vpop.f32.mrb[118].mxu1 }
 0x90e   : > { %v8795_v34 = vadd.f32 %v8774_v21, %v8632_v56  ;;  %v8633_v17 = vadd.f32 %v8614_v44, %v18915_v3  ;;  %v8777_v15 = vpop.f32.mrb[90].mxu0  ;;  %v14459_v42 = vpop.f32.mrb[119].mxu1 }
 0x90f   : > { %v14495_v7 = vpop.f32.mrb[91].mxu0 }
 0x910   : > { %v8796_v54 = vadd.f32 %v8777_v15, %v8633_v17 }
 0x913   : > { %v8619_v19 = vpop.f32.mrb[120].mxu1 }
 0x914   : > { %v8634_v28 = vadd.f32 %v8619_v19, %v18925_v0  ;;  %v8782_v27 = vpop.f32.mrb[92].mxu0  ;;  %v14462_v20 = vpop.f32.mrb[121].mxu1 }
 0x915   : > { %v14498_v6 = vpop.f32.mrb[93].mxu0  ;;  %v8622_v33 = vpop.f32.mrb[122].mxu1 }
 0x916   : > { %v8797_v58 = vadd.f32 %v8782_v27, %v8634_v28  ;;  %v8635_v24 = vadd.f32 %v8622_v33, %v18928_v40  ;;  %v8785_v43 = vpop.f32.mrb[94].mxu0  ;;  %v14463_v1 = vpop.f32.mrb[123].mxu1 }
 0x917   : > { %v14499_v35 = vpop.f32.mrb[95].mxu0 }
 0x918   : > { %v8798_v31 = vadd.f32 %v8785_v43, %v8635_v24 }
 0x91b   : > { %v8913_v16 = vpop.f32.mrb[124].mxu1 }
 0x91c   : > { %v8952_v3 = vadd.f32 %v8913_v16, %v18937_v38  ;;  %v9076_v48 = vpop.f32.mrb[96].mxu0  ;;  %v14518_v52 = vpop.f32.mrb[125].mxu1 }
 0x91d   : > { %v14554_v25 = vpop.f32.mrb[97].mxu0  ;;  %v8916_v30 = vpop.f32.mrb[126].mxu1 }
 0x91e   : > { %v9115_v37 = vadd.f32 %v9076_v48, %v8952_v3  ;;  %v8953_v0 = vadd.f32 %v8916_v30, %v18948_v39  ;;  %v9079_v12 = vpop.f32.mrb[98].mxu0  ;;  %v14519_v62 = vpop.f32.mrb[127].mxu1 }
 0x91f   : > { %v14555_v36 = vpop.f32.mrb[99].mxu0 }
 0x920   : > { %v9116_v4 = vadd.f32 %v9079_v12, %v8953_v0 }
 0x923   : > { %v8921_v60 = vpop.f32.mrb[128].mxu1 }
 0x924   : > { %v8954_v40 = vadd.f32 %v8921_v60, %v18956_v51  ;;  %v9084_v41 = vpop.f32.mrb[100].mxu0  ;;  %v14522_v59 = vpop.f32.mrb[129].mxu1 }
 0x925   : > { %v14558_v14 = vpop.f32.mrb[101].mxu0  ;;  %v8924_v47 = vpop.f32.mrb[130].mxu1 }
 0x926   : > { %v9117_v61 = vadd.f32 %v9084_v41, %v8954_v40  ;;  %v8955_v38 = vadd.f32 %v8924_v47, %v18966_v10  ;;  %v9087_v29 = vpop.f32.mrb[102].mxu0  ;;  %v14523_v23 = vpop.f32.mrb[131].mxu1 }
 0x927   : > { %v14559_v32 = vpop.f32.mrb[103].mxu0 }
 0x928   : > { %v9118_v53 = vadd.f32 %v9087_v29, %v8955_v38 }
 0x92b   : > { %v8929_v56 = vpop.f32.mrb[132].mxu1 }
 0x92c   : > { %v8956_v39 = vadd.f32 %v8929_v56, %v8793_v8  ;;  %v9092_v21 = vpop.f32.mrb[104].mxu0  ;;  %v14526_v49 = vpop.f32.mrb[133].mxu1 }
 0x92d   : > { %v14562_v45 = vpop.f32.mrb[105].mxu0  ;;  %v8932_v44 = vpop.f32.mrb[134].mxu1 }
 0x92e   : > { %v9119_v17 = vadd.f32 %v9092_v21, %v8956_v39  ;;  %v8957_v15 = vadd.f32 %v8932_v44, %v8794_v11  ;;  %v9095_v51 = vpop.f32.mrb[106].mxu0  ;;  %v14527_v42 = vpop.f32.mrb[135].mxu1 }
 0x92f   : > { %v14563_v7 = vpop.f32.mrb[107].mxu0 }
 0x930   : > { %v9120_v19 = vadd.f32 %v9095_v51, %v8957_v15 }
 0x933   : > { %v8937_v28 = vpop.f32.mrb[136].mxu1 }
 0x934   : > { %v8958_v27 = vadd.f32 %v8937_v28, %v8795_v34  ;;  %v9100_v20 = vpop.f32.mrb[108].mxu0  ;;  %v14530_v10 = vpop.f32.mrb[137].mxu1 }
 0x935   : > { %v14566_v6 = vpop.f32.mrb[109].mxu0  ;;  %v8940_v33 = vpop.f32.mrb[138].mxu1 }
 0x936   : > { %v9121_v24 = vadd.f32 %v9100_v20, %v8958_v27  ;;  %v8959_v43 = vadd.f32 %v8940_v33, %v8796_v54  ;;  %v9103_v1 = vpop.f32.mrb[110].mxu0  ;;  %v14531_v8 = vpop.f32.mrb[139].mxu1 }
 0x937   : > { %v14567_v35 = vpop.f32.mrb[111].mxu0 }
 0x938   : > { %v9122_v16 = vadd.f32 %v9103_v1, %v8959_v43 }
 0x93b   : > { %v8945_v3 = vpop.f32.mrb[140].mxu1 }
 0x93c   : > { %v8960_v48 = vadd.f32 %v8945_v3, %v8797_v58  ;;  %v9108_v52 = vpop.f32.mrb[112].mxu0  ;;  %v14534_v11 = vpop.f32.mrb[141].mxu1 }
 0x93d   : > { %v14570_v25 = vpop.f32.mrb[113].mxu0  ;;  %v8948_v30 = vpop.f32.mrb[142].mxu1 }
 0x93e   : > { %v9123_v0 = vadd.f32 %v9108_v52, %v8960_v48  ;;  %v8961_v12 = vadd.f32 %v8948_v30, %v8798_v31  ;;  %v9111_v62 = vpop.f32.mrb[114].mxu0  ;;  %v14535_v34 = vpop.f32.mrb[143].mxu1 }
 0x93f   : > { %v14571_v36 = vpop.f32.mrb[115].mxu0 }
 0x940   : > { %v9124_v60 = vadd.f32 %v9111_v62, %v8961_v12 }
 0x943   : > { %v9239_v40 = vpop.f32.mrb[144].mxu1 }
 0x944   : > { %v9278_v41 = vadd.f32 %v9239_v40, %v9115_v37  ;;  %v9402_v59 = vpop.f32.mrb[116].mxu0  ;;  %v14590_v54 = vpop.f32.mrb[145].mxu1 }
 0x945   : > { %v14626_v14 = vpop.f32.mrb[117].mxu0  ;;  %v9242_v47 = vpop.f32.mrb[146].mxu1 }
 0x946   : > { %v9441_v38 = vadd.f32 %v9402_v59, %v9278_v41  ;;  %v9279_v29 = vadd.f32 %v9242_v47, %v9116_v4  ;;  %v9405_v23 = vpop.f32.mrb[118].mxu0  ;;  %v14591_v58 = vpop.f32.mrb[147].mxu1 }
 0x947   : > { %v14627_v32 = vpop.f32.mrb[119].mxu0 }
 0x948   : > { %v9442_v56 = vadd.f32 %v9405_v23, %v9279_v29  ;;  %v9616_v32 = vsub.s32 3, %v16547_v18 }
 0x94b   : > { %v9247_v39 = vpop.f32.mrb[148].mxu1 }
 0x94c   : > { %v9280_v21 = vadd.f32 %v9247_v39, %v9117_v61  ;;  %v9410_v49 = vpop.f32.mrb[120].mxu0  ;;  %v14594_v31 = vpop.f32.mrb[149].mxu1 }
 0x94d   : > { %v14630_v45 = vpop.f32.mrb[121].mxu0  ;;  %v9250_v44 = vpop.f32.mrb[150].mxu1 }
 0x94e   : > { %v9443_v15 = vadd.f32 %v9410_v49, %v9280_v21  ;;  %v9281_v51 = vadd.f32 %v9250_v44, %v9118_v53  ;;  %v9413_v42 = vpop.f32.mrb[122].mxu0  ;;  %v14595_v37 = vpop.f32.mrb[151].mxu1  ;;  %v15782_v21 = vld [vmem:[%s19632_s2] sm:$0x1f] }
 0x94f   : > { %v14631_v7 = vpop.f32.mrb[123].mxu0  ;;  %v19004_v49 = vrot.slane %v15782_v21, %v9616_v32 }
 0x950   : > { %v9444_v28 = vadd.f32 %v9413_v42, %v9281_v51 }
 0x953   : > { %v9255_v27 = vpop.f32.mrb[152].mxu1 }
 0x954   : > { %v9282_v20 = vadd.f32 %v9255_v27, %v9119_v17  ;;  %v9418_v10 = vpop.f32.mrb[124].mxu0  ;;  %v14598_v4 = vpop.f32.mrb[153].mxu1 }
 0x955   : > { %v14634_v6 = vpop.f32.mrb[125].mxu0  ;;  %v9258_v33 = vpop.f32.mrb[154].mxu1 }
 0x956   : > { %v18988_v43 = vadd.f32 %v9418_v10, %v9282_v20  ;;  %v9283_v1 = vadd.f32 %v9258_v33, %v9120_v19  ;;  %v9421_v61 = vpop.f32.mrb[126].mxu0  ;;  %v14599_v8 = vpop.f32.mrb[155].mxu1 }
 0x957   : > { %v14635_v35 = vpop.f32.mrb[127].mxu0 }
 0x958   : > { %v18990_v3 = vadd.f32 %v9421_v61, %v9283_v1 }
 0x95b   : > { %v9263_v48 = vpop.f32.mrb[156].mxu1 }
 0x95c   : > { %v9284_v53 = vadd.f32 %v9263_v48, %v9121_v24  ;;  %v9426_v52 = vpop.f32.mrb[128].mxu0  ;;  %v14602_v11 = vpop.f32.mrb[157].mxu1 }
 0x95d   : > { %v14638_v25 = vpop.f32.mrb[129].mxu0  ;;  %v9266_v30 = vpop.f32.mrb[158].mxu1 }
 0x95e   : > { %v18992_v12 = vadd.f32 %v9426_v52, %v9284_v53  ;;  %v9285_v17 = vadd.f32 %v9266_v30, %v9122_v16  ;;  %v9429_v62 = vpop.f32.mrb[130].mxu0  ;;  %v14603_v34 = vpop.f32.mrb[159].mxu1  ;;  %v9690_v53 = vld [vmem:[#allocation3 + $0x1] sm:$0xff] }
 0x95f   : > { %v14639_v36 = vpop.f32.mrb[131].mxu0 }
 0x960   : > { %v18994_v40 = vadd.f32 %v9429_v62, %v9285_v17  ;;  %v15719_v17 = vld [vmem:[%s19631_s1 + $0x980] sm:$0xff]  }
 0x963   : > { %v9271_v19 = vpop.f32.mrb[160].mxu1 }
 0x964   : > { %v9286_v41 = vadd.f32 %v9271_v19, %v9123_v0  ;;  %v9434_v59 = vpop.f32.mrb[132].mxu0  ;;  %v14606_v54 = vpop.f32.mrb[161].mxu1 }
 0x965   : > { %v14642_v14 = vpop.f32.mrb[133].mxu0  ;;  %v9274_v47 = vpop.f32.mrb[162].mxu1 }
 0x966   : > { %v18996_v29 = vadd.f32 %v9434_v59, %v9286_v41  ;;  %v9287_v24 = vadd.f32 %v9274_v47, %v9124_v60  ;;  %v9437_v23 = vpop.f32.mrb[134].mxu0  ;;  %v14607_v58 = vpop.f32.mrb[163].mxu1  ;;  %v15721_v59 = vld [vmem:[%s19631_s1 + $0x9c0] sm:$0xff]  }
 0x967   : > { %v14643_v39 = vpop.f32.mrb[135].mxu0 }
 0x968   : > { %v18999_v16 = vadd.f32 %v9437_v23, %v9287_v24 }
 0x96b   : > { %v9565_v0 = vpop.f32.mrb[164].mxu1 }
 0x96c   : > { %v9604_v31 = vadd.f32 %v9565_v0, %v9441_v38  ;;  %v14662_v45 = vpop.f32.mrb[165].mxu1  ;;  %v15722_v0 = vld [vmem:[%s19631_s1 + $0x990] sm:$0xff]  }
 0x96d   : > { %v9568_v44 = vpop.f32.mrb[166].mxu1 }
 0x96e   : > { %v9618_v51 = vadd.f32 %v19004_v49, %v9604_v31  ;;  %v9605_v60 = vadd.f32 %v9568_v44, %v9442_v56  ;;  %v14663_v42 = vpop.f32.mrb[167].mxu1 }
 0x970   : > { %v9628_v37 = vmax.f32 %v9618_v51, 0.0  ;;  %v9619_v7 = vadd.f32 %v19004_v49, %v9605_v60 }
 0x972   : > { %v19009_v27 = vmul.f32 %v17708_v5, %v9628_v37  ;;  %v9629_v20 = vmax.f32 %v9619_v7, 0.0 }
 0x973   : > { %v9573_v10 = vpop.f32.mrb[168].mxu1 }
 0x974   : > { %9648 = vst [vmem:[#allocation3 + $0xb] sm:$0xff] %v19009_v27  ;;  %v19013_v4 = vmul.f32 %v17745_v55, %v9629_v20  ;;  %v9606_v38 = vadd.f32 %v9573_v10, %v9443_v15  ;;  %v14666_v6 = vpop.f32.mrb[169].mxu1  ;;  %v19064_v10 = vld [vmem:[#allocation2] sm:$0xff] }
 0x975   : > { %v9576_v33 = vpop.f32.mrb[170].mxu1 }
 0x976   : > { %9649 = vst [vmem:[#allocation3 + $0x13] sm:$0xff] %v19013_v4  ;;  %v9620_v56 = vadd.f32 %v19004_v49, %v9606_v38  ;;  %v9607_v1 = vadd.f32 %v9576_v33, %v9444_v28  ;;  %v14667_v61 = vpop.f32.mrb[171].mxu1  ;;  %v10300_v8 = vpack.c.bf16 %v19013_v4, %v19009_v27  ;;  %v15755_v27 = vld [vmem:[%s19631_s1 + $0xac8] sm:$0xff]  }
 0x978   : > { %v9630_v35 = vmax.f32 %v9620_v56, 0.0  ;;  %v9621_v48 = vadd.f32 %v19004_v49, %v9607_v1  ;;  %v15724_v56 = vld [vmem:[%s19631_s1 + $0x998] sm:$0xff]  }
 0x97a   : > { %v19021_v52 = vmul.f32 %v17761_v46, %v9630_v35  ;;  %v9631_v11 = vmax.f32 %v9621_v48, 0.0 }
 0x97b   : > { %v9581_v15 = vpop.f32.mrb[172].mxu1  ;;  %v9691_v25 = vld [vmem:[#allocation3 + $0x9] sm:$0xff] }
 0x97c   : > { %v9659_v30 = vld [vmem:[#allocation3 + $0x8] sm:$0xff]  ;;  %9650 = vst [vmem:[#allocation3 + $0x1b] sm:$0xff] %v19021_v52  ;;  %v19028_v28 = vmul.f32 %v17780_v57, %v9631_v11  ;;  %v9608_v62 = vadd.f32 %v9581_v15, %v18988_v43  ;;  %v14670_v34 = vpop.f32.mrb[173].mxu1  ;;  %v9700_v36 = vpack.c.bf16 %v9691_v25, %v9690_v53  ;;  %v15720_v43 = vld [vmem:[%s19631_s1 + $0x988] sm:$0xff]   ;;  %v15726_v11 = vld [vmem:[%s19631_s1 + $0x9a0] sm:$0xff]  }
 0x97d   : > { %v9668_v19 = vpack.c.bf16 %v9659_v30, %v18706_v63  ;;  %v9584_v41 = vpop.f32.mrb[174].mxu1  ;;  %v9692_v21 = vld [vmem:[#allocation3 + $0x11] sm:$0xff] }
 0x97e   : > { %9651 = vst [vmem:[#allocation3 + $0x23] sm:$0xff] %v19028_v28  ;;  %v9622_v54 = vadd.f32 %v19004_v49, %v9608_v62  ;;  %v9609_v14 = vadd.f32 %v9584_v41, %v18990_v3  ;;  %v14671_v47 = vpop.f32.mrb[175].mxu1  ;;  %14697 = vmatmul.mubr.bf16.vlgmr.msra.gmra.mrb[136].mxu0 %v9700_v36  ;;  %v10301_v24 = vpack.c.bf16 %v19028_v28, %v19021_v52  ;;  %v15723_v3 = vld [vmem:[%s19631_s1 + $0x9c8] sm:$0xff]   ;;  %v9660_v44 = vld [vmem:[#allocation3 + $0x10] sm:$0xff] }
 0x97f   : > { %14733 = vmatmul.mubr.bf16.vlgmr.msra.gmra.mrb[184].mxu1 %v9668_v19  ;;  %14753 = vmatpush3.bf16.msra.mxu0 %v15719_v17  ;;  %v15727_v15 = vld [vmem:[%s19631_s1 + $0x9d8] sm:$0xff]  }
 0x980   : > { %14700 = vmatprep.mubr.msk.bf16.mxu0 %vm15850_vm0, %v18706_v63  ;;  %v9632_v23 = vmax.f32 %v9622_v54, 0.0  ;;  %v9623_v58 = vadd.f32 %v19004_v49, %v9609_v14  ;;  %14754 = vmatprep.subr.bf16.mxu0 %v18706_v63 }
 0x981   : > { %14736 = vmatprep.mubr.msk.bf16.mxu1 %vm15850_vm0, %v18706_v63  ;;  %14789 = vmatpush3.bf16.msra.mxu1 %v15721_v59 }
 0x982   : > { %v19053_v32 = vmul.f32 %v17820_v50, %v9632_v23  ;;  %v9633_v39 = vmax.f32 %v9623_v58, 0.0  ;;  %14790 = vmatprep.subr.bf16.mxu1 %v18706_v63  ;;  %v15729_v23 = vld [vmem:[%s19631_s1 + $0x9a8] sm:$0xff]  }
 0x983   : > { %v9589_v31 = vpop.f32.mrb[176].mxu1  ;;  %14755 = vmatpush3.bf16.msra.mxu0 %v15720_v43  ;;  %v9693_v45 = vld [vmem:[#allocation3 + $0x19] sm:$0xff] }
 0x984   : > { %v9661_v51 = vld [vmem:[#allocation3 + $0x18] sm:$0xff]  ;;  %9652 = vst [vmem:[#allocation3 + $0x2b] sm:$0xff] %v19053_v32  ;;  %v19061_v60 = vmul.f32 %v17844_v2, %v9633_v39  ;;  %v9610_v42 = vadd.f32 %v9589_v31, %v18992_v12  ;;  %v14674_v37 = vpop.f32.mrb[177].mxu1  ;;  %v9701_v7 = vpack.c.bf16 %v9693_v45, %v9692_v21  ;;  %14756 = vmatprep.subr.bf16.mxu0 %v19064_v10  ;;  %v15725_v12 = vld [vmem:[%s19631_s1 + $0x9d0] sm:$0xff]   ;;  %v15730_v31 = vld [vmem:[%s19631_s1 + $0x9e8] sm:$0xff]  }
 0x985   : > { %v9669_v20 = vpack.c.bf16 %v9661_v51, %v9660_v44  ;;  %v9592_v63 = vpop.f32.mrb[178].mxu1  ;;  %14791 = vmatpush3.bf16.msra.mxu1 %v15723_v3  ;;  %v9694_v53 = vld [vmem:[#allocation3 + $0x21] sm:$0xff] }
 0x986   : > { %9653 = vst [vmem:[#allocation3 + $0x33] sm:$0xff] %v19061_v60  ;;  %v9624_v38 = vadd.f32 %v19004_v49, %v9610_v42  ;;  %v9611_v6 = vadd.f32 %v9592_v63, %v18994_v40  ;;  %v14675_v33 = vpop.f32.mrb[179].mxu1  ;;  %14701 = vmatmul.mubr.bf16.gmra.mrb[140].mxu0 %v9701_v7  ;;  %v10302_v1 = vpack.c.bf16 %v19061_v60, %v19053_v32  ;;  %v9662_v17 = vld [vmem:[#allocation3 + $0x20] sm:$0xff]  ;;  %v15731_v7 = vld [vmem:[%s19631_s1 + $0x9b0] sm:$0xff]  }
 0x987   : > { %14737 = vmatmul.mubr.bf16.gmra.mrb[188].mxu1 %v9669_v20  ;;  %14757 = vmatpush3.bf16.msra.mxu0 %v15722_v0  ;;  %v15732_v63 = vld [vmem:[%s19631_s1 + $0x9f0] sm:$0xff]   ;;  %v15734_v33 = vld [vmem:[%s19631_s1 + $0x9f8] sm:$0xff]   ;;  %v19269_v4 = vld [vmem:[#allocation3 + $0x1c] sm:$0xff] }
 0x988   : > { %14704 = vmatprep.mubr.msk.bf16.mxu0 %vm15850_vm0, %v19064_v10  ;;  %v9634_v61 = vmax.f32 %v9624_v38, 0.0  ;;  %v9625_v40 = vadd.f32 %v19004_v49, %v9611_v6  ;;  %14740 = vmatprep.mubr.msk.bf16.mxu1 %vm15850_vm0, %v19064_v10  ;;  %v15733_v38 = vld [vmem:[%s19631_s1 + $0x9b8] sm:$0xff]   ;;  %v15762_v60 = vld [vmem:[%s19631_s1 + $0xae8] sm:$0xff]  }
 0x989   : > { %14758 = vmatprep.subr.bf16.mxu0 %v19064_v10  ;;  %14792 = vmatprep.subr.bf16.mxu1 %v19064_v10 }
 0x98a   : > { %v19086_v35 = vmul.f32 %v17886_v26, %v9634_v61  ;;  %v9635_v48 = vmax.f32 %v9625_v40, 0.0  ;;  %14793 = vmatpush3.bf16.msra.mxu1 %v15725_v12 }
 0x98b   : > { %v9597_v25 = vpop.f32.mrb[180].mxu1  ;;  %v9695_v30 = vld [vmem:[#allocation3 + $0x29] sm:$0xff]  ;;  %14759 = vmatpush3.bf16.msra.mxu0 %v15724_v56  ;;  %14794 = vmatprep.subr.bf16.mxu1 %v19064_v10 }
 0x98c   : > { %v9663_v62 = vld [vmem:[#allocation3 + $0x28] sm:$0xff]  ;;  %9654 = vst [vmem:[#allocation3 + $0x3b] sm:$0xff] %v19086_v35  ;;  %v19097_v34 = vmul.f32 %v17906_v13, %v9635_v48  ;;  %v9612_v36 = vadd.f32 %v9597_v25, %v18996_v29  ;;  %v14678_v19 = vpop.f32.mrb[181].mxu1  ;;  %v9702_v41 = vpack.c.bf16 %v9695_v30, %v9694_v53  ;;  %14760 = vmatprep.subr.bf16.mxu0 %v19064_v10  ;;  %v15728_v29 = vld [vmem:[%s19631_s1 + $0x9e0] sm:$0xff]  }
 0x98d   : > { %v9670_v59 = vpack.c.bf16 %v9663_v62, %v9662_v17  ;;  %v9600_v54 = vpop.f32.mrb[182].mxu1  ;;  %v9696_v0 = vld [vmem:[#allocation3 + $0x31] sm:$0xff]  ;;  %v9964_v53 = vld [vmem:[#allocation3 + $0x2] sm:$0xff]  ;;  %v9967_v19 = vld [vmem:[#allocation3 + $0x1a] sm:$0xff] }
 0x98e   : > { %9655 = vst [vmem:[#allocation3 + $0x43] sm:$0xff] %v19097_v34  ;;  %v9626_v14 = vadd.f32 %v19004_v49, %v9612_v36  ;;  %v9613_v47 = vadd.f32 %v9600_v54, %v18999_v16  ;;  %v14679_v43 = vpop.f32.mrb[183].mxu1  ;;  %14705 = vmatmul.mubr.bf16.gmra.mrb[144].mxu0 %v9702_v41  ;;  %14795 = vmatpush3.bf16.msra.mxu1 %v15727_v15  ;;  %v9664_v45 = vld [vmem:[#allocation3 + $0x30] sm:$0xff]  ;;  %v15735_v25 = vld [vmem:[%s19631_s1 + $0xa00] sm:$0xff]   ;;  %v15736_v36 = vld [vmem:[%s19631_s1 + $0xa08] sm:$0xff]  }
 0x98f   : > { %14741 = vmatmul.mubr.bf16.gmra.mrb[192].mxu1 %v9670_v59  ;;  %14761 = vmatpush3.bf16.msra.mxu0 %v15726_v11  ;;  %v10303_v58 = vpack.c.bf16 %v19097_v34, %v19086_v35  ;;  %v9965_v11 = vld [vmem:[#allocation3 + $0xa] sm:$0xff]  ;;  %v10128_v15 = vld [vmem:[#allocation3 + $0x12] sm:$0xff]  ;;  %v10130_v41 = vld [vmem:[#allocation3 + $0x22] sm:$0xff] }
 0x990   : > { %v9636_v3 = vmax.f32 %v9626_v14, 0.0  ;;  %v9627_v39 = vadd.f32 %v19004_v49, %v9613_v47  ;;  %14708 = vmatprep.mubr.msk.bf16.mxu0 %vm15850_vm0, %v19064_v10  ;;  %14744 = vmatprep.mubr.msk.bf16.mxu1 %vm15850_vm0, %v19064_v10  ;;  %v9974_v30 = vpack.c.bf16 %v9965_v11, %v9964_v53  ;;  %v10137_v17 = vpack.c.bf16 %v10128_v15, %v9965_v11  ;;  %v15737_v62 = vld [vmem:[%s19631_s1 + $0xa40] sm:$0xff]   ;;  %v15739_v59 = vld [vmem:[%s19631_s1 + $0xa48] sm:$0xff]   ;;  %v15738_v54 = vld [vmem:[%s19631_s1 + $0xa10] sm:$0xff]  }
 0x991   : > { %14796 = vmatprep.subr.bf16.mxu1 %v19064_v10  ;;  %14762 = vmatprep.subr.bf16.mxu0 %v19064_v10  ;;  %v9975_v14 = vpack.c.bf16 %v9967_v19, %v10128_v15  ;;  %v10138_v47 = vpack.c.bf16 %v10130_v41, %v9967_v19  ;;  %v15741_v43 = vld [vmem:[%s19631_s1 + $0xa50] sm:$0xff]   ;;  %v19243_v53 = vld [vmem:[#allocation3 + $0x14] sm:$0xff] }
 0x992   : > { %v19120_v16 = vmul.f32 %v17943_v22, %v9636_v3  ;;  %v9637_v21 = vmax.f32 %v9627_v39, 0.0  ;;  %14797 = vmatpush3.bf16.msra.mxu1 %v15728_v29  ;;  %v15740_v29 = vld [vmem:[%s19631_s1 + $0xa18] sm:$0xff]   ;;  %v15742_v39 = vld [vmem:[%s19631_s1 + $0xa20] sm:$0xff]   ;;  %v15757_v19 = vld [vmem:[%s19631_s1 + $0xad0] sm:$0xff]  }
 0x993   : > { %v9697_v49 = vld [vmem:[#allocation3 + $0x39] sm:$0xff]  ;;  %14763 = vmatpush3.bf16.msra.mxu0 %v15729_v23  ;;  %14798 = vmatprep.subr.bf16.mxu1 %v19064_v10  ;;  %v9969_v23 = vld [vmem:[#allocation3 + $0x2a] sm:$0xff] }
 0x994   : > { %v9665_v44 = vld [vmem:[#allocation3 + $0x38] sm:$0xff]  ;;  %9656 = vst [vmem:[#allocation3 + $0x4b] sm:$0xff] %v19120_v16  ;;  %v19127_v51 = vmul.f32 %v17955_v9, %v9637_v21  ;;  %v9703_v42 = vpack.c.bf16 %v9697_v49, %v9696_v0  ;;  %14764 = vmatprep.subr.bf16.mxu0 %v19064_v10  ;;  %v15743_v21 = vld [vmem:[%s19631_s1 + $0xa58] sm:$0xff]   ;;  %v9976_v0 = vpack.c.bf16 %v9969_v23, %v10130_v41 }
 0x995   : > { %v9671_v37 = vpack.c.bf16 %v9665_v44, %v9664_v45  ;;  %v9698_v6 = vld [vmem:[#allocation3 + $0x41] sm:$0xff]  ;;  %v10132_v3 = vld [vmem:[#allocation3 + $0x32] sm:$0xff] }
 0x996   : > { %9657 = vst [vmem:[#allocation3 + $0x53] sm:$0xff] %v19127_v51  ;;  %14709 = vmatmul.mubr.bf16.gmra.mrb[148].mxu0 %v9703_v42  ;;  %v10304_v20 = vpack.c.bf16 %v19127_v51, %v19120_v16  ;;  %14799 = vmatpush3.bf16.msra.mxu1 %v15730_v31  ;;  %v9666_v56 = vld [vmem:[#allocation3 + $0x40] sm:$0xff]  ;;  %v10139_v31 = vpack.c.bf16 %v10132_v3, %v9969_v23  ;;  %v15744_v49 = vld [vmem:[%s19631_s1 + $0xa60] sm:$0xff]   ;;  %v10453_v11 = vld [vmem:[#allocation3 + $0xc] sm:$0xff] }
 0x997   : > { %14745 = vmatmul.mubr.bf16.gmra.mrb[196].mxu1 %v9671_v37  ;;  %14712 = vmatprep.mubr.msk.bf16.mxu0 %vm15850_vm0, %v19064_v10  ;;  %v15745_v45 = vld [vmem:[%s19631_s1 + $0xa28] sm:$0xff]   ;;  %v15751_v15 = vld [vmem:[%s19631_s1 + $0xa80] sm:$0xff]   ;;  %v15756_v41 = vld [vmem:[%s19631_s1 + $0xa98] sm:$0xff]  }
 0x998   : > { %14748 = vmatprep.mubr.msk.bf16.mxu1 %vm15850_vm0, %v19064_v10  ;;  %14765 = vmatpush3.bf16.msra.mxu0 %v15731_v7  ;;  %v9971_v44 = vld [vmem:[#allocation3 + $0x3a] sm:$0xff]  ;;  %v10134_v42 = vld [vmem:[#allocation3 + $0x42] sm:$0xff]  ;;  %v19294_v28 = vld [vmem:[#allocation3 + $0x2c] sm:$0xff] }
 0x999   : > { %14800 = vmatprep.subr.bf16.mxu1 %v19064_v10  ;;  %14766 = vmatprep.subr.bf16.mxu0 %v19064_v10  ;;  %v15746_v37 = vld [vmem:[%s19631_s1 + $0xa68] sm:$0xff]   ;;  %v9977_v7 = vpack.c.bf16 %v9971_v44, %v10132_v3  ;;  %v19291_v52 = vld [vmem:[#allocation3 + $0x34] sm:$0xff]  ;;  %v15764_v23 = vld [vmem:[%s19631_s1 + $0xaf0] sm:$0xff]  }
 0x99a   : > { %14801 = vmatpush3.bf16.msra.mxu1 %v15732_v63  ;;  %v10140_v63 = vpack.c.bf16 %v10134_v42, %v9971_v44  ;;  %v19323_v32 = vld [vmem:[#allocation3 + $0x3c] sm:$0xff]  ;;  %v15765_v3 = vld [vmem:[%s19631_s1 + $0xab8] sm:$0xff]   ;;  %v15769_v44 = vld [vmem:[%s19631_s1 + $0xb10] sm:$0xff]  }
 0x99b   : > { %v9699_v12 = vld [vmem:[#allocation3 + $0x49] sm:$0xff]  ;;  %14802 = vmatprep.subr.bf16.mxu1 %v19064_v10  ;;  %v15768_v16 = vld [vmem:[%s19631_s1 + $0xb08] sm:$0xff]  }
 0x99c   : > { %v9667_v61 = vld [vmem:[#allocation3 + $0x48] sm:$0xff]  ;;  %v9704_v40 = vpack.c.bf16 %v9699_v12, %v9698_v6  ;;  %14767 = vmatpush3.bf16.msra.mxu0 %v15733_v38  ;;  %v15766_v34 = vld [vmem:[%s19631_s1 + $0xaf8] sm:$0xff]  }
 0x99d   : > { %v9672_v48 = vpack.c.bf16 %v9667_v61, %v9666_v56  ;;  %14824 = vmatprep.subr.bf16.mxu0 %v19064_v10  ;;  %v15747_v38 = vld [vmem:[%s19631_s1 + $0xa30] sm:$0xff]   ;;  %v10136_v56 = vld [vmem:[#allocation3 + $0x52] sm:$0xff] }
 0x99e   : > { %14713 = vmatmul.mubr.bf16.gmra.mrb[152].mxu0 %v9704_v40  ;;  %14803 = vmatpush3.bf16.msra.mxu1 %v15734_v33  ;;  %v15748_v6 = vld [vmem:[%s19631_s1 + $0xa70] sm:$0xff]   ;;  %v15749_v33 = vld [vmem:[%s19631_s1 + $0xa38] sm:$0xff]  }
 0x99f   : > { %14749 = vmatmul.mubr.bf16.gmra.mrb[200].mxu1 %v9672_v48  ;;  %14768 = vmatprep.mubr.msk.bf16.mxu0 %vm15850_vm0, %v19064_v10  ;;  %v9973_v12 = vld [vmem:[#allocation3 + $0x4a] sm:$0xff]  ;;  %v19348_v35 = vld [vmem:[#allocation3 + $0x54] sm:$0xff] }
 0x9a0   : > { %14804 = vmatprep.mubr.msk.bf16.mxu1 %vm15850_vm0, %v19064_v10  ;;  %14860 = vmatprep.subr.bf16.mxu1 %v19064_v10  ;;  %v15750_v61 = vld [vmem:[%s19631_s1 + $0xa78] sm:$0xff]   ;;  %v9978_v40 = vpack.c.bf16 %v9973_v12, %v10134_v42  ;;  %v10141_v48 = vpack.c.bf16 %v10136_v56, %v9973_v12  ;;  %v15772_v56 = vld [vmem:[%s19631_s1 + $0xb28] sm:$0xff]  }
 0x9a1   : > { %v10782_v51 = vld [vmem:[#allocation3 + $0x2d] sm:$0xff] }
 0x9a6   : > { %14769 = vmatmul.mubr.bf16.vlgmr.msra.gmra.mrb[156].mxu0 %v9974_v30  ;;  %v15753_v30 = vld [vmem:[%s19631_s1 + $0xac0] sm:$0xff]  }
 0x9a7   : > { %14805 = vmatmul.mubr.bf16.vlgmr.msra.gmra.mrb[204].mxu1 %v10137_v17  ;;  %14825 = vmatpush3.bf16.msra.mxu0 %v15735_v25  ;;  %v10463_v25 = vpack.c.bf16 %v19243_v53, %v10453_v11  ;;  %v15752_v17 = vld [vmem:[%s19631_s1 + $0xa88] sm:$0xff]   ;;  %v15773_v11 = vld [vmem:[%s19631_s1 + $0xb30] sm:$0xff]  }
 0x9a8   : > { %14772 = vmatprep.mubr.msk.bf16.mxu0 %vm15850_vm0, %v19064_v10  ;;  %14826 = vmatprep.subr.bf16.mxu0 %v19064_v10 }
 0x9a9   : > { %14808 = vmatprep.mubr.msk.bf16.mxu1 %vm15850_vm0, %v19064_v10  ;;  %14861 = vmatpush3.bf16.msra.mxu1 %v15737_v62  ;;  %v19263_v62 = vld [vmem:[#allocation3 + $0x24] sm:$0xff] }
 0x9aa   : > { %14862 = vmatprep.subr.bf16.mxu1 %v19064_v10  ;;  %v10627_v42 = vpack.c.bf16 %v19294_v28, %v19263_v62 }
 0x9ab   : > { %14827 = vmatpush3.bf16.msra.mxu0 %v15736_v36  ;;  %v10464_v36 = vpack.c.bf16 %v19263_v62, %v19269_v4 }
 0x9ac   : > { %14828 = vmatprep.subr.bf16.mxu0 %v19064_v10 }
 0x9ad   : > { %14863 = vmatpush3.bf16.msra.mxu1 %v15739_v59  ;;  %v15759_v59 = vld [vmem:[%s19631_s1 + $0xad8] sm:$0xff]  }
 0x9ae   : > { %14773 = vmatmul.mubr.bf16.gmra.mrb[160].mxu0 %v9975_v14  ;;  %14864 = vmatprep.subr.bf16.mxu1 %v19064_v10  ;;  %v15760_v14 = vld [vmem:[%s19631_s1 + $0xae0] sm:$0xff]  }
 0x9af   : > { %14809 = vmatmul.mubr.bf16.gmra.mrb[208].mxu1 %v10138_v47  ;;  %14829 = vmatpush3.bf16.msra.mxu0 %v15738_v54  ;;  %v10465_v54 = vpack.c.bf16 %v19291_v52, %v19294_v28  ;;  %v15761_v47 = vld [vmem:[%s19631_s1 + $0xaa8] sm:$0xff]  }
 0x9b0   : > { %14776 = vmatprep.mubr.msk.bf16.mxu0 %vm15850_vm0, %v19064_v10  ;;  %14812 = vmatprep.mubr.msk.bf16.mxu1 %vm15850_vm0, %v19064_v10  ;;  %v10947_v28 = vld [vmem:[#allocation3 + $0x3e] sm:$0xff] }
 0x9b1   : > { %14830 = vmatprep.subr.bf16.mxu0 %v19064_v10  ;;  %14865 = vmatpush3.bf16.msra.mxu1 %v15741_v43  ;;  %v19319_v43 = vld [vmem:[#allocation3 + $0x44] sm:$0xff] }
 0x9b2   : > { %14866 = vmatprep.subr.bf16.mxu1 %v19064_v10 }
 0x9b3   : > { %14831 = vmatpush3.bf16.msra.mxu0 %v15740_v29  ;;  %v15763_v29 = vld [vmem:[%s19631_s1 + $0xab0] sm:$0xff]  }
 0x9b4   : > { %14832 = vmatprep.subr.bf16.mxu0 %v19064_v10 }
 0x9b5   : > { %14867 = vmatpush3.bf16.msra.mxu1 %v15743_v21  ;;  %v10780_v21 = vld [vmem:[#allocation3 + $0x1d] sm:$0xff] }
 0x9b6   : > { %14777 = vmatmul.mubr.bf16.gmra.mrb[164].mxu0 %v9976_v0  ;;  %14868 = vmatprep.subr.bf16.mxu1 %v19064_v10  ;;  %v10779_v0 = vld [vmem:[#allocation3 + $0x15] sm:$0xff] }
 0x9b7   : > { %14813 = vmatmul.mubr.bf16.gmra.mrb[212].mxu1 %v10139_v31  ;;  %14833 = vmatpush3.bf16.msra.mxu0 %v15742_v39  ;;  %v10461_v39 = vld [vmem:[#allocation3 + $0x4c] sm:$0xff]  ;;  %v15767_v31 = vld [vmem:[%s19631_s1 + $0xb00] sm:$0xff]  }
 0x9b8   : > { %14780 = vmatprep.mubr.msk.bf16.mxu0 %vm15850_vm0, %v19064_v10  ;;  %14816 = vmatprep.mubr.msk.bf16.mxu1 %vm15850_vm0, %v19064_v10 }
 0x9b9   : > { %14834 = vmatprep.subr.bf16.mxu0 %v19064_v10  ;;  %14869 = vmatpush3.bf16.msra.mxu1 %v15744_v49  ;;  %v10626_v49 = vpack.c.bf16 %v19269_v4, %v19243_v53  ;;  %v10943_v4 = vld [vmem:[#allocation3 + $0x1e] sm:$0xff] }
 0x9ba   : > { %14870 = vmatprep.subr.bf16.mxu1 %v19064_v10 }
 0x9bb   : > { %14835 = vmatpush3.bf16.msra.mxu0 %v15745_v45  ;;  %v10789_v45 = vpack.c.bf16 %v10780_v21, %v10779_v0 }
 0x9bc   : > { %14836 = vmatprep.subr.bf16.mxu0 %v19064_v10 }
 0x9bd   : > { %14871 = vmatpush3.bf16.msra.mxu1 %v15746_v37 }
 0x9be   : > { %14781 = vmatmul.mubr.bf16.gmra.mrb[168].mxu0 %v9977_v7  ;;  %14872 = vmatprep.subr.bf16.mxu1 %v19064_v10  ;;  %v15770_v7 = vld [vmem:[%s19631_s1 + $0xb18] sm:$0xff]  }
 0x9bf   : > { %14817 = vmatmul.mubr.bf16.gmra.mrb[216].mxu1 %v10140_v63  ;;  %14784 = vmatprep.mubr.msk.bf16.mxu0 %vm15850_vm0, %v19064_v10  ;;  %v10784_v63 = vld [vmem:[#allocation3 + $0x3d] sm:$0xff] }
 0x9c0   : > { %14820 = vmatprep.mubr.msk.bf16.mxu1 %vm15850_vm0, %v19064_v10  ;;  %14837 = vmatpush3.bf16.msra.mxu0 %v15747_v38  ;;  %v10783_v38 = vld [vmem:[#allocation3 + $0x35] sm:$0xff] }
 0x9c1   : > { %14838 = vmatprep.subr.bf16.mxu0 %v19064_v10  ;;  %14873 = vmatpush3.bf16.msra.mxu1 %v15748_v6  ;;  %v15771_v6 = vld [vmem:[%s19631_s1 + $0xb20] sm:$0xff]   ;;  %v10791_v12 = vpack.c.bf16 %v10784_v63, %v10783_v38 }
 0x9c2   : > { %14874 = vmatprep.subr.bf16.mxu1 %v19064_v10 }
 0x9c4   : > { %14839 = vmatpush3.bf16.msra.mxu0 %v15749_v33  ;;  %v10628_v33 = vpack.c.bf16 %v19323_v32, %v19291_v52 }
 0x9c5   : > { %14896 = vmatprep.subr.bf16.mxu0 %v19064_v10  ;;  %14875 = vmatpush3.bf16.msra.mxu1 %v15750_v61  ;;  %v10786_v61 = vld [vmem:[#allocation3 + $0x4d] sm:$0xff] }
 0x9c6   : > { %14785 = vmatmul.mubr.bf16.gmra.mrb[172].mxu0 %v9978_v40  ;;  %14932 = vmatprep.subr.bf16.mxu1 %v19064_v10  ;;  %v10785_v40 = vld [vmem:[#allocation3 + $0x45] sm:$0xff] }
 0x9c7   : > { %14821 = vmatmul.mubr.bf16.gmra.mrb[220].mxu1 %v10141_v48  ;;  %14840 = vmatprep.mubr.msk.bf16.mxu0 %vm15850_vm0, %v19064_v10  ;;  %v10629_v48 = vpack.c.bf16 %v10461_v39, %v19319_v43  ;;  %v10792_v53 = vpack.c.bf16 %v10786_v61, %v10785_v40 }
 0x9c8   : > { %14876 = vmatprep.mubr.msk.bf16.mxu1 %vm15850_vm0, %v19064_v10 }
 0x9ce   : > { %14841 = vmatmul.mubr.bf16.vlgmr.msra.gmra.mrb[176].mxu0 %v10300_v8  ;;  %v15754_v8 = vld [vmem:[%s19631_s1 + $0xa90] sm:$0xff]  }
 0x9cf   : > { %14877 = vmatmul.mubr.bf16.vlgmr.msra.gmra.mrb[224].mxu1 %v10463_v25  ;;  %14897 = vmatpush3.bf16.msra.mxu0 %v15751_v15  ;;  %v15774_v15 = vld [vmem:[%s19631_s1 + $0xb38] sm:$0xff]   ;;  %v10625_v25 = vld [vmem:[#allocation3 + $0x5c] sm:$0xff] }
 0x9d0   : > { %14844 = vmatprep.mubr.msk.bf16.mxu0 %vm15850_vm0, %v19064_v10  ;;  %14898 = vmatprep.subr.bf16.mxu0 %v19064_v10  ;;  %v10630_v62 = vpack.c.bf16 %v10625_v25, %v19348_v35 }
 0x9d1   : > { %14880 = vmatprep.mubr.msk.bf16.mxu1 %vm15850_vm0, %v19064_v10  ;;  %14933 = vmatpush3.bf16.msra.mxu1 %v15753_v30  ;;  %v10787_v30 = vld [vmem:[#allocation3 + $0x55] sm:$0xff] }
 0x9d2   : > { %14934 = vmatprep.subr.bf16.mxu1 %v19064_v10 }
 0x9d3   : > { %14899 = vmatpush3.bf16.msra.mxu0 %v15752_v17  ;;  %v10788_v17 = vld [vmem:[#allocation3 + $0x5d] sm:$0xff] }
 0x9d4   : > { %14900 = vmatprep.subr.bf16.mxu0 %v19064_v10 }
 0x9d5   : > { %14935 = vmatpush3.bf16.msra.mxu1 %v15755_v27  ;;  %v10793_v27 = vpack.c.bf16 %v10788_v17, %v10787_v30 }
 0x9d6   : > { %14845 = vmatmul.mubr.bf16.gmra.mrb[180].mxu0 %v10301_v24  ;;  %14936 = vmatprep.subr.bf16.mxu1 %v19064_v10  ;;  %v15758_v24 = vld [vmem:[%s19631_s1 + $0xaa0] sm:$0xff]  }
 0x9d7   : > { %14881 = vmatmul.mubr.bf16.gmra.mrb[228].mxu1 %v10464_v36  ;;  %14901 = vmatpush3.bf16.msra.mxu0 %v15754_v8  ;;  %v10942_v8 = vld [vmem:[#allocation3 + $0x16] sm:$0xff] }
 0x9d8   : > { %14848 = vmatprep.mubr.msk.bf16.mxu0 %vm15850_vm0, %v19064_v10  ;;  %14884 = vmatprep.mubr.msk.bf16.mxu1 %vm15850_vm0, %v19064_v10  ;;  %v10952_v36 = vpack.c.bf16 %v10943_v4, %v10942_v8 }
 0x9d9   : > { %14902 = vmatprep.subr.bf16.mxu0 %v19064_v10  ;;  %14937 = vmatpush3.bf16.msra.mxu1 %v15757_v19  ;;  %v10945_v19 = vld [vmem:[#allocation3 + $0x2e] sm:$0xff] }
 0x9da   : > { %14938 = vmatprep.subr.bf16.mxu1 %v19064_v10 }
 0x9db   : > { %14903 = vmatpush3.bf16.msra.mxu0 %v15756_v41  ;;  %v10944_v41 = vld [vmem:[#allocation3 + $0x26] sm:$0xff] }
 0x9dc   : > { %14904 = vmatprep.subr.bf16.mxu0 %v19064_v10  ;;  %v10953_v52 = vpack.c.bf16 %v10945_v19, %v10944_v41 }
 0x9dd   : > { %14939 = vmatpush3.bf16.msra.mxu1 %v15759_v59 }
 0x9de   : > { %14849 = vmatmul.mubr.bf16.gmra.mrb[184].mxu0 %v10302_v1  ;;  %14940 = vmatprep.subr.bf16.mxu1 %v19064_v10  ;;  %v10466_v1 = vpack.c.bf16 %v19319_v43, %v19323_v32  ;;  %v10950_v43 = vld [vmem:[#allocation3 + $0x56] sm:$0xff]  ;;  %v10951_v32 = vld [vmem:[#allocation3 + $0x5e] sm:$0xff] }
 0x9df   : > { %14885 = vmatmul.mubr.bf16.gmra.mrb[232].mxu1 %v10465_v54  ;;  %14905 = vmatpush3.bf16.msra.mxu0 %v15758_v24  ;;  %v10946_v24 = vld [vmem:[#allocation3 + $0x36] sm:$0xff]  ;;  %v10949_v54 = vld [vmem:[#allocation3 + $0x4e] sm:$0xff] }
 0x9e0   : > { %14852 = vmatprep.mubr.msk.bf16.mxu0 %vm15850_vm0, %v19064_v10  ;;  %14888 = vmatprep.mubr.msk.bf16.mxu1 %vm15850_vm0, %v19064_v10  ;;  %v10954_v59 = vpack.c.bf16 %v10947_v28, %v10946_v24 }
 0x9e1   : > { %14906 = vmatprep.subr.bf16.mxu0 %v19064_v10  ;;  %14941 = vmatpush3.bf16.msra.mxu1 %v15760_v14  ;;  %v10948_v14 = vld [vmem:[#allocation3 + $0x46] sm:$0xff] }
 0x9e2   : > { %14942 = vmatprep.subr.bf16.mxu1 %v19064_v10 }
 0x9e3   : > { %14907 = vmatpush3.bf16.msra.mxu0 %v15761_v47  ;;  %v10955_v47 = vpack.c.bf16 %v10949_v54, %v10948_v14 }
 0x9e4   : > { %14908 = vmatprep.subr.bf16.mxu0 %v19064_v10 }
 0x9e5   : > { %14943 = vmatpush3.bf16.msra.mxu1 %v15762_v60  ;;  %v10956_v60 = vpack.c.bf16 %v10951_v32, %v10950_v43 }
 0x9e6   : > { %14853 = vmatmul.mubr.bf16.gmra.mrb[188].mxu0 %v10303_v58  ;;  %14944 = vmatprep.subr.bf16.mxu1 %v19064_v10  ;;  %v10467_v58 = vpack.c.bf16 %v19348_v35, %v10461_v39 }
 0x9e7   : > { %14889 = vmatmul.mubr.bf16.gmra.mrb[236].mxu1 %v10466_v1  ;;  %14856 = vmatprep.mubr.msk.bf16.mxu0 %vm15850_vm0, %v19064_v10 }
 0x9e8   : > { %14892 = vmatprep.mubr.msk.bf16.mxu1 %vm15850_vm0, %v19064_v10  ;;  %14909 = vmatpush3.bf16.msra.mxu0 %v15763_v29 }
 0x9e9   : > { %14910 = vmatprep.subr.bf16.mxu0 %v19064_v10  ;;  %14945 = vmatpush3.bf16.msra.mxu1 %v15764_v23 }
 0x9ea   : > { %14946 = vmatprep.subr.bf16.mxu1 %v19064_v10 }
 0x9ec   : > { %14911 = vmatpush3.bf16.msra.mxu0 %v15765_v3 }
 0x9ed   : > { %14968 = vmatprep.subr.bf16.mxu0 %v19064_v10  ;;  %14947 = vmatpush3.bf16.msra.mxu1 %v15766_v34 }
 0x9ee   : > { %14857 = vmatmul.mubr.bf16.gmra.mrb[192].mxu0 %v10304_v20  ;;  %v10781_v20 = vld [vmem:[#allocation3 + $0x25] sm:$0xff] }
 0x9ef   : > { %14893 = vmatmul.mubr.bf16.gmra.mrb[240].mxu1 %v10467_v58  ;;  %14912 = vmatprep.mubr.msk.bf16.mxu0 %vm15850_vm0, %v19064_v10  ;;  %v10790_v37 = vpack.c.bf16 %v10782_v51, %v10781_v20 }
 0x9f0   : > { %14948 = vmatprep.mubr.msk.bf16.mxu1 %vm15850_vm0, %v19064_v10 }
 0x9f6   : > { %14913 = vmatmul.mubr.bf16.vlgmr.msra.gmra.mrb[196].mxu0 %v10626_v49 }
 0x9f7   : > { %14949 = vmatmul.mubr.bf16.vlgmr.msra.gmra.mrb[244].mxu1 %v10789_v45  ;;  %14969 = vmatpush3.bf16.msra.mxu0 %v15767_v31 }
 0x9f8   : > { %14916 = vmatprep.mubr.msk.bf16.mxu0 %vm15850_vm0, %v19064_v10  ;;  %14970 = vmatprep.subr.bf16.mxu0 %v19064_v10 }
 0x9f9   : > { %14952 = vmatprep.mubr.msk.bf16.mxu1 %vm15850_vm0, %v19064_v10 }
 0x9fb   : > { %14971 = vmatpush3.bf16.msra.mxu0 %v15768_v16 }
 0x9fc   : > { %14972 = vmatprep.subr.bf16.mxu0 %v19064_v10 }
 0x9fe   : > { %14917 = vmatmul.mubr.bf16.gmra.mrb[200].mxu0 %v10627_v42 }
 0x9ff   : > { %14953 = vmatmul.mubr.bf16.gmra.mrb[248].mxu1 %v10790_v37  ;;  %14973 = vmatpush3.bf16.msra.mxu0 %v15769_v44 }
 0xa00   : > { %14920 = vmatprep.mubr.msk.bf16.mxu0 %vm15850_vm0, %v19064_v10  ;;  %14956 = vmatprep.mubr.msk.bf16.mxu1 %vm15850_vm0, %v19064_v10 }
 0xa01   : > { %14974 = vmatprep.subr.bf16.mxu0 %v19064_v10 }
 0xa03   : > { %14975 = vmatpush3.bf16.msra.mxu0 %v15770_v7 }
 0xa04   : > { %14976 = vmatprep.subr.bf16.mxu0 %v19064_v10 }
 0xa06   : > { %14921 = vmatmul.mubr.bf16.gmra.mrb[204].mxu0 %v10628_v33 }
 0xa07   : > { %14957 = vmatmul.mubr.bf16.gmra.mrb[252].mxu1 %v10791_v12  ;;  %14977 = vmatpush3.bf16.msra.mxu0 %v15771_v6 }
 0xa08   : > { %14924 = vmatprep.mubr.msk.bf16.mxu0 %vm15850_vm0, %v19064_v10  ;;  %14960 = vmatprep.mubr.msk.bf16.mxu1 %vm15850_vm0, %v19064_v10 }
 0xa09   : > { %14978 = vmatprep.subr.bf16.mxu0 %v19064_v10 }
 0xa0b   : > { %14979 = vmatpush3.bf16.msra.mxu0 %v15772_v56 }
 0xa0c   : > { %14980 = vmatprep.subr.bf16.mxu0 %v19064_v10 }
 0xa0e   : > { %14925 = vmatmul.mubr.bf16.gmra.mrb[208].mxu0 %v10629_v48 }
 0xa0f   : > { %14961 = vmatmul.mubr.bf16.gmra.mrb[0].mxu1 %v10792_v53  ;;  %14928 = vmatprep.mubr.msk.bf16.mxu0 %vm15850_vm0, %v19064_v10 }
 0xa10   : > { %14964 = vmatprep.mubr.msk.bf16.mxu1 %vm15850_vm0, %v19064_v10  ;;  %14981 = vmatpush3.bf16.msra.mxu0 %v15773_v11 }
 0xa11   : > { %14982 = vmatprep.subr.bf16.mxu0 %v19064_v10 }
 0xa14   : > { %14983 = vmatpush3.bf16.msra.mxu0 %v15774_v15 }
 0xa16   : > { %14929 = vmatmul.mubr.bf16.gmra.mrb[212].mxu0 %v10630_v62 }
 0xa17   : > { %14965 = vmatmul.mubr.bf16.gmra.mrb[4].mxu1 %v10793_v27  ;;  %14984 = vmatprep.mubr.msk.bf16.mxu0 %vm15850_vm0, %v19064_v10 }
 0xa18   : > { %15036 = vmatprep.mubr.msk.f32.mxu1 %vm15850_vm0, %v19064_v10 }
 0xa1e   : > { %14985 = vmatmul.mubr.bf16.vlgmr.msra.gmra.mrb[216].mxu0 %v10952_v36 }
 0xa1f   : > { %14988 = vmatprep.mubr.msk.bf16.mxu0 %vm15850_vm0, %v19064_v10 }
 0xa26   : > { %14989 = vmatmul.mubr.bf16.gmra.mrb[220].mxu0 %v10953_v52 }
 0xa27   : > { %14992 = vmatprep.mubr.msk.bf16.mxu0 %vm15850_vm0, %v19064_v10 }
 0xa2e   : > { %14993 = vmatmul.mubr.bf16.gmra.mrb[224].mxu0 %v10954_v59 }
 0xa2f   : > { %14996 = vmatprep.mubr.msk.bf16.mxu0 %vm15850_vm0, %v19064_v10 }
 0xa36   : > { %14997 = vmatmul.mubr.bf16.gmra.mrb[228].mxu0 %v10955_v47 }
 0xa37   : > { %15000 = vmatprep.mubr.msk.bf16.mxu0 %vm15850_vm0, %v19064_v10 }
 0xa3e   : > { %15001 = vmatmul.mubr.bf16.gmra.mrb[232].mxu0 %v10956_v60 }
 0xa51   : > { %v9804_v1 = vpop.f32.mrb[136].mxu0 }
 0xa52   : > { %v9925_v29 = vpop.f32.mrb[184].mxu1  ;;  %v14698_v3 = vpop.f32.mrb[137].mxu0 }
 0xa53   : > { %v9926_v23 = vadd.f32 %v9925_v29, %v9804_v1  ;;  %v14734_v39 = vpop.f32.mrb[185].mxu1  ;;  %v9807_v35 = vpop.f32.mrb[138].mxu0 }
 0xa54   : > { %v9928_v34 = vpop.f32.mrb[186].mxu1  ;;  %v14699_v21 = vpop.f32.mrb[139].mxu0 }
 0xa55   : > { %v9929_v58 = vadd.f32 %v9928_v34, %v9807_v35  ;;  %v14735_v0 = vpop.f32.mrb[187].mxu1 }
 0xa59   : > { %v9812_v31 = vpop.f32.mrb[140].mxu0 }
 0xa5a   : > { %v9933_v49 = vpop.f32.mrb[188].mxu1  ;;  %v14702_v16 = vpop.f32.mrb[141].mxu0 }
 0xa5b   : > { %v9934_v45 = vadd.f32 %v9933_v49, %v9812_v31  ;;  %v14738_v51 = vpop.f32.mrb[189].mxu1  ;;  %v9815_v10 = vpop.f32.mrb[142].mxu0 }
 0xa5c   : > { %v9936_v20 = vpop.f32.mrb[190].mxu1  ;;  %v14703_v42 = vpop.f32.mrb[143].mxu0 }
 0xa5d   : > { %v9937_v44 = vadd.f32 %v9936_v20, %v9815_v10  ;;  %v14739_v37 = vpop.f32.mrb[191].mxu1 }
 0xa61   : > { %v9820_v7 = vpop.f32.mrb[144].mxu0 }
 0xa62   : > { %v9941_v63 = vpop.f32.mrb[192].mxu1  ;;  %v14706_v6 = vpop.f32.mrb[145].mxu0 }
 0xa63   : > { %v9942_v38 = vadd.f32 %v9941_v63, %v9820_v7  ;;  %v14742_v33 = vpop.f32.mrb[193].mxu1  ;;  %v9823_v12 = vpop.f32.mrb[146].mxu0 }
 0xa64   : > { %v9944_v56 = vpop.f32.mrb[194].mxu1  ;;  %v14707_v40 = vpop.f32.mrb[147].mxu0 }
 0xa65   : > { %v9945_v61 = vadd.f32 %v9944_v56, %v9823_v12  ;;  %v14743_v48 = vpop.f32.mrb[195].mxu1 }
 0xa69   : > { %v9828_v53 = vpop.f32.mrb[148].mxu0 }
 0xa6a   : > { %v9949_v11 = vpop.f32.mrb[196].mxu1  ;;  %v14710_v25 = vpop.f32.mrb[149].mxu0 }
 0xa6b   : > { %v19432_v15 = vadd.f32 %v9949_v11, %v9828_v53  ;;  %v14746_v30 = vpop.f32.mrb[197].mxu1  ;;  %v9831_v17 = vpop.f32.mrb[150].mxu0 }
 0xa6c   : > { %v9952_v62 = vpop.f32.mrb[198].mxu1  ;;  %v14711_v4 = vpop.f32.mrb[151].mxu0 }
 0xa6d   : > { %v19434_v27 = vadd.f32 %v9952_v62, %v9831_v17  ;;  %v14747_v8 = vpop.f32.mrb[199].mxu1  ;;  %v11156_v62 = vld [vmem:[%s19633_s3 + $0x8] sm:$0xff]  ;;  %v15852_v4 = vmov 0.0|0.0  }
 0xa6e   : > { %15039 = vmatprep.subr.bf16.mxu1 %v15852_v4 }
 0xa71   : > { %v9836_v36 = vpop.f32.mrb[152].mxu0 }
 0xa72   : > { %v9957_v19 = vpop.f32.mrb[200].mxu1  ;;  %v14714_v52 = vpop.f32.mrb[153].mxu0 }
 0xa73   : > { %v19436_v41 = vadd.f32 %v9957_v19, %v9836_v36  ;;  %v14750_v28 = vpop.f32.mrb[201].mxu1  ;;  %v9839_v24 = vpop.f32.mrb[154].mxu0 }
 0xa74   : > { %v9960_v59 = vpop.f32.mrb[202].mxu1  ;;  %v14715_v14 = vpop.f32.mrb[155].mxu0 }
 0xa75   : > { %v19438_v54 = vadd.f32 %v9960_v59, %v9839_v24  ;;  %v14751_v47 = vpop.f32.mrb[203].mxu1  ;;  %v11157_v24 = vld [vmem:[%s19633_s3 + $0x10] sm:$0xff]  ;;  %v11158_v59 = vld [vmem:[%s19633_s3 + $0x18] sm:$0xff] }
 0xa79   : > { %v10078_v43 = vpop.f32.mrb[156].mxu0 }
 0xa7a   : > { %v10241_v32 = vpop.f32.mrb[204].mxu1  ;;  %v10117_v60 = vadd.f32 %v10078_v43, %v9926_v23  ;;  %v14770_v1 = vpop.f32.mrb[157].mxu0  ;;  %v15043_v43 = vpack.c.bf16 %v11158_v59, %v11157_v24 }
 0xa7b   : > { %v14806_v29 = vpop.f32.mrb[205].mxu1  ;;  %v10081_v3 = vpop.f32.mrb[158].mxu0 }
 0xa7c   : > { %v10244_v39 = vpop.f32.mrb[206].mxu1  ;;  %v19440_v35 = vadd.f32 %v10241_v32, %v10117_v60  ;;  %v10118_v34 = vadd.f32 %v10081_v3, %v9929_v58  ;;  %v14771_v21 = vpop.f32.mrb[159].mxu0  ;;  %v11160_v3 = vld [vmem:[%s19633_s3 + $0x28] sm:$0xff] }
 0xa7d   : > { %v14807_v0 = vpop.f32.mrb[207].mxu1 }
 0xa7e   : > { %v19442_v31 = vadd.f32 %v10244_v39, %v10118_v34 }
 0xa81   : > { %v10086_v49 = vpop.f32.mrb[160].mxu0 }
 0xa82   : > { %v10249_v16 = vpop.f32.mrb[208].mxu1  ;;  %v10119_v51 = vadd.f32 %v10086_v49, %v9934_v45  ;;  %v14774_v10 = vpop.f32.mrb[161].mxu0 }
 0xa83   : > { %v14810_v20 = vpop.f32.mrb[209].mxu1  ;;  %v10089_v42 = vpop.f32.mrb[162].mxu0 }
 0xa84   : > { %v10252_v37 = vpop.f32.mrb[210].mxu1  ;;  %v19444_v7 = vadd.f32 %v10249_v16, %v10119_v51  ;;  %v10120_v23 = vadd.f32 %v10089_v42, %v9937_v44  ;;  %v14775_v63 = vpop.f32.mrb[163].mxu0  ;;  %v11155_v44 = vld [vmem:[%s19633_s3] sm:$0xff] }
 0xa85   : > { %v14811_v6 = vpop.f32.mrb[211].mxu1 }
 0xa86   : > { %v19446_v33 = vadd.f32 %v10252_v37, %v10120_v23 }
 0xa89   : > { %v10094_v12 = vpop.f32.mrb[164].mxu0 }
 0xa8a   : > { %v10257_v58 = vpop.f32.mrb[212].mxu1  ;;  %v10121_v56 = vadd.f32 %v10094_v12, %v9942_v38  ;;  %v14778_v40 = vpop.f32.mrb[165].mxu0  ;;  %v15040_v38 = vpack.c.bf16 %v11156_v62, %v11155_v44 }
 0xa8b   : > { %v14814_v48 = vpop.f32.mrb[213].mxu1  ;;  %v10097_v53 = vpop.f32.mrb[166].mxu0 }
 0xa8c   : > { %v10260_v11 = vpop.f32.mrb[214].mxu1  ;;  %v19448_v25 = vadd.f32 %v10257_v58, %v10121_v56  ;;  %v10122_v45 = vadd.f32 %v10097_v53, %v9945_v61  ;;  %v14779_v30 = vpop.f32.mrb[167].mxu0  ;;  %15041 = vmatpush3.bf16.msra.mxu1 %v15040_v38 }
 0xa8d   : > { %v14815_v17 = vpop.f32.mrb[215].mxu1  ;;  %15042 = vmatprep.subr.bf16.mxu1 %v15852_v4 }
 0xa8e   : > { %v19457_v8 = vadd.f32 %v10260_v11, %v10122_v45 }
 0xa90   : > { %15044 = vmatpush3.bf16.msra.mxu1 %v15043_v43 }
 0xa91   : > { %v10102_v61 = vpop.f32.mrb[168].mxu0  ;;  %15045 = vmatprep.subr.bf16.mxu1 %v15852_v4 }
 0xa92   : > { %v10265_v36 = vpop.f32.mrb[216].mxu1  ;;  %v10123_v19 = vadd.f32 %v10102_v61, %v19432_v15  ;;  %v14782_v52 = vpop.f32.mrb[169].mxu0  ;;  %v11159_v15 = vld [vmem:[%s19633_s3 + $0x20] sm:$0xff] }
 0xa93   : > { %v14818_v28 = vpop.f32.mrb[217].mxu1  ;;  %v10105_v14 = vpop.f32.mrb[170].mxu0  ;;  %v15046_v39 = vpack.c.bf16 %v11160_v3, %v11159_v15 }
 0xa94   : > { %v10268_v47 = vpop.f32.mrb[218].mxu1  ;;  %v19467_v32 = vadd.f32 %v10265_v36, %v10123_v19  ;;  %v10124_v60 = vadd.f32 %v10105_v14, %v19434_v27  ;;  %v14783_v1 = vpop.f32.mrb[171].mxu0  ;;  %v11162_v36 = vld [vmem:[%s19633_s3 + $0x38] sm:$0xff] }
 0xa95   : > { %v14819_v29 = vpop.f32.mrb[219].mxu1  ;;  %15047 = vmatpush3.bf16.msra.mxu1 %v15046_v39  ;;  %v11165_v1 = vld [vmem:[%s19633_s3 + $0x50] sm:$0xff] }
 0xa96   : > { %v19476_v34 = vadd.f32 %v10268_v47, %v10124_v60  ;;  %15048 = vmatprep.subr.bf16.mxu1 %v15852_v4  ;;  %v11166_v29 = vld [vmem:[%s19633_s3 + $0x58] sm:$0xff] }
 0xa99   : > { %v10110_v21 = vpop.f32.mrb[172].mxu0 }
 0xa9a   : > { %v10273_v0 = vpop.f32.mrb[220].mxu1  ;;  %v10125_v27 = vadd.f32 %v10110_v21, %v19436_v41  ;;  %v14786_v49 = vpop.f32.mrb[173].mxu0 }
 0xa9b   : > { %v14822_v16 = vpop.f32.mrb[221].mxu1  ;;  %v10113_v51 = vpop.f32.mrb[174].mxu0  ;;  %v11168_v49 = vld [vmem:[%s19633_s3 + $0x68] sm:$0xff] }
 0xa9c   : > { %v10276_v10 = vpop.f32.mrb[222].mxu1  ;;  %v19481_v20 = vadd.f32 %v10273_v0, %v10125_v27  ;;  %v10126_v42 = vadd.f32 %v10113_v51, %v19438_v54  ;;  %v14787_v37 = vpop.f32.mrb[175].mxu0  ;;  %v11167_v27 = vld [vmem:[%s19633_s3 + $0x60] sm:$0xff] }
 0xa9d   : > { %v14823_v23 = vpop.f32.mrb[223].mxu1 }
 0xa9e   : > { %v19484_v63 = vadd.f32 %v10276_v10, %v10126_v42  ;;  %v15058_v23 = vpack.c.bf16 %v11168_v49, %v11167_v27 }
 0xaa1   : > { %v10404_v6 = vpop.f32.mrb[176].mxu0 }
 0xaa2   : > { %v10567_v12 = vpop.f32.mrb[224].mxu1  ;;  %v10443_v58 = vadd.f32 %v10404_v6, %v19440_v35  ;;  %v14842_v56 = vpop.f32.mrb[177].mxu0  ;;  %v11161_v35 = vld [vmem:[%s19633_s3 + $0x30] sm:$0xff] }
 0xaa3   : > { %v14878_v41 = vpop.f32.mrb[225].mxu1  ;;  %v10407_v40 = vpop.f32.mrb[178].mxu0  ;;  %v15049_v28 = vpack.c.bf16 %v11162_v36, %v11161_v35 }
 0xaa4   : > { %v10570_v48 = vpop.f32.mrb[226].mxu1  ;;  %v19487_v53 = vadd.f32 %v10567_v12, %v10443_v58  ;;  %v10444_v11 = vadd.f32 %v10407_v40, %v19442_v31  ;;  %v14843_v45 = vpop.f32.mrb[179].mxu0  ;;  %v11163_v31 = vld [vmem:[%s19633_s3 + $0x40] sm:$0xff]  ;;  %v11169_v12 = vld [vmem:[%s19633_s3 + $0x70] sm:$0xff]  ;;  %v11170_v58 = vld [vmem:[%s19633_s3 + $0x78] sm:$0xff] }
 0xaa5   : > { %v14879_v30 = vpop.f32.mrb[227].mxu1  ;;  %15050 = vmatpush3.bf16.msra.mxu1 %v15049_v28 }
 0xaa6   : > { %v19490_v17 = vadd.f32 %v10570_v48, %v10444_v11  ;;  %15051 = vmatprep.subr.bf16.mxu1 %v15852_v4 }
 0xaa9   : > { %v10412_v54 = vpop.f32.mrb[180].mxu0 }
 0xaaa   : > { %v10575_v44 = vpop.f32.mrb[228].mxu1  ;;  %v10445_v62 = vadd.f32 %v10412_v54, %v19444_v7  ;;  %v14846_v38 = vpop.f32.mrb[181].mxu0  ;;  %v11164_v7 = vld [vmem:[%s19633_s3 + $0x48] sm:$0xff] }
 0xaab   : > { %v14882_v61 = vpop.f32.mrb[229].mxu1  ;;  %v10415_v19 = vpop.f32.mrb[182].mxu0  ;;  %v15052_v43 = vpack.c.bf16 %v11164_v7, %v11163_v31 }
 0xaac   : > { %v10578_v52 = vpop.f32.mrb[230].mxu1  ;;  %v19505_v24 = vadd.f32 %v10575_v44, %v10445_v62  ;;  %v10446_v59 = vadd.f32 %v10415_v19, %v19446_v33  ;;  %v14847_v14 = vpop.f32.mrb[183].mxu0  ;;  %v15055_v33 = vpack.c.bf16 %v11166_v29, %v11165_v1 }
 0xaad   : > { %v14883_v47 = vpop.f32.mrb[231].mxu1  ;;  %15053 = vmatpush3.bf16.msra.mxu1 %v15052_v43 }
 0xaae   : > { %v19508_v60 = vadd.f32 %v10578_v52, %v10446_v59  ;;  %15054 = vmatprep.subr.bf16.mxu1 %v15852_v4 }
 0xab1   : > { %v10420_v15 = vpop.f32.mrb[184].mxu0  ;;  %15056 = vmatpush3.bf16.msra.mxu1 %v15055_v33 }
 0xab2   : > { %v10583_v3 = vpop.f32.mrb[232].mxu1  ;;  %v10447_v39 = vadd.f32 %v10420_v15, %v19448_v25  ;;  %v14850_v21 = vpop.f32.mrb[185].mxu0  ;;  %15057 = vmatprep.subr.bf16.mxu1 %v15852_v4 }
 0xab3   : > { %v14886_v0 = vpop.f32.mrb[233].mxu1  ;;  %v10423_v16 = vpop.f32.mrb[186].mxu0 }
 0xab4   : > { %v10586_v51 = vpop.f32.mrb[234].mxu1  ;;  %v19525_v10 = vadd.f32 %v10583_v3, %v10447_v39  ;;  %v10448_v42 = vadd.f32 %v10423_v16, %v19457_v8  ;;  %v14851_v37 = vpop.f32.mrb[187].mxu0  ;;  %v15061_v8 = vpack.c.bf16 %v11170_v58, %v11169_v12 }
 0xab5   : > { %v14887_v25 = vpop.f32.mrb[235].mxu1  ;;  %15059 = vmatpush3.bf16.msra.mxu1 %v15058_v23 }
 0xab6   : > { %v19528_v6 = vadd.f32 %v10586_v51, %v10448_v42  ;;  %15060 = vmatprep.subr.bf16.mxu1 %v15852_v4 }
 0xab9   : > { %v10428_v56 = vpop.f32.mrb[188].mxu0  ;;  %15062 = vmatpush3.bf16.msra.mxu1 %v15061_v8 }
 0xaba   : > { %v10591_v41 = vpop.f32.mrb[236].mxu1  ;;  %v10449_v40 = vadd.f32 %v10428_v56, %v19467_v32  ;;  %v14854_v48 = vpop.f32.mrb[189].mxu0 }
 0xabb   : > { %v14890_v11 = vpop.f32.mrb[237].mxu1  ;;  %v10431_v45 = vpop.f32.mrb[190].mxu0 }
 0xabc   : > { %v10594_v30 = vpop.f32.mrb[238].mxu1  ;;  %v10612_v54 = vadd.f32 %v10591_v41, %v10449_v40  ;;  %v10450_v44 = vadd.f32 %v10431_v45, %v19476_v34  ;;  %v14855_v62 = vpop.f32.mrb[191].mxu0 }
 0xabd   : > { %v14891_v38 = vpop.f32.mrb[239].mxu1 }
 0xabe   : > { %v10613_v61 = vadd.f32 %v10594_v30, %v10450_v44 }
 0xac1   : > { %v10436_v35 = vpop.f32.mrb[192].mxu0 }
 0xac2   : > { %v10599_v36 = vpop.f32.mrb[240].mxu1  ;;  %v10451_v31 = vadd.f32 %v10436_v35, %v19481_v20  ;;  %v14858_v19 = vpop.f32.mrb[193].mxu0 }
 0xac3   : > { %v14894_v52 = vpop.f32.mrb[241].mxu1  ;;  %v10439_v32 = vpop.f32.mrb[194].mxu0 }
 0xac4   : > { %v10602_v28 = vpop.f32.mrb[242].mxu1  ;;  %v10614_v7 = vadd.f32 %v10599_v36, %v10451_v31  ;;  %v10452_v4 = vadd.f32 %v10439_v32, %v19484_v63  ;;  %v14859_v59 = vpop.f32.mrb[195].mxu0 }
 0xac5   : > { %v14895_v14 = vpop.f32.mrb[243].mxu1 }
 0xac6   : > { %v10615_v47 = vadd.f32 %v10602_v28, %v10452_v4 }
 0xac9   : > { %v10730_v43 = vpop.f32.mrb[196].mxu0 }
 0xaca   : > { %v10893_v34 = vpop.f32.mrb[244].mxu1  ;;  %v10769_v1 = vadd.f32 %v10730_v43, %v19487_v53  ;;  %v14914_v29 = vpop.f32.mrb[197].mxu0 }
 0xacb   : > { %v14950_v15 = vpop.f32.mrb[245].mxu1  ;;  %v10733_v3 = vpop.f32.mrb[198].mxu0 }
 0xacc   : > { %v10896_v33 = vpop.f32.mrb[246].mxu1  ;;  %v10932_v39 = vadd.f32 %v10893_v34, %v10769_v1  ;;  %v10770_v20 = vadd.f32 %v10733_v3, %v19490_v17  ;;  %v14915_v21 = vpop.f32.mrb[199].mxu0 }
 0xacd   : > { %v14951_v0 = vpop.f32.mrb[247].mxu1 }
 0xace   : > { %v10933_v27 = vadd.f32 %v10896_v33, %v10770_v20  ;;  %v11107_v0 = vsub.s32 4, %v16547_v18 }
 0xad1   : > { %v10738_v49 = vpop.f32.mrb[200].mxu0 }
 0xad2   : > { %v10901_v16 = vpop.f32.mrb[248].mxu1  ;;  %v10771_v63 = vadd.f32 %v10738_v49, %v19505_v24  ;;  %v14918_v51 = vpop.f32.mrb[201].mxu0 }
 0xad3   : > { %v14954_v42 = vpop.f32.mrb[249].mxu1  ;;  %v10741_v37 = vpop.f32.mrb[202].mxu0 }
 0xad4   : > { %v10904_v25 = vpop.f32.mrb[250].mxu1  ;;  %v10934_v23 = vadd.f32 %v10901_v16, %v10771_v63  ;;  %v10772_v53 = vadd.f32 %v10741_v37, %v19508_v60  ;;  %v14919_v12 = vpop.f32.mrb[203].mxu0 }
 0xad5   : > { %v14955_v58 = vpop.f32.mrb[251].mxu1 }
 0xad6   : > { %v10935_v56 = vadd.f32 %v10904_v25, %v10772_v53 }
 0xad9   : > { %v10746_v41 = vpop.f32.mrb[204].mxu0 }
 0xada   : > { %v10909_v8 = vpop.f32.mrb[252].mxu1  ;;  %v10773_v17 = vadd.f32 %v10746_v41, %v19525_v10  ;;  %v14922_v40 = vpop.f32.mrb[205].mxu0 }
 0xadb   : > { %v14958_v48 = vpop.f32.mrb[253].mxu1  ;;  %v10749_v11 = vpop.f32.mrb[206].mxu0 }
 0xadc   : > { %v10912_v45 = vpop.f32.mrb[254].mxu1  ;;  %v10936_v30 = vadd.f32 %v10909_v8, %v10773_v17  ;;  %v10774_v24 = vadd.f32 %v10749_v11, %v19528_v6  ;;  %v14923_v44 = vpop.f32.mrb[207].mxu0 }
 0xadd   : > { %v14959_v62 = vpop.f32.mrb[255].mxu1 }
 0xade   : > { %v10937_v38 = vadd.f32 %v10912_v45, %v10774_v24 }
 0xae1   : > { %v10754_v35 = vpop.f32.mrb[208].mxu0 }
 0xae2   : > { %v10917_v36 = vpop.f32.mrb[0].mxu1  ;;  %v10775_v60 = vadd.f32 %v10754_v35, %v10612_v54  ;;  %v14926_v31 = vpop.f32.mrb[209].mxu0 }
 0xae3   : > { %v14962_v19 = vpop.f32.mrb[1].mxu1  ;;  %v10757_v52 = vpop.f32.mrb[210].mxu0 }
 0xae4   : > { %v10920_v32 = vpop.f32.mrb[2].mxu1  ;;  %v10938_v28 = vadd.f32 %v10917_v36, %v10775_v60  ;;  %v10776_v4 = vadd.f32 %v10757_v52, %v10613_v61  ;;  %v14927_v10 = vpop.f32.mrb[211].mxu0  ;;  %v15784_v61 = vld [vmem:[%s19632_s2] sm:$0x1f] }
 0xae5   : > { %v14963_v59 = vpop.f32.mrb[3].mxu1  ;;  %v19556_v16 = vrot.slane %v15784_v61, %v11107_v0 }
 0xae6   : > { %v10939_v14 = vadd.f32 %v10920_v32, %v10776_v4 }
 0xae9   : > { %v10762_v43 = vpop.f32.mrb[212].mxu0 }
 0xaea   : > { %v10925_v34 = vpop.f32.mrb[4].mxu1  ;;  %v10777_v1 = vadd.f32 %v10762_v43, %v10614_v7  ;;  %v14930_v29 = vpop.f32.mrb[213].mxu0 }
 0xaeb   : > { %v14966_v6 = vpop.f32.mrb[5].mxu1  ;;  %v10765_v15 = vpop.f32.mrb[214].mxu0 }
 0xaec   : > { %v10928_v3 = vpop.f32.mrb[6].mxu1  ;;  %v19548_v33 = vadd.f32 %v10925_v34, %v10777_v1  ;;  %v10778_v20 = vadd.f32 %v10765_v15, %v10615_v47  ;;  %v14931_v54 = vpop.f32.mrb[215].mxu0 }
 0xaed   : > { %v14967_v21 = vpop.f32.mrb[7].mxu1 }
 0xaee   : > { %v19551_v49 = vadd.f32 %v10928_v3, %v10778_v20 }
 0xaf1   : > { %v11056_v7 = vpop.f32.mrb[216].mxu0 }
 0xaf2   : > { %v11095_v63 = vadd.f32 %v11056_v7, %v10932_v39  ;;  %v14986_v51 = vpop.f32.mrb[217].mxu0 }
 0xaf3   : > { %v11059_v42 = vpop.f32.mrb[218].mxu0 }
 0xaf4   : > { %v11109_v37 = vadd.f32 %v19556_v16, %v11095_v63  ;;  %v11096_v25 = vadd.f32 %v11059_v42, %v10933_v27  ;;  %v14987_v47 = vpop.f32.mrb[219].mxu0 }
 0xaf6   : > { %v11119_v53 = vmax.f32 %v11109_v37, 0.0  ;;  %v11110_v12 = vadd.f32 %v19556_v16, %v11096_v25 }
 0xaf8   : > { %v11120_v18 = vmax.f32 %v11110_v12, 0.0  ;;  %v11129_v41 = vmul.f32 %v17708_v5, %v11119_v53 }
 0xaf9   : > { %v11064_v58 = vpop.f32.mrb[220].mxu0 }
 0xafa   : > { %v11130_v8 = vmul.f32 %v17745_v55, %v11120_v18  ;;  %v11097_v17 = vadd.f32 %v11064_v58, %v10934_v23  ;;  %v14990_v40 = vpop.f32.mrb[221].mxu0 }
 0xafb   : > { %v11067_v48 = vpop.f32.mrb[222].mxu0 }
 0xafc   : > { %v11139_v11 = vadd.f32 %v11130_v8, %v11129_v41  ;;  %v11111_v39 = vadd.f32 %v19556_v16, %v11097_v17  ;;  %v11098_v45 = vadd.f32 %v11067_v48, %v10935_v56  ;;  %v14991_v24 = vpop.f32.mrb[223].mxu0 }
 0xafe   : > { %v11121_v44 = vmax.f32 %v11111_v39, 0.0  ;;  %v11112_v27 = vadd.f32 %v19556_v16, %v11098_v45 }
 0xb00   : > { %v11131_v62 = vmul.f32 %v17761_v46, %v11121_v44  ;;  %v11122_v35 = vmax.f32 %v11112_v27, 0.0 }
 0xb01   : > { %v11072_v36 = vpop.f32.mrb[224].mxu0 }
 0xb02   : > { %v11140_v60 = vadd.f32 %v11139_v11, %v11131_v62  ;;  %v11132_v5 = vmul.f32 %v17780_v57, %v11122_v35  ;;  %v11099_v31 = vadd.f32 %v11072_v36, %v10936_v30  ;;  %v14994_v55 = vpop.f32.mrb[225].mxu0 }
 0xb03   : > { %v11075_v23 = vpop.f32.mrb[226].mxu0 }
 0xb04   : > { %v11141_v19 = vadd.f32 %v11140_v60, %v11132_v5  ;;  %v11113_v52 = vadd.f32 %v19556_v16, %v11099_v31  ;;  %v11100_v32 = vadd.f32 %v11075_v23, %v10937_v38  ;;  %v14995_v4 = vpop.f32.mrb[227].mxu0 }
 0xb06   : > { %v11123_v56 = vmax.f32 %v11113_v52, 0.0  ;;  %v11114_v10 = vadd.f32 %v19556_v16, %v11100_v32 }
 0xb08   : > { %v11133_v59 = vmul.f32 %v17820_v50, %v11123_v56  ;;  %v11124_v43 = vmax.f32 %v11114_v10, 0.0 }
 0xb09   : > { %v11080_v46 = vpop.f32.mrb[228].mxu0 }
 0xb0a   : > { %v11142_v34 = vadd.f32 %v11141_v19, %v11133_v59  ;;  %v11134_v1 = vmul.f32 %v17844_v2, %v11124_v43  ;;  %v11101_v29 = vadd.f32 %v11080_v46, %v10938_v28  ;;  %v14998_v57 = vpop.f32.mrb[229].mxu0 }
 0xb0b   : > { %v11083_v30 = vpop.f32.mrb[230].mxu0 }
 0xb0c   : > { %v11143_v6 = vadd.f32 %v11142_v34, %v11134_v1  ;;  %v11115_v15 = vadd.f32 %v19556_v16, %v11101_v29  ;;  %v11102_v3 = vadd.f32 %v11083_v30, %v10939_v14  ;;  %v14999_v20 = vpop.f32.mrb[231].mxu0 }
 0xb0e   : > { %v11125_v38 = vmax.f32 %v11115_v15, 0.0  ;;  %v11116_v54 = vadd.f32 %v19556_v16, %v11102_v3 }
 0xb10   : > { %v11135_v21 = vmul.f32 %v17886_v26, %v11125_v38  ;;  %v11126_v0 = vmax.f32 %v11116_v54, 0.0 }
 0xb11   : > { %v11088_v50 = vpop.f32.mrb[232].mxu0 }
 0xb12   : > { %v11144_v61 = vadd.f32 %v11143_v6, %v11135_v21  ;;  %v11136_v7 = vmul.f32 %v17906_v13, %v11126_v0  ;;  %v11103_v2 = vadd.f32 %v11088_v50, %v19548_v33  ;;  %v15002_v28 = vpop.f32.mrb[233].mxu0 }
 0xb13   : > { %v11091_v63 = vpop.f32.mrb[234].mxu0 }
 0xb14   : > { %v11145_v51 = vadd.f32 %v11144_v61, %v11136_v7  ;;  %v11117_v42 = vadd.f32 %v19556_v16, %v11103_v2  ;;  %v11104_v14 = vadd.f32 %v11091_v63, %v19551_v49  ;;  %v15003_v37 = vpop.f32.mrb[235].mxu0 }
 0xb16   : > { %v11127_v25 = vmax.f32 %v11117_v42, 0.0  ;;  %v11118_v47 = vadd.f32 %v19556_v16, %v11104_v14  ;;  %v11171_v16 = vld [vmem:[%s19634_s4] sm:$0x1] }
 0xb18   : > { %v11137_v26 = vmul.f32 %v17943_v22, %v11127_v25  ;;  %v11128_v53 = vmax.f32 %v11118_v47, 0.0 }
 0xb1a   : > { %v11146_v12 = vadd.f32 %v11145_v51, %v11137_v26  ;;  %v11138_v13 = vmul.f32 %v17955_v9, %v11128_v53 }
 0xb1c   : > { %v11147_v33 = vadd.f32 %v11146_v12, %v11138_v13 }
 0xb1e   : > { %v11148_v18 = vrot.slane %v11147_v33, 4 }
 0xb20   : > { %v11149_v58 = vadd.f32 %v11148_v18, %v11147_v33 }
 0xb22   : > { %v11150_v41 = vrot.slane %v11149_v58, 2 }
 0xb24   : > { %v11151_v8 = vadd.f32 %v11150_v41, %v11149_v58 }
 0xb26   : > { %v11152_v17 = vrot.slane %v11151_v8, 1 }
 0xb28   : > { %v11153_v40 = vadd.f32 %v11152_v17, %v11151_v8 }
 0xb2a   : > { %v11154_v49 = vmul.f32 0.015625, %v11153_v40 }
 0xb2c   : > { %15037 = vmatmul.mubr.f32.vlgmr.msra.gmra.mrb[8].mxu1 %v11154_v49 }
 0xbff   : > { %v11238_v22 = vpop.f32.mrb[8].mxu1 }
 0xc00   : > { %v11239_v9 = vadd.f32 %v11238_v22, %v11171_v16  ;;  %v15038_v48 = vpop.f32.mrb[9].mxu1 }
 0xc02   : > { %11242 = vst [vmem:[%s216_s17] sm:$0x1] %v11239_v9 }
 0xc03   : > { %15798 = shalt.err (!%p15795_p3)
}
 0xc04   : > { %s15799_s9 = scalar_lea.hbm %s19588_s15, 16  ;;  %s15803_s12 = scalar_lea.hbm %s19635_s5, 32 }
 0xc05   : > { %p15800_p4 = scmp.ne.s32.totalorder %s19588_s15, %s15799_s9  ;;  %p15804_p9 = scmp.lt.u32.totalorder %s19588_s15, %s19635_s5 }
 0xc06   : > { %p15805_p10 = scmp.lt.u32.totalorder %s15803_s12, %s15799_s9  ;;  %p15807_p12 = scmp.lt.u32.totalorder %s15799_s9, %s19588_s15 }
 0xc07   : > { %p15801_p7 = pnand %p15800_p4, %p15922_p5 }
 0xc08   : > { %p15806_p11 = por %p15805_p10, %p15804_p9 }
 0xc09   : > { %p15802_p8 = pneg %p15801_p7 }
 0xc0a   : > { %p15808_p13 = por %p15807_p12, %p15806_p11 }
 0xc0c   : > { %p15809_p0 = pnand %p15808_p13, %p15802_p8 }
 0xc0e   : > { %15812 = shalt.err (!%p15809_p0)
}
 0xc0f   : > { %15372 = dma.vmem_to_hbm [thread:$0]  (%p15922_p5), %s19590_s23, 16, %s19588_s15, %s11244_s30  }
 0xc10 PF: > { %p15378_p1 = scmp.ge.s32.totalorder %s15847_s21, 2  ;;  %s11268_s16 = sand.u32 1, %s15835_s18  }
 0xc11   : > { %s11269_s17 = scalar_lea.sflag [#allocation5], %s11268_s16 }
 0xc12   : > { %p15375_p2 = pnand %p15378_p1, %p15926_p6 }
 0xc14   : > { %15830 = dma.done.wait (!%p15375_p2), %s11269_s17, 16  }
 0xc15   : > { %15832 = vsyncadd (!%p15375_p2), %s11269_s17, 4294967280  ;;  %p15_p3 = scmp.ge.s32.totalorder %s15909_s24, 4   ;;  %s19672_s18 = smov %s15839_s19 }
 0xc16   : > { %s19673_s19 = smov %s15843_s20  ;;  %s19674_s20 = smov %s15920_s27 }
 0xc17   : > { %s19675_s21 = smov %s15909_s24  ;;  %17 = sbr.rel (!%p15_p3) target bundleno = 3 (0x3), region = 119 }
 0xc1e   :  { %11273 = vsyncpa [#allocation5], 1 }
 0xc1f   :  { %11275 = vsyncpa [#allocation5 + $0x1], 1 }

</bundles_post_ra>
